<compile_context>
chip_gen: v7x
topology: tpu7x:2x2x1
jax: 0.10.0
libtpu: 0.0.40
codegen_flags: <defaults>
</compile_context>

<pallas_src>
import functools
import math

import jax
import jax.numpy as jnp
from jax.experimental import pallas as pl
from jax.experimental.pallas import tpu as pltpu


# --------------------------- small helpers -----------------------------------

def _largest_divisor_leq(n, target):
    t = max(1, min(n, target))
    while n % t:
        t -= 1
    return t


# --------------------- two-way cross-attention transformer --------------------
# TODO(synk): the PyTorch MaskDecoder receives an arbitrary injected
# `transformer` module; this is a deterministic single-block two-way
# cross-attention stand-in with matching (hs, src) shape semantics.
# Pass 1 (tokens attend to image) uses flash-style online softmax over pixel
# tiles; pass 2 (image attends to tokens) is computed in transposed layout so
# its output is already (B, C, HW), the layout the fused upscaler consumes.

def _tok_attn_kernel(tok_ref, img_ref, pos_ref, hs_ref, m_sc, l_sc, acc_sc, *, scale):
    kv = pl.program_id(1)

    @pl.when(kv == 0)
    def _():
        m_sc[...] = jnp.full_like(m_sc, -1e30)
        l_sc[...] = jnp.zeros_like(l_sc)
        acc_sc[...] = jnp.zeros_like(acc_sc)

    t = tok_ref[0]                                  # (T, C) f32
    im_t = img_ref[0]                               # (C, thw) bf16
    k_t = im_t + pos_ref[0]                         # (C, thw) bf16
    s = jax.lax.dot_general(t.astype(jnp.bfloat16), k_t,
                            (((1,), (0,)), ((), ())),
                            preferred_element_type=jnp.float32) * scale   # (T, thw)
    m_prev = m_sc[...]
    m_new = jnp.maximum(m_prev, jnp.max(s, axis=-1, keepdims=True))
    alpha = jnp.exp(m_prev - m_new)
    p = jnp.exp(s - m_new)
    l_sc[...] = alpha * l_sc[...] + jnp.sum(p, axis=-1, keepdims=True)
    acc_sc[...] = alpha * acc_sc[...] + jax.lax.dot_general(
        p.astype(jnp.bfloat16), im_t, (((1,), (1,)), ((), ())),
        preferred_element_type=jnp.float32)         # (T, C)
    m_sc[...] = m_new

    @pl.when(kv == pl.num_programs(1) - 1)
    def _():
        hs_ref[0] = t + acc_sc[...] * pl.reciprocal(l_sc[...], approx=True)


def _img_attn_kernel(hs_ref, img_ref, pos_ref, src_ref, *, scale):
    hs = hs_ref[0]                                  # (T, C) f32
    im_t = img_ref[0]                               # (C, thw) bf16
    q_t = im_t + pos_ref[0]                         # (C, thw) bf16
    s = jax.lax.dot_general(hs.astype(jnp.bfloat16), q_t,
                            (((1,), (0,)), ((), ())),
                            preferred_element_type=jnp.float32) * scale   # (T, thw)
    # softmax over the (tiny, static) token axis: explicit row combines (VPU only)
    n_tok = s.shape[0]
    mx = s[0:1, :]
    for i in range(1, n_tok):
        mx = jnp.maximum(mx, s[i:i + 1, :])
    p = jnp.exp(s - mx)
    ssum = p[0:1, :]
    for i in range(1, n_tok):
        ssum = ssum + p[i:i + 1, :]
    a = p * pl.reciprocal(ssum, approx=True)        # (T, thw)
    # attn^T = hs^T @ a  ->  (C, thw)
    attn_t = jax.lax.dot_general(hs.astype(jnp.bfloat16), a.astype(jnp.bfloat16),
                                 (((0,), (0,)), ((), ())),
                                 preferred_element_type=jnp.float32)
    src_ref[0] = (im_t.astype(jnp.float32) + attn_t).astype(src_ref.dtype)


def twoway_transformer(tokens, img_t, pos_t, tile_hw=512):
    """tokens: (B,T,C) f32; img_t: (B,C,HW) bf16; pos_t: (1,C,HW) bf16."""
    B, T, C = tokens.shape
    HW = img_t.shape[2]
    thw = _largest_divisor_leq(HW, tile_hw)
    n_kv = HW // thw
    scale = 1.0 / math.sqrt(C)

    hs = pl.pallas_call(
        functools.partial(_tok_attn_kernel, scale=scale),
        out_shape=jax.ShapeDtypeStruct((B, T, C), jnp.float32),
        grid=(B, n_kv),
        in_specs=[
            pl.BlockSpec((1, T, C), lambda b, k: (b, 0, 0)),
            pl.BlockSpec((1, C, thw), lambda b, k: (b, 0, k)),
            pl.BlockSpec((1, C, thw), lambda b, k: (0, 0, k)),
        ],
        out_specs=pl.BlockSpec((1, T, C), lambda b, k: (b, 0, 0)),
        scratch_shapes=[pltpu.VMEM((T, 1), jnp.float32),
                        pltpu.VMEM((T, 1), jnp.float32),
                        pltpu.VMEM((T, C), jnp.float32)],
        compiler_params=pltpu.CompilerParams(
            dimension_semantics=("parallel", "arbitrary")),
    )(tokens, img_t, pos_t)

    # grid (n_kv, B): pos tile index depends only on the outer axis -> stays
    # resident across the inner batch loop.
    src_t = pl.pallas_call(
        functools.partial(_img_attn_kernel, scale=scale),
        out_shape=jax.ShapeDtypeStruct((B, C, HW), jnp.bfloat16),
        grid=(n_kv, B),
        in_specs=[
            pl.BlockSpec((1, T, C), lambda k, b: (b, 0, 0)),
            pl.BlockSpec((1, C, thw), lambda k, b: (b, 0, k)),
            pl.BlockSpec((1, C, thw), lambda k, b: (0, 0, k)),
        ],
        out_specs=pl.BlockSpec((1, C, thw), lambda k, b: (b, 0, k)),
        compiler_params=pltpu.CompilerParams(
            dimension_semantics=("parallel", "parallel")),
    )(hs, img_t, pos_t)

    return hs, src_t


# ----------------------- fused token MLP heads (tiny) -------------------------

def _heads_kernel(mt_ref, dt_ref,
                  hw0, hb0, hw1, hb1, hw2, hb2,
                  dw0, db0, dw1, db1, dw2, db2,
                  hyper_ref, det_ref):
    x = mt_ref[...]
    x = jnp.maximum(jnp.dot(x, hw0[...], preferred_element_type=jnp.float32) + hb0[...], 0.0)
    x = jnp.maximum(jnp.dot(x, hw1[...], preferred_element_type=jnp.float32) + hb1[...], 0.0)
    hyper_ref[...] = jnp.dot(x, hw2[...], preferred_element_type=jnp.float32) + hb2[...]

    y = dt_ref[...]
    y = jnp.maximum(jnp.dot(y, dw0[...], preferred_element_type=jnp.float32) + db0[...], 0.0)
    y = jnp.maximum(jnp.dot(y, dw1[...], preferred_element_type=jnp.float32) + db1[...], 0.0)
    det_ref[...] = jax.nn.sigmoid(
        jnp.dot(y, dw2[...], preferred_element_type=jnp.float32) + db2[...])


def token_heads(mask_tok, det_tok, params):
    B, _ = mask_tok.shape
    d8 = params["hyper_w"][2].shape[1]
    args = [mask_tok.astype(jnp.float32), det_tok.astype(jnp.float32)]
    for w, b in zip(params["hyper_w"], params["hyper_b"]):
        args += [w.astype(jnp.float32), b.reshape(1, -1).astype(jnp.float32)]
    for w, b in zip(params["det_w"], params["det_b"]):
        args += [w.astype(jnp.float32), b.reshape(1, -1).astype(jnp.float32)]
    hyper_in, det_pred = pl.pallas_call(
        _heads_kernel,
        out_shape=(jax.ShapeDtypeStruct((B, d8), jnp.float32),
                   jax.ShapeDtypeStruct((B, 1), jnp.float32)),
    )(*args)
    return hyper_in, det_pred


# ----- fused 4x(ConvT(2,2) + LayerNorm2d + act) + hypernetwork projection -----
# Transposed layout: channels on sublanes, pixels on lanes.  Each grid step
# handles `tn` source pixels (full source rows).  Stage-k tap chunks are placed
# at static lane offsets of the VMEM scratch, so the pixel axis quadruples per
# stage with no relayout.  Stage 4 is processed in 4 lane chunks to bound the
# live f32 matmul result; the mask projection is a (1,d8)x(d8,N) MXU matmul per
# tap chunk, and the tile's full (4, 64*tn) mask slab is written in one dense
# store (the only HBM write of the whole upscaling chain).

def _upscale_mask_kernel(src_ref,
                         w1, b1, g1, be1,
                         w2, b2, g2, be2,
                         w3, b3, g3, be3,
                         w4, b4, g4, be4,
                         hyp_ref, out_ref, s1, s2, s3, *, eps):
    def ln(y, oc, tap, g, be, ones_row):
        c = y[tap * oc:(tap + 1) * oc, :]
        # LayerNorm2d stats over channels via MXU matmuls (keeps XLU free).
        u = jnp.dot(ones_row, c, preferred_element_type=jnp.float32) * (1.0 / oc)
        d = c - u
        v = jnp.dot(ones_row, d * d, preferred_element_type=jnp.float32) * (1.0 / oc)
        return d * jax.lax.rsqrt(v + eps) * g + be

    # TODO(synk): PyTorch nn.GELU() default is the exact erf formulation; the
    # tanh approximation is used here for Mosaic-safe lowering.
    gelu = functools.partial(jax.nn.gelu, approximate=True)

    x0 = src_ref[0]                                   # (C, n0) bf16
    n0 = src_ref.shape[2]
    d4 = g1.shape[0]
    d8 = g2.shape[0]
    ones4 = jnp.ones((1, d4), jnp.float32)
    ones8 = jnp.ones((1, d8), jnp.float32)

    # stage 1: ConvT(dim -> dim/4) + LN + GELU
    y1 = jnp.dot(w1[...], x0, preferred_element_type=jnp.float32) + b1[...]
    g1v, e1v = g1[...], be1[...]
    for t in range(4):
        s1[:, t * n0:(t + 1) * n0] = gelu(ln(y1, d4, t, g1v, e1v, ones4)).astype(s1.dtype)

    # stage 2: ConvT(dim/4 -> dim/8) + LN + GELU
    n1 = 4 * n0
    y2 = jnp.dot(w2[...], s1[...], preferred_element_type=jnp.float32) + b2[...]
    g2v, e2v = g2[...], be2[...]
    for t in range(4):
        s2[:, t * n1:(t + 1) * n1] = gelu(ln(y2, d8, t, g2v, e2v, ones8)).astype(s2.dtype)

    # stage 3: ConvT(dim/8 -> dim/8) + LN + GELU
    n2 = 4 * n1
    y3 = jnp.dot(w3[...], s2[...], preferred_element_type=jnp.float32) + b3[...]
    g3v, e3v = g3[...], be3[...]
    for t in range(4):
        s3[:, t * n2:(t + 1) * n2] = gelu(ln(y3, d8, t, g3v, e3v, ones8)).astype(s3.dtype)

    # stage 4: ConvT(dim/8 -> dim/8) + LN + Sigmoid, fused with the
    # hypernetwork projection and the outer Sigmoid (matches the reference).
    g4v, e4v = g4[...], be4[...]
    hyp = hyp_ref[0]                                  # (1, d8) f32
    rows = [[] for _ in range(4)]
    for t3 in range(4):
        x3 = s3[:, t3 * n2:(t3 + 1) * n2]             # (d8, n2) bf16
        y4 = jnp.dot(w4[...], x3, preferred_element_type=jnp.float32) + b4[...]
        for t4 in range(4):
            act4 = jax.nn.sigmoid(ln(y4, d8, t4, g4v, e4v, ones8))        # (d8, n2)
            mval = jnp.dot(hyp, act4, preferred_element_type=jnp.float32)  # (1, n2)
            rows[t4].append(jax.nn.sigmoid(mval))
    out_ref[0] = jnp.concatenate(
        [jnp.concatenate(r, axis=1) for r in rows], axis=0)               # (4, 64*n0)


def fused_upscale_masks(src_t, params, hyper_in, H, W, tile_pixels=512):
    """src_t: (B, C, H*W) bf16; hyper_in: (B, dim//8). Returns (B, 16H, 16W)."""
    B, C, HW = src_t.shape
    d4 = params["ct"][0][0].shape[-1]
    d8 = params["ct"][1][0].shape[-1]

    def prep(w, b):
        ic, _, _, oc = w.shape
        # (IC, kh, kw, OC) -> rows = (2*kh + kw)*OC + oc
        wt = jnp.transpose(w, (1, 2, 3, 0)).reshape(4 * oc, ic).astype(jnp.bfloat16)
        bt = jnp.tile(b, 4).reshape(4 * oc, 1).astype(jnp.float32)
        return wt, bt

    stage_args = []
    for i in range(4):
        wt, bt = prep(*params["ct"][i])
        g, be = params["ln"][i]
        oc = g.shape[0]
        stage_args += [wt, bt,
                       g.reshape(oc, 1).astype(jnp.float32),
                       be.reshape(oc, 1).astype(jnp.float32)]

    th = _largest_divisor_leq(H, max(1, tile_pixels // W))   # full src rows per tile
    tn = th * W
    n_tiles = HW // tn

    in_specs = [pl.BlockSpec((1, C, tn), lambda b, i: (b, 0, i))]
    for i in range(4):
        ic = params["ct"][i][0].shape[0]
        oc = params["ct"][i][0].shape[-1]
        in_specs += [pl.BlockSpec((4 * oc, ic), lambda b, i: (0, 0)),
                     pl.BlockSpec((4 * oc, 1), lambda b, i: (0, 0)),
                     pl.BlockSpec((oc, 1), lambda b, i: (0, 0)),
                     pl.BlockSpec((oc, 1), lambda b, i: (0, 0))]
    in_specs.append(pl.BlockSpec((1, 1, d8), lambda b, i: (b, 0, 0)))

    out = pl.pallas_call(
        functools.partial(_upscale_mask_kernel, eps=1e-6),
        out_shape=jax.ShapeDtypeStruct((B, 4, 64 * HW), jnp.float32),
        grid=(B, n_tiles),
        in_specs=in_specs,
        out_specs=pl.BlockSpec((1, 4, 64 * tn), lambda b, i: (b, 0, i)),
        scratch_shapes=[pltpu.VMEM((d4, 4 * tn), jnp.bfloat16),
                        pltpu.VMEM((d8, 16 * tn), jnp.bfloat16),
                        pltpu.VMEM((d8, 64 * tn), jnp.bfloat16)],
        compiler_params=pltpu.CompilerParams(
            dimension_semantics=("parallel", "parallel"),
            vmem_limit_bytes=48 * 1024 * 1024),
    )(src_t, *stage_args, hyper_in.reshape(B, 1, d8).astype(jnp.float32))

    # Untangle the tap hierarchy into the final 16x-upscaled spatial grid.
    # out columns = tile*(64*tn) + tap3*16*tn + tap2*4*tn + tap1*tn + hh*W + w,
    # out dim-1   = tap4, with tap_k = 2*dh_k + dw_k.
    # TODO(synk): at production sizes this interleave should be a dedicated
    # Pallas interleave kernel (or folded into the output index_map) instead
    # of a host-side transpose.
    m = out.reshape(B, 2, 2, n_tiles, 2, 2, 2, 2, 2, 2, th, W)
    m = jnp.transpose(m, (0, 3, 10, 8, 6, 4, 1, 11, 9, 7, 5, 2))
    return m.reshape(B, 16 * H, 16 * W)


# ------------------------------ parameter init --------------------------------

def init_params(key, dim):
    d4, d8 = dim // 4, dim // 8
    keys = iter(jax.random.split(key, 40))

    def nrm(shape, scale=0.05):
        return (scale * jax.random.normal(next(keys), shape)).astype(jnp.float32)

    return {
        "det_token": nrm((1, dim)),
        "mask_tokens": nrm((1, dim)),
        # TODO(synk): ConvTranspose2d weights stored as (IC, kh, kw, OC); loading
        # real PyTorch (IC, OC, kh, kw) weights would require a permute.
        "ct": [
            (nrm((dim, 2, 2, d4)), nrm((d4,))),
            (nrm((d4, 2, 2, d8)), nrm((d8,))),
            (nrm((d8, 2, 2, d8)), nrm((d8,))),
            (nrm((d8, 2, 2, d8)), nrm((d8,))),
        ],
        # TODO(synk): the reference declares LayerNorm2d(transformer_dim // 4)
        # for all four norms, which cannot broadcast against the dim//8-channel
        # conv outputs; we use the actual conv output channel counts instead.
        "ln": [
            (jnp.ones((d4,), jnp.float32), jnp.zeros((d4,), jnp.float32)),
            (jnp.ones((d8,), jnp.float32), jnp.zeros((d8,), jnp.float32)),
            (jnp.ones((d8,), jnp.float32), jnp.zeros((d8,), jnp.float32)),
            (jnp.ones((d8,), jnp.float32), jnp.zeros((d8,), jnp.float32)),
        ],
        "hyper_w": [nrm((dim, dim)), nrm((dim, dim)), nrm((dim, d8))],
        "hyper_b": [nrm((dim,)), nrm((dim,)), nrm((d8,))],
        "det_w": [nrm((dim, 256)), nrm((256, 256)), nrm((256, 1))],
        "det_b": [nrm((256,)), nrm((256,)), nrm((1,))],
    }


# ------------------------------ MaskDecoder.forward ---------------------------

def mask_decoder_forward(params, image_embeddings, image_pe):
    B, C, H, W = image_embeddings.shape
    dim = C

    # predict(): tokens = [det_token, mask_token, zero prompt embeddings]
    prompt = jnp.zeros((B, 2, dim), jnp.float32)
    out_tok = jnp.concatenate([params["det_token"], params["mask_tokens"]], axis=0)
    tokens = jnp.concatenate(
        [jnp.broadcast_to(out_tok[None], (B, 2, dim)), prompt], axis=1)   # (B, 4, dim)

    # Native NCHW layout kept end-to-end (no host NCHW->NHWC transpose);
    # bf16 image/pos streams, f32 accumulation inside kernels.
    img_t = image_embeddings.reshape(B, C, H * W).astype(jnp.bfloat16)
    pos_t = image_pe.reshape(1, C, H * W).astype(jnp.bfloat16)

    hs, src_t = twoway_transformer(tokens, img_t, pos_t)
    det_token_out = hs[:, 0, :]      # (B, dim)
    mask_token_out = hs[:, 1, :]     # (B, dim), num_mask_tokens == 1

    hyper_in, det_pred = token_heads(mask_token_out, det_token_out, params)

    masks = fused_upscale_masks(src_t, params, hyper_in, H, W)

    # forward(): masks[:, 0, :, :], det_pred[:, 0]
    return det_pred[:, 0], masks


# ----------------------------------- main --------------------------------------

if __name__ == "__main__":
    key = jax.random.PRNGKey(0)
    k_img, k_pe, k_par = jax.random.split(key, 3)

    B, C, H, W = 2, 32, 4, 4          # transformer_dim = 32
    image_embeddings = jax.random.normal(k_img, (B, C, H, W), jnp.float32)
    image_pe = jax.random.normal(k_pe, (1, C, H, W), jnp.float32)
    params = init_params(k_par, C)

    fwd = jax.jit(mask_decoder_forward)
    det_pred, masks = fwd(params, image_embeddings, image_pe)
    jax.block_until_ready((det_pred, masks))

    assert det_pred.shape == (B,), det_pred.shape
    assert masks.shape == (B, 16 * H, 16 * W), masks.shape   # 4 x 2x upscales
    assert bool(jnp.all(jnp.isfinite(det_pred))) and bool(jnp.all(jnp.isfinite(masks)))
    print("KERNEL_OK")
</pallas_src>

<mosaic_0001>
module attributes {stable_mosaic.version = 11 : i64} {
  func.func @_img_attn_kernel(%arg0: i32, %arg1: i32, %arg2: memref<1x4x32xf32, #tpu.memory_space<vmem>>, %arg3: memref<1x32x16xbf16, #tpu.memory_space<vmem>>, %arg4: memref<1x32x16xbf16, #tpu.memory_space<vmem>>, %arg5: memref<1x32x16xbf16, #tpu.memory_space<vmem>>) attributes {dimension_semantics = [#tpu.dimension_semantics<parallel>, #tpu.dimension_semantics<parallel>], iteration_bounds = array<i64: 1, 2>, scalar_prefetch = 0 : i64, scratch_operands = 0 : i64, tpu.core_type = #tpu.core_type<tc>, window_params = [{transform_indices = @transform_0, window_bounds = array<i64: 1, 4, 32>}, {transform_indices = @transform_1, window_bounds = array<i64: 1, 32, 16>}, {transform_indices = @transform_2, window_bounds = array<i64: 1, 32, 16>}, {transform_indices = @transform_3, window_bounds = array<i64: 1, 32, 16>}]} {
    %c0 = arith.constant 0 : index
    %c0_0 = arith.constant 0 : index
    %c0_1 = arith.constant 0 : index
    %0 = vector.load %arg2[%c0, %c0_0, %c0_1] : memref<1x4x32xf32, #tpu.memory_space<vmem>>, vector<1x4x32xf32>
    %1 = vector.shape_cast %0 : vector<1x4x32xf32> to vector<4x32xf32>
    %c0_2 = arith.constant 0 : index
    %c0_3 = arith.constant 0 : index
    %c0_4 = arith.constant 0 : index
    %2 = vector.load %arg3[%c0_2, %c0_3, %c0_4] : memref<1x32x16xbf16, #tpu.memory_space<vmem>>, vector<1x32x16xbf16>
    %3 = vector.shape_cast %2 : vector<1x32x16xbf16> to vector<32x16xbf16>
    %c0_5 = arith.constant 0 : index
    %c0_6 = arith.constant 0 : index
    %c0_7 = arith.constant 0 : index
    %4 = vector.load %arg4[%c0_5, %c0_6, %c0_7] : memref<1x32x16xbf16, #tpu.memory_space<vmem>>, vector<1x32x16xbf16>
    %5 = vector.shape_cast %4 : vector<1x32x16xbf16> to vector<32x16xbf16>
    %6 = arith.addf %3, %5 : vector<32x16xbf16>
    %7 = arith.truncf %1 : vector<4x32xf32> to vector<4x32xbf16>
    %cst = arith.constant dense<0.000000e+00> : vector<4x16xf32>
    %8 = tpu.matmul %7, %6, %cst {dimension_numbers = #tpu.dot_dimension_numbers<[1], [0], [0], [1], [0, 0, 1, 1], [], []>} : vector<4x32xbf16>, vector<32x16xbf16>, vector<4x16xf32> -> vector<4x16xf32>
    %cst_8 = arith.constant 0.176776692 : f32
    %9 = vector.broadcast %cst_8 : f32 to vector<4x16xf32>
    %10 = arith.mulf %8, %9 : vector<4x16xf32>
    %11 = vector.extract_strided_slice %10 {offsets = [0, 0], sizes = [1, 16], strides = [1, 1]} : vector<4x16xf32> to vector<1x16xf32>
    %12 = vector.extract_strided_slice %10 {offsets = [1, 0], sizes = [1, 16], strides = [1, 1]} : vector<4x16xf32> to vector<1x16xf32>
    %13 = arith.maximumf %11, %12 : vector<1x16xf32>
    %14 = vector.extract_strided_slice %10 {offsets = [2, 0], sizes = [1, 16], strides = [1, 1]} : vector<4x16xf32> to vector<1x16xf32>
    %15 = arith.maximumf %13, %14 : vector<1x16xf32>
    %16 = vector.extract_strided_slice %10 {offsets = [3, 0], sizes = [1, 16], strides = [1, 1]} : vector<4x16xf32> to vector<1x16xf32>
    %17 = arith.maximumf %15, %16 : vector<1x16xf32>
    %18 = vector.broadcast %17 : vector<1x16xf32> to vector<4x16xf32>
    %19 = arith.subf %10, %18 : vector<4x16xf32>
    %20 = math.exp %19 : vector<4x16xf32>
    %21 = vector.extract_strided_slice %20 {offsets = [0, 0], sizes = [1, 16], strides = [1, 1]} : vector<4x16xf32> to vector<1x16xf32>
    %22 = vector.extract_strided_slice %20 {offsets = [1, 0], sizes = [1, 16], strides = [1, 1]} : vector<4x16xf32> to vector<1x16xf32>
    %23 = arith.addf %21, %22 : vector<1x16xf32>
    %24 = vector.extract_strided_slice %20 {offsets = [2, 0], sizes = [1, 16], strides = [1, 1]} : vector<4x16xf32> to vector<1x16xf32>
    %25 = arith.addf %23, %24 : vector<1x16xf32>
    %26 = vector.extract_strided_slice %20 {offsets = [3, 0], sizes = [1, 16], strides = [1, 1]} : vector<4x16xf32> to vector<1x16xf32>
    %27 = arith.addf %25, %26 : vector<1x16xf32>
    %28 = tpu.reciprocal %27 {approx = true} : vector<1x16xf32> -> vector<1x16xf32>
    %29 = vector.broadcast %28 : vector<1x16xf32> to vector<4x16xf32>
    %30 = arith.mulf %20, %29 : vector<4x16xf32>
    %31 = arith.truncf %1 : vector<4x32xf32> to vector<4x32xbf16>
    %32 = arith.truncf %30 : vector<4x16xf32> to vector<4x16xbf16>
    %cst_9 = arith.constant dense<0.000000e+00> : vector<32x16xf32>
    %33 = tpu.matmul %31, %32, %cst_9 {dimension_numbers = #tpu.dot_dimension_numbers<[0], [0], [1], [1], [0, 1, 1, 1], [], []>} : vector<4x32xbf16>, vector<4x16xbf16>, vector<32x16xf32> -> vector<32x16xf32>
    %34 = arith.extf %3 : vector<32x16xbf16> to vector<32x16xf32>
    %35 = arith.addf %34, %33 : vector<32x16xf32>
    %36 = arith.truncf %35 : vector<32x16xf32> to vector<32x16xbf16>
    %c0_10 = arith.constant 0 : index
    %c0_11 = arith.constant 0 : index
    %c0_12 = arith.constant 0 : index
    %37 = vector.load %arg5[%c0_10, %c0_11, %c0_12] : memref<1x32x16xbf16, #tpu.memory_space<vmem>>, vector<1x32x16xbf16>
    %38 = vector.shape_cast %37 : vector<1x32x16xbf16> to vector<32x16xbf16>
    %39 = vector.shape_cast %36 : vector<32x16xbf16> to vector<1x32x16xbf16>
    tpu.vector_store %arg5[%c0_10, %c0_11, %c0_12], %39 {strides = array<i32>} : memref<1x32x16xbf16, #tpu.memory_space<vmem>>, vector<1x32x16xbf16>,
    return
  }
  func.func @transform_0(%arg0: i32, %arg1: i32) -> (i32, i32, i32) {
    %c0_i32 = arith.constant 0 : i32
    %c0_i32_0 = arith.constant 0 : i32
    %c0_i32_1 = arith.constant 0 : i32
    return %arg1, %c0_i32, %c0_i32_0 : i32, i32, i32
  }
  func.func @transform_1(%arg0: i32, %arg1: i32) -> (i32, i32, i32) {
    %c0_i32 = arith.constant 0 : i32
    %c0_i32_0 = arith.constant 0 : i32
    return %arg1, %c0_i32, %arg0 : i32, i32, i32
  }
  func.func @transform_2(%arg0: i32, %arg1: i32) -> (i32, i32, i32) {
    %c0_i32 = arith.constant 0 : i32
    %c0_i32_0 = arith.constant 0 : i32
    %c0_i32_1 = arith.constant 0 : i32
    return %c0_i32, %c0_i32_0, %arg0 : i32, i32, i32
  }
  func.func @transform_3(%arg0: i32, %arg1: i32) -> (i32, i32, i32) {
    %c0_i32 = arith.constant 0 : i32
    %c0_i32_0 = arith.constant 0 : i32
    return %arg1, %c0_i32, %arg0 : i32, i32, i32
  }
}

module attributes {stable_mosaic.version = 11 : i64} {
  func.func @_tok_attn_kernel(%arg0: i32, %arg1: i32, %arg2: memref<1x4x32xf32, #tpu.memory_space<vmem>>, %arg3: memref<1x32x16xbf16, #tpu.memory_space<vmem>>, %arg4: memref<1x32x16xbf16, #tpu.memory_space<vmem>>, %arg5: memref<1x4x32xf32, #tpu.memory_space<vmem>>, %arg6: memref<4x1xf32, #tpu.memory_space<vmem>>, %arg7: memref<4x1xf32, #tpu.memory_space<vmem>>, %arg8: memref<4x32xf32, #tpu.memory_space<vmem>>) attributes {dimension_semantics = [#tpu.dimension_semantics<parallel>, #tpu.dimension_semantics<arbitrary>], iteration_bounds = array<i64: 2, 1>, scalar_prefetch = 0 : i64, scratch_operands = 3 : i64, tpu.core_type = #tpu.core_type<tc>, window_params = [{transform_indices = @transform_0, window_bounds = array<i64: 1, 4, 32>}, {transform_indices = @transform_1, window_bounds = array<i64: 1, 32, 16>}, {transform_indices = @transform_2, window_bounds = array<i64: 1, 32, 16>}, {transform_indices = @transform_3, window_bounds = array<i64: 1, 4, 32>}]} {
    %c0_i32 = arith.constant 0 : i32
    %0 = arith.cmpi eq, %arg1, %c0_i32 : i32
    %1 = arith.extui %0 : i1 to i32
    %c0_i32_0 = arith.constant 0 : i32
    %2 = arith.cmpi ne, %1, %c0_i32_0 : i32
    scf.if %2 {
      %cst_27 = arith.constant -1.000000e+30 : f32
      %40 = vector.broadcast %cst_27 : f32 to vector<4x1xf32>
      %c0_28 = arith.constant 0 : index
      %c0_29 = arith.constant 0 : index
      %41 = vector.load %arg6[%c0_28, %c0_29] : memref<4x1xf32, #tpu.memory_space<vmem>>, vector<4x1xf32>
      tpu.vector_store %arg6[%c0_28, %c0_29], %40 {strides = array<i32>} : memref<4x1xf32, #tpu.memory_space<vmem>>, vector<4x1xf32>,
      %cst_30 = arith.constant 0.000000e+00 : f32
      %42 = vector.broadcast %cst_30 : f32 to vector<4x1xf32>
      %c0_31 = arith.constant 0 : index
      %c0_32 = arith.constant 0 : index
      %43 = vector.load %arg7[%c0_31, %c0_32] : memref<4x1xf32, #tpu.memory_space<vmem>>, vector<4x1xf32>
      tpu.vector_store %arg7[%c0_31, %c0_32], %42 {strides = array<i32>} : memref<4x1xf32, #tpu.memory_space<vmem>>, vector<4x1xf32>,
      %cst_33 = arith.constant 0.000000e+00 : f32
      %44 = vector.broadcast %cst_33 : f32 to vector<4x32xf32>
      %c0_34 = arith.constant 0 : index
      %c0_35 = arith.constant 0 : index
      %45 = vector.load %arg8[%c0_34, %c0_35] : memref<4x32xf32, #tpu.memory_space<vmem>>, vector<4x32xf32>
      tpu.vector_store %arg8[%c0_34, %c0_35], %44 {strides = array<i32>} : memref<4x32xf32, #tpu.memory_space<vmem>>, vector<4x32xf32>,
    } else {
    }
    %c0 = arith.constant 0 : index
    %c0_1 = arith.constant 0 : index
    %c0_2 = arith.constant 0 : index
    %3 = vector.load %arg2[%c0, %c0_1, %c0_2] : memref<1x4x32xf32, #tpu.memory_space<vmem>>, vector<1x4x32xf32>
    %4 = vector.shape_cast %3 : vector<1x4x32xf32> to vector<4x32xf32>
    %c0_3 = arith.constant 0 : index
    %c0_4 = arith.constant 0 : index
    %c0_5 = arith.constant 0 : index
    %5 = vector.load %arg3[%c0_3, %c0_4, %c0_5] : memref<1x32x16xbf16, #tpu.memory_space<vmem>>, vector<1x32x16xbf16>
    %6 = vector.shape_cast %5 : vector<1x32x16xbf16> to vector<32x16xbf16>
    %c0_6 = arith.constant 0 : index
    %c0_7 = arith.constant 0 : index
    %c0_8 = arith.constant 0 : index
    %7 = vector.load %arg4[%c0_6, %c0_7, %c0_8] : memref<1x32x16xbf16, #tpu.memory_space<vmem>>, vector<1x32x16xbf16>
    %8 = vector.shape_cast %7 : vector<1x32x16xbf16> to vector<32x16xbf16>
    %9 = arith.addf %6, %8 : vector<32x16xbf16>
    %10 = arith.truncf %4 : vector<4x32xf32> to vector<4x32xbf16>
    %cst = arith.constant dense<0.000000e+00> : vector<4x16xf32>
    %11 = tpu.matmul %10, %9, %cst {dimension_numbers = #tpu.dot_dimension_numbers<[1], [0], [0], [1], [0, 0, 1, 1], [], []>} : vector<4x32xbf16>, vector<32x16xbf16>, vector<4x16xf32> -> vector<4x16xf32>
    %cst_9 = arith.constant 0.176776692 : f32
    %12 = vector.broadcast %cst_9 : f32 to vector<4x16xf32>
    %13 = arith.mulf %11, %12 : vector<4x16xf32>
    %c0_10 = arith.constant 0 : index
    %c0_11 = arith.constant 0 : index
    %14 = vector.load %arg6[%c0_10, %c0_11] : memref<4x1xf32, #tpu.memory_space<vmem>>, vector<4x1xf32>
    %cst_12 = arith.constant dense<0xFF800000> : vector<4xf32>
    %15 = vector.multi_reduction <maximumf>, %13, %cst_12 [1] : vector<4x16xf32> to vector<4xf32>
    %16 = vector.shape_cast %15 : vector<4xf32> to vector<4x1xf32>
    %17 = arith.maximumf %14, %16 : vector<4x1xf32>
    %18 = arith.subf %14, %17 : vector<4x1xf32>
    %19 = math.exp %18 : vector<4x1xf32>
    %20 = vector.broadcast %17 : vector<4x1xf32> to vector<4x16xf32>
    %21 = arith.subf %13, %20 : vector<4x16xf32>
    %22 = math.exp %21 : vector<4x16xf32>
    %c0_13 = arith.constant 0 : index
    %c0_14 = arith.constant 0 : index
    %23 = vector.load %arg7[%c0_13, %c0_14] : memref<4x1xf32, #tpu.memory_space<vmem>>, vector<4x1xf32>
    %24 = arith.mulf %19, %23 : vector<4x1xf32>
    %cst_15 = arith.constant dense<0.000000e+00> : vector<4xf32>
    %25 = vector.multi_reduction <add>, %22, %cst_15 [1] : vector<4x16xf32> to vector<4xf32>
    %26 = vector.shape_cast %25 : vector<4xf32> to vector<4x1xf32>
    %27 = arith.addf %24, %26 : vector<4x1xf32>
    %c0_16 = arith.constant 0 : index
    %c0_17 = arith.constant 0 : index
    %28 = vector.load %arg7[%c0_16, %c0_17] : memref<4x1xf32, #tpu.memory_space<vmem>>, vector<4x1xf32>
    tpu.vector_store %arg7[%c0_16, %c0_17], %27 {strides = array<i32>} : memref<4x1xf32, #tpu.memory_space<vmem>>, vector<4x1xf32>,
    %c0_18 = arith.constant 0 : index
    %c0_19 = arith.constant 0 : index
    %29 = vector.load %arg8[%c0_18, %c0_19] : memref<4x32xf32, #tpu.memory_space<vmem>>, vector<4x32xf32>
    %30 = vector.broadcast %19 : vector<4x1xf32> to vector<4x32xf32>
    %31 = arith.mulf %30, %29 : vector<4x32xf32>
    %32 = arith.truncf %22 : vector<4x16xf32> to vector<4x16xbf16>
    %cst_20 = arith.constant dense<0.000000e+00> : vector<4x32xf32>
    %33 = tpu.matmul %32, %6, %cst_20 {dimension_numbers = #tpu.dot_dimension_numbers<[1], [1], [0], [0], [0, 0, 1, 0], [], []>} : vector<4x16xbf16>, vector<32x16xbf16>, vector<4x32xf32> -> vector<4x32xf32>
    %34 = arith.addf %31, %33 : vector<4x32xf32>
    %c0_21 = arith.constant 0 : index
    %c0_22 = arith.constant 0 : index
    %35 = vector.load %arg8[%c0_21, %c0_22] : memref<4x32xf32, #tpu.memory_space<vmem>>, vector<4x32xf32>
    tpu.vector_store %arg8[%c0_21, %c0_22], %34 {strides = array<i32>} : memref<4x32xf32, #tpu.memory_space<vmem>>, vector<4x32xf32>,
    %c0_23 = arith.constant 0 : index
    %c0_24 = arith.constant 0 : index
    %36 = vector.load %arg6[%c0_23, %c0_24] : memref<4x1xf32, #tpu.memory_space<vmem>>, vector<4x1xf32>
    tpu.vector_store %arg6[%c0_23, %c0_24], %17 {strides = array<i32>} : memref<4x1xf32, #tpu.memory_space<vmem>>, vector<4x1xf32>,
    %c0_i32_25 = arith.constant 0 : i32
    %37 = arith.cmpi eq, %arg1, %c0_i32_25 : i32
    %38 = arith.extui %37 : i1 to i32
    %c0_i32_26 = arith.constant 0 : i32
    %39 = arith.cmpi ne, %38, %c0_i32_26 : i32
    scf.if %39 {
      %c0_27 = arith.constant 0 : index
      %c0_28 = arith.constant 0 : index
      %40 = vector.load %arg8[%c0_27, %c0_28] : memref<4x32xf32, #tpu.memory_space<vmem>>, vector<4x32xf32>
      %c0_29 = arith.constant 0 : index
      %c0_30 = arith.constant 0 : index
      %41 = vector.load %arg7[%c0_29, %c0_30] : memref<4x1xf32, #tpu.memory_space<vmem>>, vector<4x1xf32>
      %42 = tpu.reciprocal %41 {approx = true} : vector<4x1xf32> -> vector<4x1xf32>
      %43 = vector.broadcast %42 : vector<4x1xf32> to vector<4x32xf32>
      %44 = arith.mulf %40, %43 : vector<4x32xf32>
      %45 = arith.addf %4, %44 : vector<4x32xf32>
      %c0_31 = arith.constant 0 : index
      %c0_32 = arith.constant 0 : index
      %c0_33 = arith.constant 0 : index
      %46 = vector.load %arg5[%c0_31, %c0_32, %c0_33] : memref<1x4x32xf32, #tpu.memory_space<vmem>>, vector<1x4x32xf32>
      %47 = vector.shape_cast %46 : vector<1x4x32xf32> to vector<4x32xf32>
      %48 = vector.shape_cast %45 : vector<4x32xf32> to vector<1x4x32xf32>
      tpu.vector_store %arg5[%c0_31, %c0_32, %c0_33], %48 {strides = array<i32>} : memref<1x4x32xf32, #tpu.memory_space<vmem>>, vector<1x4x32xf32>,
    } else {
    }
    return
  }
  func.func @transform_0(%arg0: i32, %arg1: i32) -> (i32, i32, i32) {
    %c0_i32 = arith.constant 0 : i32
    %c0_i32_0 = arith.constant 0 : i32
    %c0_i32_1 = arith.constant 0 : i32
    return %arg0, %c0_i32, %c0_i32_0 : i32, i32, i32
  }
  func.func @transform_1(%arg0: i32, %arg1: i32) -> (i32, i32, i32) {
    %c0_i32 = arith.constant 0 : i32
    %c0_i32_0 = arith.constant 0 : i32
    return %arg0, %c0_i32, %arg1 : i32, i32, i32
  }
  func.func @transform_2(%arg0: i32, %arg1: i32) -> (i32, i32, i32) {
    %c0_i32 = arith.constant 0 : i32
    %c0_i32_0 = arith.constant 0 : i32
    %c0_i32_1 = arith.constant 0 : i32
    return %c0_i32, %c0_i32_0, %arg1 : i32, i32, i32
  }
  func.func @transform_3(%arg0: i32, %arg1: i32) -> (i32, i32, i32) {
    %c0_i32 = arith.constant 0 : i32
    %c0_i32_0 = arith.constant 0 : i32
    %c0_i32_1 = arith.constant 0 : i32
    return %arg0, %c0_i32, %c0_i32_0 : i32, i32, i32
  }
}

module attributes {stable_mosaic.version = 11 : i64} {
  func.func @_heads_kernel(%arg0: memref<2x32xf32, #tpu.memory_space<vmem>>, %arg1: memref<2x32xf32, #tpu.memory_space<vmem>>, %arg2: memref<32x32xf32, #tpu.memory_space<vmem>>, %arg3: memref<1x32xf32, #tpu.memory_space<vmem>>, %arg4: memref<32x32xf32, #tpu.memory_space<vmem>>, %arg5: memref<1x32xf32, #tpu.memory_space<vmem>>, %arg6: memref<32x4xf32, #tpu.memory_space<vmem>>, %arg7: memref<1x4xf32, #tpu.memory_space<vmem>>, %arg8: memref<32x256xf32, #tpu.memory_space<vmem>>, %arg9: memref<1x256xf32, #tpu.memory_space<vmem>>, %arg10: memref<256x256xf32, #tpu.memory_space<vmem>>, %arg11: memref<1x256xf32, #tpu.memory_space<vmem>>, %arg12: memref<256x1xf32, #tpu.memory_space<vmem>>, %arg13: memref<1x1xf32, #tpu.memory_space<vmem>>, %arg14: memref<2x4xf32, #tpu.memory_space<vmem>>, %arg15: memref<2x1xf32, #tpu.memory_space<vmem>>) attributes {dimension_semantics = [], scalar_prefetch = 0 : i64, scratch_operands = 0 : i64, tpu.core_type = #tpu.core_type<tc>} {
    %c0 = arith.constant 0 : index
    %c0_0 = arith.constant 0 : index
    %0 = vector.load %arg0[%c0, %c0_0] : memref<2x32xf32, #tpu.memory_space<vmem>>, vector<2x32xf32>
    %c0_1 = arith.constant 0 : index
    %c0_2 = arith.constant 0 : index
    %1 = vector.load %arg2[%c0_1, %c0_2] : memref<32x32xf32, #tpu.memory_space<vmem>>, vector<32x32xf32>
    %cst = arith.constant dense<0.000000e+00> : vector<2x32xf32>
    %2 = tpu.matmul %0, %1, %cst {dimension_numbers = #tpu.dot_dimension_numbers<[1], [0], [0], [1], [0, 0, 1, 1], [], []>} : vector<2x32xf32>, vector<32x32xf32>, vector<2x32xf32> -> vector<2x32xf32>
    %c0_3 = arith.constant 0 : index
    %c0_4 = arith.constant 0 : index
    %3 = vector.load %arg3[%c0_3, %c0_4] : memref<1x32xf32, #tpu.memory_space<vmem>>, vector<1x32xf32>
    %4 = vector.broadcast %3 : vector<1x32xf32> to vector<2x32xf32>
    %5 = arith.addf %2, %4 : vector<2x32xf32>
    %cst_5 = arith.constant 0.000000e+00 : f32
    %6 = vector.broadcast %cst_5 : f32 to vector<2x32xf32>
    %7 = arith.maximumf %5, %6 : vector<2x32xf32>
    %c0_6 = arith.constant 0 : index
    %c0_7 = arith.constant 0 : index
    %8 = vector.load %arg4[%c0_6, %c0_7] : memref<32x32xf32, #tpu.memory_space<vmem>>, vector<32x32xf32>
    %cst_8 = arith.constant dense<0.000000e+00> : vector<2x32xf32>
    %9 = tpu.matmul %7, %8, %cst_8 {dimension_numbers = #tpu.dot_dimension_numbers<[1], [0], [0], [1], [0, 0, 1, 1], [], []>} : vector<2x32xf32>, vector<32x32xf32>, vector<2x32xf32> -> vector<2x32xf32>
    %c0_9 = arith.constant 0 : index
    %c0_10 = arith.constant 0 : index
    %10 = vector.load %arg5[%c0_9, %c0_10] : memref<1x32xf32, #tpu.memory_space<vmem>>, vector<1x32xf32>
    %11 = vector.broadcast %10 : vector<1x32xf32> to vector<2x32xf32>
    %12 = arith.addf %9, %11 : vector<2x32xf32>
    %cst_11 = arith.constant 0.000000e+00 : f32
    %13 = vector.broadcast %cst_11 : f32 to vector<2x32xf32>
    %14 = arith.maximumf %12, %13 : vector<2x32xf32>
    %c0_12 = arith.constant 0 : index
    %c0_13 = arith.constant 0 : index
    %15 = vector.load %arg6[%c0_12, %c0_13] : memref<32x4xf32, #tpu.memory_space<vmem>>, vector<32x4xf32>
    %cst_14 = arith.constant dense<0.000000e+00> : vector<2x4xf32>
    %16 = tpu.matmul %14, %15, %cst_14 {dimension_numbers = #tpu.dot_dimension_numbers<[1], [0], [0], [1], [0, 0, 1, 1], [], []>} : vector<2x32xf32>, vector<32x4xf32>, vector<2x4xf32> -> vector<2x4xf32>
    %c0_15 = arith.constant 0 : index
    %c0_16 = arith.constant 0 : index
    %17 = vector.load %arg7[%c0_15, %c0_16] : memref<1x4xf32, #tpu.memory_space<vmem>>, vector<1x4xf32>
    %18 = vector.broadcast %17 : vector<1x4xf32> to vector<2x4xf32>
    %19 = arith.addf %16, %18 : vector<2x4xf32>
    %c0_17 = arith.constant 0 : index
    %c0_18 = arith.constant 0 : index
    %20 = vector.load %arg14[%c0_17, %c0_18] : memref<2x4xf32, #tpu.memory_space<vmem>>, vector<2x4xf32>
    tpu.vector_store %arg14[%c0_17, %c0_18], %19 {strides = array<i32>} : memref<2x4xf32, #tpu.memory_space<vmem>>, vector<2x4xf32>,
    %c0_19 = arith.constant 0 : index
    %c0_20 = arith.constant 0 : index
    %21 = vector.load %arg1[%c0_19, %c0_20] : memref<2x32xf32, #tpu.memory_space<vmem>>, vector<2x32xf32>
    %c0_21 = arith.constant 0 : index
    %c0_22 = arith.constant 0 : index
    %22 = vector.load %arg8[%c0_21, %c0_22] : memref<32x256xf32, #tpu.memory_space<vmem>>, vector<32x256xf32>
    %cst_23 = arith.constant dense<0.000000e+00> : vector<2x256xf32>
    %23 = tpu.matmul %21, %22, %cst_23 {dimension_numbers = #tpu.dot_dimension_numbers<[1], [0], [0], [1], [0, 0, 1, 1], [], []>} : vector<2x32xf32>, vector<32x256xf32>, vector<2x256xf32> -> vector<2x256xf32>
    %c0_24 = arith.constant 0 : index
    %c0_25 = arith.constant 0 : index
    %24 = vector.load %arg9[%c0_24, %c0_25] : memref<1x256xf32, #tpu.memory_space<vmem>>, vector<1x256xf32>
    %25 = vector.broadcast %24 : vector<1x256xf32> to vector<2x256xf32>
    %26 = arith.addf %23, %25 : vector<2x256xf32>
    %cst_26 = arith.constant 0.000000e+00 : f32
    %27 = vector.broadcast %cst_26 : f32 to vector<2x256xf32>
    %28 = arith.maximumf %26, %27 : vector<2x256xf32>
    %c0_27 = arith.constant 0 : index
    %c0_28 = arith.constant 0 : index
    %29 = vector.load %arg10[%c0_27, %c0_28] : memref<256x256xf32, #tpu.memory_space<vmem>>, vector<256x256xf32>
    %cst_29 = arith.constant dense<0.000000e+00> : vector<2x256xf32>
    %30 = tpu.matmul %28, %29, %cst_29 {dimension_numbers = #tpu.dot_dimension_numbers<[1], [0], [0], [1], [0, 0, 1, 1], [], []>} : vector<2x256xf32>, vector<256x256xf32>, vector<2x256xf32> -> vector<2x256xf32>
    %c0_30 = arith.constant 0 : index
    %c0_31 = arith.constant 0 : index
    %31 = vector.load %arg11[%c0_30, %c0_31] : memref<1x256xf32, #tpu.memory_space<vmem>>, vector<1x256xf32>
    %32 = vector.broadcast %31 : vector<1x256xf32> to vector<2x256xf32>
    %33 = arith.addf %30, %32 : vector<2x256xf32>
    %cst_32 = arith.constant 0.000000e+00 : f32
    %34 = vector.broadcast %cst_32 : f32 to vector<2x256xf32>
    %35 = arith.maximumf %33, %34 : vector<2x256xf32>
    %c0_33 = arith.constant 0 : index
    %c0_34 = arith.constant 0 : index
    %36 = vector.load %arg12[%c0_33, %c0_34] : memref<256x1xf32, #tpu.memory_space<vmem>>, vector<256x1xf32>
    %cst_35 = arith.constant dense<0.000000e+00> : vector<2x1xf32>
    %37 = tpu.matmul %35, %36, %cst_35 {dimension_numbers = #tpu.dot_dimension_numbers<[1], [0], [0], [1], [0, 0, 1, 1], [], []>} : vector<2x256xf32>, vector<256x1xf32>, vector<2x1xf32> -> vector<2x1xf32>
    %c0_36 = arith.constant 0 : index
    %c0_37 = arith.constant 0 : index
    %38 = vector.load %arg13[%c0_36, %c0_37] : memref<1x1xf32, #tpu.memory_space<vmem>>, vector<1x1xf32>
    %39 = vector.broadcast %38 : vector<1x1xf32> to vector<2x1xf32>
    %40 = arith.addf %37, %39 : vector<2x1xf32>
    %41 = arith.negf %40 : vector<2x1xf32>
    %42 = math.exp %41 : vector<2x1xf32>
    %cst_38 = arith.constant 1.000000e+00 : f32
    %43 = vector.broadcast %cst_38 : f32 to vector<2x1xf32>
    %44 = arith.addf %43, %42 : vector<2x1xf32>
    %45 = arith.divf %43, %44 : vector<2x1xf32>
    %c0_39 = arith.constant 0 : index
    %c0_40 = arith.constant 0 : index
    %46 = vector.load %arg15[%c0_39, %c0_40] : memref<2x1xf32, #tpu.memory_space<vmem>>, vector<2x1xf32>
    tpu.vector_store %arg15[%c0_39, %c0_40], %45 {strides = array<i32>} : memref<2x1xf32, #tpu.memory_space<vmem>>, vector<2x1xf32>,
    return
  }
}

module attributes {stable_mosaic.version = 11 : i64} {
  func.func @_upscale_mask_kernel(%arg0: i32, %arg1: i32, %arg2: memref<1x32x16xbf16, #tpu.memory_space<vmem>>, %arg3: memref<32x32xbf16, #tpu.memory_space<vmem>>, %arg4: memref<32x1xf32, #tpu.memory_space<vmem>>, %arg5: memref<8x1xf32, #tpu.memory_space<vmem>>, %arg6: memref<8x1xf32, #tpu.memory_space<vmem>>, %arg7: memref<16x8xbf16, #tpu.memory_space<vmem>>, %arg8: memref<16x1xf32, #tpu.memory_space<vmem>>, %arg9: memref<4x1xf32, #tpu.memory_space<vmem>>, %arg10: memref<4x1xf32, #tpu.memory_space<vmem>>, %arg11: memref<16x4xbf16, #tpu.memory_space<vmem>>, %arg12: memref<16x1xf32, #tpu.memory_space<vmem>>, %arg13: memref<4x1xf32, #tpu.memory_space<vmem>>, %arg14: memref<4x1xf32, #tpu.memory_space<vmem>>, %arg15: memref<16x4xbf16, #tpu.memory_space<vmem>>, %arg16: memref<16x1xf32, #tpu.memory_space<vmem>>, %arg17: memref<4x1xf32, #tpu.memory_space<vmem>>, %arg18: memref<4x1xf32, #tpu.memory_space<vmem>>, %arg19: memref<1x1x4xf32, #tpu.memory_space<vmem>>, %arg20: memref<1x4x1024xf32, #tpu.memory_space<vmem>>, %arg21: memref<8x64xbf16, #tpu.memory_space<vmem>>, %arg22: memref<4x256xbf16, #tpu.memory_space<vmem>>, %arg23: memref<4x1024xbf16, #tpu.memory_space<vmem>>) attributes {dimension_semantics = [#tpu.dimension_semantics<parallel>, #tpu.dimension_semantics<parallel>], iteration_bounds = array<i64: 2, 1>, scalar_prefetch = 0 : i64, scratch_operands = 3 : i64, tpu.core_type = #tpu.core_type<tc>, window_params = [{transform_indices = @transform_0, window_bounds = array<i64: 1, 32, 16>}, {pipeline_mode = #tpu.pipeline_mode<synchronous>, transform_indices = @transform_1, window_bounds = array<i64: 32, 32>}, {pipeline_mode = #tpu.pipeline_mode<synchronous>, transform_indices = @transform_2, window_bounds = array<i64: 32, 1>}, {pipeline_mode = #tpu.pipeline_mode<synchronous>, transform_indices = @transform_3, window_bounds = array<i64: 8, 1>}, {pipeline_mode = #tpu.pipeline_mode<synchronous>, transform_indices = @transform_4, window_bounds = array<i64: 8, 1>}, {pipeline_mode = #tpu.pipeline_mode<synchronous>, transform_indices = @transform_5, window_bounds = array<i64: 16, 8>}, {pipeline_mode = #tpu.pipeline_mode<synchronous>, transform_indices = @transform_6, window_bounds = array<i64: 16, 1>}, {pipeline_mode = #tpu.pipeline_mode<synchronous>, transform_indices = @transform_7, window_bounds = array<i64: 4, 1>}, {pipeline_mode = #tpu.pipeline_mode<synchronous>, transform_indices = @transform_8, window_bounds = array<i64: 4, 1>}, {pipeline_mode = #tpu.pipeline_mode<synchronous>, transform_indices = @transform_9, window_bounds = array<i64: 16, 4>}, {pipeline_mode = #tpu.pipeline_mode<synchronous>, transform_indices = @transform_10, window_bounds = array<i64: 16, 1>}, {pipeline_mode = #tpu.pipeline_mode<synchronous>, transform_indices = @transform_11, window_bounds = array<i64: 4, 1>}, {pipeline_mode = #tpu.pipeline_mode<synchronous>, transform_indices = @transform_12, window_bounds = array<i64: 4, 1>}, {pipeline_mode = #tpu.pipeline_mode<synchronous>, transform_indices = @transform_13, window_bounds = array<i64: 16, 4>}, {pipeline_mode = #tpu.pipeline_mode<synchronous>, transform_indices = @transform_14, window_bounds = array<i64: 16, 1>}, {pipeline_mode = #tpu.pipeline_mode<synchronous>, transform_indices = @transform_15, window_bounds = array<i64: 4, 1>}, {pipeline_mode = #tpu.pipeline_mode<synchronous>, transform_indices = @transform_16, window_bounds = array<i64: 4, 1>}, {transform_indices = @transform_17, window_bounds = array<i64: 1, 1, 4>}, {transform_indices = @transform_18, window_bounds = array<i64: 1, 4, 1024>}]} {
    %c0 = arith.constant 0 : index
    %c0_0 = arith.constant 0 : index
    %c0_1 = arith.constant 0 : index
    %0 = vector.load %arg2[%c0, %c0_0, %c0_1] : memref<1x32x16xbf16, #tpu.memory_space<vmem>>, vector<1x32x16xbf16>
    %1 = vector.shape_cast %0 : vector<1x32x16xbf16> to vector<32x16xbf16>
    %cst = arith.constant 1.000000e+00 : f32
    %2 = vector.broadcast %cst : f32 to vector<1x8xf32>
    %cst_2 = arith.constant 1.000000e+00 : f32
    %3 = vector.broadcast %cst_2 : f32 to vector<1x4xf32>
    %c0_3 = arith.constant 0 : index
    %c0_4 = arith.constant 0 : index
    %4 = vector.load %arg3[%c0_3, %c0_4] : memref<32x32xbf16, #tpu.memory_space<vmem>>, vector<32x32xbf16>
    %cst_5 = arith.constant dense<0.000000e+00> : vector<32x16xf32>
    %5 = tpu.matmul %4, %1, %cst_5 {dimension_numbers = #tpu.dot_dimension_numbers<[1], [0], [0], [1], [0, 0, 1, 1], [], []>} : vector<32x32xbf16>, vector<32x16xbf16>, vector<32x16xf32> -> vector<32x16xf32>
    %c0_6 = arith.constant 0 : index
    %c0_7 = arith.constant 0 : index
    %6 = vector.load %arg4[%c0_6, %c0_7] : memref<32x1xf32, #tpu.memory_space<vmem>>, vector<32x1xf32>
    %7 = vector.broadcast %6 : vector<32x1xf32> to vector<32x16xf32>
    %8 = arith.addf %5, %7 : vector<32x16xf32>
    %c0_8 = arith.constant 0 : index
    %c0_9 = arith.constant 0 : index
    %9 = vector.load %arg5[%c0_8, %c0_9] : memref<8x1xf32, #tpu.memory_space<vmem>>, vector<8x1xf32>
    %c0_10 = arith.constant 0 : index
    %c0_11 = arith.constant 0 : index
    %10 = vector.load %arg6[%c0_10, %c0_11] : memref<8x1xf32, #tpu.memory_space<vmem>>, vector<8x1xf32>
    %11 = vector.extract_strided_slice %8 {offsets = [0, 0], sizes = [8, 16], strides = [1, 1]} : vector<32x16xf32> to vector<8x16xf32>
    %cst_12 = arith.constant dense<0.000000e+00> : vector<1x16xf32>
    %12 = tpu.matmul %2, %11, %cst_12 {dimension_numbers = #tpu.dot_dimension_numbers<[1], [0], [0], [1], [0, 0, 1, 1], [], []>} : vector<1x8xf32>, vector<8x16xf32>, vector<1x16xf32> -> vector<1x16xf32>
    %cst_13 = arith.constant 1.250000e-01 : f32
    %13 = vector.broadcast %cst_13 : f32 to vector<1x16xf32>
    %14 = arith.mulf %12, %13 : vector<1x16xf32>
    %15 = vector.broadcast %14 : vector<1x16xf32> to vector<8x16xf32>
    %16 = arith.subf %11, %15 : vector<8x16xf32>
    %17 = arith.mulf %16, %16 : vector<8x16xf32>
    %cst_14 = arith.constant dense<0.000000e+00> : vector<1x16xf32>
    %18 = tpu.matmul %2, %17, %cst_14 {dimension_numbers = #tpu.dot_dimension_numbers<[1], [0], [0], [1], [0, 0, 1, 1], [], []>} : vector<1x8xf32>, vector<8x16xf32>, vector<1x16xf32> -> vector<1x16xf32>
    %cst_15 = arith.constant 1.250000e-01 : f32
    %19 = vector.broadcast %cst_15 : f32 to vector<1x16xf32>
    %20 = arith.mulf %18, %19 : vector<1x16xf32>
    %cst_16 = arith.constant 9.99999997E-7 : f32
    %21 = vector.broadcast %cst_16 : f32 to vector<1x16xf32>
    %22 = arith.addf %20, %21 : vector<1x16xf32>
    %23 = math.rsqrt %22 : vector<1x16xf32>
    %24 = vector.broadcast %23 : vector<1x16xf32> to vector<8x16xf32>
    %25 = arith.mulf %16, %24 : vector<8x16xf32>
    %26 = vector.broadcast %9 : vector<8x1xf32> to vector<8x16xf32>
    %27 = arith.mulf %25, %26 : vector<8x16xf32>
    %28 = vector.broadcast %10 : vector<8x1xf32> to vector<8x16xf32>
    %29 = arith.addf %27, %28 : vector<8x16xf32>
    %30 = arith.mulf %29, %29 : vector<8x16xf32>
    %31 = arith.mulf %29, %30 : vector<8x16xf32>
    %cst_17 = arith.constant 4.471500e-02 : f32
    %32 = vector.broadcast %cst_17 : f32 to vector<8x16xf32>
    %33 = arith.mulf %32, %31 : vector<8x16xf32>
    %34 = arith.addf %29, %33 : vector<8x16xf32>
    %cst_18 = arith.constant 0.797884583 : f32
    %35 = vector.broadcast %cst_18 : f32 to vector<8x16xf32>
    %36 = arith.mulf %35, %34 : vector<8x16xf32>
    %37 = math.tanh %36 : vector<8x16xf32>
    %cst_19 = arith.constant 1.000000e+00 : f32
    %38 = vector.broadcast %cst_19 : f32 to vector<8x16xf32>
    %39 = arith.addf %38, %37 : vector<8x16xf32>
    %cst_20 = arith.constant 5.000000e-01 : f32
    %40 = vector.broadcast %cst_20 : f32 to vector<8x16xf32>
    %41 = arith.mulf %40, %39 : vector<8x16xf32>
    %42 = arith.mulf %29, %41 : vector<8x16xf32>
    %43 = arith.truncf %42 : vector<8x16xf32> to vector<8x16xbf16>
    %c0_21 = arith.constant 0 : index
    %c0_22 = arith.constant 0 : index
    %44 = vector.load %arg21[%c0_21, %c0_22] : memref<8x64xbf16, #tpu.memory_space<vmem>>, vector<8x16xbf16>
    tpu.vector_store %arg21[%c0_21, %c0_22], %43 {strides = array<i32>} : memref<8x64xbf16, #tpu.memory_space<vmem>>, vector<8x16xbf16>,
    %45 = vector.extract_strided_slice %8 {offsets = [8, 0], sizes = [8, 16], strides = [1, 1]} : vector<32x16xf32> to vector<8x16xf32>
    %cst_23 = arith.constant dense<0.000000e+00> : vector<1x16xf32>
    %46 = tpu.matmul %2, %45, %cst_23 {dimension_numbers = #tpu.dot_dimension_numbers<[1], [0], [0], [1], [0, 0, 1, 1], [], []>} : vector<1x8xf32>, vector<8x16xf32>, vector<1x16xf32> -> vector<1x16xf32>
    %cst_24 = arith.constant 1.250000e-01 : f32
    %47 = vector.broadcast %cst_24 : f32 to vector<1x16xf32>
    %48 = arith.mulf %46, %47 : vector<1x16xf32>
    %49 = vector.broadcast %48 : vector<1x16xf32> to vector<8x16xf32>
    %50 = arith.subf %45, %49 : vector<8x16xf32>
    %51 = arith.mulf %50, %50 : vector<8x16xf32>
    %cst_25 = arith.constant dense<0.000000e+00> : vector<1x16xf32>
    %52 = tpu.matmul %2, %51, %cst_25 {dimension_numbers = #tpu.dot_dimension_numbers<[1], [0], [0], [1], [0, 0, 1, 1], [], []>} : vector<1x8xf32>, vector<8x16xf32>, vector<1x16xf32> -> vector<1x16xf32>
    %cst_26 = arith.constant 1.250000e-01 : f32
    %53 = vector.broadcast %cst_26 : f32 to vector<1x16xf32>
    %54 = arith.mulf %52, %53 : vector<1x16xf32>
    %cst_27 = arith.constant 9.99999997E-7 : f32
    %55 = vector.broadcast %cst_27 : f32 to vector<1x16xf32>
    %56 = arith.addf %54, %55 : vector<1x16xf32>
    %57 = math.rsqrt %56 : vector<1x16xf32>
    %58 = vector.broadcast %57 : vector<1x16xf32> to vector<8x16xf32>
    %59 = arith.mulf %50, %58 : vector<8x16xf32>
    %60 = vector.broadcast %9 : vector<8x1xf32> to vector<8x16xf32>
    %61 = arith.mulf %59, %60 : vector<8x16xf32>
    %62 = vector.broadcast %10 : vector<8x1xf32> to vector<8x16xf32>
    %63 = arith.addf %61, %62 : vector<8x16xf32>
    %64 = arith.mulf %63, %63 : vector<8x16xf32>
    %65 = arith.mulf %63, %64 : vector<8x16xf32>
    %cst_28 = arith.constant 4.471500e-02 : f32
    %66 = vector.broadcast %cst_28 : f32 to vector<8x16xf32>
    %67 = arith.mulf %66, %65 : vector<8x16xf32>
    %68 = arith.addf %63, %67 : vector<8x16xf32>
    %cst_29 = arith.constant 0.797884583 : f32
    %69 = vector.broadcast %cst_29 : f32 to vector<8x16xf32>
    %70 = arith.mulf %69, %68 : vector<8x16xf32>
    %71 = math.tanh %70 : vector<8x16xf32>
    %cst_30 = arith.constant 1.000000e+00 : f32
    %72 = vector.broadcast %cst_30 : f32 to vector<8x16xf32>
    %73 = arith.addf %72, %71 : vector<8x16xf32>
    %cst_31 = arith.constant 5.000000e-01 : f32
    %74 = vector.broadcast %cst_31 : f32 to vector<8x16xf32>
    %75 = arith.mulf %74, %73 : vector<8x16xf32>
    %76 = arith.mulf %63, %75 : vector<8x16xf32>
    %77 = arith.truncf %76 : vector<8x16xf32> to vector<8x16xbf16>
    %c0_32 = arith.constant 0 : index
    %c16 = arith.constant 16 : index
    %78 = vector.load %arg21[%c0_32, %c16] : memref<8x64xbf16, #tpu.memory_space<vmem>>, vector<8x16xbf16>
    tpu.vector_store %arg21[%c0_32, %c16], %77 {strides = array<i32>} : memref<8x64xbf16, #tpu.memory_space<vmem>>, vector<8x16xbf16>,
    %79 = vector.extract_strided_slice %8 {offsets = [16, 0], sizes = [8, 16], strides = [1, 1]} : vector<32x16xf32> to vector<8x16xf32>
    %cst_33 = arith.constant dense<0.000000e+00> : vector<1x16xf32>
    %80 = tpu.matmul %2, %79, %cst_33 {dimension_numbers = #tpu.dot_dimension_numbers<[1], [0], [0], [1], [0, 0, 1, 1], [], []>} : vector<1x8xf32>, vector<8x16xf32>, vector<1x16xf32> -> vector<1x16xf32>
    %cst_34 = arith.constant 1.250000e-01 : f32
    %81 = vector.broadcast %cst_34 : f32 to vector<1x16xf32>
    %82 = arith.mulf %80, %81 : vector<1x16xf32>
    %83 = vector.broadcast %82 : vector<1x16xf32> to vector<8x16xf32>
    %84 = arith.subf %79, %83 : vector<8x16xf32>
    %85 = arith.mulf %84, %84 : vector<8x16xf32>
    %cst_35 = arith.constant dense<0.000000e+00> : vector<1x16xf32>
    %86 = tpu.matmul %2, %85, %cst_35 {dimension_numbers = #tpu.dot_dimension_numbers<[1], [0], [0], [1], [0, 0, 1, 1], [], []>} : vector<1x8xf32>, vector<8x16xf32>, vector<1x16xf32> -> vector<1x16xf32>
    %cst_36 = arith.constant 1.250000e-01 : f32
    %87 = vector.broadcast %cst_36 : f32 to vector<1x16xf32>
    %88 = arith.mulf %86, %87 : vector<1x16xf32>
    %cst_37 = arith.constant 9.99999997E-7 : f32
    %89 = vector.broadcast %cst_37 : f32 to vector<1x16xf32>
    %90 = arith.addf %88, %89 : vector<1x16xf32>
    %91 = math.rsqrt %90 : vector<1x16xf32>
    %92 = vector.broadcast %91 : vector<1x16xf32> to vector<8x16xf32>
    %93 = arith.mulf %84, %92 : vector<8x16xf32>
    %94 = vector.broadcast %9 : vector<8x1xf32> to vector<8x16xf32>
    %95 = arith.mulf %93, %94 : vector<8x16xf32>
    %96 = vector.broadcast %10 : vector<8x1xf32> to vector<8x16xf32>
    %97 = arith.addf %95, %96 : vector<8x16xf32>
    %98 = arith.mulf %97, %97 : vector<8x16xf32>
    %99 = arith.mulf %97, %98 : vector<8x16xf32>
    %cst_38 = arith.constant 4.471500e-02 : f32
    %100 = vector.broadcast %cst_38 : f32 to vector<8x16xf32>
    %101 = arith.mulf %100, %99 : vector<8x16xf32>
    %102 = arith.addf %97, %101 : vector<8x16xf32>
    %cst_39 = arith.constant 0.797884583 : f32
    %103 = vector.broadcast %cst_39 : f32 to vector<8x16xf32>
    %104 = arith.mulf %103, %102 : vector<8x16xf32>
    %105 = math.tanh %104 : vector<8x16xf32>
    %cst_40 = arith.constant 1.000000e+00 : f32
    %106 = vector.broadcast %cst_40 : f32 to vector<8x16xf32>
    %107 = arith.addf %106, %105 : vector<8x16xf32>
    %cst_41 = arith.constant 5.000000e-01 : f32
    %108 = vector.broadcast %cst_41 : f32 to vector<8x16xf32>
    %109 = arith.mulf %108, %107 : vector<8x16xf32>
    %110 = arith.mulf %97, %109 : vector<8x16xf32>
    %111 = arith.truncf %110 : vector<8x16xf32> to vector<8x16xbf16>
    %c0_42 = arith.constant 0 : index
    %c32 = arith.constant 32 : index
    %112 = vector.load %arg21[%c0_42, %c32] : memref<8x64xbf16, #tpu.memory_space<vmem>>, vector<8x16xbf16>
    tpu.vector_store %arg21[%c0_42, %c32], %111 {strides = array<i32>} : memref<8x64xbf16, #tpu.memory_space<vmem>>, vector<8x16xbf16>,
    %113 = vector.extract_strided_slice %8 {offsets = [24, 0], sizes = [8, 16], strides = [1, 1]} : vector<32x16xf32> to vector<8x16xf32>
    %cst_43 = arith.constant dense<0.000000e+00> : vector<1x16xf32>
    %114 = tpu.matmul %2, %113, %cst_43 {dimension_numbers = #tpu.dot_dimension_numbers<[1], [0], [0], [1], [0, 0, 1, 1], [], []>} : vector<1x8xf32>, vector<8x16xf32>, vector<1x16xf32> -> vector<1x16xf32>
    %cst_44 = arith.constant 1.250000e-01 : f32
    %115 = vector.broadcast %cst_44 : f32 to vector<1x16xf32>
    %116 = arith.mulf %114, %115 : vector<1x16xf32>
    %117 = vector.broadcast %116 : vector<1x16xf32> to vector<8x16xf32>
    %118 = arith.subf %113, %117 : vector<8x16xf32>
    %119 = arith.mulf %118, %118 : vector<8x16xf32>
    %cst_45 = arith.constant dense<0.000000e+00> : vector<1x16xf32>
    %120 = tpu.matmul %2, %119, %cst_45 {dimension_numbers = #tpu.dot_dimension_numbers<[1], [0], [0], [1], [0, 0, 1, 1], [], []>} : vector<1x8xf32>, vector<8x16xf32>, vector<1x16xf32> -> vector<1x16xf32>
    %cst_46 = arith.constant 1.250000e-01 : f32
    %121 = vector.broadcast %cst_46 : f32 to vector<1x16xf32>
    %122 = arith.mulf %120, %121 : vector<1x16xf32>
    %cst_47 = arith.constant 9.99999997E-7 : f32
    %123 = vector.broadcast %cst_47 : f32 to vector<1x16xf32>
    %124 = arith.addf %122, %123 : vector<1x16xf32>
    %125 = math.rsqrt %124 : vector<1x16xf32>
    %126 = vector.broadcast %125 : vector<1x16xf32> to vector<8x16xf32>
    %127 = arith.mulf %118, %126 : vector<8x16xf32>
    %128 = vector.broadcast %9 : vector<8x1xf32> to vector<8x16xf32>
    %129 = arith.mulf %127, %128 : vector<8x16xf32>
    %130 = vector.broadcast %10 : vector<8x1xf32> to vector<8x16xf32>
    %131 = arith.addf %129, %130 : vector<8x16xf32>
    %132 = arith.mulf %131, %131 : vector<8x16xf32>
    %133 = arith.mulf %131, %132 : vector<8x16xf32>
    %cst_48 = arith.constant 4.471500e-02 : f32
    %134 = vector.broadcast %cst_48 : f32 to vector<8x16xf32>
    %135 = arith.mulf %134, %133 : vector<8x16xf32>
    %136 = arith.addf %131, %135 : vector<8x16xf32>
    %cst_49 = arith.constant 0.797884583 : f32
    %137 = vector.broadcast %cst_49 : f32 to vector<8x16xf32>
    %138 = arith.mulf %137, %136 : vector<8x16xf32>
    %139 = math.tanh %138 : vector<8x16xf32>
    %cst_50 = arith.constant 1.000000e+00 : f32
    %140 = vector.broadcast %cst_50 : f32 to vector<8x16xf32>
    %141 = arith.addf %140, %139 : vector<8x16xf32>
    %cst_51 = arith.constant 5.000000e-01 : f32
    %142 = vector.broadcast %cst_51 : f32 to vector<8x16xf32>
    %143 = arith.mulf %142, %141 : vector<8x16xf32>
    %144 = arith.mulf %131, %143 : vector<8x16xf32>
    %145 = arith.truncf %144 : vector<8x16xf32> to vector<8x16xbf16>
    %c0_52 = arith.constant 0 : index
    %c48 = arith.constant 48 : index
    %146 = vector.load %arg21[%c0_52, %c48] : memref<8x64xbf16, #tpu.memory_space<vmem>>, vector<8x16xbf16>
    tpu.vector_store %arg21[%c0_52, %c48], %145 {strides = array<i32>} : memref<8x64xbf16, #tpu.memory_space<vmem>>, vector<8x16xbf16>,
    %c0_53 = arith.constant 0 : index
    %c0_54 = arith.constant 0 : index
    %147 = vector.load %arg7[%c0_53, %c0_54] : memref<16x8xbf16, #tpu.memory_space<vmem>>, vector<16x8xbf16>
    %c0_55 = arith.constant 0 : index
    %c0_56 = arith.constant 0 : index
    %148 = vector.load %arg21[%c0_55, %c0_56] : memref<8x64xbf16, #tpu.memory_space<vmem>>, vector<8x64xbf16>
    %cst_57 = arith.constant dense<0.000000e+00> : vector<16x64xf32>
    %149 = tpu.matmul %147, %148, %cst_57 {dimension_numbers = #tpu.dot_dimension_numbers<[1], [0], [0], [1], [0, 0, 1, 1], [], []>} : vector<16x8xbf16>, vector<8x64xbf16>, vector<16x64xf32> -> vector<16x64xf32>
    %c0_58 = arith.constant 0 : index
    %c0_59 = arith.constant 0 : index
    %150 = vector.load %arg8[%c0_58, %c0_59] : memref<16x1xf32, #tpu.memory_space<vmem>>, vector<16x1xf32>
    %151 = vector.broadcast %150 : vector<16x1xf32> to vector<16x64xf32>
    %152 = arith.addf %149, %151 : vector<16x64xf32>
    %c0_60 = arith.constant 0 : index
    %c0_61 = arith.constant 0 : index
    %153 = vector.load %arg9[%c0_60, %c0_61] : memref<4x1xf32, #tpu.memory_space<vmem>>, vector<4x1xf32>
    %c0_62 = arith.constant 0 : index
    %c0_63 = arith.constant 0 : index
    %154 = vector.load %arg10[%c0_62, %c0_63] : memref<4x1xf32, #tpu.memory_space<vmem>>, vector<4x1xf32>
    %155 = vector.extract_strided_slice %152 {offsets = [0, 0], sizes = [4, 64], strides = [1, 1]} : vector<16x64xf32> to vector<4x64xf32>
    %cst_64 = arith.constant dense<0.000000e+00> : vector<1x64xf32>
    %156 = tpu.matmul %3, %155, %cst_64 {dimension_numbers = #tpu.dot_dimension_numbers<[1], [0], [0], [1], [0, 0, 1, 1], [], []>} : vector<1x4xf32>, vector<4x64xf32>, vector<1x64xf32> -> vector<1x64xf32>
    %cst_65 = arith.constant 2.500000e-01 : f32
    %157 = vector.broadcast %cst_65 : f32 to vector<1x64xf32>
    %158 = arith.mulf %156, %157 : vector<1x64xf32>
    %159 = vector.broadcast %158 : vector<1x64xf32> to vector<4x64xf32>
    %160 = arith.subf %155, %159 : vector<4x64xf32>
    %161 = arith.mulf %160, %160 : vector<4x64xf32>
    %cst_66 = arith.constant dense<0.000000e+00> : vector<1x64xf32>
    %162 = tpu.matmul %3, %161, %cst_66 {dimension_numbers = #tpu.dot_dimension_numbers<[1], [0], [0], [1], [0, 0, 1, 1], [], []>} : vector<1x4xf32>, vector<4x64xf32>, vector<1x64xf32> -> vector<1x64xf32>
    %cst_67 = arith.constant 2.500000e-01 : f32
    %163 = vector.broadcast %cst_67 : f32 to vector<1x64xf32>
    %164 = arith.mulf %162, %163 : vector<1x64xf32>
    %cst_68 = arith.constant 9.99999997E-7 : f32
    %165 = vector.broadcast %cst_68 : f32 to vector<1x64xf32>
    %166 = arith.addf %164, %165 : vector<1x64xf32>
    %167 = math.rsqrt %166 : vector<1x64xf32>
    %168 = vector.broadcast %167 : vector<1x64xf32> to vector<4x64xf32>
    %169 = arith.mulf %160, %168 : vector<4x64xf32>
    %170 = vector.broadcast %153 : vector<4x1xf32> to vector<4x64xf32>
    %171 = arith.mulf %169, %170 : vector<4x64xf32>
    %172 = vector.broadcast %154 : vector<4x1xf32> to vector<4x64xf32>
    %173 = arith.addf %171, %172 : vector<4x64xf32>
    %174 = arith.mulf %173, %173 : vector<4x64xf32>
    %175 = arith.mulf %173, %174 : vector<4x64xf32>
    %cst_69 = arith.constant 4.471500e-02 : f32
    %176 = vector.broadcast %cst_69 : f32 to vector<4x64xf32>
    %177 = arith.mulf %176, %175 : vector<4x64xf32>
    %178 = arith.addf %173, %177 : vector<4x64xf32>
    %cst_70 = arith.constant 0.797884583 : f32
    %179 = vector.broadcast %cst_70 : f32 to vector<4x64xf32>
    %180 = arith.mulf %179, %178 : vector<4x64xf32>
    %181 = math.tanh %180 : vector<4x64xf32>
    %cst_71 = arith.constant 1.000000e+00 : f32
    %182 = vector.broadcast %cst_71 : f32 to vector<4x64xf32>
    %183 = arith.addf %182, %181 : vector<4x64xf32>
    %cst_72 = arith.constant 5.000000e-01 : f32
    %184 = vector.broadcast %cst_72 : f32 to vector<4x64xf32>
    %185 = arith.mulf %184, %183 : vector<4x64xf32>
    %186 = arith.mulf %173, %185 : vector<4x64xf32>
    %187 = arith.truncf %186 : vector<4x64xf32> to vector<4x64xbf16>
    %c0_73 = arith.constant 0 : index
    %c0_74 = arith.constant 0 : index
    %188 = vector.load %arg22[%c0_73, %c0_74] : memref<4x256xbf16, #tpu.memory_space<vmem>>, vector<4x64xbf16>
    tpu.vector_store %arg22[%c0_73, %c0_74], %187 {strides = array<i32>} : memref<4x256xbf16, #tpu.memory_space<vmem>>, vector<4x64xbf16>,
    %189 = vector.extract_strided_slice %152 {offsets = [4, 0], sizes = [4, 64], strides = [1, 1]} : vector<16x64xf32> to vector<4x64xf32>
    %cst_75 = arith.constant dense<0.000000e+00> : vector<1x64xf32>
    %190 = tpu.matmul %3, %189, %cst_75 {dimension_numbers = #tpu.dot_dimension_numbers<[1], [0], [0], [1], [0, 0, 1, 1], [], []>} : vector<1x4xf32>, vector<4x64xf32>, vector<1x64xf32> -> vector<1x64xf32>
    %cst_76 = arith.constant 2.500000e-01 : f32
    %191 = vector.broadcast %cst_76 : f32 to vector<1x64xf32>
    %192 = arith.mulf %190, %191 : vector<1x64xf32>
    %193 = vector.broadcast %192 : vector<1x64xf32> to vector<4x64xf32>
    %194 = arith.subf %189, %193 : vector<4x64xf32>
    %195 = arith.mulf %194, %194 : vector<4x64xf32>
    %cst_77 = arith.constant dense<0.000000e+00> : vector<1x64xf32>
    %196 = tpu.matmul %3, %195, %cst_77 {dimension_numbers = #tpu.dot_dimension_numbers<[1], [0], [0], [1], [0, 0, 1, 1], [], []>} : vector<1x4xf32>, vector<4x64xf32>, vector<1x64xf32> -> vector<1x64xf32>
    %cst_78 = arith.constant 2.500000e-01 : f32
    %197 = vector.broadcast %cst_78 : f32 to vector<1x64xf32>
    %198 = arith.mulf %196, %197 : vector<1x64xf32>
    %cst_79 = arith.constant 9.99999997E-7 : f32
    %199 = vector.broadcast %cst_79 : f32 to vector<1x64xf32>
    %200 = arith.addf %198, %199 : vector<1x64xf32>
    %201 = math.rsqrt %200 : vector<1x64xf32>
    %202 = vector.broadcast %201 : vector<1x64xf32> to vector<4x64xf32>
    %203 = arith.mulf %194, %202 : vector<4x64xf32>
    %204 = vector.broadcast %153 : vector<4x1xf32> to vector<4x64xf32>
    %205 = arith.mulf %203, %204 : vector<4x64xf32>
    %206 = vector.broadcast %154 : vector<4x1xf32> to vector<4x64xf32>
    %207 = arith.addf %205, %206 : vector<4x64xf32>
    %208 = arith.mulf %207, %207 : vector<4x64xf32>
    %209 = arith.mulf %207, %208 : vector<4x64xf32>
    %cst_80 = arith.constant 4.471500e-02 : f32
    %210 = vector.broadcast %cst_80 : f32 to vector<4x64xf32>
    %211 = arith.mulf %210, %209 : vector<4x64xf32>
    %212 = arith.addf %207, %211 : vector<4x64xf32>
    %cst_81 = arith.constant 0.797884583 : f32
    %213 = vector.broadcast %cst_81 : f32 to vector<4x64xf32>
    %214 = arith.mulf %213, %212 : vector<4x64xf32>
    %215 = math.tanh %214 : vector<4x64xf32>
    %cst_82 = arith.constant 1.000000e+00 : f32
    %216 = vector.broadcast %cst_82 : f32 to vector<4x64xf32>
    %217 = arith.addf %216, %215 : vector<4x64xf32>
    %cst_83 = arith.constant 5.000000e-01 : f32
    %218 = vector.broadcast %cst_83 : f32 to vector<4x64xf32>
    %219 = arith.mulf %218, %217 : vector<4x64xf32>
    %220 = arith.mulf %207, %219 : vector<4x64xf32>
    %221 = arith.truncf %220 : vector<4x64xf32> to vector<4x64xbf16>
    %c0_84 = arith.constant 0 : index
    %c64 = arith.constant 64 : index
    %222 = vector.load %arg22[%c0_84, %c64] : memref<4x256xbf16, #tpu.memory_space<vmem>>, vector<4x64xbf16>
    tpu.vector_store %arg22[%c0_84, %c64], %221 {strides = array<i32>} : memref<4x256xbf16, #tpu.memory_space<vmem>>, vector<4x64xbf16>,
    %223 = vector.extract_strided_slice %152 {offsets = [8, 0], sizes = [4, 64], strides = [1, 1]} : vector<16x64xf32> to vector<4x64xf32>
    %cst_85 = arith.constant dense<0.000000e+00> : vector<1x64xf32>
    %224 = tpu.matmul %3, %223, %cst_85 {dimension_numbers = #tpu.dot_dimension_numbers<[1], [0], [0], [1], [0, 0, 1, 1], [], []>} : vector<1x4xf32>, vector<4x64xf32>, vector<1x64xf32> -> vector<1x64xf32>
    %cst_86 = arith.constant 2.500000e-01 : f32
    %225 = vector.broadcast %cst_86 : f32 to vector<1x64xf32>
    %226 = arith.mulf %224, %225 : vector<1x64xf32>
    %227 = vector.broadcast %226 : vector<1x64xf32> to vector<4x64xf32>
    %228 = arith.subf %223, %227 : vector<4x64xf32>
    %229 = arith.mulf %228, %228 : vector<4x64xf32>
    %cst_87 = arith.constant dense<0.000000e+00> : vector<1x64xf32>
    %230 = tpu.matmul %3, %229, %cst_87 {dimension_numbers = #tpu.dot_dimension_numbers<[1], [0], [0], [1], [0, 0, 1, 1], [], []>} : vector<1x4xf32>, vector<4x64xf32>, vector<1x64xf32> -> vector<1x64xf32>
    %cst_88 = arith.constant 2.500000e-01 : f32
    %231 = vector.broadcast %cst_88 : f32 to vector<1x64xf32>
    %232 = arith.mulf %230, %231 : vector<1x64xf32>
    %cst_89 = arith.constant 9.99999997E-7 : f32
    %233 = vector.broadcast %cst_89 : f32 to vector<1x64xf32>
    %234 = arith.addf %232, %233 : vector<1x64xf32>
    %235 = math.rsqrt %234 : vector<1x64xf32>
    %236 = vector.broadcast %235 : vector<1x64xf32> to vector<4x64xf32>
    %237 = arith.mulf %228, %236 : vector<4x64xf32>
    %238 = vector.broadcast %153 : vector<4x1xf32> to vector<4x64xf32>
    %239 = arith.mulf %237, %238 : vector<4x64xf32>
    %240 = vector.broadcast %154 : vector<4x1xf32> to vector<4x64xf32>
    %241 = arith.addf %239, %240 : vector<4x64xf32>
    %242 = arith.mulf %241, %241 : vector<4x64xf32>
    %243 = arith.mulf %241, %242 : vector<4x64xf32>
    %cst_90 = arith.constant 4.471500e-02 : f32
    %244 = vector.broadcast %cst_90 : f32 to vector<4x64xf32>
    %245 = arith.mulf %244, %243 : vector<4x64xf32>
    %246 = arith.addf %241, %245 : vector<4x64xf32>
    %cst_91 = arith.constant 0.797884583 : f32
    %247 = vector.broadcast %cst_91 : f32 to vector<4x64xf32>
    %248 = arith.mulf %247, %246 : vector<4x64xf32>
    %249 = math.tanh %248 : vector<4x64xf32>
    %cst_92 = arith.constant 1.000000e+00 : f32
    %250 = vector.broadcast %cst_92 : f32 to vector<4x64xf32>
    %251 = arith.addf %250, %249 : vector<4x64xf32>
    %cst_93 = arith.constant 5.000000e-01 : f32
    %252 = vector.broadcast %cst_93 : f32 to vector<4x64xf32>
    %253 = arith.mulf %252, %251 : vector<4x64xf32>
    %254 = arith.mulf %241, %253 : vector<4x64xf32>
    %255 = arith.truncf %254 : vector<4x64xf32> to vector<4x64xbf16>
    %c0_94 = arith.constant 0 : index
    %c128 = arith.constant 128 : index
    %256 = vector.load %arg22[%c0_94, %c128] : memref<4x256xbf16, #tpu.memory_space<vmem>>, vector<4x64xbf16>
    tpu.vector_store %arg22[%c0_94, %c128], %255 {strides = array<i32>} : memref<4x256xbf16, #tpu.memory_space<vmem>>, vector<4x64xbf16>,
    %257 = vector.extract_strided_slice %152 {offsets = [12, 0], sizes = [4, 64], strides = [1, 1]} : vector<16x64xf32> to vector<4x64xf32>
    %cst_95 = arith.constant dense<0.000000e+00> : vector<1x64xf32>
    %258 = tpu.matmul %3, %257, %cst_95 {dimension_numbers = #tpu.dot_dimension_numbers<[1], [0], [0], [1], [0, 0, 1, 1], [], []>} : vector<1x4xf32>, vector<4x64xf32>, vector<1x64xf32> -> vector<1x64xf32>
    %cst_96 = arith.constant 2.500000e-01 : f32
    %259 = vector.broadcast %cst_96 : f32 to vector<1x64xf32>
    %260 = arith.mulf %258, %259 : vector<1x64xf32>
    %261 = vector.broadcast %260 : vector<1x64xf32> to vector<4x64xf32>
    %262 = arith.subf %257, %261 : vector<4x64xf32>
    %263 = arith.mulf %262, %262 : vector<4x64xf32>
    %cst_97 = arith.constant dense<0.000000e+00> : vector<1x64xf32>
    %264 = tpu.matmul %3, %263, %cst_97 {dimension_numbers = #tpu.dot_dimension_numbers<[1], [0], [0], [1], [0, 0, 1, 1], [], []>} : vector<1x4xf32>, vector<4x64xf32>, vector<1x64xf32> -> vector<1x64xf32>
    %cst_98 = arith.constant 2.500000e-01 : f32
    %265 = vector.broadcast %cst_98 : f32 to vector<1x64xf32>
    %266 = arith.mulf %264, %265 : vector<1x64xf32>
    %cst_99 = arith.constant 9.99999997E-7 : f32
    %267 = vector.broadcast %cst_99 : f32 to vector<1x64xf32>
    %268 = arith.addf %266, %267 : vector<1x64xf32>
    %269 = math.rsqrt %268 : vector<1x64xf32>
    %270 = vector.broadcast %269 : vector<1x64xf32> to vector<4x64xf32>
    %271 = arith.mulf %262, %270 : vector<4x64xf32>
    %272 = vector.broadcast %153 : vector<4x1xf32> to vector<4x64xf32>
    %273 = arith.mulf %271, %272 : vector<4x64xf32>
    %274 = vector.broadcast %154 : vector<4x1xf32> to vector<4x64xf32>
    %275 = arith.addf %273, %274 : vector<4x64xf32>
    %276 = arith.mulf %275, %275 : vector<4x64xf32>
    %277 = arith.mulf %275, %276 : vector<4x64xf32>
    %cst_100 = arith.constant 4.471500e-02 : f32
    %278 = vector.broadcast %cst_100 : f32 to vector<4x64xf32>
    %279 = arith.mulf %278, %277 : vector<4x64xf32>
    %280 = arith.addf %275, %279 : vector<4x64xf32>
    %cst_101 = arith.constant 0.797884583 : f32
    %281 = vector.broadcast %cst_101 : f32 to vector<4x64xf32>
    %282 = arith.mulf %281, %280 : vector<4x64xf32>
    %283 = math.tanh %282 : vector<4x64xf32>
    %cst_102 = arith.constant 1.000000e+00 : f32
    %284 = vector.broadcast %cst_102 : f32 to vector<4x64xf32>
    %285 = arith.addf %284, %283 : vector<4x64xf32>
    %cst_103 = arith.constant 5.000000e-01 : f32
    %286 = vector.broadcast %cst_103 : f32 to vector<4x64xf32>
    %287 = arith.mulf %286, %285 : vector<4x64xf32>
    %288 = arith.mulf %275, %287 : vector<4x64xf32>
    %289 = arith.truncf %288 : vector<4x64xf32> to vector<4x64xbf16>
    %c0_104 = arith.constant 0 : index
    %c192 = arith.constant 192 : index
    %290 = vector.load %arg22[%c0_104, %c192] : memref<4x256xbf16, #tpu.memory_space<vmem>>, vector<4x64xbf16>
    tpu.vector_store %arg22[%c0_104, %c192], %289 {strides = array<i32>} : memref<4x256xbf16, #tpu.memory_space<vmem>>, vector<4x64xbf16>,
    %c0_105 = arith.constant 0 : index
    %c0_106 = arith.constant 0 : index
    %291 = vector.load %arg11[%c0_105, %c0_106] : memref<16x4xbf16, #tpu.memory_space<vmem>>, vector<16x4xbf16>
    %c0_107 = arith.constant 0 : index
    %c0_108 = arith.constant 0 : index
    %292 = vector.load %arg22[%c0_107, %c0_108] : memref<4x256xbf16, #tpu.memory_space<vmem>>, vector<4x256xbf16>
    %cst_109 = arith.constant dense<0.000000e+00> : vector<16x256xf32>
    %293 = tpu.matmul %291, %292, %cst_109 {dimension_numbers = #tpu.dot_dimension_numbers<[1], [0], [0], [1], [0, 0, 1, 1], [], []>} : vector<16x4xbf16>, vector<4x256xbf16>, vector<16x256xf32> -> vector<16x256xf32>
    %c0_110 = arith.constant 0 : index
    %c0_111 = arith.constant 0 : index
    %294 = vector.load %arg12[%c0_110, %c0_111] : memref<16x1xf32, #tpu.memory_space<vmem>>, vector<16x1xf32>
    %295 = vector.broadcast %294 : vector<16x1xf32> to vector<16x256xf32>
    %296 = arith.addf %293, %295 : vector<16x256xf32>
    %c0_112 = arith.constant 0 : index
    %c0_113 = arith.constant 0 : index
    %297 = vector.load %arg13[%c0_112, %c0_113] : memref<4x1xf32, #tpu.memory_space<vmem>>, vector<4x1xf32>
    %c0_114 = arith.constant 0 : index
    %c0_115 = arith.constant 0 : index
    %298 = vector.load %arg14[%c0_114, %c0_115] : memref<4x1xf32, #tpu.memory_space<vmem>>, vector<4x1xf32>
    %299 = vector.extract_strided_slice %296 {offsets = [0, 0], sizes = [4, 256], strides = [1, 1]} : vector<16x256xf32> to vector<4x256xf32>
    %cst_116 = arith.constant dense<0.000000e+00> : vector<1x256xf32>
    %300 = tpu.matmul %3, %299, %cst_116 {dimension_numbers = #tpu.dot_dimension_numbers<[1], [0], [0], [1], [0, 0, 1, 1], [], []>} : vector<1x4xf32>, vector<4x256xf32>, vector<1x256xf32> -> vector<1x256xf32>
    %cst_117 = arith.constant 2.500000e-01 : f32
    %301 = vector.broadcast %cst_117 : f32 to vector<1x256xf32>
    %302 = arith.mulf %300, %301 : vector<1x256xf32>
    %303 = vector.broadcast %302 : vector<1x256xf32> to vector<4x256xf32>
    %304 = arith.subf %299, %303 : vector<4x256xf32>
    %305 = arith.mulf %304, %304 : vector<4x256xf32>
    %cst_118 = arith.constant dense<0.000000e+00> : vector<1x256xf32>
    %306 = tpu.matmul %3, %305, %cst_118 {dimension_numbers = #tpu.dot_dimension_numbers<[1], [0], [0], [1], [0, 0, 1, 1], [], []>} : vector<1x4xf32>, vector<4x256xf32>, vector<1x256xf32> -> vector<1x256xf32>
    %cst_119 = arith.constant 2.500000e-01 : f32
    %307 = vector.broadcast %cst_119 : f32 to vector<1x256xf32>
    %308 = arith.mulf %306, %307 : vector<1x256xf32>
    %cst_120 = arith.constant 9.99999997E-7 : f32
    %309 = vector.broadcast %cst_120 : f32 to vector<1x256xf32>
    %310 = arith.addf %308, %309 : vector<1x256xf32>
    %311 = math.rsqrt %310 : vector<1x256xf32>
    %312 = vector.broadcast %311 : vector<1x256xf32> to vector<4x256xf32>
    %313 = arith.mulf %304, %312 : vector<4x256xf32>
    %314 = vector.broadcast %297 : vector<4x1xf32> to vector<4x256xf32>
    %315 = arith.mulf %313, %314 : vector<4x256xf32>
    %316 = vector.broadcast %298 : vector<4x1xf32> to vector<4x256xf32>
    %317 = arith.addf %315, %316 : vector<4x256xf32>
    %318 = arith.mulf %317, %317 : vector<4x256xf32>
    %319 = arith.mulf %317, %318 : vector<4x256xf32>
    %cst_121 = arith.constant 4.471500e-02 : f32
    %320 = vector.broadcast %cst_121 : f32 to vector<4x256xf32>
    %321 = arith.mulf %320, %319 : vector<4x256xf32>
    %322 = arith.addf %317, %321 : vector<4x256xf32>
    %cst_122 = arith.constant 0.797884583 : f32
    %323 = vector.broadcast %cst_122 : f32 to vector<4x256xf32>
    %324 = arith.mulf %323, %322 : vector<4x256xf32>
    %325 = math.tanh %324 : vector<4x256xf32>
    %cst_123 = arith.constant 1.000000e+00 : f32
    %326 = vector.broadcast %cst_123 : f32 to vector<4x256xf32>
    %327 = arith.addf %326, %325 : vector<4x256xf32>
    %cst_124 = arith.constant 5.000000e-01 : f32
    %328 = vector.broadcast %cst_124 : f32 to vector<4x256xf32>
    %329 = arith.mulf %328, %327 : vector<4x256xf32>
    %330 = arith.mulf %317, %329 : vector<4x256xf32>
    %331 = arith.truncf %330 : vector<4x256xf32> to vector<4x256xbf16>
    %c0_125 = arith.constant 0 : index
    %c0_126 = arith.constant 0 : index
    %332 = vector.load %arg23[%c0_125, %c0_126] : memref<4x1024xbf16, #tpu.memory_space<vmem>>, vector<4x256xbf16>
    tpu.vector_store %arg23[%c0_125, %c0_126], %331 {strides = array<i32>} : memref<4x1024xbf16, #tpu.memory_space<vmem>>, vector<4x256xbf16>,
    %333 = vector.extract_strided_slice %296 {offsets = [4, 0], sizes = [4, 256], strides = [1, 1]} : vector<16x256xf32> to vector<4x256xf32>
    %cst_127 = arith.constant dense<0.000000e+00> : vector<1x256xf32>
    %334 = tpu.matmul %3, %333, %cst_127 {dimension_numbers = #tpu.dot_dimension_numbers<[1], [0], [0], [1], [0, 0, 1, 1], [], []>} : vector<1x4xf32>, vector<4x256xf32>, vector<1x256xf32> -> vector<1x256xf32>
    %cst_128 = arith.constant 2.500000e-01 : f32
    %335 = vector.broadcast %cst_128 : f32 to vector<1x256xf32>
    %336 = arith.mulf %334, %335 : vector<1x256xf32>
    %337 = vector.broadcast %336 : vector<1x256xf32> to vector<4x256xf32>
    %338 = arith.subf %333, %337 : vector<4x256xf32>
    %339 = arith.mulf %338, %338 : vector<4x256xf32>
    %cst_129 = arith.constant dense<0.000000e+00> : vector<1x256xf32>
    %340 = tpu.matmul %3, %339, %cst_129 {dimension_numbers = #tpu.dot_dimension_numbers<[1], [0], [0], [1], [0, 0, 1, 1], [], []>} : vector<1x4xf32>, vector<4x256xf32>, vector<1x256xf32> -> vector<1x256xf32>
    %cst_130 = arith.constant 2.500000e-01 : f32
    %341 = vector.broadcast %cst_130 : f32 to vector<1x256xf32>
    %342 = arith.mulf %340, %341 : vector<1x256xf32>
    %cst_131 = arith.constant 9.99999997E-7 : f32
    %343 = vector.broadcast %cst_131 : f32 to vector<1x256xf32>
    %344 = arith.addf %342, %343 : vector<1x256xf32>
    %345 = math.rsqrt %344 : vector<1x256xf32>
    %346 = vector.broadcast %345 : vector<1x256xf32> to vector<4x256xf32>
    %347 = arith.mulf %338, %346 : vector<4x256xf32>
    %348 = vector.broadcast %297 : vector<4x1xf32> to vector<4x256xf32>
    %349 = arith.mulf %347, %348 : vector<4x256xf32>
    %350 = vector.broadcast %298 : vector<4x1xf32> to vector<4x256xf32>
    %351 = arith.addf %349, %350 : vector<4x256xf32>
    %352 = arith.mulf %351, %351 : vector<4x256xf32>
    %353 = arith.mulf %351, %352 : vector<4x256xf32>
    %cst_132 = arith.constant 4.471500e-02 : f32
    %354 = vector.broadcast %cst_132 : f32 to vector<4x256xf32>
    %355 = arith.mulf %354, %353 : vector<4x256xf32>
    %356 = arith.addf %351, %355 : vector<4x256xf32>
    %cst_133 = arith.constant 0.797884583 : f32
    %357 = vector.broadcast %cst_133 : f32 to vector<4x256xf32>
    %358 = arith.mulf %357, %356 : vector<4x256xf32>
    %359 = math.tanh %358 : vector<4x256xf32>
    %cst_134 = arith.constant 1.000000e+00 : f32
    %360 = vector.broadcast %cst_134 : f32 to vector<4x256xf32>
    %361 = arith.addf %360, %359 : vector<4x256xf32>
    %cst_135 = arith.constant 5.000000e-01 : f32
    %362 = vector.broadcast %cst_135 : f32 to vector<4x256xf32>
    %363 = arith.mulf %362, %361 : vector<4x256xf32>
    %364 = arith.mulf %351, %363 : vector<4x256xf32>
    %365 = arith.truncf %364 : vector<4x256xf32> to vector<4x256xbf16>
    %c0_136 = arith.constant 0 : index
    %c256 = arith.constant 256 : index
    %366 = vector.load %arg23[%c0_136, %c256] : memref<4x1024xbf16, #tpu.memory_space<vmem>>, vector<4x256xbf16>
    tpu.vector_store %arg23[%c0_136, %c256], %365 {strides = array<i32>} : memref<4x1024xbf16, #tpu.memory_space<vmem>>, vector<4x256xbf16>,
    %367 = vector.extract_strided_slice %296 {offsets = [8, 0], sizes = [4, 256], strides = [1, 1]} : vector<16x256xf32> to vector<4x256xf32>
    %cst_137 = arith.constant dense<0.000000e+00> : vector<1x256xf32>
    %368 = tpu.matmul %3, %367, %cst_137 {dimension_numbers = #tpu.dot_dimension_numbers<[1], [0], [0], [1], [0, 0, 1, 1], [], []>} : vector<1x4xf32>, vector<4x256xf32>, vector<1x256xf32> -> vector<1x256xf32>
    %cst_138 = arith.constant 2.500000e-01 : f32
    %369 = vector.broadcast %cst_138 : f32 to vector<1x256xf32>
    %370 = arith.mulf %368, %369 : vector<1x256xf32>
    %371 = vector.broadcast %370 : vector<1x256xf32> to vector<4x256xf32>
    %372 = arith.subf %367, %371 : vector<4x256xf32>
    %373 = arith.mulf %372, %372 : vector<4x256xf32>
    %cst_139 = arith.constant dense<0.000000e+00> : vector<1x256xf32>
    %374 = tpu.matmul %3, %373, %cst_139 {dimension_numbers = #tpu.dot_dimension_numbers<[1], [0], [0], [1], [0, 0, 1, 1], [], []>} : vector<1x4xf32>, vector<4x256xf32>, vector<1x256xf32> -> vector<1x256xf32>
    %cst_140 = arith.constant 2.500000e-01 : f32
    %375 = vector.broadcast %cst_140 : f32 to vector<1x256xf32>
    %376 = arith.mulf %374, %375 : vector<1x256xf32>
    %cst_141 = arith.constant 9.99999997E-7 : f32
    %377 = vector.broadcast %cst_141 : f32 to vector<1x256xf32>
    %378 = arith.addf %376, %377 : vector<1x256xf32>
    %379 = math.rsqrt %378 : vector<1x256xf32>
    %380 = vector.broadcast %379 : vector<1x256xf32> to vector<4x256xf32>
    %381 = arith.mulf %372, %380 : vector<4x256xf32>
    %382 = vector.broadcast %297 : vector<4x1xf32> to vector<4x256xf32>
    %383 = arith.mulf %381, %382 : vector<4x256xf32>
    %384 = vector.broadcast %298 : vector<4x1xf32> to vector<4x256xf32>
    %385 = arith.addf %383, %384 : vector<4x256xf32>
    %386 = arith.mulf %385, %385 : vector<4x256xf32>
    %387 = arith.mulf %385, %386 : vector<4x256xf32>
    %cst_142 = arith.constant 4.471500e-02 : f32
    %388 = vector.broadcast %cst_142 : f32 to vector<4x256xf32>
    %389 = arith.mulf %388, %387 : vector<4x256xf32>
    %390 = arith.addf %385, %389 : vector<4x256xf32>
    %cst_143 = arith.constant 0.797884583 : f32
    %391 = vector.broadcast %cst_143 : f32 to vector<4x256xf32>
    %392 = arith.mulf %391, %390 : vector<4x256xf32>
    %393 = math.tanh %392 : vector<4x256xf32>
    %cst_144 = arith.constant 1.000000e+00 : f32
    %394 = vector.broadcast %cst_144 : f32 to vector<4x256xf32>
    %395 = arith.addf %394, %393 : vector<4x256xf32>
    %cst_145 = arith.constant 5.000000e-01 : f32
    %396 = vector.broadcast %cst_145 : f32 to vector<4x256xf32>
    %397 = arith.mulf %396, %395 : vector<4x256xf32>
    %398 = arith.mulf %385, %397 : vector<4x256xf32>
    %399 = arith.truncf %398 : vector<4x256xf32> to vector<4x256xbf16>
    %c0_146 = arith.constant 0 : index
    %c512 = arith.constant 512 : index
    %400 = vector.load %arg23[%c0_146, %c512] : memref<4x1024xbf16, #tpu.memory_space<vmem>>, vector<4x256xbf16>
    tpu.vector_store %arg23[%c0_146, %c512], %399 {strides = array<i32>} : memref<4x1024xbf16, #tpu.memory_space<vmem>>, vector<4x256xbf16>,
    %401 = vector.extract_strided_slice %296 {offsets = [12, 0], sizes = [4, 256], strides = [1, 1]} : vector<16x256xf32> to vector<4x256xf32>
    %cst_147 = arith.constant dense<0.000000e+00> : vector<1x256xf32>
    %402 = tpu.matmul %3, %401, %cst_147 {dimension_numbers = #tpu.dot_dimension_numbers<[1], [0], [0], [1], [0, 0, 1, 1], [], []>} : vector<1x4xf32>, vector<4x256xf32>, vector<1x256xf32> -> vector<1x256xf32>
    %cst_148 = arith.constant 2.500000e-01 : f32
    %403 = vector.broadcast %cst_148 : f32 to vector<1x256xf32>
    %404 = arith.mulf %402, %403 : vector<1x256xf32>
    %405 = vector.broadcast %404 : vector<1x256xf32> to vector<4x256xf32>
    %406 = arith.subf %401, %405 : vector<4x256xf32>
    %407 = arith.mulf %406, %406 : vector<4x256xf32>
    %cst_149 = arith.constant dense<0.000000e+00> : vector<1x256xf32>
    %408 = tpu.matmul %3, %407, %cst_149 {dimension_numbers = #tpu.dot_dimension_numbers<[1], [0], [0], [1], [0, 0, 1, 1], [], []>} : vector<1x4xf32>, vector<4x256xf32>, vector<1x256xf32> -> vector<1x256xf32>
    %cst_150 = arith.constant 2.500000e-01 : f32
    %409 = vector.broadcast %cst_150 : f32 to vector<1x256xf32>
    %410 = arith.mulf %408, %409 : vector<1x256xf32>
    %cst_151 = arith.constant 9.99999997E-7 : f32
    %411 = vector.broadcast %cst_151 : f32 to vector<1x256xf32>
    %412 = arith.addf %410, %411 : vector<1x256xf32>
    %413 = math.rsqrt %412 : vector<1x256xf32>
    %414 = vector.broadcast %413 : vector<1x256xf32> to vector<4x256xf32>
    %415 = arith.mulf %406, %414 : vector<4x256xf32>
    %416 = vector.broadcast %297 : vector<4x1xf32> to vector<4x256xf32>
    %417 = arith.mulf %415, %416 : vector<4x256xf32>
    %418 = vector.broadcast %298 : vector<4x1xf32> to vector<4x256xf32>
    %419 = arith.addf %417, %418 : vector<4x256xf32>
    %420 = arith.mulf %419, %419 : vector<4x256xf32>
    %421 = arith.mulf %419, %420 : vector<4x256xf32>
    %cst_152 = arith.constant 4.471500e-02 : f32
    %422 = vector.broadcast %cst_152 : f32 to vector<4x256xf32>
    %423 = arith.mulf %422, %421 : vector<4x256xf32>
    %424 = arith.addf %419, %423 : vector<4x256xf32>
    %cst_153 = arith.constant 0.797884583 : f32
    %425 = vector.broadcast %cst_153 : f32 to vector<4x256xf32>
    %426 = arith.mulf %425, %424 : vector<4x256xf32>
    %427 = math.tanh %426 : vector<4x256xf32>
    %cst_154 = arith.constant 1.000000e+00 : f32
    %428 = vector.broadcast %cst_154 : f32 to vector<4x256xf32>
    %429 = arith.addf %428, %427 : vector<4x256xf32>
    %cst_155 = arith.constant 5.000000e-01 : f32
    %430 = vector.broadcast %cst_155 : f32 to vector<4x256xf32>
    %431 = arith.mulf %430, %429 : vector<4x256xf32>
    %432 = arith.mulf %419, %431 : vector<4x256xf32>
    %433 = arith.truncf %432 : vector<4x256xf32> to vector<4x256xbf16>
    %c0_156 = arith.constant 0 : index
    %c768 = arith.constant 768 : index
    %434 = vector.load %arg23[%c0_156, %c768] : memref<4x1024xbf16, #tpu.memory_space<vmem>>, vector<4x256xbf16>
    tpu.vector_store %arg23[%c0_156, %c768], %433 {strides = array<i32>} : memref<4x1024xbf16, #tpu.memory_space<vmem>>, vector<4x256xbf16>,
    %c0_157 = arith.constant 0 : index
    %c0_158 = arith.constant 0 : index
    %435 = vector.load %arg17[%c0_157, %c0_158] : memref<4x1xf32, #tpu.memory_space<vmem>>, vector<4x1xf32>
    %c0_159 = arith.constant 0 : index
    %c0_160 = arith.constant 0 : index
    %436 = vector.load %arg18[%c0_159, %c0_160] : memref<4x1xf32, #tpu.memory_space<vmem>>, vector<4x1xf32>
    %c0_161 = arith.constant 0 : index
    %c0_162 = arith.constant 0 : index
    %c0_163 = arith.constant 0 : index
    %437 = vector.load %arg19[%c0_161, %c0_162, %c0_163] : memref<1x1x4xf32, #tpu.memory_space<vmem>>, vector<1x1x4xf32>
    %438 = vector.shape_cast %437 : vector<1x1x4xf32> to vector<1x4xf32>
    %c0_164 = arith.constant 0 : index
    %c0_165 = arith.constant 0 : index
    %439 = vector.load %arg23[%c0_164, %c0_165] : memref<4x1024xbf16, #tpu.memory_space<vmem>>, vector<4x256xbf16>
    %c0_166 = arith.constant 0 : index
    %c0_167 = arith.constant 0 : index
    %440 = vector.load %arg15[%c0_166, %c0_167] : memref<16x4xbf16, #tpu.memory_space<vmem>>, vector<16x4xbf16>
    %cst_168 = arith.constant dense<0.000000e+00> : vector<16x256xf32>
    %441 = tpu.matmul %440, %439, %cst_168 {dimension_numbers = #tpu.dot_dimension_numbers<[1], [0], [0], [1], [0, 0, 1, 1], [], []>} : vector<16x4xbf16>, vector<4x256xbf16>, vector<16x256xf32> -> vector<16x256xf32>
    %c0_169 = arith.constant 0 : index
    %c0_170 = arith.constant 0 : index
    %442 = vector.load %arg16[%c0_169, %c0_170] : memref<16x1xf32, #tpu.memory_space<vmem>>, vector<16x1xf32>
    %443 = vector.broadcast %442 : vector<16x1xf32> to vector<16x256xf32>
    %444 = arith.addf %441, %443 : vector<16x256xf32>
    %445 = vector.extract_strided_slice %444 {offsets = [0, 0], sizes = [4, 256], strides = [1, 1]} : vector<16x256xf32> to vector<4x256xf32>
    %cst_171 = arith.constant dense<0.000000e+00> : vector<1x256xf32>
    %446 = tpu.matmul %3, %445, %cst_171 {dimension_numbers = #tpu.dot_dimension_numbers<[1], [0], [0], [1], [0, 0, 1, 1], [], []>} : vector<1x4xf32>, vector<4x256xf32>, vector<1x256xf32> -> vector<1x256xf32>
    %cst_172 = arith.constant 2.500000e-01 : f32
    %447 = vector.broadcast %cst_172 : f32 to vector<1x256xf32>
    %448 = arith.mulf %446, %447 : vector<1x256xf32>
    %449 = vector.broadcast %448 : vector<1x256xf32> to vector<4x256xf32>
    %450 = arith.subf %445, %449 : vector<4x256xf32>
    %451 = arith.mulf %450, %450 : vector<4x256xf32>
    %cst_173 = arith.constant dense<0.000000e+00> : vector<1x256xf32>
    %452 = tpu.matmul %3, %451, %cst_173 {dimension_numbers = #tpu.dot_dimension_numbers<[1], [0], [0], [1], [0, 0, 1, 1], [], []>} : vector<1x4xf32>, vector<4x256xf32>, vector<1x256xf32> -> vector<1x256xf32>
    %cst_174 = arith.constant 2.500000e-01 : f32
    %453 = vector.broadcast %cst_174 : f32 to vector<1x256xf32>
    %454 = arith.mulf %452, %453 : vector<1x256xf32>
    %cst_175 = arith.constant 9.99999997E-7 : f32
    %455 = vector.broadcast %cst_175 : f32 to vector<1x256xf32>
    %456 = arith.addf %454, %455 : vector<1x256xf32>
    %457 = math.rsqrt %456 : vector<1x256xf32>
    %458 = vector.broadcast %457 : vector<1x256xf32> to vector<4x256xf32>
    %459 = arith.mulf %450, %458 : vector<4x256xf32>
    %460 = vector.broadcast %435 : vector<4x1xf32> to vector<4x256xf32>
    %461 = arith.mulf %459, %460 : vector<4x256xf32>
    %462 = vector.broadcast %436 : vector<4x1xf32> to vector<4x256xf32>
    %463 = arith.addf %461, %462 : vector<4x256xf32>
    %464 = arith.negf %463 : vector<4x256xf32>
    %465 = math.exp %464 : vector<4x256xf32>
    %cst_176 = arith.constant 1.000000e+00 : f32
    %466 = vector.broadcast %cst_176 : f32 to vector<4x256xf32>
    %467 = arith.addf %466, %465 : vector<4x256xf32>
    %468 = arith.divf %466, %467 : vector<4x256xf32>
    %cst_177 = arith.constant dense<0.000000e+00> : vector<1x256xf32>
    %469 = tpu.matmul %438, %468, %cst_177 {dimension_numbers = #tpu.dot_dimension_numbers<[1], [0], [0], [1], [0, 0, 1, 1], [], []>} : vector<1x4xf32>, vector<4x256xf32>, vector<1x256xf32> -> vector<1x256xf32>
    %470 = arith.negf %469 : vector<1x256xf32>
    %471 = math.exp %470 : vector<1x256xf32>
    %cst_178 = arith.constant 1.000000e+00 : f32
    %472 = vector.broadcast %cst_178 : f32 to vector<1x256xf32>
    %473 = arith.addf %472, %471 : vector<1x256xf32>
    %474 = arith.divf %472, %473 : vector<1x256xf32>
    %475 = vector.extract_strided_slice %444 {offsets = [4, 0], sizes = [4, 256], strides = [1, 1]} : vector<16x256xf32> to vector<4x256xf32>
    %cst_179 = arith.constant dense<0.000000e+00> : vector<1x256xf32>
    %476 = tpu.matmul %3, %475, %cst_179 {dimension_numbers = #tpu.dot_dimension_numbers<[1], [0], [0], [1], [0, 0, 1, 1], [], []>} : vector<1x4xf32>, vector<4x256xf32>, vector<1x256xf32> -> vector<1x256xf32>
    %cst_180 = arith.constant 2.500000e-01 : f32
    %477 = vector.broadcast %cst_180 : f32 to vector<1x256xf32>
    %478 = arith.mulf %476, %477 : vector<1x256xf32>
    %479 = vector.broadcast %478 : vector<1x256xf32> to vector<4x256xf32>
    %480 = arith.subf %475, %479 : vector<4x256xf32>
    %481 = arith.mulf %480, %480 : vector<4x256xf32>
    %cst_181 = arith.constant dense<0.000000e+00> : vector<1x256xf32>
    %482 = tpu.matmul %3, %481, %cst_181 {dimension_numbers = #tpu.dot_dimension_numbers<[1], [0], [0], [1], [0, 0, 1, 1], [], []>} : vector<1x4xf32>, vector<4x256xf32>, vector<1x256xf32> -> vector<1x256xf32>
    %cst_182 = arith.constant 2.500000e-01 : f32
    %483 = vector.broadcast %cst_182 : f32 to vector<1x256xf32>
    %484 = arith.mulf %482, %483 : vector<1x256xf32>
    %cst_183 = arith.constant 9.99999997E-7 : f32
    %485 = vector.broadcast %cst_183 : f32 to vector<1x256xf32>
    %486 = arith.addf %484, %485 : vector<1x256xf32>
    %487 = math.rsqrt %486 : vector<1x256xf32>
    %488 = vector.broadcast %487 : vector<1x256xf32> to vector<4x256xf32>
    %489 = arith.mulf %480, %488 : vector<4x256xf32>
    %490 = vector.broadcast %435 : vector<4x1xf32> to vector<4x256xf32>
    %491 = arith.mulf %489, %490 : vector<4x256xf32>
    %492 = vector.broadcast %436 : vector<4x1xf32> to vector<4x256xf32>
    %493 = arith.addf %491, %492 : vector<4x256xf32>
    %494 = arith.negf %493 : vector<4x256xf32>
    %495 = math.exp %494 : vector<4x256xf32>
    %cst_184 = arith.constant 1.000000e+00 : f32
    %496 = vector.broadcast %cst_184 : f32 to vector<4x256xf32>
    %497 = arith.addf %496, %495 : vector<4x256xf32>
    %498 = arith.divf %496, %497 : vector<4x256xf32>
    %cst_185 = arith.constant dense<0.000000e+00> : vector<1x256xf32>
    %499 = tpu.matmul %438, %498, %cst_185 {dimension_numbers = #tpu.dot_dimension_numbers<[1], [0], [0], [1], [0, 0, 1, 1], [], []>} : vector<1x4xf32>, vector<4x256xf32>, vector<1x256xf32> -> vector<1x256xf32>
    %500 = arith.negf %499 : vector<1x256xf32>
    %501 = math.exp %500 : vector<1x256xf32>
    %cst_186 = arith.constant 1.000000e+00 : f32
    %502 = vector.broadcast %cst_186 : f32 to vector<1x256xf32>
    %503 = arith.addf %502, %501 : vector<1x256xf32>
    %504 = arith.divf %502, %503 : vector<1x256xf32>
    %505 = vector.extract_strided_slice %444 {offsets = [8, 0], sizes = [4, 256], strides = [1, 1]} : vector<16x256xf32> to vector<4x256xf32>
    %cst_187 = arith.constant dense<0.000000e+00> : vector<1x256xf32>
    %506 = tpu.matmul %3, %505, %cst_187 {dimension_numbers = #tpu.dot_dimension_numbers<[1], [0], [0], [1], [0, 0, 1, 1], [], []>} : vector<1x4xf32>, vector<4x256xf32>, vector<1x256xf32> -> vector<1x256xf32>
    %cst_188 = arith.constant 2.500000e-01 : f32
    %507 = vector.broadcast %cst_188 : f32 to vector<1x256xf32>
    %508 = arith.mulf %506, %507 : vector<1x256xf32>
    %509 = vector.broadcast %508 : vector<1x256xf32> to vector<4x256xf32>
    %510 = arith.subf %505, %509 : vector<4x256xf32>
    %511 = arith.mulf %510, %510 : vector<4x256xf32>
    %cst_189 = arith.constant dense<0.000000e+00> : vector<1x256xf32>
    %512 = tpu.matmul %3, %511, %cst_189 {dimension_numbers = #tpu.dot_dimension_numbers<[1], [0], [0], [1], [0, 0, 1, 1], [], []>} : vector<1x4xf32>, vector<4x256xf32>, vector<1x256xf32> -> vector<1x256xf32>
    %cst_190 = arith.constant 2.500000e-01 : f32
    %513 = vector.broadcast %cst_190 : f32 to vector<1x256xf32>
    %514 = arith.mulf %512, %513 : vector<1x256xf32>
    %cst_191 = arith.constant 9.99999997E-7 : f32
    %515 = vector.broadcast %cst_191 : f32 to vector<1x256xf32>
    %516 = arith.addf %514, %515 : vector<1x256xf32>
    %517 = math.rsqrt %516 : vector<1x256xf32>
    %518 = vector.broadcast %517 : vector<1x256xf32> to vector<4x256xf32>
    %519 = arith.mulf %510, %518 : vector<4x256xf32>
    %520 = vector.broadcast %435 : vector<4x1xf32> to vector<4x256xf32>
    %521 = arith.mulf %519, %520 : vector<4x256xf32>
    %522 = vector.broadcast %436 : vector<4x1xf32> to vector<4x256xf32>
    %523 = arith.addf %521, %522 : vector<4x256xf32>
    %524 = arith.negf %523 : vector<4x256xf32>
    %525 = math.exp %524 : vector<4x256xf32>
    %cst_192 = arith.constant 1.000000e+00 : f32
    %526 = vector.broadcast %cst_192 : f32 to vector<4x256xf32>
    %527 = arith.addf %526, %525 : vector<4x256xf32>
    %528 = arith.divf %526, %527 : vector<4x256xf32>
    %cst_193 = arith.constant dense<0.000000e+00> : vector<1x256xf32>
    %529 = tpu.matmul %438, %528, %cst_193 {dimension_numbers = #tpu.dot_dimension_numbers<[1], [0], [0], [1], [0, 0, 1, 1], [], []>} : vector<1x4xf32>, vector<4x256xf32>, vector<1x256xf32> -> vector<1x256xf32>
    %530 = arith.negf %529 : vector<1x256xf32>
    %531 = math.exp %530 : vector<1x256xf32>
    %cst_194 = arith.constant 1.000000e+00 : f32
    %532 = vector.broadcast %cst_194 : f32 to vector<1x256xf32>
    %533 = arith.addf %532, %531 : vector<1x256xf32>
    %534 = arith.divf %532, %533 : vector<1x256xf32>
    %535 = vector.extract_strided_slice %444 {offsets = [12, 0], sizes = [4, 256], strides = [1, 1]} : vector<16x256xf32> to vector<4x256xf32>
    %cst_195 = arith.constant dense<0.000000e+00> : vector<1x256xf32>
    %536 = tpu.matmul %3, %535, %cst_195 {dimension_numbers = #tpu.dot_dimension_numbers<[1], [0], [0], [1], [0, 0, 1, 1], [], []>} : vector<1x4xf32>, vector<4x256xf32>, vector<1x256xf32> -> vector<1x256xf32>
    %cst_196 = arith.constant 2.500000e-01 : f32
    %537 = vector.broadcast %cst_196 : f32 to vector<1x256xf32>
    %538 = arith.mulf %536, %537 : vector<1x256xf32>
    %539 = vector.broadcast %538 : vector<1x256xf32> to vector<4x256xf32>
    %540 = arith.subf %535, %539 : vector<4x256xf32>
    %541 = arith.mulf %540, %540 : vector<4x256xf32>
    %cst_197 = arith.constant dense<0.000000e+00> : vector<1x256xf32>
    %542 = tpu.matmul %3, %541, %cst_197 {dimension_numbers = #tpu.dot_dimension_numbers<[1], [0], [0], [1], [0, 0, 1, 1], [], []>} : vector<1x4xf32>, vector<4x256xf32>, vector<1x256xf32> -> vector<1x256xf32>
    %cst_198 = arith.constant 2.500000e-01 : f32
    %543 = vector.broadcast %cst_198 : f32 to vector<1x256xf32>
    %544 = arith.mulf %542, %543 : vector<1x256xf32>
    %cst_199 = arith.constant 9.99999997E-7 : f32
    %545 = vector.broadcast %cst_199 : f32 to vector<1x256xf32>
    %546 = arith.addf %544, %545 : vector<1x256xf32>
    %547 = math.rsqrt %546 : vector<1x256xf32>
    %548 = vector.broadcast %547 : vector<1x256xf32> to vector<4x256xf32>
    %549 = arith.mulf %540, %548 : vector<4x256xf32>
    %550 = vector.broadcast %435 : vector<4x1xf32> to vector<4x256xf32>
    %551 = arith.mulf %549, %550 : vector<4x256xf32>
    %552 = vector.broadcast %436 : vector<4x1xf32> to vector<4x256xf32>
    %553 = arith.addf %551, %552 : vector<4x256xf32>
    %554 = arith.negf %553 : vector<4x256xf32>
    %555 = math.exp %554 : vector<4x256xf32>
    %cst_200 = arith.constant 1.000000e+00 : f32
    %556 = vector.broadcast %cst_200 : f32 to vector<4x256xf32>
    %557 = arith.addf %556, %555 : vector<4x256xf32>
    %558 = arith.divf %556, %557 : vector<4x256xf32>
    %cst_201 = arith.constant dense<0.000000e+00> : vector<1x256xf32>
    %559 = tpu.matmul %438, %558, %cst_201 {dimension_numbers = #tpu.dot_dimension_numbers<[1], [0], [0], [1], [0, 0, 1, 1], [], []>} : vector<1x4xf32>, vector<4x256xf32>, vector<1x256xf32> -> vector<1x256xf32>
    %560 = arith.negf %559 : vector<1x256xf32>
    %561 = math.exp %560 : vector<1x256xf32>
    %cst_202 = arith.constant 1.000000e+00 : f32
    %562 = vector.broadcast %cst_202 : f32 to vector<1x256xf32>
    %563 = arith.addf %562, %561 : vector<1x256xf32>
    %564 = arith.divf %562, %563 : vector<1x256xf32>
    %c0_203 = arith.constant 0 : index
    %c256_204 = arith.constant 256 : index
    %565 = vector.load %arg23[%c0_203, %c256_204] : memref<4x1024xbf16, #tpu.memory_space<vmem>>, vector<4x256xbf16>
    %c0_205 = arith.constant 0 : index
    %c0_206 = arith.constant 0 : index
    %566 = vector.load %arg15[%c0_205, %c0_206] : memref<16x4xbf16, #tpu.memory_space<vmem>>, vector<16x4xbf16>
    %cst_207 = arith.constant dense<0.000000e+00> : vector<16x256xf32>
    %567 = tpu.matmul %566, %565, %cst_207 {dimension_numbers = #tpu.dot_dimension_numbers<[1], [0], [0], [1], [0, 0, 1, 1], [], []>} : vector<16x4xbf16>, vector<4x256xbf16>, vector<16x256xf32> -> vector<16x256xf32>
    %c0_208 = arith.constant 0 : index
    %c0_209 = arith.constant 0 : index
    %568 = vector.load %arg16[%c0_208, %c0_209] : memref<16x1xf32, #tpu.memory_space<vmem>>, vector<16x1xf32>
    %569 = vector.broadcast %568 : vector<16x1xf32> to vector<16x256xf32>
    %570 = arith.addf %567, %569 : vector<16x256xf32>
    %571 = vector.extract_strided_slice %570 {offsets = [0, 0], sizes = [4, 256], strides = [1, 1]} : vector<16x256xf32> to vector<4x256xf32>
    %cst_210 = arith.constant dense<0.000000e+00> : vector<1x256xf32>
    %572 = tpu.matmul %3, %571, %cst_210 {dimension_numbers = #tpu.dot_dimension_numbers<[1], [0], [0], [1], [0, 0, 1, 1], [], []>} : vector<1x4xf32>, vector<4x256xf32>, vector<1x256xf32> -> vector<1x256xf32>
    %cst_211 = arith.constant 2.500000e-01 : f32
    %573 = vector.broadcast %cst_211 : f32 to vector<1x256xf32>
    %574 = arith.mulf %572, %573 : vector<1x256xf32>
    %575 = vector.broadcast %574 : vector<1x256xf32> to vector<4x256xf32>
    %576 = arith.subf %571, %575 : vector<4x256xf32>
    %577 = arith.mulf %576, %576 : vector<4x256xf32>
    %cst_212 = arith.constant dense<0.000000e+00> : vector<1x256xf32>
    %578 = tpu.matmul %3, %577, %cst_212 {dimension_numbers = #tpu.dot_dimension_numbers<[1], [0], [0], [1], [0, 0, 1, 1], [], []>} : vector<1x4xf32>, vector<4x256xf32>, vector<1x256xf32> -> vector<1x256xf32>
    %cst_213 = arith.constant 2.500000e-01 : f32
    %579 = vector.broadcast %cst_213 : f32 to vector<1x256xf32>
    %580 = arith.mulf %578, %579 : vector<1x256xf32>
    %cst_214 = arith.constant 9.99999997E-7 : f32
    %581 = vector.broadcast %cst_214 : f32 to vector<1x256xf32>
    %582 = arith.addf %580, %581 : vector<1x256xf32>
    %583 = math.rsqrt %582 : vector<1x256xf32>
    %584 = vector.broadcast %583 : vector<1x256xf32> to vector<4x256xf32>
    %585 = arith.mulf %576, %584 : vector<4x256xf32>
    %586 = vector.broadcast %435 : vector<4x1xf32> to vector<4x256xf32>
    %587 = arith.mulf %585, %586 : vector<4x256xf32>
    %588 = vector.broadcast %436 : vector<4x1xf32> to vector<4x256xf32>
    %589 = arith.addf %587, %588 : vector<4x256xf32>
    %590 = arith.negf %589 : vector<4x256xf32>
    %591 = math.exp %590 : vector<4x256xf32>
    %cst_215 = arith.constant 1.000000e+00 : f32
    %592 = vector.broadcast %cst_215 : f32 to vector<4x256xf32>
    %593 = arith.addf %592, %591 : vector<4x256xf32>
    %594 = arith.divf %592, %593 : vector<4x256xf32>
    %cst_216 = arith.constant dense<0.000000e+00> : vector<1x256xf32>
    %595 = tpu.matmul %438, %594, %cst_216 {dimension_numbers = #tpu.dot_dimension_numbers<[1], [0], [0], [1], [0, 0, 1, 1], [], []>} : vector<1x4xf32>, vector<4x256xf32>, vector<1x256xf32> -> vector<1x256xf32>
    %596 = arith.negf %595 : vector<1x256xf32>
    %597 = math.exp %596 : vector<1x256xf32>
    %cst_217 = arith.constant 1.000000e+00 : f32
    %598 = vector.broadcast %cst_217 : f32 to vector<1x256xf32>
    %599 = arith.addf %598, %597 : vector<1x256xf32>
    %600 = arith.divf %598, %599 : vector<1x256xf32>
    %601 = vector.extract_strided_slice %570 {offsets = [4, 0], sizes = [4, 256], strides = [1, 1]} : vector<16x256xf32> to vector<4x256xf32>
    %cst_218 = arith.constant dense<0.000000e+00> : vector<1x256xf32>
    %602 = tpu.matmul %3, %601, %cst_218 {dimension_numbers = #tpu.dot_dimension_numbers<[1], [0], [0], [1], [0, 0, 1, 1], [], []>} : vector<1x4xf32>, vector<4x256xf32>, vector<1x256xf32> -> vector<1x256xf32>
    %cst_219 = arith.constant 2.500000e-01 : f32
    %603 = vector.broadcast %cst_219 : f32 to vector<1x256xf32>
    %604 = arith.mulf %602, %603 : vector<1x256xf32>
    %605 = vector.broadcast %604 : vector<1x256xf32> to vector<4x256xf32>
    %606 = arith.subf %601, %605 : vector<4x256xf32>
    %607 = arith.mulf %606, %606 : vector<4x256xf32>
    %cst_220 = arith.constant dense<0.000000e+00> : vector<1x256xf32>
    %608 = tpu.matmul %3, %607, %cst_220 {dimension_numbers = #tpu.dot_dimension_numbers<[1], [0], [0], [1], [0, 0, 1, 1], [], []>} : vector<1x4xf32>, vector<4x256xf32>, vector<1x256xf32> -> vector<1x256xf32>
    %cst_221 = arith.constant 2.500000e-01 : f32
    %609 = vector.broadcast %cst_221 : f32 to vector<1x256xf32>
    %610 = arith.mulf %608, %609 : vector<1x256xf32>
    %cst_222 = arith.constant 9.99999997E-7 : f32
    %611 = vector.broadcast %cst_222 : f32 to vector<1x256xf32>
    %612 = arith.addf %610, %611 : vector<1x256xf32>
    %613 = math.rsqrt %612 : vector<1x256xf32>
    %614 = vector.broadcast %613 : vector<1x256xf32> to vector<4x256xf32>
    %615 = arith.mulf %606, %614 : vector<4x256xf32>
    %616 = vector.broadcast %435 : vector<4x1xf32> to vector<4x256xf32>
    %617 = arith.mulf %615, %616 : vector<4x256xf32>
    %618 = vector.broadcast %436 : vector<4x1xf32> to vector<4x256xf32>
    %619 = arith.addf %617, %618 : vector<4x256xf32>
    %620 = arith.negf %619 : vector<4x256xf32>
    %621 = math.exp %620 : vector<4x256xf32>
    %cst_223 = arith.constant 1.000000e+00 : f32
    %622 = vector.broadcast %cst_223 : f32 to vector<4x256xf32>
    %623 = arith.addf %622, %621 : vector<4x256xf32>
    %624 = arith.divf %622, %623 : vector<4x256xf32>
    %cst_224 = arith.constant dense<0.000000e+00> : vector<1x256xf32>
    %625 = tpu.matmul %438, %624, %cst_224 {dimension_numbers = #tpu.dot_dimension_numbers<[1], [0], [0], [1], [0, 0, 1, 1], [], []>} : vector<1x4xf32>, vector<4x256xf32>, vector<1x256xf32> -> vector<1x256xf32>
    %626 = arith.negf %625 : vector<1x256xf32>
    %627 = math.exp %626 : vector<1x256xf32>
    %cst_225 = arith.constant 1.000000e+00 : f32
    %628 = vector.broadcast %cst_225 : f32 to vector<1x256xf32>
    %629 = arith.addf %628, %627 : vector<1x256xf32>
    %630 = arith.divf %628, %629 : vector<1x256xf32>
    %631 = vector.extract_strided_slice %570 {offsets = [8, 0], sizes = [4, 256], strides = [1, 1]} : vector<16x256xf32> to vector<4x256xf32>
    %cst_226 = arith.constant dense<0.000000e+00> : vector<1x256xf32>
    %632 = tpu.matmul %3, %631, %cst_226 {dimension_numbers = #tpu.dot_dimension_numbers<[1], [0], [0], [1], [0, 0, 1, 1], [], []>} : vector<1x4xf32>, vector<4x256xf32>, vector<1x256xf32> -> vector<1x256xf32>
    %cst_227 = arith.constant 2.500000e-01 : f32
    %633 = vector.broadcast %cst_227 : f32 to vector<1x256xf32>
    %634 = arith.mulf %632, %633 : vector<1x256xf32>
    %635 = vector.broadcast %634 : vector<1x256xf32> to vector<4x256xf32>
    %636 = arith.subf %631, %635 : vector<4x256xf32>
    %637 = arith.mulf %636, %636 : vector<4x256xf32>
    %cst_228 = arith.constant dense<0.000000e+00> : vector<1x256xf32>
    %638 = tpu.matmul %3, %637, %cst_228 {dimension_numbers = #tpu.dot_dimension_numbers<[1], [0], [0], [1], [0, 0, 1, 1], [], []>} : vector<1x4xf32>, vector<4x256xf32>, vector<1x256xf32> -> vector<1x256xf32>
    %cst_229 = arith.constant 2.500000e-01 : f32
    %639 = vector.broadcast %cst_229 : f32 to vector<1x256xf32>
    %640 = arith.mulf %638, %639 : vector<1x256xf32>
    %cst_230 = arith.constant 9.99999997E-7 : f32
    %641 = vector.broadcast %cst_230 : f32 to vector<1x256xf32>
    %642 = arith.addf %640, %641 : vector<1x256xf32>
    %643 = math.rsqrt %642 : vector<1x256xf32>
    %644 = vector.broadcast %643 : vector<1x256xf32> to vector<4x256xf32>
    %645 = arith.mulf %636, %644 : vector<4x256xf32>
    %646 = vector.broadcast %435 : vector<4x1xf32> to vector<4x256xf32>
    %647 = arith.mulf %645, %646 : vector<4x256xf32>
    %648 = vector.broadcast %436 : vector<4x1xf32> to vector<4x256xf32>
    %649 = arith.addf %647, %648 : vector<4x256xf32>
    %650 = arith.negf %649 : vector<4x256xf32>
    %651 = math.exp %650 : vector<4x256xf32>
    %cst_231 = arith.constant 1.000000e+00 : f32
    %652 = vector.broadcast %cst_231 : f32 to vector<4x256xf32>
    %653 = arith.addf %652, %651 : vector<4x256xf32>
    %654 = arith.divf %652, %653 : vector<4x256xf32>
    %cst_232 = arith.constant dense<0.000000e+00> : vector<1x256xf32>
    %655 = tpu.matmul %438, %654, %cst_232 {dimension_numbers = #tpu.dot_dimension_numbers<[1], [0], [0], [1], [0, 0, 1, 1], [], []>} : vector<1x4xf32>, vector<4x256xf32>, vector<1x256xf32> -> vector<1x256xf32>
    %656 = arith.negf %655 : vector<1x256xf32>
    %657 = math.exp %656 : vector<1x256xf32>
    %cst_233 = arith.constant 1.000000e+00 : f32
    %658 = vector.broadcast %cst_233 : f32 to vector<1x256xf32>
    %659 = arith.addf %658, %657 : vector<1x256xf32>
    %660 = arith.divf %658, %659 : vector<1x256xf32>
    %661 = vector.extract_strided_slice %570 {offsets = [12, 0], sizes = [4, 256], strides = [1, 1]} : vector<16x256xf32> to vector<4x256xf32>
    %cst_234 = arith.constant dense<0.000000e+00> : vector<1x256xf32>
    %662 = tpu.matmul %3, %661, %cst_234 {dimension_numbers = #tpu.dot_dimension_numbers<[1], [0], [0], [1], [0, 0, 1, 1], [], []>} : vector<1x4xf32>, vector<4x256xf32>, vector<1x256xf32> -> vector<1x256xf32>
    %cst_235 = arith.constant 2.500000e-01 : f32
    %663 = vector.broadcast %cst_235 : f32 to vector<1x256xf32>
    %664 = arith.mulf %662, %663 : vector<1x256xf32>
    %665 = vector.broadcast %664 : vector<1x256xf32> to vector<4x256xf32>
    %666 = arith.subf %661, %665 : vector<4x256xf32>
    %667 = arith.mulf %666, %666 : vector<4x256xf32>
    %cst_236 = arith.constant dense<0.000000e+00> : vector<1x256xf32>
    %668 = tpu.matmul %3, %667, %cst_236 {dimension_numbers = #tpu.dot_dimension_numbers<[1], [0], [0], [1], [0, 0, 1, 1], [], []>} : vector<1x4xf32>, vector<4x256xf32>, vector<1x256xf32> -> vector<1x256xf32>
    %cst_237 = arith.constant 2.500000e-01 : f32
    %669 = vector.broadcast %cst_237 : f32 to vector<1x256xf32>
    %670 = arith.mulf %668, %669 : vector<1x256xf32>
    %cst_238 = arith.constant 9.99999997E-7 : f32
    %671 = vector.broadcast %cst_238 : f32 to vector<1x256xf32>
    %672 = arith.addf %670, %671 : vector<1x256xf32>
    %673 = math.rsqrt %672 : vector<1x256xf32>
    %674 = vector.broadcast %673 : vector<1x256xf32> to vector<4x256xf32>
    %675 = arith.mulf %666, %674 : vector<4x256xf32>
    %676 = vector.broadcast %435 : vector<4x1xf32> to vector<4x256xf32>
    %677 = arith.mulf %675, %676 : vector<4x256xf32>
    %678 = vector.broadcast %436 : vector<4x1xf32> to vector<4x256xf32>
    %679 = arith.addf %677, %678 : vector<4x256xf32>
    %680 = arith.negf %679 : vector<4x256xf32>
    %681 = math.exp %680 : vector<4x256xf32>
    %cst_239 = arith.constant 1.000000e+00 : f32
    %682 = vector.broadcast %cst_239 : f32 to vector<4x256xf32>
    %683 = arith.addf %682, %681 : vector<4x256xf32>
    %684 = arith.divf %682, %683 : vector<4x256xf32>
    %cst_240 = arith.constant dense<0.000000e+00> : vector<1x256xf32>
    %685 = tpu.matmul %438, %684, %cst_240 {dimension_numbers = #tpu.dot_dimension_numbers<[1], [0], [0], [1], [0, 0, 1, 1], [], []>} : vector<1x4xf32>, vector<4x256xf32>, vector<1x256xf32> -> vector<1x256xf32>
    %686 = arith.negf %685 : vector<1x256xf32>
    %687 = math.exp %686 : vector<1x256xf32>
    %cst_241 = arith.constant 1.000000e+00 : f32
    %688 = vector.broadcast %cst_241 : f32 to vector<1x256xf32>
    %689 = arith.addf %688, %687 : vector<1x256xf32>
    %690 = arith.divf %688, %689 : vector<1x256xf32>
    %c0_242 = arith.constant 0 : index
    %c512_243 = arith.constant 512 : index
    %691 = vector.load %arg23[%c0_242, %c512_243] : memref<4x1024xbf16, #tpu.memory_space<vmem>>, vector<4x256xbf16>
    %c0_244 = arith.constant 0 : index
    %c0_245 = arith.constant 0 : index
    %692 = vector.load %arg15[%c0_244, %c0_245] : memref<16x4xbf16, #tpu.memory_space<vmem>>, vector<16x4xbf16>
    %cst_246 = arith.constant dense<0.000000e+00> : vector<16x256xf32>
    %693 = tpu.matmul %692, %691, %cst_246 {dimension_numbers = #tpu.dot_dimension_numbers<[1], [0], [0], [1], [0, 0, 1, 1], [], []>} : vector<16x4xbf16>, vector<4x256xbf16>, vector<16x256xf32> -> vector<16x256xf32>
    %c0_247 = arith.constant 0 : index
    %c0_248 = arith.constant 0 : index
    %694 = vector.load %arg16[%c0_247, %c0_248] : memref<16x1xf32, #tpu.memory_space<vmem>>, vector<16x1xf32>
    %695 = vector.broadcast %694 : vector<16x1xf32> to vector<16x256xf32>
    %696 = arith.addf %693, %695 : vector<16x256xf32>
    %697 = vector.extract_strided_slice %696 {offsets = [0, 0], sizes = [4, 256], strides = [1, 1]} : vector<16x256xf32> to vector<4x256xf32>
    %cst_249 = arith.constant dense<0.000000e+00> : vector<1x256xf32>
    %698 = tpu.matmul %3, %697, %cst_249 {dimension_numbers = #tpu.dot_dimension_numbers<[1], [0], [0], [1], [0, 0, 1, 1], [], []>} : vector<1x4xf32>, vector<4x256xf32>, vector<1x256xf32> -> vector<1x256xf32>
    %cst_250 = arith.constant 2.500000e-01 : f32
    %699 = vector.broadcast %cst_250 : f32 to vector<1x256xf32>
    %700 = arith.mulf %698, %699 : vector<1x256xf32>
    %701 = vector.broadcast %700 : vector<1x256xf32> to vector<4x256xf32>
    %702 = arith.subf %697, %701 : vector<4x256xf32>
    %703 = arith.mulf %702, %702 : vector<4x256xf32>
    %cst_251 = arith.constant dense<0.000000e+00> : vector<1x256xf32>
    %704 = tpu.matmul %3, %703, %cst_251 {dimension_numbers = #tpu.dot_dimension_numbers<[1], [0], [0], [1], [0, 0, 1, 1], [], []>} : vector<1x4xf32>, vector<4x256xf32>, vector<1x256xf32> -> vector<1x256xf32>
    %cst_252 = arith.constant 2.500000e-01 : f32
    %705 = vector.broadcast %cst_252 : f32 to vector<1x256xf32>
    %706 = arith.mulf %704, %705 : vector<1x256xf32>
    %cst_253 = arith.constant 9.99999997E-7 : f32
    %707 = vector.broadcast %cst_253 : f32 to vector<1x256xf32>
    %708 = arith.addf %706, %707 : vector<1x256xf32>
    %709 = math.rsqrt %708 : vector<1x256xf32>
    %710 = vector.broadcast %709 : vector<1x256xf32> to vector<4x256xf32>
    %711 = arith.mulf %702, %710 : vector<4x256xf32>
    %712 = vector.broadcast %435 : vector<4x1xf32> to vector<4x256xf32>
    %713 = arith.mulf %711, %712 : vector<4x256xf32>
    %714 = vector.broadcast %436 : vector<4x1xf32> to vector<4x256xf32>
    %715 = arith.addf %713, %714 : vector<4x256xf32>
    %716 = arith.negf %715 : vector<4x256xf32>
    %717 = math.exp %716 : vector<4x256xf32>
    %cst_254 = arith.constant 1.000000e+00 : f32
    %718 = vector.broadcast %cst_254 : f32 to vector<4x256xf32>
    %719 = arith.addf %718, %717 : vector<4x256xf32>
    %720 = arith.divf %718, %719 : vector<4x256xf32>
    %cst_255 = arith.constant dense<0.000000e+00> : vector<1x256xf32>
    %721 = tpu.matmul %438, %720, %cst_255 {dimension_numbers = #tpu.dot_dimension_numbers<[1], [0], [0], [1], [0, 0, 1, 1], [], []>} : vector<1x4xf32>, vector<4x256xf32>, vector<1x256xf32> -> vector<1x256xf32>
    %722 = arith.negf %721 : vector<1x256xf32>
    %723 = math.exp %722 : vector<1x256xf32>
    %cst_256 = arith.constant 1.000000e+00 : f32
    %724 = vector.broadcast %cst_256 : f32 to vector<1x256xf32>
    %725 = arith.addf %724, %723 : vector<1x256xf32>
    %726 = arith.divf %724, %725 : vector<1x256xf32>
    %727 = vector.extract_strided_slice %696 {offsets = [4, 0], sizes = [4, 256], strides = [1, 1]} : vector<16x256xf32> to vector<4x256xf32>
    %cst_257 = arith.constant dense<0.000000e+00> : vector<1x256xf32>
    %728 = tpu.matmul %3, %727, %cst_257 {dimension_numbers = #tpu.dot_dimension_numbers<[1], [0], [0], [1], [0, 0, 1, 1], [], []>} : vector<1x4xf32>, vector<4x256xf32>, vector<1x256xf32> -> vector<1x256xf32>
    %cst_258 = arith.constant 2.500000e-01 : f32
    %729 = vector.broadcast %cst_258 : f32 to vector<1x256xf32>
    %730 = arith.mulf %728, %729 : vector<1x256xf32>
    %731 = vector.broadcast %730 : vector<1x256xf32> to vector<4x256xf32>
    %732 = arith.subf %727, %731 : vector<4x256xf32>
    %733 = arith.mulf %732, %732 : vector<4x256xf32>
    %cst_259 = arith.constant dense<0.000000e+00> : vector<1x256xf32>
    %734 = tpu.matmul %3, %733, %cst_259 {dimension_numbers = #tpu.dot_dimension_numbers<[1], [0], [0], [1], [0, 0, 1, 1], [], []>} : vector<1x4xf32>, vector<4x256xf32>, vector<1x256xf32> -> vector<1x256xf32>
    %cst_260 = arith.constant 2.500000e-01 : f32
    %735 = vector.broadcast %cst_260 : f32 to vector<1x256xf32>
    %736 = arith.mulf %734, %735 : vector<1x256xf32>
    %cst_261 = arith.constant 9.99999997E-7 : f32
    %737 = vector.broadcast %cst_261 : f32 to vector<1x256xf32>
    %738 = arith.addf %736, %737 : vector<1x256xf32>
    %739 = math.rsqrt %738 : vector<1x256xf32>
    %740 = vector.broadcast %739 : vector<1x256xf32> to vector<4x256xf32>
    %741 = arith.mulf %732, %740 : vector<4x256xf32>
    %742 = vector.broadcast %435 : vector<4x1xf32> to vector<4x256xf32>
    %743 = arith.mulf %741, %742 : vector<4x256xf32>
    %744 = vector.broadcast %436 : vector<4x1xf32> to vector<4x256xf32>
    %745 = arith.addf %743, %744 : vector<4x256xf32>
    %746 = arith.negf %745 : vector<4x256xf32>
    %747 = math.exp %746 : vector<4x256xf32>
    %cst_262 = arith.constant 1.000000e+00 : f32
    %748 = vector.broadcast %cst_262 : f32 to vector<4x256xf32>
    %749 = arith.addf %748, %747 : vector<4x256xf32>
    %750 = arith.divf %748, %749 : vector<4x256xf32>
    %cst_263 = arith.constant dense<0.000000e+00> : vector<1x256xf32>
    %751 = tpu.matmul %438, %750, %cst_263 {dimension_numbers = #tpu.dot_dimension_numbers<[1], [0], [0], [1], [0, 0, 1, 1], [], []>} : vector<1x4xf32>, vector<4x256xf32>, vector<1x256xf32> -> vector<1x256xf32>
    %752 = arith.negf %751 : vector<1x256xf32>
    %753 = math.exp %752 : vector<1x256xf32>
    %cst_264 = arith.constant 1.000000e+00 : f32
    %754 = vector.broadcast %cst_264 : f32 to vector<1x256xf32>
    %755 = arith.addf %754, %753 : vector<1x256xf32>
    %756 = arith.divf %754, %755 : vector<1x256xf32>
    %757 = vector.extract_strided_slice %696 {offsets = [8, 0], sizes = [4, 256], strides = [1, 1]} : vector<16x256xf32> to vector<4x256xf32>
    %cst_265 = arith.constant dense<0.000000e+00> : vector<1x256xf32>
    %758 = tpu.matmul %3, %757, %cst_265 {dimension_numbers = #tpu.dot_dimension_numbers<[1], [0], [0], [1], [0, 0, 1, 1], [], []>} : vector<1x4xf32>, vector<4x256xf32>, vector<1x256xf32> -> vector<1x256xf32>
    %cst_266 = arith.constant 2.500000e-01 : f32
    %759 = vector.broadcast %cst_266 : f32 to vector<1x256xf32>
    %760 = arith.mulf %758, %759 : vector<1x256xf32>
    %761 = vector.broadcast %760 : vector<1x256xf32> to vector<4x256xf32>
    %762 = arith.subf %757, %761 : vector<4x256xf32>
    %763 = arith.mulf %762, %762 : vector<4x256xf32>
    %cst_267 = arith.constant dense<0.000000e+00> : vector<1x256xf32>
    %764 = tpu.matmul %3, %763, %cst_267 {dimension_numbers = #tpu.dot_dimension_numbers<[1], [0], [0], [1], [0, 0, 1, 1], [], []>} : vector<1x4xf32>, vector<4x256xf32>, vector<1x256xf32> -> vector<1x256xf32>
    %cst_268 = arith.constant 2.500000e-01 : f32
    %765 = vector.broadcast %cst_268 : f32 to vector<1x256xf32>
    %766 = arith.mulf %764, %765 : vector<1x256xf32>
    %cst_269 = arith.constant 9.99999997E-7 : f32
    %767 = vector.broadcast %cst_269 : f32 to vector<1x256xf32>
    %768 = arith.addf %766, %767 : vector<1x256xf32>
    %769 = math.rsqrt %768 : vector<1x256xf32>
    %770 = vector.broadcast %769 : vector<1x256xf32> to vector<4x256xf32>
    %771 = arith.mulf %762, %770 : vector<4x256xf32>
    %772 = vector.broadcast %435 : vector<4x1xf32> to vector<4x256xf32>
    %773 = arith.mulf %771, %772 : vector<4x256xf32>
    %774 = vector.broadcast %436 : vector<4x1xf32> to vector<4x256xf32>
    %775 = arith.addf %773, %774 : vector<4x256xf32>
    %776 = arith.negf %775 : vector<4x256xf32>
    %777 = math.exp %776 : vector<4x256xf32>
    %cst_270 = arith.constant 1.000000e+00 : f32
    %778 = vector.broadcast %cst_270 : f32 to vector<4x256xf32>
    %779 = arith.addf %778, %777 : vector<4x256xf32>
    %780 = arith.divf %778, %779 : vector<4x256xf32>
    %cst_271 = arith.constant dense<0.000000e+00> : vector<1x256xf32>
    %781 = tpu.matmul %438, %780, %cst_271 {dimension_numbers = #tpu.dot_dimension_numbers<[1], [0], [0], [1], [0, 0, 1, 1], [], []>} : vector<1x4xf32>, vector<4x256xf32>, vector<1x256xf32> -> vector<1x256xf32>
    %782 = arith.negf %781 : vector<1x256xf32>
    %783 = math.exp %782 : vector<1x256xf32>
    %cst_272 = arith.constant 1.000000e+00 : f32
    %784 = vector.broadcast %cst_272 : f32 to vector<1x256xf32>
    %785 = arith.addf %784, %783 : vector<1x256xf32>
    %786 = arith.divf %784, %785 : vector<1x256xf32>
    %787 = vector.extract_strided_slice %696 {offsets = [12, 0], sizes = [4, 256], strides = [1, 1]} : vector<16x256xf32> to vector<4x256xf32>
    %cst_273 = arith.constant dense<0.000000e+00> : vector<1x256xf32>
    %788 = tpu.matmul %3, %787, %cst_273 {dimension_numbers = #tpu.dot_dimension_numbers<[1], [0], [0], [1], [0, 0, 1, 1], [], []>} : vector<1x4xf32>, vector<4x256xf32>, vector<1x256xf32> -> vector<1x256xf32>
    %cst_274 = arith.constant 2.500000e-01 : f32
    %789 = vector.broadcast %cst_274 : f32 to vector<1x256xf32>
    %790 = arith.mulf %788, %789 : vector<1x256xf32>
    %791 = vector.broadcast %790 : vector<1x256xf32> to vector<4x256xf32>
    %792 = arith.subf %787, %791 : vector<4x256xf32>
    %793 = arith.mulf %792, %792 : vector<4x256xf32>
    %cst_275 = arith.constant dense<0.000000e+00> : vector<1x256xf32>
    %794 = tpu.matmul %3, %793, %cst_275 {dimension_numbers = #tpu.dot_dimension_numbers<[1], [0], [0], [1], [0, 0, 1, 1], [], []>} : vector<1x4xf32>, vector<4x256xf32>, vector<1x256xf32> -> vector<1x256xf32>
    %cst_276 = arith.constant 2.500000e-01 : f32
    %795 = vector.broadcast %cst_276 : f32 to vector<1x256xf32>
    %796 = arith.mulf %794, %795 : vector<1x256xf32>
    %cst_277 = arith.constant 9.99999997E-7 : f32
    %797 = vector.broadcast %cst_277 : f32 to vector<1x256xf32>
    %798 = arith.addf %796, %797 : vector<1x256xf32>
    %799 = math.rsqrt %798 : vector<1x256xf32>
    %800 = vector.broadcast %799 : vector<1x256xf32> to vector<4x256xf32>
    %801 = arith.mulf %792, %800 : vector<4x256xf32>
    %802 = vector.broadcast %435 : vector<4x1xf32> to vector<4x256xf32>
    %803 = arith.mulf %801, %802 : vector<4x256xf32>
    %804 = vector.broadcast %436 : vector<4x1xf32> to vector<4x256xf32>
    %805 = arith.addf %803, %804 : vector<4x256xf32>
    %806 = arith.negf %805 : vector<4x256xf32>
    %807 = math.exp %806 : vector<4x256xf32>
    %cst_278 = arith.constant 1.000000e+00 : f32
    %808 = vector.broadcast %cst_278 : f32 to vector<4x256xf32>
    %809 = arith.addf %808, %807 : vector<4x256xf32>
    %810 = arith.divf %808, %809 : vector<4x256xf32>
    %cst_279 = arith.constant dense<0.000000e+00> : vector<1x256xf32>
    %811 = tpu.matmul %438, %810, %cst_279 {dimension_numbers = #tpu.dot_dimension_numbers<[1], [0], [0], [1], [0, 0, 1, 1], [], []>} : vector<1x4xf32>, vector<4x256xf32>, vector<1x256xf32> -> vector<1x256xf32>
    %812 = arith.negf %811 : vector<1x256xf32>
    %813 = math.exp %812 : vector<1x256xf32>
    %cst_280 = arith.constant 1.000000e+00 : f32
    %814 = vector.broadcast %cst_280 : f32 to vector<1x256xf32>
    %815 = arith.addf %814, %813 : vector<1x256xf32>
    %816 = arith.divf %814, %815 : vector<1x256xf32>
    %c0_281 = arith.constant 0 : index
    %c768_282 = arith.constant 768 : index
    %817 = vector.load %arg23[%c0_281, %c768_282] : memref<4x1024xbf16, #tpu.memory_space<vmem>>, vector<4x256xbf16>
    %c0_283 = arith.constant 0 : index
    %c0_284 = arith.constant 0 : index
    %818 = vector.load %arg15[%c0_283, %c0_284] : memref<16x4xbf16, #tpu.memory_space<vmem>>, vector<16x4xbf16>
    %cst_285 = arith.constant dense<0.000000e+00> : vector<16x256xf32>
    %819 = tpu.matmul %818, %817, %cst_285 {dimension_numbers = #tpu.dot_dimension_numbers<[1], [0], [0], [1], [0, 0, 1, 1], [], []>} : vector<16x4xbf16>, vector<4x256xbf16>, vector<16x256xf32> -> vector<16x256xf32>
    %c0_286 = arith.constant 0 : index
    %c0_287 = arith.constant 0 : index
    %820 = vector.load %arg16[%c0_286, %c0_287] : memref<16x1xf32, #tpu.memory_space<vmem>>, vector<16x1xf32>
    %821 = vector.broadcast %820 : vector<16x1xf32> to vector<16x256xf32>
    %822 = arith.addf %819, %821 : vector<16x256xf32>
    %823 = vector.extract_strided_slice %822 {offsets = [0, 0], sizes = [4, 256], strides = [1, 1]} : vector<16x256xf32> to vector<4x256xf32>
    %cst_288 = arith.constant dense<0.000000e+00> : vector<1x256xf32>
    %824 = tpu.matmul %3, %823, %cst_288 {dimension_numbers = #tpu.dot_dimension_numbers<[1], [0], [0], [1], [0, 0, 1, 1], [], []>} : vector<1x4xf32>, vector<4x256xf32>, vector<1x256xf32> -> vector<1x256xf32>
    %cst_289 = arith.constant 2.500000e-01 : f32
    %825 = vector.broadcast %cst_289 : f32 to vector<1x256xf32>
    %826 = arith.mulf %824, %825 : vector<1x256xf32>
    %827 = vector.broadcast %826 : vector<1x256xf32> to vector<4x256xf32>
    %828 = arith.subf %823, %827 : vector<4x256xf32>
    %829 = arith.mulf %828, %828 : vector<4x256xf32>
    %cst_290 = arith.constant dense<0.000000e+00> : vector<1x256xf32>
    %830 = tpu.matmul %3, %829, %cst_290 {dimension_numbers = #tpu.dot_dimension_numbers<[1], [0], [0], [1], [0, 0, 1, 1], [], []>} : vector<1x4xf32>, vector<4x256xf32>, vector<1x256xf32> -> vector<1x256xf32>
    %cst_291 = arith.constant 2.500000e-01 : f32
    %831 = vector.broadcast %cst_291 : f32 to vector<1x256xf32>
    %832 = arith.mulf %830, %831 : vector<1x256xf32>
    %cst_292 = arith.constant 9.99999997E-7 : f32
    %833 = vector.broadcast %cst_292 : f32 to vector<1x256xf32>
    %834 = arith.addf %832, %833 : vector<1x256xf32>
    %835 = math.rsqrt %834 : vector<1x256xf32>
    %836 = vector.broadcast %835 : vector<1x256xf32> to vector<4x256xf32>
    %837 = arith.mulf %828, %836 : vector<4x256xf32>
    %838 = vector.broadcast %435 : vector<4x1xf32> to vector<4x256xf32>
    %839 = arith.mulf %837, %838 : vector<4x256xf32>
    %840 = vector.broadcast %436 : vector<4x1xf32> to vector<4x256xf32>
    %841 = arith.addf %839, %840 : vector<4x256xf32>
    %842 = arith.negf %841 : vector<4x256xf32>
    %843 = math.exp %842 : vector<4x256xf32>
    %cst_293 = arith.constant 1.000000e+00 : f32
    %844 = vector.broadcast %cst_293 : f32 to vector<4x256xf32>
    %845 = arith.addf %844, %843 : vector<4x256xf32>
    %846 = arith.divf %844, %845 : vector<4x256xf32>
    %cst_294 = arith.constant dense<0.000000e+00> : vector<1x256xf32>
    %847 = tpu.matmul %438, %846, %cst_294 {dimension_numbers = #tpu.dot_dimension_numbers<[1], [0], [0], [1], [0, 0, 1, 1], [], []>} : vector<1x4xf32>, vector<4x256xf32>, vector<1x256xf32> -> vector<1x256xf32>
    %848 = arith.negf %847 : vector<1x256xf32>
    %849 = math.exp %848 : vector<1x256xf32>
    %cst_295 = arith.constant 1.000000e+00 : f32
    %850 = vector.broadcast %cst_295 : f32 to vector<1x256xf32>
    %851 = arith.addf %850, %849 : vector<1x256xf32>
    %852 = arith.divf %850, %851 : vector<1x256xf32>
    %853 = vector.extract_strided_slice %822 {offsets = [4, 0], sizes = [4, 256], strides = [1, 1]} : vector<16x256xf32> to vector<4x256xf32>
    %cst_296 = arith.constant dense<0.000000e+00> : vector<1x256xf32>
    %854 = tpu.matmul %3, %853, %cst_296 {dimension_numbers = #tpu.dot_dimension_numbers<[1], [0], [0], [1], [0, 0, 1, 1], [], []>} : vector<1x4xf32>, vector<4x256xf32>, vector<1x256xf32> -> vector<1x256xf32>
    %cst_297 = arith.constant 2.500000e-01 : f32
    %855 = vector.broadcast %cst_297 : f32 to vector<1x256xf32>
    %856 = arith.mulf %854, %855 : vector<1x256xf32>
    %857 = vector.broadcast %856 : vector<1x256xf32> to vector<4x256xf32>
    %858 = arith.subf %853, %857 : vector<4x256xf32>
    %859 = arith.mulf %858, %858 : vector<4x256xf32>
    %cst_298 = arith.constant dense<0.000000e+00> : vector<1x256xf32>
    %860 = tpu.matmul %3, %859, %cst_298 {dimension_numbers = #tpu.dot_dimension_numbers<[1], [0], [0], [1], [0, 0, 1, 1], [], []>} : vector<1x4xf32>, vector<4x256xf32>, vector<1x256xf32> -> vector<1x256xf32>
    %cst_299 = arith.constant 2.500000e-01 : f32
    %861 = vector.broadcast %cst_299 : f32 to vector<1x256xf32>
    %862 = arith.mulf %860, %861 : vector<1x256xf32>
    %cst_300 = arith.constant 9.99999997E-7 : f32
    %863 = vector.broadcast %cst_300 : f32 to vector<1x256xf32>
    %864 = arith.addf %862, %863 : vector<1x256xf32>
    %865 = math.rsqrt %864 : vector<1x256xf32>
    %866 = vector.broadcast %865 : vector<1x256xf32> to vector<4x256xf32>
    %867 = arith.mulf %858, %866 : vector<4x256xf32>
    %868 = vector.broadcast %435 : vector<4x1xf32> to vector<4x256xf32>
    %869 = arith.mulf %867, %868 : vector<4x256xf32>
    %870 = vector.broadcast %436 : vector<4x1xf32> to vector<4x256xf32>
    %871 = arith.addf %869, %870 : vector<4x256xf32>
    %872 = arith.negf %871 : vector<4x256xf32>
    %873 = math.exp %872 : vector<4x256xf32>
    %cst_301 = arith.constant 1.000000e+00 : f32
    %874 = vector.broadcast %cst_301 : f32 to vector<4x256xf32>
    %875 = arith.addf %874, %873 : vector<4x256xf32>
    %876 = arith.divf %874, %875 : vector<4x256xf32>
    %cst_302 = arith.constant dense<0.000000e+00> : vector<1x256xf32>
    %877 = tpu.matmul %438, %876, %cst_302 {dimension_numbers = #tpu.dot_dimension_numbers<[1], [0], [0], [1], [0, 0, 1, 1], [], []>} : vector<1x4xf32>, vector<4x256xf32>, vector<1x256xf32> -> vector<1x256xf32>
    %878 = arith.negf %877 : vector<1x256xf32>
    %879 = math.exp %878 : vector<1x256xf32>
    %cst_303 = arith.constant 1.000000e+00 : f32
    %880 = vector.broadcast %cst_303 : f32 to vector<1x256xf32>
    %881 = arith.addf %880, %879 : vector<1x256xf32>
    %882 = arith.divf %880, %881 : vector<1x256xf32>
    %883 = vector.extract_strided_slice %822 {offsets = [8, 0], sizes = [4, 256], strides = [1, 1]} : vector<16x256xf32> to vector<4x256xf32>
    %cst_304 = arith.constant dense<0.000000e+00> : vector<1x256xf32>
    %884 = tpu.matmul %3, %883, %cst_304 {dimension_numbers = #tpu.dot_dimension_numbers<[1], [0], [0], [1], [0, 0, 1, 1], [], []>} : vector<1x4xf32>, vector<4x256xf32>, vector<1x256xf32> -> vector<1x256xf32>
    %cst_305 = arith.constant 2.500000e-01 : f32
    %885 = vector.broadcast %cst_305 : f32 to vector<1x256xf32>
    %886 = arith.mulf %884, %885 : vector<1x256xf32>
    %887 = vector.broadcast %886 : vector<1x256xf32> to vector<4x256xf32>
    %888 = arith.subf %883, %887 : vector<4x256xf32>
    %889 = arith.mulf %888, %888 : vector<4x256xf32>
    %cst_306 = arith.constant dense<0.000000e+00> : vector<1x256xf32>
    %890 = tpu.matmul %3, %889, %cst_306 {dimension_numbers = #tpu.dot_dimension_numbers<[1], [0], [0], [1], [0, 0, 1, 1], [], []>} : vector<1x4xf32>, vector<4x256xf32>, vector<1x256xf32> -> vector<1x256xf32>
    %cst_307 = arith.constant 2.500000e-01 : f32
    %891 = vector.broadcast %cst_307 : f32 to vector<1x256xf32>
    %892 = arith.mulf %890, %891 : vector<1x256xf32>
    %cst_308 = arith.constant 9.99999997E-7 : f32
    %893 = vector.broadcast %cst_308 : f32 to vector<1x256xf32>
    %894 = arith.addf %892, %893 : vector<1x256xf32>
    %895 = math.rsqrt %894 : vector<1x256xf32>
    %896 = vector.broadcast %895 : vector<1x256xf32> to vector<4x256xf32>
    %897 = arith.mulf %888, %896 : vector<4x256xf32>
    %898 = vector.broadcast %435 : vector<4x1xf32> to vector<4x256xf32>
    %899 = arith.mulf %897, %898 : vector<4x256xf32>
    %900 = vector.broadcast %436 : vector<4x1xf32> to vector<4x256xf32>
    %901 = arith.addf %899, %900 : vector<4x256xf32>
    %902 = arith.negf %901 : vector<4x256xf32>
    %903 = math.exp %902 : vector<4x256xf32>
    %cst_309 = arith.constant 1.000000e+00 : f32
    %904 = vector.broadcast %cst_309 : f32 to vector<4x256xf32>
    %905 = arith.addf %904, %903 : vector<4x256xf32>
    %906 = arith.divf %904, %905 : vector<4x256xf32>
    %cst_310 = arith.constant dense<0.000000e+00> : vector<1x256xf32>
    %907 = tpu.matmul %438, %906, %cst_310 {dimension_numbers = #tpu.dot_dimension_numbers<[1], [0], [0], [1], [0, 0, 1, 1], [], []>} : vector<1x4xf32>, vector<4x256xf32>, vector<1x256xf32> -> vector<1x256xf32>
    %908 = arith.negf %907 : vector<1x256xf32>
    %909 = math.exp %908 : vector<1x256xf32>
    %cst_311 = arith.constant 1.000000e+00 : f32
    %910 = vector.broadcast %cst_311 : f32 to vector<1x256xf32>
    %911 = arith.addf %910, %909 : vector<1x256xf32>
    %912 = arith.divf %910, %911 : vector<1x256xf32>
    %913 = vector.extract_strided_slice %822 {offsets = [12, 0], sizes = [4, 256], strides = [1, 1]} : vector<16x256xf32> to vector<4x256xf32>
    %cst_312 = arith.constant dense<0.000000e+00> : vector<1x256xf32>
    %914 = tpu.matmul %3, %913, %cst_312 {dimension_numbers = #tpu.dot_dimension_numbers<[1], [0], [0], [1], [0, 0, 1, 1], [], []>} : vector<1x4xf32>, vector<4x256xf32>, vector<1x256xf32> -> vector<1x256xf32>
    %cst_313 = arith.constant 2.500000e-01 : f32
    %915 = vector.broadcast %cst_313 : f32 to vector<1x256xf32>
    %916 = arith.mulf %914, %915 : vector<1x256xf32>
    %917 = vector.broadcast %916 : vector<1x256xf32> to vector<4x256xf32>
    %918 = arith.subf %913, %917 : vector<4x256xf32>
    %919 = arith.mulf %918, %918 : vector<4x256xf32>
    %cst_314 = arith.constant dense<0.000000e+00> : vector<1x256xf32>
    %920 = tpu.matmul %3, %919, %cst_314 {dimension_numbers = #tpu.dot_dimension_numbers<[1], [0], [0], [1], [0, 0, 1, 1], [], []>} : vector<1x4xf32>, vector<4x256xf32>, vector<1x256xf32> -> vector<1x256xf32>
    %cst_315 = arith.constant 2.500000e-01 : f32
    %921 = vector.broadcast %cst_315 : f32 to vector<1x256xf32>
    %922 = arith.mulf %920, %921 : vector<1x256xf32>
    %cst_316 = arith.constant 9.99999997E-7 : f32
    %923 = vector.broadcast %cst_316 : f32 to vector<1x256xf32>
    %924 = arith.addf %922, %923 : vector<1x256xf32>
    %925 = math.rsqrt %924 : vector<1x256xf32>
    %926 = vector.broadcast %925 : vector<1x256xf32> to vector<4x256xf32>
    %927 = arith.mulf %918, %926 : vector<4x256xf32>
    %928 = vector.broadcast %435 : vector<4x1xf32> to vector<4x256xf32>
    %929 = arith.mulf %927, %928 : vector<4x256xf32>
    %930 = vector.broadcast %436 : vector<4x1xf32> to vector<4x256xf32>
    %931 = arith.addf %929, %930 : vector<4x256xf32>
    %932 = arith.negf %931 : vector<4x256xf32>
    %933 = math.exp %932 : vector<4x256xf32>
    %cst_317 = arith.constant 1.000000e+00 : f32
    %934 = vector.broadcast %cst_317 : f32 to vector<4x256xf32>
    %935 = arith.addf %934, %933 : vector<4x256xf32>
    %936 = arith.divf %934, %935 : vector<4x256xf32>
    %cst_318 = arith.constant dense<0.000000e+00> : vector<1x256xf32>
    %937 = tpu.matmul %438, %936, %cst_318 {dimension_numbers = #tpu.dot_dimension_numbers<[1], [0], [0], [1], [0, 0, 1, 1], [], []>} : vector<1x4xf32>, vector<4x256xf32>, vector<1x256xf32> -> vector<1x256xf32>
    %938 = arith.negf %937 : vector<1x256xf32>
    %939 = math.exp %938 : vector<1x256xf32>
    %cst_319 = arith.constant 1.000000e+00 : f32
    %940 = vector.broadcast %cst_319 : f32 to vector<1x256xf32>
    %941 = arith.addf %940, %939 : vector<1x256xf32>
    %942 = arith.divf %940, %941 : vector<1x256xf32>
    %943 = tpu.concatenate %474, %600, %726, %852 in 1 : vector<1x256xf32>, vector<1x256xf32>, vector<1x256xf32>, vector<1x256xf32> -> vector<1x1024xf32>
    %944 = tpu.concatenate %504, %630, %756, %882 in 1 : vector<1x256xf32>, vector<1x256xf32>, vector<1x256xf32>, vector<1x256xf32> -> vector<1x1024xf32>
    %945 = tpu.concatenate %534, %660, %786, %912 in 1 : vector<1x256xf32>, vector<1x256xf32>, vector<1x256xf32>, vector<1x256xf32> -> vector<1x1024xf32>
    %946 = tpu.concatenate %564, %690, %816, %942 in 1 : vector<1x256xf32>, vector<1x256xf32>, vector<1x256xf32>, vector<1x256xf32> -> vector<1x1024xf32>
    %947 = tpu.concatenate %943, %944, %945, %946 in 0 : vector<1x1024xf32>, vector<1x1024xf32>, vector<1x1024xf32>, vector<1x1024xf32> -> vector<4x1024xf32>
    %c0_320 = arith.constant 0 : index
    %c0_321 = arith.constant 0 : index
    %c0_322 = arith.constant 0 : index
    %948 = vector.load %arg20[%c0_320, %c0_321, %c0_322] : memref<1x4x1024xf32, #tpu.memory_space<vmem>>, vector<1x4x1024xf32>
    %949 = vector.shape_cast %948 : vector<1x4x1024xf32> to vector<4x1024xf32>
    %950 = vector.shape_cast %947 : vector<4x1024xf32> to vector<1x4x1024xf32>
    tpu.vector_store %arg20[%c0_320, %c0_321, %c0_322], %950 {strides = array<i32>} : memref<1x4x1024xf32, #tpu.memory_space<vmem>>, vector<1x4x1024xf32>,
    return
  }
  func.func @transform_0(%arg0: i32, %arg1: i32) -> (i32, i32, i32) {
    %c0_i32 = arith.constant 0 : i32
    %c0_i32_0 = arith.constant 0 : i32
    return %arg0, %c0_i32, %arg1 : i32, i32, i32
  }
  func.func @transform_1(%arg0: i32, %arg1: i32) -> (i32, i32) {
    %c0_i32 = arith.constant 0 : i32
    %c0_i32_0 = arith.constant 0 : i32
    %c0_i32_1 = arith.constant 0 : i32
    return %c0_i32, %c0_i32_0 : i32, i32
  }
  func.func @transform_2(%arg0: i32, %arg1: i32) -> (i32, i32) {
    %c0_i32 = arith.constant 0 : i32
    %c0_i32_0 = arith.constant 0 : i32
    %c0_i32_1 = arith.constant 0 : i32
    return %c0_i32, %c0_i32_0 : i32, i32
  }
  func.func @transform_3(%arg0: i32, %arg1: i32) -> (i32, i32) {
    %c0_i32 = arith.constant 0 : i32
    %c0_i32_0 = arith.constant 0 : i32
    %c0_i32_1 = arith.constant 0 : i32
    return %c0_i32, %c0_i32_0 : i32, i32
  }
  func.func @transform_4(%arg0: i32, %arg1: i32) -> (i32, i32) {
    %c0_i32 = arith.constant 0 : i32
    %c0_i32_0 = arith.constant 0 : i32
    %c0_i32_1 = arith.constant 0 : i32
    return %c0_i32, %c0_i32_0 : i32, i32
  }
  func.func @transform_5(%arg0: i32, %arg1: i32) -> (i32, i32) {
    %c0_i32 = arith.constant 0 : i32
    %c0_i32_0 = arith.constant 0 : i32
    %c0_i32_1 = arith.constant 0 : i32
    return %c0_i32, %c0_i32_0 : i32, i32
  }
  func.func @transform_6(%arg0: i32, %arg1: i32) -> (i32, i32) {
    %c0_i32 = arith.constant 0 : i32
    %c0_i32_0 = arith.constant 0 : i32
    %c0_i32_1 = arith.constant 0 : i32
    return %c0_i32, %c0_i32_0 : i32, i32
  }
  func.func @transform_7(%arg0: i32, %arg1: i32) -> (i32, i32) {
    %c0_i32 = arith.constant 0 : i32
    %c0_i32_0 = arith.constant 0 : i32
    %c0_i32_1 = arith.constant 0 : i32
    return %c0_i32, %c0_i32_0 : i32, i32
  }
  func.func @transform_8(%arg0: i32, %arg1: i32) -> (i32, i32) {
    %c0_i32 = arith.constant 0 : i32
    %c0_i32_0 = arith.constant 0 : i32
    %c0_i32_1 = arith.constant 0 : i32
    return %c0_i32, %c0_i32_0 : i32, i32
  }
  func.func @transform_9(%arg0: i32, %arg1: i32) -> (i32, i32) {
    %c0_i32 = arith.constant 0 : i32
    %c0_i32_0 = arith.constant 0 : i32
    %c0_i32_1 = arith.constant 0 : i32
    return %c0_i32, %c0_i32_0 : i32, i32
  }
  func.func @transform_10(%arg0: i32, %arg1: i32) -> (i32, i32) {
    %c0_i32 = arith.constant 0 : i32
    %c0_i32_0 = arith.constant 0 : i32
    %c0_i32_1 = arith.constant 0 : i32
    return %c0_i32, %c0_i32_0 : i32, i32
  }
  func.func @transform_11(%arg0: i32, %arg1: i32) -> (i32, i32) {
    %c0_i32 = arith.constant 0 : i32
    %c0_i32_0 = arith.constant 0 : i32
    %c0_i32_1 = arith.constant 0 : i32
    return %c0_i32, %c0_i32_0 : i32, i32
  }
  func.func @transform_12(%arg0: i32, %arg1: i32) -> (i32, i32) {
    %c0_i32 = arith.constant 0 : i32
    %c0_i32_0 = arith.constant 0 : i32
    %c0_i32_1 = arith.constant 0 : i32
    return %c0_i32, %c0_i32_0 : i32, i32
  }
  func.func @transform_13(%arg0: i32, %arg1: i32) -> (i32, i32) {
    %c0_i32 = arith.constant 0 : i32
    %c0_i32_0 = arith.constant 0 : i32
    %c0_i32_1 = arith.constant 0 : i32
    return %c0_i32, %c0_i32_0 : i32, i32
  }
  func.func @transform_14(%arg0: i32, %arg1: i32) -> (i32, i32) {
    %c0_i32 = arith.constant 0 : i32
    %c0_i32_0 = arith.constant 0 : i32
    %c0_i32_1 = arith.constant 0 : i32
    return %c0_i32, %c0_i32_0 : i32, i32
  }
  func.func @transform_15(%arg0: i32, %arg1: i32) -> (i32, i32) {
    %c0_i32 = arith.constant 0 : i32
    %c0_i32_0 = arith.constant 0 : i32
    %c0_i32_1 = arith.constant 0 : i32
    return %c0_i32, %c0_i32_0 : i32, i32
  }
  func.func @transform_16(%arg0: i32, %arg1: i32) -> (i32, i32) {
    %c0_i32 = arith.constant 0 : i32
    %c0_i32_0 = arith.constant 0 : i32
    %c0_i32_1 = arith.constant 0 : i32
    return %c0_i32, %c0_i32_0 : i32, i32
  }
  func.func @transform_17(%arg0: i32, %arg1: i32) -> (i32, i32, i32) {
    %c0_i32 = arith.constant 0 : i32
    %c0_i32_0 = arith.constant 0 : i32
    %c0_i32_1 = arith.constant 0 : i32
    return %arg0, %c0_i32, %c0_i32_0 : i32, i32, i32
  }
  func.func @transform_18(%arg0: i32, %arg1: i32) -> (i32, i32, i32) {
    %c0_i32 = arith.constant 0 : i32
    %c0_i32_0 = arith.constant 0 : i32
    return %arg0, %c0_i32, %arg1 : i32, i32, i32
  }
}

</mosaic_0001>

<bundles_post_ra>
// kernel: tile.23
= control target key start
LH: loop header
LB: loop body
LE: loop exit
PB: predicated region body
PF: predicated region fallthrough
CT: control target
= control target key end

     0   :  { %2 = vsyncpa [#allocation1], 0  ;;  %s44_s6 = smov [#allocation0]   ;;  %s70_s0 = inlined_call_operand.hbm [shape: f32[8], index: 0, kind: input, shape index: {}]   ;;  %s71_s1 = inlined_call_operand.vmem [shape: f32[4,8], index: 1, kind: output, shape index: {}]  }
   0x1   :  { %s9_s7 = sshll.u32 %s44_s6, 4  ;;  %s20_s10 = scalar_lea.hbm %s70_s0, 16  ;;  %s10_s7 = int_to_ptr.vmem [resolvable:$true] %s9_s7 }
   0x2   :  { %p21_p0 = scmp.ne.s32.totalorder %s70_s0, %s20_s10  ;;  %p24_p1 = scmp.lt.u32.totalorder %s20_s10, %s70_s0 }
   0x4   :  { %p26_p2 = pnand %p24_p1, %p21_p0 }
   0x6   :  { %29 = shalt.err (!%p26_p2)
}
   0x7   :  { %s30_s15 = scalar_lea.vmem %s10_s7, 16  ;;  %s34_s16 = scalar_lea.vmem %s10_s7, 32 }
   0x8   :  { %p31_p3 = scmp.ne.s32.totalorder %s10_s7, %s30_s15  ;;  %p35_p4 = scmp.lt.s32.totalorder %s10_s7, %s10_s7 }
   0x9   :  { %p36_p5 = scmp.lt.s32.totalorder %s34_s16, %s30_s15 }
   0xb   :  { %p37_p6 = por %p36_p5, %p35_p4 }
   0xd   :  { %p38_p7 = pnand %p37_p6, %p31_p3 }
   0xf   :  { %41 = shalt.err (!%p38_p7)
}
  0x10   :  { %12 = dma.hbm_to_vmem [thread:$0]  %s70_s0, 16, %s10_s7, [#allocation1]  }
  0x11   :  { %42 = dma.done.wait [#allocation1], 16  }
  0x12   :  { %43 = vsyncadd [#allocation1], 4294967280  ;;  %v16_v0 = vld [vmem:[#allocation0] ss:$0 sm:$0xff] }
  0x13   :  { %17 = vst [vmem:[%s71_s1] sm:$0xf] %v16_v0 }
  0x14   :  { %18 = vsyncpa [#allocation1], 1 }

// kernel: tile.28
= control target key start
LH: loop header
LB: loop body
LE: loop exit
PB: predicated region body
PF: predicated region fallthrough
CT: control target
= control target key end

     0   :  { %2 = vsyncpa [#allocation1], 0  ;;  %s44_s6 = smov [#allocation0]   ;;  %s70_s0 = inlined_call_operand.hbm [shape: f32[4], index: 0, kind: input, shape index: {}]   ;;  %s71_s1 = inlined_call_operand.vmem [shape: f32[4,4], index: 1, kind: output, shape index: {}]  }
   0x1   :  { %s9_s7 = sshll.u32 %s44_s6, 4  ;;  %s20_s10 = scalar_lea.hbm %s70_s0, 16  ;;  %s10_s7 = int_to_ptr.vmem [resolvable:$true] %s9_s7 }
   0x2   :  { %p21_p0 = scmp.ne.s32.totalorder %s70_s0, %s20_s10  ;;  %p24_p1 = scmp.lt.u32.totalorder %s20_s10, %s70_s0 }
   0x4   :  { %p26_p2 = pnand %p24_p1, %p21_p0 }
   0x6   :  { %29 = shalt.err (!%p26_p2)
}
   0x7   :  { %s30_s15 = scalar_lea.vmem %s10_s7, 16  ;;  %s34_s16 = scalar_lea.vmem %s10_s7, 32 }
   0x8   :  { %p31_p3 = scmp.ne.s32.totalorder %s10_s7, %s30_s15  ;;  %p35_p4 = scmp.lt.s32.totalorder %s10_s7, %s10_s7 }
   0x9   :  { %p36_p5 = scmp.lt.s32.totalorder %s34_s16, %s30_s15 }
   0xb   :  { %p37_p6 = por %p36_p5, %p35_p4 }
   0xd   :  { %p38_p7 = pnand %p37_p6, %p31_p3 }
   0xf   :  { %41 = shalt.err (!%p38_p7)
}
  0x10   :  { %12 = dma.hbm_to_vmem [thread:$0]  %s70_s0, 16, %s10_s7, [#allocation1]  }
  0x11   :  { %42 = dma.done.wait [#allocation1], 16  }
  0x12   :  { %43 = vsyncadd [#allocation1], 4294967280  ;;  %v16_v0 = vld [vmem:[#allocation0] ss:$0 sm:$0xff] }
  0x13   :  { %17 = vst [vmem:[%s71_s1] sm:$0xf] %v16_v0 }
  0x14   :  { %18 = vsyncpa [#allocation1], 1 }

// kernel: tile.3
= control target key start
LH: loop header
LB: loop body
LE: loop exit
PB: predicated region body
PF: predicated region fallthrough
CT: control target
= control target key end

     0   :  { %s34_s8 = smov 125   ;;  %vm7_vm0 = vcmask 7168   ;;  %s35_s11 = smov 126   ;;  %s61_s0 = inlined_call_operand.vmem [shape: f32[4,4], index: 0, kind: input, shape index: {}]   ;;  %s62_s1 = inlined_call_operand.vmem [shape: f32[16,1], index: 1, kind: output, shape index: {}]  }
   0x1   :  { %v4_v0 = vld [vmem:[%s61_s0] sm:$0xf]  ;;  %s33_s0 = smov 127  }
   0x2   :  { %5 = vst [vmem:[#allocation0] sm:$0xf] %v4_v0 }
   0x9   :  { %v9_v1 = vld [vmem:[#allocation0] sm:$0xf]  }
   0xa   :  { %v21_v2 = vld [vmem:[#allocation0] sm:$0xf]   ;;  %10 = vrot.lane.b32.xlu0 %v9_v1, %s33_s0 }
   0xb   :  { %22 = vrot.lane.b32.xlu1 %v21_v2, %s34_s8  ;;  %v6_v3 = vld [vmem:[#allocation0] sm:$0xf]  }
   0xc   :  { %v15_v4 = vld [vmem:[#allocation0] sm:$0xf]   ;;  %8 = vst.msk [vmem:[%s62_s1] ss:$4 sm:$0xf] %vm7_vm0, %v6_v3  }
   0xe   :  { %16 = vrot.lane.b32.xlu0 %v15_v4, %s35_s11 }
  0x7c   :  { %v11_v5 = vpop.permute.xlu0 %10  }
  0x7d   :  { %v23_v6 = vpop.permute.xlu1 %22   ;;  %27 = vst.msk [vmem:[%s62_s1 + $0x1] ss:$4 sm:$0xf] %vm7_vm0, %v11_v5  }
  0x7e   :  { %29 = vst.msk [vmem:[%s62_s1 + $0x3] ss:$4 sm:$0xf] %vm7_vm0, %v23_v6  }
  0x80   :  { %v17_v7 = vpop.permute.xlu0 %16  }
  0x81   :  { %28 = vst.msk [vmem:[%s62_s1 + $0x2] ss:$4 sm:$0xf] %vm7_vm0, %v17_v7  }

// kernel: tile.0
= control target key start
LH: loop header
LB: loop body
LE: loop exit
PB: predicated region body
PF: predicated region fallthrough
CT: control target
= control target key end

     0   :  { %s66_s8 = smov 125   ;;  %vm7_vm0 = vcmask 7168   ;;  %s67_s11 = smov 126   ;;  %s117_s0 = inlined_call_operand.vmem [shape: f32[4,8], index: 0, kind: input, shape index: {}]   ;;  %s118_s1 = inlined_call_operand.vmem [shape: f32[32,1], index: 1, kind: output, shape index: {}]  }
   0x1   :  { %v4_v0 = vld [vmem:[%s117_s0] sm:$0xf]  ;;  %s65_s0 = smov 127   ;;  %s68_s12 = smov 124  }
   0x2   :  { %5 = vst [vmem:[#allocation0] sm:$0xf] %v4_v0  ;;  %s69_s13 = smov 123   ;;  %s70_s14 = smov 122  }
   0x3   :  { %s71_s15 = smov 121  }
   0x9   :  { %v9_v1 = vld [vmem:[#allocation0] sm:$0xf]  }
   0xa   :  { %v21_v2 = vld [vmem:[#allocation0] sm:$0xf]   ;;  %10 = vrot.lane.b32.xlu0 %v9_v1, %s65_s0 }
   0xb   :  { %22 = vrot.lane.b32.xlu1 %v21_v2, %s66_s8  ;;  %v15_v3 = vld [vmem:[#allocation0] sm:$0xf]  }
   0xc   :  { %v27_v4 = vld [vmem:[#allocation0] sm:$0xf]  }
   0xd   :  { %v6_v5 = vld [vmem:[#allocation0] sm:$0xf]  }
   0xe   :  { %8 = vst.msk [vmem:[%s118_s1] ss:$8 sm:$0xf] %vm7_vm0, %v6_v5   ;;  %16 = vrot.lane.b32.xlu0 %v15_v3, %s67_s11  ;;  %v33_v6 = vld [vmem:[#allocation0] sm:$0xf]  }
   0xf   :  { %28 = vrot.lane.b32.xlu1 %v27_v4, %s68_s12  ;;  %v39_v7 = vld [vmem:[#allocation0] sm:$0xf]  }
  0x10   :  { %v45_v8 = vld [vmem:[#allocation0] sm:$0xf]  }
  0x12   :  { %34 = vrot.lane.b32.xlu0 %v33_v6, %s69_s13 }
  0x13   :  { %40 = vrot.lane.b32.xlu1 %v39_v7, %s70_s14 }
  0x16   :  { %46 = vrot.lane.b32.xlu0 %v45_v8, %s71_s15 }
  0x7c   :  { %v11_v9 = vpop.permute.xlu0 %10  }
  0x7d   :  { %v23_v10 = vpop.permute.xlu1 %22   ;;  %51 = vst.msk [vmem:[%s118_s1 + $0x1] ss:$8 sm:$0xf] %vm7_vm0, %v11_v9  }
  0x7e   :  { %53 = vst.msk [vmem:[%s118_s1 + $0x3] ss:$8 sm:$0xf] %vm7_vm0, %v23_v10  }
  0x80   :  { %v17_v11 = vpop.permute.xlu0 %16  }
  0x81   :  { %v29_v12 = vpop.permute.xlu1 %28   ;;  %52 = vst.msk [vmem:[%s118_s1 + $0x2] ss:$8 sm:$0xf] %vm7_vm0, %v17_v11  }
  0x82   :  { %54 = vst.msk [vmem:[%s118_s1 + $0x4] ss:$8 sm:$0xf] %vm7_vm0, %v29_v12  }
  0x84   :  { %v35_v13 = vpop.permute.xlu0 %34  }
  0x85   :  { %v41_v14 = vpop.permute.xlu1 %40   ;;  %55 = vst.msk [vmem:[%s118_s1 + $0x5] ss:$8 sm:$0xf] %vm7_vm0, %v35_v13  }
  0x86   :  { %56 = vst.msk [vmem:[%s118_s1 + $0x6] ss:$8 sm:$0xf] %vm7_vm0, %v41_v14  }
  0x88   :  { %v47_v15 = vpop.permute.xlu0 %46  }
  0x89   :  { %57 = vst.msk [vmem:[%s118_s1 + $0x7] ss:$8 sm:$0xf] %vm7_vm0, %v47_v15  }

// kernel: mask_decoder_forward.4
= control target key start
LH: loop header
LB: loop body
LE: loop exit
PB: predicated region body
PF: predicated region fallthrough
CT: control target
= control target key end

     0   :  { %s638_s12 = smov 0   ;;  %s640_s13 = smov 0   ;;  %s708_s0 = inlined_call_operand.vmem [shape: f32[2,4,32], index: 0, kind: input, shape index: {}]   ;;  %s709_s1 = inlined_call_operand.vmem [shape: bf16[2,32,16], index: 1, kind: input, shape index: {}]   ;;  %s710_s2 = inlined_call_operand.vmem [shape: bf16[1,32,16], index: 2, kind: input, shape index: {}]   ;;  %s711_s3 = inlined_call_operand.vmem [shape: f32[2,4,32], index: 3, kind: output, shape index: {}]  }
   0x1   :  { %s642_s14 = smov 0  }
   0x2 LB: > { %s25_s15 = sadd.s32 1, %s608_s13  ;;  %p518_p0 = scmp.ge.s32.totalorder %s612_s14, 1  ;;  %s612_s14 = sphi %s642_s14, %s13_s14   ;;  %s608_s13 = sphi %s640_s13, %s713_s13   ;;  %s604_s12 = sphi %s638_s12, %s712_s12  }
   0x3   : > { %p27_p1 = scmp.ge.s32.totalorder %s25_s15, 2  ;;  %p172_p2 = scmp.lt.s32.totalorder %s612_s14, 3 }
   0x5   : > { %s715_s15 = smov (%p27_p1, %s25_s15), 0  ;;  %p173_p3 = pnand %p518_p0, %p172_p2 }
   0x6   : > { %vm234_vm0 = vcmask (!%p173_p3), 257024   ;;  %p206_p4 = scmp.lt.s32.totalorder (!%p173_p3), %s604_s12, 1  ;;  %v614_v0 = vmov (!%p173_p3), 0.0   ;;  %vm615_vm1 = vmmov (!%p173_p3), 0   ;;  %v241_v1 = vld [vmem:[%s710_s2] sm:$0xf] (!%p173_p3) }
   0x7   : > { %176 = sbr.rel (%p173_p3) target bundleno = 828 (0x33c), region = 32  ;;  %235 = vst.msk [vmem:[#allocation4] sm:$0xf] (!%p173_p3), %vm234_vm0, %v614_v0  ;;  %538 = vmatprep.subr.bf16.mxu0 (!%p173_p3), %v614_v0  ;;  %542 = vmatprep.mubr.msk.bf16.mxu0 (!%p173_p3), %vm615_vm1, %v614_v0  ;;  %v242_v2 = vld [vmem:[%s710_s2 + $0x4] sm:$0xf] (!%p173_p3)  ;;  %vm262_vm2 = vcmask (!%p173_p3), 261120  }
   0x8   : > { %546 = vmatprep.subr.bf16.mxu1 (!%p173_p3), %v614_v0  ;;  %550 = vmatprep.mubr.msk.bf16.mxu1 (!%p173_p3), %vm615_vm1, %v614_v0  ;;  %v243_v3 = vld [vmem:[%s710_s2 + $0x8] sm:$0xf] (!%p173_p3)  ;;  %v244_v4 = vld [vmem:[%s710_s2 + $0xc] sm:$0xf] (!%p173_p3)  ;;  %vm231_vm3 = vcmask (!%p173_p3), 3072   ;;  %vm308_vm4 = vcmask (!%p173_p3), 125952  }
   0x9   : > { %v616_v17 = vmov (!%p173_p3), -1e+30   ;;  %233 = vst.msk [vmem:[#allocation3] sm:$0xf] (!%p173_p3), %vm231_vm3, %v614_v0  ;;  %v617_v24 = vmov (!%p173_p3), 0   ;;  %vm350_vm5 = vcmask (!%p173_p3), 130048  }
   0xa   : > { %232 = vst.msk [vmem:[#allocation2] sm:$0xf] (!%p173_p3), %vm231_vm3, %v616_v17  ;;  %582 = vset.pattern.permute.xlu0 (!%p173_p3), %v617_v24  ;;  %583 = vset.pattern.permute.xlu1 (!%p173_p3), %v617_v24 }
   0xe   : > { %s717_s12 = smov (!%p206_p4, %s604_s12), 1  ;;  %v332_v47 = vld [vmem:[#allocation4] sm:$0xf] }
   0xf   : > { %s531_s18 = sshll.u32 %s717_s12, 4  ;;  %s519_s28 = sshll.u32 %s717_s12, 2 }
  0x10   : > { %s217_s25 = scalar_lea.vmem %s709_s1, %s531_s18  ;;  %s209_s4 = scalar_lea.vmem %s708_s0, %s519_s28  ;;  %v324_v41 = vld [vmem:[#allocation3] sm:$0xf] }
  0x11   : > { %v237_v5 = vld [vmem:[%s217_s25] sm:$0xf]  ;;  %v238_v6 = vld [vmem:[%s217_s25 + $0x4] sm:$0xf]  ;;  %v239_v7 = vld [vmem:[%s217_s25 + $0x8] sm:$0xf]  ;;  %s225_s7 = scalar_lea.vmem %s711_s3, %s519_s28 }
  0x12   : > { %v245_v8 = vadd.bf16 %v241_v1, %v237_v5  ;;  %v246_v9 = vadd.bf16 %v242_v2, %v238_v6  ;;  %v240_v10 = vld [vmem:[%s217_s25 + $0xc] sm:$0xf]  ;;  %v247_v11 = vadd.bf16 %v243_v3, %v239_v7  ;;  %v681_v15 = vld [vmem:[%s209_s4] sm:$0xf]  ;;  %v526_v28 = vcombine.low %v237_v5, %v238_v6 }
  0x13   : > { %v248_v12 = vadd.bf16 %v244_v4, %v240_v10  ;;  %v249_v16 = vpack.c.bf16 %v681_v15, %v681_v15  ;;  %v307_v25 = vld [vmem:[#allocation2] sm:$0xf]  ;;  %v527_v31 = vcombine.low %v239_v7, %v240_v10 }
  0x14   : > { %v523_v13 = vcombine.low %v245_v8, %v246_v9  ;;  %v355_v30 = vsel %vm350_vm5, %v526_v28, 0 }
  0x15   : > { %v524_v14 = vcombine.low %v247_v11, %v248_v12  ;;  %547 = vmatpush3.bf16.xpose.msra.mxu1 %v355_v30  ;;  %v358_v32 = vsel %vm350_vm5, %v527_v31, 0 }
  0x16   : > { %539 = vmatpush3.bf16.msra.mxu0 %v523_v13  ;;  %548 = vmatprep.subr.bf16.mxu1 %v614_v0 }
  0x17   : > { %540 = vmatprep.subr.bf16.mxu0 %v614_v0 }
  0x1a   : > { %541 = vmatpush3.bf16.msra.mxu0 %v524_v14 }
  0x1d   : > { %543 = vmatmul.mubr.msk.bf16.vlgmr.msra.gmra.mrb[0].mxu0 %vm262_vm2, %v249_v16  ;;  %549 = vmatpush3.bf16.xpose.msra.mxu1 %v358_v32 }
  0xf0   : > { %v300_v18 = vpop.f32.mrb[0].mxu0 }
  0xf1   : > { %v306_v19 = vmul.f32 0.17677669, %v300_v18  ;;  %v544_v20 = vpop.f32.mrb[1].mxu0 }
  0xf2   : > { %v303_v21 = vpop.f32.mrb[2].mxu0 }
  0xf3   : > { %v545_v22 = vpop.f32.mrb[3].mxu0  ;;  %v309_v23 = vsel %vm308_vm4, %v306_v19, -inf }
  0xf4   : > { %310 = vmax.xlane.f32.xlu0 %v309_v23 }
 0x181   : > { %v311_v26 = vpop.xlane.xlu0 %310 }
 0x182   : > { %v312_v27 = vmax.f32 %v307_v25, %v311_v26 }
 0x184   : > { %v313_v29 = vsub.f32 %v307_v25, %v312_v27  ;;  %403 = vst.msk [vmem:[#allocation2] sm:$0xf] %vm231_vm3, %v312_v27  ;;  %318 = vperm.xlu0 %582, %v312_v27  }
 0x186   : > { %v314_v39 = vmul.f32 1.442695, %v313_v29 }
 0x203   : > { %v319_v33 = vpop.permute.xlu0 %318 }
 0x204   : > { %v321_v34 = vsub.f32 %v306_v19, %v319_v33 }
 0x206   : > { %v322_v35 = vmul.f32 1.442695, %v321_v34 }
 0x208   : > { %584 = vpow2.f32 %v322_v35 }
 0x209   : > { %586 = vpow2.f32 %v314_v39 }
 0x212   : > { %v585_v36 = vpop.eup %584 }
 0x213   : > { %v326_v37 = vsel %vm308_vm4, %v585_v36, 0.0  ;;  %v339_v38 = vpack.c.bf16 %v585_v36, %v585_v36  ;;  %v587_v40 = vpop.eup %586 }
 0x214   : > { %327 = vadd.xlane.f32.xlu1 %v326_v37  ;;  %v325_v42 = vmul.f32 %v587_v40, %v324_v41 }
 0x215   : > { %551 = vmatmul.mubr.msk.bf16.vlgmr.msra.gmra.mrb[0].mxu1 %vm350_vm5, %v339_v38 }
 0x225   : > { %335 = vperm.xlu1 %583, %v587_v40  }
 0x2a1   : > { %v328_v43 = vpop.xlane.xlu1 %327 }
 0x2a2   : > { %v329_v44 = vadd.f32 %v328_v43, %v325_v42 }
 0x2a4   : > { %331 = vst.msk [vmem:[#allocation3] sm:$0xf] %vm231_vm3, %v329_v44 }
 0x2a5   : > { %v336_v48 = vpop.permute.xlu1 %335 }
 0x2a6   : > { %v338_v49 = vmul.f32 %v336_v48, %v332_v47 }
 0x2ab   : > { %v408_v45 = vld [vmem:[#allocation3] sm:$0xf] }
 0x2ac   : > { %588 = vrcp.f32 %v408_v45 }
 0x2b6   : > { %v589_v46 = vpop.eup %588 }
 0x2b7   : > { %412 = vperm.xlu1 %583, %v589_v46  }
 0x2e8   : > { %v394_v50 = vpop.f32.mrb[0].mxu1 }
 0x2e9   : > { %v400_v51 = vadd.f32 %v394_v50, %v338_v49  ;;  %v552_v52 = vpop.f32.mrb[1].mxu1 }
 0x2ea   : > { %v397_v53 = vpop.f32.mrb[2].mxu1 }
 0x2eb   : > { %402 = vst.msk [vmem:[#allocation4] sm:$0xf] %vm234_vm0, %v400_v51  ;;  %v553_v54 = vpop.f32.mrb[3].mxu1 }
 0x2f2   : > { %v407_v55 = vld [vmem:[#allocation4] sm:$0xf] }
 0x336   : > { %v413_v56 = vpop.permute.xlu1 %412 }
 0x337   : > { %v415_v57 = vmul.f32 %v413_v56, %v407_v55 }
 0x339   : > { %v416_v58 = vadd.f32 %v415_v57, %v681_v15 }
 0x33b   : > { %417 = vst.msk [vmem:[%s225_s7] sm:$0xf] %vm234_vm0, %v416_v58 }
 0x33c PF: > { %s13_s14 = sadd.s32 1, %s612_s14   ;;  %s712_s12 = smov %s608_s13 }
 0x33d   : > { %p10_p5 = scmp.ge.s32.totalorder %s13_s14, 4   ;;  %s713_s13 = smov %s715_s15 }
 0x33f   :  { %12 = sbr.rel (!%p10_p5) target bundleno = 2 (0x2), region = 76 }

// kernel: mask_decoder_forward.5
= control target key start
LH: loop header
LB: loop body
LE: loop exit
PB: predicated region body
PF: predicated region fallthrough
CT: control target
= control target key end

     0   :  { %s684_s12 = smov 0   ;;  %s686_s13 = smov 0   ;;  %s754_s0 = inlined_call_operand.vmem [shape: f32[2,4,32], index: 0, kind: input, shape index: {}]   ;;  %s755_s1 = inlined_call_operand.vmem [shape: bf16[2,32,16], index: 1, kind: input, shape index: {}]   ;;  %s756_s2 = inlined_call_operand.vmem [shape: bf16[1,32,16], index: 2, kind: input, shape index: {}]   ;;  %s757_s3 = inlined_call_operand.vmem [shape: bf16[2,32,16], index: 3, kind: output, shape index: {}]  }
   0x1   :  { %s688_s14 = smov 0  }
   0x2 LB: > { %s22_s15 = sadd.s32 1, %s656_s13  ;;  %p563_p0 = scmp.ge.s32.totalorder %s660_s14, 1  ;;  %s660_s14 = sphi %s688_s14, %s13_s14   ;;  %s656_s13 = sphi %s686_s13, %s759_s13   ;;  %s652_s12 = sphi %s684_s12, %s758_s12  }
   0x3   : > { %p23_p1 = scmp.ge.s32.totalorder %s22_s15, 2  ;;  %p174_p2 = scmp.lt.s32.totalorder %s660_s14, 3 }
   0x5   : > { %s761_s15 = smov (%p23_p1, %s22_s15), 0  ;;  %p175_p3 = pnand %p563_p0, %p174_p2 }
   0x6   : > { %p212_p4 = scmp.lt.s32.totalorder (!%p175_p3), %s652_s12, 1  ;;  %v662_v0 = vmov (!%p175_p3), 0.0   ;;  %vm663_vm0 = vmmov (!%p175_p3), 0   ;;  %v242_v1 = vld [vmem:[%s756_s2] sm:$0xf] (!%p175_p3)  ;;  %vm263_vm1 = vcmask (!%p175_p3), 261120   ;;  %v318_v18 = vlaneseq (!%p175_p3) }
   0x7   : > { %178 = sbr.rel (%p175_p3) target bundleno = 517 (0x205), region = 32  ;;  %592 = vmatprep.subr.bf16.mxu0 (!%p175_p3), %v662_v0  ;;  %596 = vmatprep.mubr.msk.bf16.mxu0 (!%p175_p3), %vm663_vm0, %v662_v0  ;;  %v243_v2 = vld [vmem:[%s756_s2 + $0x4] sm:$0xf] (!%p175_p3)  ;;  %v244_v3 = vld [vmem:[%s756_s2 + $0x8] sm:$0xf] (!%p175_p3)  ;;  %vm358_vm2 = vcmask (!%p175_p3), 31744  }
   0x8   : > { %v245_v4 = vld [vmem:[%s756_s2 + $0xc] sm:$0xf] (!%p175_p3)  ;;  %v319_v25 = vshrl.u32 (!%p175_p3), %v318_v18, 7  ;;  %vm365_vm3 = vcmask (!%p175_p3), 1041408   ;;  %vm442_vm4 = vcmask (!%p175_p3), 125952  }
   0xa   : > { %v320_v30 = vsub.s32 (!%p175_p3), 0, %v319_v25 }
   0xe   : > { %s763_s12 = smov (!%p212_p4, %s652_s12), 1 }
   0xf   : > { %s580_s18 = sshll.u32 %s763_s12, 4  ;;  %s564_s23 = sshll.u32 %s763_s12, 2 }
  0x10   : > { %s223_s26 = scalar_lea.vmem %s755_s1, %s580_s18  ;;  %s215_s4 = scalar_lea.vmem %s754_s0, %s564_s23 }
  0x11   : > { %v726_v5 = vld [vmem:[%s223_s26] sm:$0xf]  ;;  %v728_v6 = vld [vmem:[%s223_s26 + $0x4] sm:$0xf]  ;;  %v240_v7 = vld [vmem:[%s223_s26 + $0x8] sm:$0xf]  ;;  %s235_s7 = scalar_lea.vmem %s757_s3, %s580_s18 }
  0x12   : > { %v246_v8 = vadd.bf16 %v242_v1, %v726_v5  ;;  %v247_v9 = vadd.bf16 %v243_v2, %v728_v6  ;;  %v732_v10 = vld [vmem:[%s223_s26 + $0xc] sm:$0xf]  ;;  %v248_v11 = vadd.bf16 %v244_v3, %v240_v7  ;;  %v237_v12 = vld [vmem:[%s215_s4] sm:$0xf]  ;;  %v420_v48 = vunpack.c.l.bf16 %v240_v7 }
  0x13   : > { %v249_v13 = vadd.bf16 %v245_v4, %v732_v10  ;;  %v250_v14 = vpack.c.bf16 %v237_v12, %v237_v12  ;;  %v418_v49 = vunpack.c.l.bf16 %v726_v5  ;;  %v421_v50 = vunpack.c.l.bf16 %v732_v10 }
  0x14   : > { %v569_v15 = vcombine.low %v246_v8, %v247_v9  ;;  %v419_v52 = vunpack.c.l.bf16 %v728_v6 }
  0x15   : > { %342 = vxpose.xlu0.c.b16.start.end [1/1] (short) (narrow) %v250_v14, 32  ;;  %v570_v16 = vcombine.low %v248_v11, %v249_v13 }
  0x16   : > { %593 = vmatpush3.bf16.msra.mxu0 %v569_v15 }
  0x17   : > { %594 = vmatprep.subr.bf16.mxu0 %v662_v0 }
  0x1a   : > { %595 = vmatpush3.bf16.msra.mxu0 %v570_v16 }
  0x1d   : > { %597 = vmatmul.mubr.msk.bf16.vlgmr.msra.gmra.mrb[0].mxu0 %vm263_vm1, %v250_v14 }
  0x7b   : > { %v350_v17 = vpop.trf.xlu0 }
  0x7c   : > { %602 = vmatprep.mubr.msk.bf16.mxu1 %vm358_vm2, %v350_v17 }
  0x7f   : > { %v351_v47 = vpop.trf.xlu0 }
  0xf0   : > { %v301_v19 = vpop.f32.mrb[0].mxu0 }
  0xf1   : > { %v307_v20 = vmul.f32 0.17677669, %v301_v19  ;;  %v598_v21 = vpop.f32.mrb[1].mxu0 }
  0xf2   : > { %v304_v22 = vpop.f32.mrb[2].mxu0 }
  0xf3   : > { %v309_v23 = vrot.slane %v307_v20, 1  ;;  %v599_v24 = vpop.f32.mrb[3].mxu0  ;;  %v312_v27 = vrot.slane %v307_v20, 2  ;;  %v315_v29 = vrot.slane %v307_v20, 3 }
  0xf5   : > { %v311_v26 = vmax.f32 %v307_v20, %v309_v23 }
  0xf7   : > { %v314_v28 = vmax.f32 %v311_v26, %v312_v27 }
  0xf9   : > { %v317_v31 = vmax.f32 %v314_v28, %v315_v29 }
  0xfb   : > { %v321_v32 = vrot.slane %v317_v31, %v320_v30 }
  0xfd   : > { %v322_v33 = vsub.f32 %v307_v20, %v321_v32 }
  0xff   : > { %v323_v34 = vmul.f32 1.442695, %v322_v33 }
 0x101   : > { %634 = vpow2.f32 %v323_v34 }
 0x10b   : > { %v635_v35 = vpop.eup %634 }
 0x10c   : > { %v326_v36 = vrot.slane %v635_v35, 1  ;;  %v329_v38 = vrot.slane %v635_v35, 2  ;;  %v332_v40 = vrot.slane %v635_v35, 3 }
 0x10e   : > { %v328_v37 = vadd.f32 %v635_v35, %v326_v36 }
 0x110   : > { %v331_v39 = vadd.f32 %v329_v38, %v328_v37 }
 0x112   : > { %v334_v41 = vadd.f32 %v332_v40, %v331_v39 }
 0x114   : > { %636 = vrcp.f32 %v334_v41 }
 0x11e   : > { %v637_v42 = vpop.eup %636 }
 0x11f   : > { %v339_v43 = vrot.slane %v637_v42, %v320_v30 }
 0x121   : > { %v340_v44 = vmul.f32 %v635_v35, %v339_v43 }
 0x123   : > { %v341_v45 = vpack.c.bf16 %v340_v44, %v340_v44 }
 0x125   : > { %606 = vmatprep.subr.msk.bf16.mxu1 %vm365_vm3, %v341_v45  ;;  %v367_v46 = vsel %vm365_vm3, %v341_v45, 0 }
 0x126   : > { %601 = vmatpush3.bf16.msra.mxu1 %v367_v46 }
 0x129   : > { %603 = vmatmul.mubr.msk.bf16.vlgmr.msra.gmra.mrb[0].mxu1 %vm358_vm2, %v351_v47 }
 0x1fc   : > { %v604_v51 = vpop.f32.mrb[0].mxu1 }
 0x1fd   : > { %v424_v53 = vadd.f32 %v604_v51, %v420_v48  ;;  %v403_v54 = vpop.f32.mrb[1].mxu1 }
 0x1fe   : > { %v422_v55 = vadd.f32 %v418_v49, %v403_v54  ;;  %v605_v56 = vpop.f32.mrb[2].mxu1 }
 0x1ff   : > { %v584_v57 = vpack.c.bf16 %v424_v53, %v424_v53  ;;  %v425_v58 = vadd.f32 %v605_v56, %v421_v50  ;;  %v406_v59 = vpop.f32.mrb[3].mxu1 }
 0x200   : > { %v582_v60 = vpack.c.bf16 %v422_v55, %v422_v55  ;;  %v423_v61 = vadd.f32 %v419_v52, %v406_v59 }
 0x201   : > { %445 = vst.msk [vmem:[%s235_s7 + $0x8] sm:$0xf] %vm442_vm4, %v584_v57  ;;  %v585_v62 = vpack.c.bf16 %v425_v58, %v425_v58 }
 0x202   : > { %443 = vst.msk [vmem:[%s235_s7] sm:$0xf] %vm442_vm4, %v582_v60  ;;  %v583_v63 = vpack.c.bf16 %v423_v61, %v423_v61 }
 0x203   : > { %446 = vst.msk [vmem:[%s235_s7 + $0xc] sm:$0xf] %vm442_vm4, %v585_v62 }
 0x204   : > { %444 = vst.msk [vmem:[%s235_s7 + $0x4] sm:$0xf] %vm442_vm4, %v583_v63 }
 0x205 PF: > { %s13_s14 = sadd.s32 1, %s660_s14   ;;  %s758_s12 = smov %s656_s13 }
 0x206   : > { %p10_p5 = scmp.ge.s32.totalorder %s13_s14, 4   ;;  %s759_s13 = smov %s761_s15 }
 0x208   :  { %12 = sbr.rel (!%p10_p5) target bundleno = 2 (0x2), region = 68 }

// kernel: mask_decoder_forward.6
= control target key start
LH: loop header
LB: loop body
LE: loop exit
PB: predicated region body
PF: predicated region fallthrough
CT: control target
= control target key end

     0   :  { %s1577_s0 = inlined_call_operand.vmem [shape: f32[2,32], index: 0, kind: input, shape index: {}]   ;;  %s1578_s1 = inlined_call_operand.vmem [shape: f32[2,32], index: 1, kind: input, shape index: {}]   ;;  %s1579_s2 = inlined_call_operand.hbm [shape: f32[32,32], index: 2, kind: input, shape index: {}]   ;;  %s1580_s3 = inlined_call_operand.hbm [shape: f32[1,32], index: 3, kind: input, shape index: {}]   ;;  %s1581_s4 = inlined_call_operand.hbm [shape: f32[32,32], index: 4, kind: input, shape index: {}]   ;;  %s1582_s5 = inlined_call_operand.hbm [shape: f32[1,32], index: 5, kind: input, shape index: {}]   ;;  %s1583_s6 = inlined_call_operand.vmem [shape: f32[32,4], index: 6, kind: input, shape index: {}]   ;;  %s1584_s7 = inlined_call_operand.hbm [shape: f32[1,4], index: 7, kind: input, shape index: {}]   ;;  %s1585_s8 = inlined_call_operand.hbm [shape: f32[32,256], index: 8, kind: input, shape index: {}]   ;;  %s1586_s9 = inlined_call_operand.hbm [shape: f32[1,256], index: 9, kind: input, shape index: {}]   ;;  %s1587_s10 = inlined_call_operand.hbm [shape: f32[256,256], index: 10, kind: input, shape index: {}]   ;;  %s1588_s11 = inlined_call_operand.hbm [shape: f32[1,256], index: 11, kind: input, shape index: {}]   ;;  %s1589_s12 = inlined_call_operand.vmem [shape: f32[256,1], index: 12, kind: input, shape index: {}]   ;;  %s1590_s13 = inlined_call_operand.<no memory space> [shape: f32[1,1], index: 13, kind: input, shape index: {}]   ;;  %s1591_s14 = inlined_call_operand.vmem [shape: f32[2,4], index: 14, kind: output, shape index: {0}]   ;;  %s1592_s15 = inlined_call_operand.vmem [shape: f32[2,1], index: 15, kind: output, shape index: {1}]  }
   0x1   :  { %v21_v0 = vstv %s1590_s13 }
   0x2   :  { %22 = vst [vmem:[#allocation2] sm:$0x1] %v21_v0 }
   0x3   :  { %23 = vsyncpa [#allocation4], 0 }
   0x4   :  { %24 = vsyncpa [#allocation6], 0 }
   0x5   :  { %25 = vsyncpa [#allocation9], 0 }
   0x6   :  { %26 = vsyncpa [#allocation12], 0 }
   0x7   :  { %27 = vsyncpa [#allocation15], 0  ;;  %s1239_s20 = smov [#allocation5]   ;;  %s1240_s22 = smov [#allocation8]  }
   0x8   :  { %s50_s21 = sshll.u32 %s1239_s20, 4  ;;  %s72_s23 = sshll.u32 %s1240_s22, 4  ;;  %s51_s21 = int_to_ptr.vmem [resolvable:$true] %s50_s21  ;;  %s73_s23 = int_to_ptr.vmem [resolvable:$true] %s72_s23 }
   0x9   :  { %s1031_s26 = scalar_lea.hbm %s1580_s3, 16 }
   0xa   :  { %p1032_p0 = scmp.ne.s32.totalorder %s1580_s3, %s1031_s26  ;;  %p1035_p1 = scmp.lt.u32.totalorder %s1031_s26, %s1580_s3 }
   0xc   :  { %p1037_p2 = pnand %p1035_p1, %p1032_p0 }
   0xe   :  { %1040 = shalt.err (!%p1037_p2)
}
   0xf   :  { %s1041_s30 = scalar_lea.vmem %s51_s21, 16  ;;  %s1045_s16 = scalar_lea.vmem %s51_s21, 32 }
  0x10   :  { %p1042_p3 = scmp.ne.s32.totalorder %s51_s21, %s1041_s30  ;;  %p1046_p4 = scmp.lt.s32.totalorder %s51_s21, %s51_s21 }
  0x11   :  { %p1047_p5 = scmp.lt.s32.totalorder %s1045_s16, %s1041_s30 }
  0x13   :  { %p1048_p6 = por %p1047_p5, %p1046_p4 }
  0x15   :  { %p1049_p7 = pnand %p1048_p6, %p1042_p3 }
  0x17   :  { %1052 = shalt.err (!%p1049_p7)
}
  0x18   :  { %53 = dma.hbm_to_vmem [thread:$0]  %s1580_s3, 16, %s51_s21, [#allocation6]  }
  0x19   :  { %s1053_s22 = scalar_lea.hbm %s1582_s5, 16 }
  0x1a   :  { %p1054_p8 = scmp.ne.s32.totalorder %s1582_s5, %s1053_s22  ;;  %p1057_p9 = scmp.lt.u32.totalorder %s1053_s22, %s1582_s5 }
  0x1c   :  { %p1059_p10 = pnand %p1057_p9, %p1054_p8 }
  0x1e   :  { %1062 = shalt.err (!%p1059_p10)
}
  0x1f   :  { %s1063_s28 = scalar_lea.vmem %s73_s23, 16  ;;  %s1067_s13 = scalar_lea.vmem %s73_s23, 32 }
  0x20   :  { %p1064_p11 = scmp.ne.s32.totalorder %s73_s23, %s1063_s28  ;;  %p1068_p12 = scmp.lt.s32.totalorder %s73_s23, %s73_s23 }
  0x21   :  { %p1069_p13 = scmp.lt.s32.totalorder %s1067_s13, %s1063_s28 }
  0x23   :  { %p1070_p0 = por %p1069_p13, %p1068_p12 }
  0x25   :  { %p1071_p1 = pnand %p1070_p0, %p1064_p11 }
  0x27   :  { %1074 = shalt.err (!%p1071_p1)
}
  0x28   :  { %75 = dma.hbm_to_vmem [thread:$0]  %s1582_s5, 16, %s73_s23, [#allocation9]  }
  0x29   :  { %s1241_s29 = smov [#allocation11]   ;;  %s1075_s18 = scalar_lea.hbm %s1585_s8, 1024 }
  0x2a   :  { %s93_s30 = sshll.u32 %s1241_s29, 4  ;;  %p1076_p2 = scmp.ne.s32.totalorder %s1585_s8, %s1075_s18  ;;  %s94_s30 = int_to_ptr.vmem [resolvable:$true] %s93_s30 }
  0x2b   :  { %p1079_p3 = scmp.lt.u32.totalorder %s1075_s18, %s1585_s8 }
  0x2d   :  { %p1081_p4 = pnand %p1079_p3, %p1076_p2 }
  0x2f   :  { %1084 = shalt.err (!%p1081_p4)
}
  0x30   :  { %s1085_s25 = scalar_lea.vmem %s94_s30, 1024  ;;  %p1090_p6 = scmp.lt.s32.totalorder %s94_s30, %s94_s30 }
  0x31   :  { %p1086_p5 = scmp.ne.s32.totalorder %s94_s30, %s1085_s25  ;;  %p1091_p7 = scmp.lt.s32.totalorder %s1085_s25, %s1085_s25 }
  0x33   :  { %p1092_p8 = por %p1091_p7, %p1090_p6 }
  0x35   :  { %p1093_p9 = pnand %p1092_p8, %p1086_p5 }
  0x37   :  { %1096 = shalt.err (!%p1093_p9)
}
  0x38   :  { %s1242_s5 = smov 256   ;;  %s1243_s23 = smov 16  }
  0x39   :  { %99 = dma.hbm_to_vmem [thread:$0]  %s1585_s8, 1024, %s94_s30, [#allocation12], %s1242_s5, %s1242_s5, %s1243_s23  }
  0x3a   :  { %s1244_s28 = smov [#allocation14]   ;;  %s1245_s3 = smov [#allocation3]  }
  0x3b   :  { %s115_s13 = sshll.u32 %s1244_s28, 4  ;;  %s37_s21 = sshll.u32 %s1245_s3, 4  ;;  %s116_s13 = int_to_ptr.vmem [resolvable:$true] %s115_s13  ;;  %s38_s21 = int_to_ptr.vmem [resolvable:$true] %s37_s21 }
  0x3c   :  { %s1097_s17 = scalar_lea.hbm %s1587_s10, 8192 }
  0x3d   :  { %p1098_p10 = scmp.ne.s32.totalorder %s1587_s10, %s1097_s17  ;;  %p1101_p11 = scmp.lt.u32.totalorder %s1097_s17, %s1587_s10 }
  0x3f   :  { %p1103_p12 = pnand %p1101_p11, %p1098_p10 }
  0x41   :  { %1106 = shalt.err (!%p1103_p12)
}
  0x42   :  { %s1107_s8 = scalar_lea.vmem %s116_s13, 8192  ;;  %p1112_p0 = scmp.lt.s32.totalorder %s116_s13, %s116_s13 }
  0x43   :  { %p1108_p13 = scmp.ne.s32.totalorder %s116_s13, %s1107_s8  ;;  %p1113_p1 = scmp.lt.s32.totalorder %s1107_s8, %s1107_s8 }
  0x45   :  { %p1114_p2 = por %p1113_p1, %p1112_p0 }
  0x47   :  { %p1115_p3 = pnand %p1114_p2, %p1108_p13 }
  0x49   :  { %1118 = shalt.err (!%p1115_p3)
}
  0x4a   :  { %121 = dma.hbm_to_vmem [thread:$0]  %s1587_s10, 8192, %s116_s13, [#allocation15], %s1242_s5, %s1242_s5, %s1243_s23  }
  0x4b   :  { %s1119_s27 = scalar_lea.hbm %s1579_s2, 512 }
  0x4c   :  { %p1120_p4 = scmp.ne.s32.totalorder %s1579_s2, %s1119_s27  ;;  %p1123_p5 = scmp.lt.u32.totalorder %s1119_s27, %s1579_s2 }
  0x4e   :  { %p1125_p6 = pnand %p1123_p5, %p1120_p4 }
  0x50   :  { %1128 = shalt.err (!%p1125_p6)
}
  0x51   :  { %s1129_s17 = scalar_lea.vmem %s38_s21, 512  ;;  %p1134_p8 = scmp.lt.s32.totalorder %s38_s21, %s38_s21 }
  0x52   :  { %p1130_p7 = scmp.ne.s32.totalorder %s38_s21, %s1129_s17  ;;  %p1135_p9 = scmp.lt.s32.totalorder %s1129_s17, %s1129_s17 }
  0x54   :  { %p1136_p10 = por %p1135_p9, %p1134_p8 }
  0x56   :  { %p1137_p11 = pnand %p1136_p10, %p1130_p7 }
  0x58   :  { %1140 = shalt.err (!%p1137_p11)
}
  0x59   :  { %s1246_s10 = smov 128   ;;  %s1247_s5 = smov 8  }
  0x5a   :  { %43 = dma.hbm_to_vmem [thread:$0]  %s1579_s2, 512, %s38_s21, [#allocation4], %s1246_s10, %s1246_s10, %s1247_s5  }
  0x5b   :  { %s1248_s18 = smov [#allocation7]   ;;  %s1249_s20 = smov [#allocation10]  }
  0x5c   :  { %s59_s19 = sshll.u32 %s1248_s18, 4  ;;  %s84_s22 = sshll.u32 %s1249_s20, 4  ;;  %s60_s19 = int_to_ptr.vmem [resolvable:$true] %s59_s19  ;;  %s85_s22 = int_to_ptr.vmem [resolvable:$true] %s84_s22 }
  0x5d   :  { %s1141_s24 = scalar_lea.hbm %s1581_s4, 512 }
  0x5e   :  { %p1142_p12 = scmp.ne.s32.totalorder %s1581_s4, %s1141_s24  ;;  %p1145_p13 = scmp.lt.u32.totalorder %s1141_s24, %s1581_s4 }
  0x60   :  { %p1147_p0 = pnand %p1145_p13, %p1142_p12 }
  0x62   :  { %1150 = shalt.err (!%p1147_p0)
}
  0x63   :  { %s1151_s2 = scalar_lea.vmem %s60_s19, 512  ;;  %p1156_p2 = scmp.lt.s32.totalorder %s60_s19, %s60_s19 }
  0x64   :  { %p1152_p1 = scmp.ne.s32.totalorder %s60_s19, %s1151_s2  ;;  %p1157_p3 = scmp.lt.s32.totalorder %s1151_s2, %s1151_s2 }
  0x66   :  { %p1158_p4 = por %p1157_p3, %p1156_p2 }
  0x68   :  { %p1159_p5 = pnand %p1158_p4, %p1152_p1 }
  0x6a   :  { %1162 = shalt.err (!%p1159_p5)
}
  0x6b   :  { %65 = dma.hbm_to_vmem [thread:$0]  %s1581_s4, 512, %s60_s19, [#allocation6], %s1246_s10, %s1246_s10, %s1247_s5  }
  0x6c   :  { %s1163_s17 = scalar_lea.hbm %s1584_s7, 16 }
  0x6d   :  { %p1164_p6 = scmp.ne.s32.totalorder %s1584_s7, %s1163_s17  ;;  %p1167_p7 = scmp.lt.u32.totalorder %s1163_s17, %s1584_s7 }
  0x6f   :  { %p1169_p8 = pnand %p1167_p7, %p1164_p6 }
  0x71   :  { %1172 = shalt.err (!%p1169_p8)
}
  0x72   :  { %s1173_s8 = scalar_lea.vmem %s85_s22, 16  ;;  %s1177_s30 = scalar_lea.vmem %s85_s22, 32 }
  0x73   :  { %p1174_p9 = scmp.ne.s32.totalorder %s85_s22, %s1173_s8  ;;  %p1178_p10 = scmp.lt.s32.totalorder %s85_s22, %s85_s22 }
  0x74   :  { %p1179_p11 = scmp.lt.s32.totalorder %s1177_s30, %s1173_s8 }
  0x76   :  { %p1180_p12 = por %p1179_p11, %p1178_p10 }
  0x78   :  { %p1181_p13 = pnand %p1180_p12, %p1174_p9 }
  0x7a   :  { %1184 = shalt.err (!%p1181_p13)
}
  0x7b   :  { %87 = dma.hbm_to_vmem [thread:$0]  %s1584_s7, 16, %s85_s22, [#allocation9]  }
  0x7c   :  { %s1250_s5 = smov [#allocation13]   ;;  %s1251_s24 = smov [#allocation16]  }
  0x7d   :  { %s106_s19 = sshll.u32 %s1250_s5, 4  ;;  %s128_s25 = sshll.u32 %s1251_s24, 4  ;;  %s107_s19 = int_to_ptr.vmem [resolvable:$true] %s106_s19  ;;  %s129_s25 = int_to_ptr.vmem [resolvable:$true] %s128_s25 }
  0x7e   :  { %s1185_s28 = scalar_lea.hbm %s1586_s9, 32 }
  0x7f   :  { %p1186_p0 = scmp.ne.s32.totalorder %s1586_s9, %s1185_s28  ;;  %p1189_p1 = scmp.lt.u32.totalorder %s1185_s28, %s1586_s9 }
  0x81   :  { %p1191_p2 = pnand %p1189_p1, %p1186_p0 }
  0x83   :  { %1194 = shalt.err (!%p1191_p2)
}
  0x84   :  { %s1195_s7 = scalar_lea.vmem %s107_s19, 32  ;;  %p1200_p4 = scmp.lt.s32.totalorder %s107_s19, %s107_s19 }
  0x85   :  { %p1196_p3 = scmp.ne.s32.totalorder %s107_s19, %s1195_s7  ;;  %p1201_p5 = scmp.lt.s32.totalorder %s1195_s7, %s1195_s7 }
  0x87   :  { %p1202_p6 = por %p1201_p5, %p1200_p4 }
  0x89   :  { %p1203_p7 = pnand %p1202_p6, %p1196_p3 }
  0x8b   :  { %1206 = shalt.err (!%p1203_p7)
}
  0x8c   :  { %109 = dma.hbm_to_vmem [thread:$0]  %s1586_s9, 32, %s107_s19, [#allocation12]  }
  0x8d   :  { %s1207_s13 = scalar_lea.hbm %s1588_s11, 32 }
  0x8e   :  { %p1208_p8 = scmp.ne.s32.totalorder %s1588_s11, %s1207_s13  ;;  %p1211_p9 = scmp.lt.u32.totalorder %s1207_s13, %s1588_s11 }
  0x90   :  { %p1213_p10 = pnand %p1211_p9, %p1208_p8 }
  0x92   :  { %1216 = shalt.err (!%p1213_p10)
}
  0x93   :  { %s1217_s4 = scalar_lea.vmem %s129_s25, 32  ;;  %p1222_p12 = scmp.lt.s32.totalorder %s129_s25, %s129_s25 }
  0x94   :  { %p1218_p11 = scmp.ne.s32.totalorder %s129_s25, %s1217_s4  ;;  %p1223_p13 = scmp.lt.s32.totalorder %s1217_s4, %s1217_s4 }
  0x96   :  { %p1224_p0 = por %p1223_p13, %p1222_p12 }
  0x98   :  { %p1225_p1 = pnand %p1224_p0, %p1218_p11 }
  0x9a   :  { %1228 = shalt.err (!%p1225_p1)
}
  0x9b   :  { %131 = dma.hbm_to_vmem [thread:$0]  %s1588_s11, 32, %s129_s25, [#allocation15]  }
  0x9c   :  { %1229 = dma.done.wait [#allocation4], 512  }
  0x9d   :  { %1230 = vsyncadd [#allocation4], 4294966784 }
  0x9e   :  { %1231 = dma.done.wait [#allocation6], 528  }
  0x9f   :  { %1232 = vsyncadd [#allocation6], 4294966768 }
  0xa0   :  { %1233 = dma.done.wait [#allocation9], 32  }
  0xa1   :  { %1234 = vsyncadd [#allocation9], 4294967264 }
  0xa2   :  { %1235 = dma.done.wait [#allocation12], 1056  }
  0xa3   :  { %1236 = vsyncadd [#allocation12], 4294966240 }
  0xa4   :  { %1237 = dma.done.wait [#allocation15], 8224  }
  0xa5   :  { %1238 = vsyncadd [#allocation15], 4294959072  ;;  %v1252_v1 = vmov 0.0|0.0   ;;  %vm1253_vm0 = vmmov 0   ;;  %v1254_v2 = vmov 0.0   ;;  %v164_v3 = vld [vmem:[#allocation3] sm:$0xff] }
  0xa6   :  { %889 = vmatprep.subr.bf16.mxu1 %v1252_v1  ;;  %864 = vmatprep.mubr.msk.f32.mxu1 %vm1253_vm0, %v1254_v2  ;;  %v165_v4 = vld [vmem:[#allocation3 + $0x8] sm:$0xff]  ;;  %v166_v5 = vld [vmem:[#allocation3 + $0x10] sm:$0xff]  ;;  %v167_v7 = vld [vmem:[#allocation3 + $0x18] sm:$0xff]  ;;  %vm175_vm1 = vcmask 261120   ;;  %vm419_vm2 = vcmask 25600   ;;  %vm782_vm3 = vcmask 1024  }
  0xa7   :  { %v890_v6 = vpack.c.bf16 %v165_v4, %v164_v3  ;;  %v893_v8 = vpack.c.bf16 %v167_v7, %v166_v5  ;;  %v250_v9 = vld [vmem:[#allocation7] sm:$0xff]  ;;  %v251_v10 = vld [vmem:[#allocation7 + $0x8] sm:$0xff]  ;;  %v163_v11 = vld [vmem:[%s1577_s0] sm:$0x3] }
  0xa8   :  { %v896_v12 = vpack.c.bf16 %v251_v10, %v250_v9  ;;  %v252_v13 = vld [vmem:[#allocation7 + $0x10] sm:$0xff]  ;;  %v253_v14 = vld [vmem:[#allocation7 + $0x18] sm:$0xff]  ;;  %v336_v18 = vld [vmem:[%s1583_s6 + $0x8] sm:$0xff] }
  0xa9   :  { %891 = vmatpush3.bf16.msra.mxu1 %v890_v6  ;;  %v899_v15 = vpack.c.bf16 %v253_v14, %v252_v13  ;;  %v797_v16 = vld [vmem:[#allocation5] ss:$0 sm:$0xff]  ;;  %v337_v24 = vld [vmem:[%s1583_s6 + $0x10] sm:$0xff]  ;;  %v338_v25 = vld [vmem:[%s1583_s6 + $0x18] sm:$0xff] }
  0xaa   :  { %892 = vmatprep.subr.bf16.mxu1 %v1252_v1  ;;  %v335_v17 = vld [vmem:[%s1583_s6] sm:$0xff]  ;;  %v905_v26 = vpack.c.bf16 %v338_v25, %v337_v24  ;;  %v423_v27 = vld [vmem:[#allocation11 + $0x8] sm:$0xff] }
  0xab   :  { %v902_v22 = vpack.c.bf16 %v336_v18, %v335_v17  ;;  %v425_v28 = vld [vmem:[#allocation11 + $0x18] sm:$0xff]  ;;  %v519_v30 = vld [vmem:[#allocation14 + $0x8] sm:$0xff]  ;;  %v518_v32 = vld [vmem:[#allocation14] sm:$0xff] }
  0xac   :  { %v907_v29 = vpack.c.bf16 %v425_v28, %v423_v27  ;;  %v521_v31 = vld [vmem:[#allocation14 + $0x18] sm:$0xff]  ;;  %v520_v34 = vld [vmem:[#allocation14 + $0x10] sm:$0xff]  ;;  %v523_v35 = vld [vmem:[#allocation14 + $0x28] sm:$0xff] }
  0xad   :  { %894 = vmatpush3.bf16.msra.mxu1 %v893_v8  ;;  %v915_v33 = vpack.c.bf16 %v521_v31, %v519_v30  ;;  %v525_v36 = vld [vmem:[#allocation14 + $0x38] sm:$0xff]  ;;  %v917_v37 = vpack.c.bf16 %v520_v34, %v518_v32  ;;  %v522_v39 = vld [vmem:[#allocation14 + $0x20] sm:$0xff]  ;;  %v524_v40 = vld [vmem:[#allocation14 + $0x30] sm:$0xff] }
  0xae   :  { %895 = vmatprep.subr.bf16.mxu1 %v1252_v1  ;;  %v919_v38 = vpack.c.bf16 %v525_v36, %v523_v35  ;;  %v527_v41 = vld [vmem:[#allocation14 + $0x48] sm:$0xff]  ;;  %v529_v42 = vld [vmem:[#allocation14 + $0x58] sm:$0xff]  ;;  %v921_v43 = vpack.c.bf16 %v524_v40, %v522_v39  ;;  %v526_v45 = vld [vmem:[#allocation14 + $0x40] sm:$0xff] }
  0xaf   :  { %916 = vmatprep.subr.bf16.mxu0 %v915_v33  ;;  %v923_v44 = vpack.c.bf16 %v529_v42, %v527_v41  ;;  %v528_v46 = vld [vmem:[#allocation14 + $0x50] sm:$0xff]  ;;  %v531_v47 = vld [vmem:[#allocation14 + $0x68] sm:$0xff]  ;;  %v533_v48 = vld [vmem:[#allocation14 + $0x78] sm:$0xff] }
  0xb0   :  { %865 = vmatmul.mubr.msk.f32.vlgmr.msra.gmra.mrb[0].mxu1 %vm175_vm1, %v163_v11  ;;  %918 = vmatpush1.bf16.msra.mxu0 %v917_v37  ;;  %v925_v49 = vpack.c.bf16 %v528_v46, %v526_v45  ;;  %v927_v50 = vpack.c.bf16 %v533_v48, %v531_v47  ;;  %v530_v51 = vld [vmem:[#allocation14 + $0x60] sm:$0xff]  ;;  %v532_v52 = vld [vmem:[#allocation14 + $0x70] sm:$0xff]  ;;  %v535_v53 = vld [vmem:[#allocation14 + $0x88] sm:$0xff] }
  0xb1   :  { %897 = vmatpush3.bf16.msra.mxu1 %v896_v12  ;;  %875 = vmatprep.mubr.msk.f32.mxu1 %vm1253_vm0, %v1254_v2  ;;  %v537_v54 = vld [vmem:[#allocation14 + $0x98] sm:$0xff]  ;;  %v929_v55 = vpack.c.bf16 %v532_v52, %v530_v51  ;;  %v534_v57 = vld [vmem:[#allocation14 + $0x80] sm:$0xff]  ;;  %v536_v58 = vld [vmem:[#allocation14 + $0x90] sm:$0xff] }
  0xb2   :  { %898 = vmatprep.subr.bf16.mxu1 %v1252_v1  ;;  %920 = vmatprep.subr.bf16.mxu0 %v919_v38  ;;  %v931_v56 = vpack.c.bf16 %v537_v54, %v535_v53  ;;  %v539_v59 = vld [vmem:[#allocation14 + $0xa8] sm:$0xff]  ;;  %v541_v60 = vld [vmem:[#allocation14 + $0xb8] sm:$0xff]  ;;  %v933_v61 = vpack.c.bf16 %v536_v58, %v534_v57  ;;  %v538_v63 = vld [vmem:[#allocation14 + $0xa0] sm:$0xff] }
  0xb3   :  { %v935_v62 = vpack.c.bf16 %v541_v60, %v539_v59  ;;  %v540_v0 = vld [vmem:[#allocation14 + $0xb0] sm:$0xff]  ;;  %v545_v3 = vld [vmem:[#allocation14 + $0xd8] sm:$0xff]  ;;  %v542_v6 = vld [vmem:[#allocation14 + $0xc0] sm:$0xff] }
  0xb4   :  { %922 = vmatpush1.bf16.msra.mxu0 %v921_v43  ;;  %v937_v4 = vpack.c.bf16 %v540_v0, %v538_v63  ;;  %v544_v7 = vld [vmem:[#allocation14 + $0xd0] sm:$0xff]  ;;  %v547_v8 = vld [vmem:[#allocation14 + $0xe8] sm:$0xff]  ;;  %v549_v9 = vld [vmem:[#allocation14 + $0xf8] sm:$0xff] }
  0xb5   :  { %900 = vmatpush3.bf16.msra.mxu1 %v899_v15  ;;  %924 = vmatprep.subr.bf16.mxu0 %v923_v44  ;;  %v941_v10 = vpack.c.bf16 %v544_v7, %v542_v6  ;;  %v943_v11 = vpack.c.bf16 %v549_v9, %v547_v8  ;;  %v546_v12 = vld [vmem:[#allocation14 + $0xe0] sm:$0xff]  ;;  %v548_v13 = vld [vmem:[#allocation14 + $0xf0] sm:$0xff]  ;;  %v551_v14 = vld [vmem:[#allocation14 + $0x108] sm:$0xff] }
  0xb6   :  { %901 = vmatprep.subr.bf16.mxu1 %v1252_v1  ;;  %v553_v15 = vld [vmem:[#allocation14 + $0x118] sm:$0xff]  ;;  %v550_v18 = vld [vmem:[#allocation14 + $0x100] sm:$0xff]  ;;  %v556_v25 = vld [vmem:[#allocation14 + $0x130] sm:$0xff] }
  0xb7   :  { %v947_v17 = vpack.c.bf16 %v553_v15, %v551_v14  ;;  %v554_v24 = vld [vmem:[#allocation14 + $0x120] sm:$0xff]  ;;  %v561_v27 = vld [vmem:[#allocation14 + $0x158] sm:$0xff]  ;;  %v560_v31 = vld [vmem:[#allocation14 + $0x150] sm:$0xff] }
  0xb8   :  { %926 = vmatpush1.bf16.msra.mxu0 %v925_v49  ;;  %v953_v28 = vpack.c.bf16 %v556_v25, %v554_v24  ;;  %v558_v30 = vld [vmem:[#allocation14 + $0x140] sm:$0xff]  ;;  %v563_v32 = vld [vmem:[#allocation14 + $0x168] sm:$0xff]  ;;  %v565_v33 = vld [vmem:[#allocation14 + $0x178] sm:$0xff] }
  0xb9   :  { %928 = vmatprep.subr.bf16.mxu0 %v927_v50  ;;  %v957_v34 = vpack.c.bf16 %v560_v31, %v558_v30  ;;  %v959_v35 = vpack.c.bf16 %v565_v33, %v563_v32  ;;  %v562_v36 = vld [vmem:[#allocation14 + $0x160] sm:$0xff]  ;;  %v564_v37 = vld [vmem:[#allocation14 + $0x170] sm:$0xff]  ;;  %v567_v38 = vld [vmem:[#allocation14 + $0x188] sm:$0xff] }
  0xba   :  { %v569_v39 = vld [vmem:[#allocation14 + $0x198] sm:$0xff]  ;;  %v961_v40 = vpack.c.bf16 %v564_v37, %v562_v36  ;;  %v566_v42 = vld [vmem:[#allocation14 + $0x180] sm:$0xff]  ;;  %v568_v43 = vld [vmem:[#allocation14 + $0x190] sm:$0xff] }
  0xbb   :  { %v963_v41 = vpack.c.bf16 %v569_v39, %v567_v38  ;;  %v965_v44 = vpack.c.bf16 %v568_v43, %v566_v42  ;;  %v799_v45 = vld [vmem:[#allocation8] ss:$0 sm:$0xff]  ;;  %v422_v46 = vld [vmem:[#allocation11] sm:$0xff]  ;;  %v424_v47 = vld [vmem:[#allocation11 + $0x10] sm:$0xff] }
  0xbc   :  { %930 = vmatpush1.bf16.msra.mxu0 %v929_v55  ;;  %v427_v49 = vld [vmem:[#allocation11 + $0x28] sm:$0xff]  ;;  %v429_v50 = vld [vmem:[#allocation11 + $0x38] sm:$0xff]  ;;  %v909_v53 = vpack.c.bf16 %v424_v47, %v422_v46  ;;  %v428_v57 = vld [vmem:[#allocation11 + $0x30] sm:$0xff] }
  0xbd   :  { %932 = vmatprep.subr.bf16.mxu0 %v931_v56  ;;  %v911_v55 = vpack.c.bf16 %v429_v50, %v427_v49  ;;  %v426_v56 = vld [vmem:[#allocation11 + $0x20] sm:$0xff]  ;;  %v421_v59 = vld [vmem:[%s1578_s1] sm:$0x3]  ;;  %v571_v60 = vld [vmem:[#allocation14 + $0x1a8] sm:$0xff] }
  0xbe   :  { %v913_v58 = vpack.c.bf16 %v428_v57, %v426_v56  ;;  %v570_v63 = vld [vmem:[#allocation14 + $0x1a0] sm:$0xff]  ;;  %v572_v0 = vld [vmem:[#allocation14 + $0x1b0] sm:$0xff]  ;;  %v579_v8 = vld [vmem:[#allocation14 + $0x1e8] sm:$0xff] }
  0xbf   :  { %v576_v6 = vld [vmem:[#allocation14 + $0x1d0] sm:$0xff]  ;;  %v581_v9 = vld [vmem:[#allocation14 + $0x1f8] sm:$0xff]  ;;  %v689_v31 = vld [vmem:[%s1589_s12 + $0xb0] sm:$0xff] }
  0xc0   :  { %934 = vmatpush1.bf16.msra.mxu0 %v933_v61  ;;  %v573_v61 = vld [vmem:[#allocation14 + $0x1b8] sm:$0xff]  ;;  %v670_v24 = vld [vmem:[%s1589_s12 + $0x18] sm:$0xff]  ;;  %v693_v43 = vld [vmem:[%s1589_s12 + $0xd0] sm:$0xff] }
  0xc1   :  { %936 = vmatprep.subr.bf16.mxu0 %v935_v62  ;;  %v967_v62 = vpack.c.bf16 %v573_v61, %v571_v60  ;;  %v683_v14 = vld [vmem:[%s1589_s12 + $0x80] sm:$0xff]  ;;  %v684_v15 = vld [vmem:[%s1589_s12 + $0x88] sm:$0xff]  ;;  %v690_v32 = vld [vmem:[%s1589_s12 + $0xb8] sm:$0xff] }
  0xc2   :  { %v687_v25 = vld [vmem:[%s1589_s12 + $0xa0] sm:$0xff]  ;;  %v672_v30 = vld [vmem:[%s1589_s12 + $0x28] sm:$0xff]  ;;  %v674_v36 = vld [vmem:[%s1589_s12 + $0x38] sm:$0xff] }
  0xc3   :  { %v691_v37 = vld [vmem:[%s1589_s12 + $0xc0] sm:$0xff]  ;;  %v692_v38 = vld [vmem:[%s1589_s12 + $0xc8] sm:$0xff]  ;;  %v677_v47 = vld [vmem:[%s1589_s12 + $0x50] sm:$0xff] }
  0xc4   :  { %938 = vmatpush1.bf16.msra.mxu0 %v937_v4  ;;  %v577_v4 = vld [vmem:[#allocation14 + $0x1d8] sm:$0xff] }
  0xc5   :  { %v676_v42 = vld [vmem:[%s1589_s12 + $0x48] sm:$0xff]  ;;  %v695_v49 = vld [vmem:[%s1589_s12 + $0xe0] sm:$0xff] }
  0xc6   :  { %v696_v50 = vld [vmem:[%s1589_s12 + $0xe8] sm:$0xff] }
  0xc7   :  { %v430_v60 = vld [vmem:[#allocation13] sm:$0x3] }
 0x183   :  { %v245_v19 = vpop.f32.mrb[0].mxu1 }
 0x184   :  { %v246_v20 = vadd.f32 %v797_v16, %v245_v19  ;;  %v866_v21 = vpop.f32.mrb[1].mxu1  ;;  %v945_v16 = vpack.c.bf16 %v548_v13, %v546_v12  ;;  %v552_v19 = vld [vmem:[#allocation14 + $0x110] sm:$0xff] }
 0x185   :  { %v557_v21 = vld [vmem:[#allocation14 + $0x138] sm:$0xff]  ;;  %v580_v12 = vld [vmem:[#allocation14 + $0x1f0] sm:$0xff] }
 0x186   :  { %v249_v23 = vmax.f32 %v246_v20, 0.0  ;;  %v555_v20 = vld [vmem:[#allocation14 + $0x128] sm:$0xff] }
 0x188   :  { %876 = vmatmul.mubr.msk.f32.vlgmr.msra.gmra.mrb[2].mxu1 %vm175_vm1, %v249_v23  ;;  %v951_v23 = vpack.c.bf16 %v557_v21, %v555_v20  ;;  %v686_v20 = vld [vmem:[%s1589_s12 + $0x98] sm:$0xff] }
 0x189   :  { %903 = vmatpush3.bf16.msra.mxu1 %v902_v22  ;;  %886 = vmatprep.mubr.msk.f32.mxu1 %vm1253_vm0, %v1254_v2  ;;  %v949_v22 = vpack.c.bf16 %v552_v19, %v550_v18  ;;  %v668_v18 = vld [vmem:[%s1589_s12 + $0x8] sm:$0xff]  ;;  %v685_v19 = vld [vmem:[%s1589_s12 + $0x90] sm:$0xff] }
 0x18a   :  { %904 = vmatprep.subr.bf16.mxu1 %v1252_v1  ;;  %v543_v1 = vld [vmem:[#allocation14 + $0xc8] sm:$0xff] }
 0x18b   :  { %v939_v5 = vpack.c.bf16 %v545_v3, %v543_v1  ;;  %v969_v1 = vpack.c.bf16 %v572_v0, %v570_v63  ;;  %v575_v3 = vld [vmem:[#allocation14 + $0x1c8] sm:$0xff] }
 0x18d   :  { %906 = vmatpush3.bf16.msra.mxu1 %v905_v26  ;;  %940 = vmatprep.subr.bf16.mxu0 %v939_v5  ;;  %v559_v26 = vld [vmem:[#allocation14 + $0x148] sm:$0xff]  ;;  %v971_v5 = vpack.c.bf16 %v577_v4, %v575_v3 }
 0x18e   :  { %908 = vmatprep.subr.bf16.mxu1 %v907_v29  ;;  %942 = vmatpush1.bf16.msra.mxu0 %v941_v10  ;;  %v955_v29 = vpack.c.bf16 %v561_v27, %v559_v26  ;;  %v975_v10 = vpack.c.bf16 %v581_v9, %v579_v8  ;;  %v688_v26 = vld [vmem:[%s1589_s12 + $0xa8] sm:$0xff]  ;;  %v697_v9 = vld [vmem:[%s1589_s12 + $0xf0] sm:$0xff] }
 0x18f   :  { %944 = vmatprep.subr.bf16.mxu0 %v943_v11  ;;  %v578_v11 = vld [vmem:[#allocation14 + $0x1e0] sm:$0xff] }
 0x190   :  { %v977_v13 = vpack.c.bf16 %v580_v12, %v578_v11  ;;  %v681_v12 = vld [vmem:[%s1589_s12 + $0x70] sm:$0xff] }
 0x192   :  { %946 = vmatpush1.bf16.msra.mxu0 %v945_v16  ;;  %v667_v16 = vld [vmem:[%s1589_s12] sm:$0xff] }
 0x193   :  { %948 = vmatprep.subr.bf16.mxu0 %v947_v17  ;;  %v979_v17 = vpack.c.bf16 %v684_v15, %v683_v14  ;;  %v981_v21 = vpack.c.bf16 %v668_v18, %v667_v16  ;;  %v582_v15 = vld [vmem:[#allocation16] sm:$0x3] }
 0x196   :  { %950 = vmatpush1.bf16.msra.mxu0 %v949_v22  ;;  %v983_v22 = vpack.c.bf16 %v686_v20, %v685_v19 }
 0x197   :  { %952 = vmatprep.subr.bf16.mxu0 %v951_v23  ;;  %v669_v23 = vld [vmem:[%s1589_s12 + $0x10] sm:$0xff] }
 0x198   :  { %v985_v27 = vpack.c.bf16 %v670_v24, %v669_v23 }
 0x19a   :  { %954 = vmatpush1.bf16.msra.mxu0 %v953_v28  ;;  %v987_v28 = vpack.c.bf16 %v688_v26, %v687_v25  ;;  %v804_v25 = vld [vmem:[#allocation2] ss:$0 sm:$0xff] }
 0x19b   :  { %956 = vmatprep.subr.bf16.mxu0 %v955_v29  ;;  %v671_v29 = vld [vmem:[%s1589_s12 + $0x20] sm:$0xff] }
 0x19c   :  { %v989_v33 = vpack.c.bf16 %v672_v30, %v671_v29 }
 0x19e   :  { %958 = vmatpush1.bf16.msra.mxu0 %v957_v34  ;;  %v991_v34 = vpack.c.bf16 %v690_v32, %v689_v31 }
 0x19f   :  { %960 = vmatprep.subr.bf16.mxu0 %v959_v35  ;;  %v673_v35 = vld [vmem:[%s1589_s12 + $0x30] sm:$0xff] }
 0x1a0   :  { %v993_v39 = vpack.c.bf16 %v674_v36, %v673_v35 }
 0x1a2   :  { %962 = vmatpush1.bf16.msra.mxu0 %v961_v40  ;;  %v995_v40 = vpack.c.bf16 %v692_v38, %v691_v37 }
 0x1a3   :  { %964 = vmatprep.subr.bf16.mxu0 %v963_v41  ;;  %v675_v41 = vld [vmem:[%s1589_s12 + $0x40] sm:$0xff] }
 0x1a6   :  { %966 = vmatpush1.bf16.msra.mxu0 %v965_v44  ;;  %v694_v44 = vld [vmem:[%s1589_s12 + $0xd8] sm:$0xff] }
 0x1a7   :  { %968 = vmatprep.subr.bf16.mxu0 %v967_v62  ;;  %v999_v46 = vpack.c.bf16 %v694_v44, %v693_v43 }
 0x1aa   :  { %970 = vmatpush1.bf16.msra.mxu0 %v969_v1 }
 0x1ab   :  { %972 = vmatprep.subr.bf16.mxu0 %v971_v5 }
 0x25b   :  { %v330_v48 = vpop.f32.mrb[2].mxu1 }
 0x25c   :  { %v331_v51 = vadd.f32 %v799_v45, %v330_v48  ;;  %v877_v52 = vpop.f32.mrb[3].mxu1  ;;  %v997_v45 = vpack.c.bf16 %v676_v42, %v675_v41  ;;  %v678_v48 = vld [vmem:[%s1589_s12 + $0x58] sm:$0xff] }
 0x25d   :  { %v1003_v52 = vpack.c.bf16 %v696_v50, %v695_v49 }
 0x25e   :  { %v334_v54 = vmax.f32 %v331_v51, 0.0  ;;  %v1001_v51 = vpack.c.bf16 %v678_v48, %v677_v47 }
 0x260   :  { %887 = vmatmul.mubr.msk.f32.vlgmr.msra.gmra.mrb[4].mxu1 %vm175_vm1, %v334_v54 }
 0x261   :  { %910 = vmatpush1.bf16.msra.mxu1 %v909_v53  ;;  %509 = vmatprep.mubr.f32.mxu1 %v1254_v2  ;;  %v574_v2 = vld [vmem:[#allocation14 + $0x1c0] sm:$0xff]  ;;  %v432_v53 = vlaneseq }
 0x262   :  { %912 = vmatprep.subr.bf16.mxu1 %v911_v55  ;;  %v973_v7 = vpack.c.bf16 %v576_v6, %v574_v2  ;;  %v801_v55 = vld [vmem:[#allocation10] ss:$0 sm:$0xff] }
 0x263   :  { %v433_v54 = vshrl.u32 %v432_v53, 7  ;;  %v679_v6 = vld [vmem:[%s1589_s12 + $0x60] sm:$0xff] }
 0x264   :  { %974 = vmatpush1.bf16.msra.mxu0 %v973_v7  ;;  %v680_v7 = vld [vmem:[%s1589_s12 + $0x68] sm:$0xff] }
 0x265   :  { %914 = vmatpush1.bf16.msra.mxu1 %v913_v58  ;;  %976 = vmatprep.subr.bf16.mxu0 %v975_v10  ;;  %v438_v61 = vsub.s32 1, %v433_v54  ;;  %v1005_v8 = vpack.c.bf16 %v680_v7, %v679_v6  ;;  %v698_v10 = vld [vmem:[%s1589_s12 + $0xf8] sm:$0xff] }
 0x266   :  { %980 = vmatprep.subr.bf16.mxu1 %v979_v17  ;;  %v1007_v11 = vpack.c.bf16 %v698_v10, %v697_v9 }
 0x267   :  { %v439_v63 = vrot.slane %v430_v60, %v438_v61  ;;  %v591_v17 = vrot.slane %v582_v15, %v438_v61 }
 0x268   :  { %803 = vmatmul.mubr.msk.f32.vlgmr.msra.gmra.mrb[6].mxu1 %vm175_vm1, %v421_v59  ;;  %978 = vmatpush1.bf16.msra.mxu0 %v977_v13  ;;  %v434_v59 = vsub.s32 0, %v433_v54  ;;  %v682_v13 = vld [vmem:[%s1589_s12 + $0x78] sm:$0xff] }
 0x269   :  { %982 = vmatpush3.bf16.msra.mxu1 %v981_v21  ;;  %v1009_v14 = vpack.c.bf16 %v682_v13, %v681_v12 }
 0x26a   :  { %984 = vmatprep.subr.bf16.mxu1 %v983_v22  ;;  %v435_v62 = vrot.slane %v430_v60, %v434_v59  ;;  %v587_v16 = vrot.slane %v582_v15, %v434_v59 }
 0x26d   :  { %986 = vmatpush3.bf16.msra.mxu1 %v985_v27 }
 0x26e   :  { %988 = vmatprep.subr.bf16.mxu1 %v987_v28 }
 0x271   :  { %990 = vmatpush3.bf16.msra.mxu1 %v989_v33 }
 0x272   :  { %992 = vmatprep.subr.bf16.mxu1 %v991_v34 }
 0x275   :  { %994 = vmatpush3.bf16.msra.mxu1 %v993_v39 }
 0x276   :  { %996 = vmatprep.subr.bf16.mxu1 %v995_v40 }
 0x279   :  { %998 = vmatpush3.bf16.msra.mxu1 %v997_v45 }
 0x27a   :  { %1000 = vmatprep.subr.bf16.mxu1 %v999_v46 }
 0x27d   :  { %1002 = vmatpush3.bf16.msra.mxu1 %v1001_v51 }
 0x27e   :  { %1004 = vmatprep.subr.bf16.mxu1 %v1003_v52 }
 0x281   :  { %1006 = vmatpush3.bf16.msra.mxu1 %v1005_v8 }
 0x282   :  { %1008 = vmatprep.subr.bf16.mxu1 %v1007_v11 }
 0x285   :  { %1010 = vmatpush3.bf16.msra.mxu1 %v1009_v14 }
 0x333   :  { %v415_v56 = vpop.f32.mrb[4].mxu1 }
 0x334   :  { %v416_v57 = vadd.f32 %v801_v55, %v415_v56  ;;  %v888_v58 = vpop.f32.mrb[5].mxu1 }
 0x336   :  { %420 = vst.msk [vmem:[%s1591_s14] sm:$0x3] %vm419_vm2, %v416_v57 }
 0x33b   :  { %v511_v0 = vpop.f32.mrb[6].mxu1 }
 0x33c   :  { %v512_v1 = vadd.f32 %v511_v0, %v435_v62  ;;  %v513_v3 = vpop.f32.mrb[7].mxu1 }
 0x33d   :  { %v514_v4 = vadd.f32 %v513_v3, %v439_v63 }
 0x33e   :  { %v516_v2 = vmax.f32 %v512_v1, 0.0 }
 0x33f   :  { %v517_v5 = vmax.f32 %v514_v4, 0.0 }
 0x341   :  { %658 = vmatprep.mubr.f32.mxu0 %v517_v5 }
 0x342   :  { %659 = vmatmul.mubr.f32.vlgmr.msra.gmra.mrb[0].mxu0 %v516_v2 }
 0x415   :  { %v660_v18 = vpop.f32.mrb[0].mxu0 }
 0x416   :  { %v661_v19 = vadd.f32 %v660_v18, %v587_v16  ;;  %v662_v20 = vpop.f32.mrb[1].mxu0 }
 0x417   :  { %v663_v21 = vadd.f32 %v662_v20, %v591_v17 }
 0x418   :  { %v665_v23 = vmax.f32 %v661_v19, 0.0 }
 0x419   :  { %v666_v22 = vmax.f32 %v663_v21, 0.0 }
 0x41b   :  { %770 = vmatprep.mubr.f32.mxu1 %v666_v22 }
 0x41c   :  { %771 = vmatmul.mubr.f32.vlgmr.msra.gmra.mrb[8].mxu1 %v665_v23 }
 0x4ef   :  { %v853_v24 = vpop.f32.mrb[8].mxu1 }
 0x4f0   :  { %v854_v26 = vpop.f32.mrb[9].mxu1 }
 0x4f1   :  { %v855_v27 = vadd.f32 %v854_v26, %v853_v24 }
 0x4f3   :  { %v773_v28 = vadd.f32 %v855_v27, %v804_v25 }
 0x4f5   :  { %v805_v29 = vmul.f32 -1.442695, %v773_v28 }
 0x4f7   :  { %1027 = vpow2.f32 %v805_v29 }
 0x501   :  { %v1028_v30 = vpop.eup %1027 }
 0x502   :  { %v779_v31 = vadd.f32 1.0, %v1028_v30 }
 0x504   :  { %1029 = vrcp.f32 %v779_v31 }
 0x50e   :  { %v1030_v32 = vpop.eup %1029 }
 0x50f   :  { %783 = vst.msk [vmem:[%s1592_s15] sm:$0x3] %vm782_vm3, %v1030_v32 }
 0x510   :  { %792 = vsyncpa [#allocation4], 1 }
 0x511   :  { %793 = vsyncpa [#allocation6], 1 }
 0x512   :  { %794 = vsyncpa [#allocation9], 1 }
 0x513   :  { %795 = vsyncpa [#allocation12], 1 }
 0x514   :  { %796 = vsyncpa [#allocation15], 1 }

// kernel: mask_decoder_forward.7
= control target key start
LH: loop header
LB: loop body
LE: loop exit
PB: predicated region body
PF: predicated region fallthrough
CT: control target
= control target key end

     0   :  { %s9383_s27 = smov 0   ;;  %s9385_s28 = smov 0   ;;  %s10404_s0 = inlined_call_operand.vmem [shape: bf16[2,32,16], index: 0, kind: input, shape index: {}]   ;;  %s10405_s1 = inlined_call_operand.vmem [shape: bf16[32,32], index: 1, kind: input, shape index: {}]   ;;  %s10406_s2 = inlined_call_operand.vmem [shape: f32[32,1], index: 2, kind: input, shape index: {}]   ;;  %s10407_s3 = inlined_call_operand.vmem [shape: f32[8,1], index: 3, kind: input, shape index: {}]   ;;  %s10408_s4 = inlined_call_operand.vmem [shape: f32[8,1], index: 4, kind: input, shape index: {}]   ;;  %s10409_s5 = inlined_call_operand.vmem [shape: bf16[16,8], index: 5, kind: input, shape index: {}]   ;;  %s10410_s6 = inlined_call_operand.vmem [shape: f32[16,1], index: 6, kind: input, shape index: {}]   ;;  %s10411_s7 = inlined_call_operand.vmem [shape: f32[4,1], index: 7, kind: input, shape index: {}]   ;;  %s10412_s8 = inlined_call_operand.vmem [shape: f32[4,1], index: 8, kind: input, shape index: {}]   ;;  %s10413_s9 = inlined_call_operand.vmem [shape: bf16[16,4], index: 9, kind: input, shape index: {}]   ;;  %s10414_s10 = inlined_call_operand.vmem [shape: f32[16,1], index: 10, kind: input, shape index: {}]   ;;  %s10415_s11 = inlined_call_operand.vmem [shape: f32[4,1], index: 11, kind: input, shape index: {}]   ;;  %s10416_s12 = inlined_call_operand.vmem [shape: f32[4,1], index: 12, kind: input, shape index: {}]   ;;  %s10417_s13 = inlined_call_operand.vmem [shape: bf16[16,4], index: 13, kind: input, shape index: {}]   ;;  %s10418_s14 = inlined_call_operand.vmem [shape: f32[16,1], index: 14, kind: input, shape index: {}]   ;;  %s10419_s15 = inlined_call_operand.vmem [shape: f32[4,1], index: 15, kind: input, shape index: {}]   ;;  %s10420_s16 = inlined_call_operand.vmem [shape: f32[4,1], index: 16, kind: input, shape index: {}]   ;;  %s10421_s17 = inlined_call_operand.vmem [shape: f32[2,1,4], index: 17, kind: input, shape index: {}]   ;;  %s10422_s18 = inlined_call_operand.vmem [shape: f32[2,4,1024], index: 18, kind: output, shape index: {}]  }
   0x1   :  { %10426 = sst [smem:[#allocation7_spill]] %s10404_s0  ;;  %s9387_s29 = smov 0  }
   0x2   :  { %10427 = sst [smem:[#allocation8_spill]] %s10405_s1 }
   0x3   :  { %10428 = sst [smem:[#allocation9_spill]] %s10406_s2 }
   0x4 LB: > { %10429 = sst [smem:[#allocation5_spill]] %s9273_s28  ;;  %s40_s30 = sadd.s32 1, %s9273_s28  ;;  %s9277_s29 = sphi %s9387_s29, %s28_s29   ;;  %s9273_s28 = sphi %s9385_s28, %s10435_s28   ;;  %s9269_s27 = sphi %s9383_s27, %s10434_s27  }
   0x5   : > { %p8392_p0 = scmp.ge.s32.totalorder %s9277_s29, 1  ;;  %p42_p1 = scmp.ge.s32.totalorder %s40_s30, 2 }
   0x6   : > { %p539_p2 = scmp.lt.s32.totalorder %s9277_s29, 3 }
   0x7   : > { %s10437_s30 = smov (%p42_p1, %s40_s30), 0 }
   0x8   : > { %10430 = sst [smem:[#allocation6_spill]] %s10437_s30  ;;  %p540_p3 = pnand %p8392_p0, %p539_p2 }
   0x9   : > { %p603_p4 = scmp.lt.s32.totalorder (!%p540_p3), %s9269_s27, 1  ;;  %s10431_s1 = sld [smem:[#allocation8_spill]] (!%p540_p3)  ;;  %vm679_vm0 = vcmask (!%p540_p3), 261120   ;;  %v9279_v3 = vmov (!%p540_p3), 0   ;;  %v735_v8 = vld [vmem:[%s10407_s3] sm:$0xff] (!%p540_p3)  ;;  %v9280_v10 = vmov (!%p540_p3), 0.0   ;;  %v812_v23 = vlaneseq (!%p540_p3) }
   0xa   : > { %543 = sbr.rel (%p540_p3) target bundleno = 8308 (0x2074), region = 92  ;;  %s10432_s22 = sld [smem:[#allocation9_spill]] (!%p540_p3)  ;;  %8859 = vset.pattern.permute.xlu0 (!%p540_p3), %v9279_v3  ;;  %8860 = vset.pattern.permute.xlu1 (!%p540_p3), %v9279_v3  ;;  %vm9281_vm1 = vmmov (!%p540_p3), 0   ;;  %v736_v11 = vld [vmem:[%s10408_s4] sm:$0xff] (!%p540_p3)  ;;  %vm737_vm2 = vcmask (!%p540_p3), 64512   ;;  %v9282_v22 = vmov (!%p540_p3), 1.0  }
   0xb   : > { %s10433_s0 = sld [smem:[#allocation7_spill]] (!%p540_p3)  ;;  %8740 = vmatprep.subr.mxu1 (!%p540_p3), %v9280_v10  ;;  %8742 = vmatprep.mubr.msk.f32.mxu1 (!%p540_p3), %vm9281_vm1, %v9280_v10  ;;  %v9456_v24 = vshrl.u32 (!%p540_p3), %v812_v23, 7  ;;  %vm918_vm3 = vcmask (!%p540_p3), 125952   ;;  %s9283_s26 = smov (!%p540_p3), 16   ;;  %vm1093_vm4 = vcmask (!%p540_p3), 257152   ;;  %vm1268_vm5 = vcmask (!%p540_p3), 388352  }
   0xc   : > { %s9285_s21 = smov (!%p540_p3), 48   ;;  %vm1443_vm6 = vcmask (!%p540_p3), 519552   ;;  %vm1468_vm7 = vcmask (!%p540_p3), 1043456   ;;  %vm1515_vm8 = vcmask (!%p540_p3), 31744   ;;  %vm1701_vm9 = vcmask (!%p540_p3), 517120  }
   0xd   : > { %v9459_v25 = vsub.s32 (!%p540_p3), 0, %v9456_v24  ;;  %vm1893_vm10 = vcmask (!%p540_p3), 1041920   ;;  %vm2288_vm11 = vcmask (!%p540_p3), 1041408   ;;  %vm8246_vm12 = vcmask (!%p540_p3), 1040384  }
   0xe   : > { %vm8263_vm13 = vcmask (!%p540_p3), 1042432  }
   0xf   : > { %v8863_v0 = vld [vmem:[%s10431_s1] sm:$0xff] (!%p540_p3)   ;;  %v8864_v9 = vld [vmem:[%s10431_s1 + $0x8] sm:$0xff] (!%p540_p3)  }
  0x10   : > { %8736 = vmatprep.mubr.msk.bf16.mxu0 (!%p540_p3), %vm679_vm0, %v8863_v0  ;;  %v633_v1 = vld [vmem:[%s10432_s22] sm:$0xff] (!%p540_p3)  ;;  %v635_v2 = vld [vmem:[%s10432_s22 + $0x10] sm:$0xff] (!%p540_p3)  ;;  %v634_v4 = vld [vmem:[%s10432_s22 + $0x8] sm:$0xff] (!%p540_p3) }
  0x11   : > { %s10439_s27 = smov (!%p603_p4, %s9269_s27), 1  ;;  %639 = vperm.xlu0 %8859, %v633_v1   ;;  %649 = vperm.xlu1 %8860, %v635_v2   ;;  %v636_v5 = vld [vmem:[%s10432_s22 + $0x18] sm:$0xff] }
  0x12   : > { %s8689_s24 = sshll.u32 %s10439_s27, 4 }
  0x13   : > { %s610_s19 = scalar_lea.vmem %s10433_s0, %s8689_s24  ;;  %s9284_s0 = smov 32  }
  0x14   : > { %v8861_v6 = vld [vmem:[%s610_s19] sm:$0xff]   ;;  %v8862_v7 = vld [vmem:[%s610_s19 + $0x8] sm:$0xff]   ;;  %s9287_s19 = smov 64  }
  0x15   : > { %8732 = vmatprep.subr.bf16.mxu0 %v8861_v6  ;;  %644 = vperm.xlu0 %8859, %v634_v4  }
  0x16   : > { %8733 = vmatpush3.bf16.msra.mxu0 %v8861_v6  ;;  %654 = vperm.xlu1 %8860, %v636_v5  }
  0x17   : > { %8734 = vmatprep.subr.bf16.mxu0 %v8862_v7 }
  0x19   : > { %898 = vperm.xlu0 %8859, %v735_v8  }
  0x1a   : > { %8735 = vmatpush3.bf16.msra.mxu0 %v8862_v7  ;;  %904 = vperm.xlu1 %8860, %v736_v11  }
  0x1b   : > { %8760 = vmatprep.subr.mxu0 %v9280_v10 }
  0x1d   : > { %8737 = vmatmul.mubr.msk.bf16.vlgmr.msra.gmra.mrb[0].mxu0 %vm679_vm0, %v8864_v9 }
  0x1e   : > { %8762 = vmatprep.mubr.msk.f32.mxu0 %vm9281_vm1, %v9280_v10 }
  0x90   : > { %v650_v12 = vpop.permute.xlu1 %649  ;;  %v640_v15 = vpop.permute.xlu0 %639 }
  0x94   : > { %v645_v36 = vpop.permute.xlu0 %644 }
  0x95   : > { %v655_v14 = vpop.permute.xlu1 %654 }
  0x98   : > { %v899_v59 = vpop.permute.xlu0 %898 }
  0x99   : > { %v905_v61 = vpop.permute.xlu1 %904 }
  0xf0   : > { %v8738_v13 = vpop.f32.mrb[0].mxu0 }
  0xf1   : > { %v729_v16 = vadd.f32 %v8738_v13, %v650_v12  ;;  %v720_v17 = vpop.f32.mrb[1].mxu0 }
  0xf2   : > { %v721_v18 = vadd.f32 %v720_v17, %v640_v15  ;;  %v8739_v19 = vpop.f32.mrb[2].mxu0 }
  0xf3   : > { %v732_v20 = vadd.f32 %v8739_v19, %v655_v14  ;;  %v723_v21 = vpop.f32.mrb[3].mxu0  ;;  %8761 = vmatpush3.msra.mxu0 %v729_v16 }
  0xf4   : > { %8741 = vmatpush3.msra.mxu1 %v721_v18  ;;  %8763 = vmatmul.mubr.msk.f32.vlgmr.msra.gmra.mrb[4].mxu0 %vm737_vm2, %v9282_v22  ;;  %v724_v37 = vadd.f32 %v723_v21, %v645_v36 }
  0xf5   : > { %8770 = vmatprep.subr.mxu0 %v9280_v10  ;;  %8743 = vmatmul.mubr.msk.f32.vlgmr.msra.gmra.mrb[0].mxu1 %vm737_vm2, %v9282_v22 }
  0xf6   : > { %8771 = vmatpush3.msra.mxu0 %v732_v20  ;;  %8772 = vmatprep.mubr.msk.f32.mxu0 %vm9281_vm1, %v9280_v10 }
  0xf7   : > { %8745 = vmatprep.subr.mxu1 %v9280_v10  ;;  %8747 = vmatprep.mubr.msk.f32.mxu1 %vm9281_vm1, %v9280_v10 }
  0xf8   : > { %8773 = vmatmul.mubr.msk.f32.vlgmr.msra.gmra.mrb[6].mxu0 %vm737_vm2, %v9282_v22  ;;  %8780 = vmatprep.subr.bf16.mxu0 %v9280_v10 }
  0xf9   : > { %8782 = vmatprep.mubr.msk.bf16.mxu0 %vm9281_vm1, %v9280_v10 }
 0x1c7   : > { %v1161_v26 = vpop.f32.mrb[4].mxu0 }
 0x1c8   : > { %v807_v27 = vpop.f32.mrb[0].mxu1  ;;  %v8764_v28 = vpop.f32.mrb[5].mxu0  ;;  %v1165_v39 = vmul.f32 0.125, %v1161_v26 }
 0x1c9   : > { %v811_v29 = vmul.f32 0.125, %v807_v27  ;;  %v8744_v30 = vpop.f32.mrb[1].mxu1 }
 0x1ca   : > { %v1169_v44 = vrot.slane %v1165_v39, %v9459_v25 }
 0x1cb   : > { %v815_v31 = vrot.slane %v811_v29, %v9459_v25  ;;  %v1336_v32 = vpop.f32.mrb[6].mxu0 }
 0x1cc   : > { %v8774_v33 = vpop.f32.mrb[7].mxu0  ;;  %v1340_v45 = vmul.f32 0.125, %v1336_v32  ;;  %v1170_v49 = vsub.f32 %v729_v16, %v1169_v44 }
 0x1cd   : > { %v816_v34 = vsub.f32 %v721_v18, %v815_v31 }
 0x1ce   : > { %v1344_v50 = vrot.slane %v1340_v45, %v9459_v25  ;;  %v1171_v53 = vmul.f32 %v1170_v49, %v1170_v49 }
 0x1cf   : > { %v817_v35 = vmul.f32 %v816_v34, %v816_v34 }
 0x1d0   : > { %v1345_v54 = vsub.f32 %v732_v20, %v1344_v50 }
 0x1d1   : > { %8746 = vmatpush3.msra.mxu1 %v817_v35 }
 0x1d2   : > { %8748 = vmatmul.mubr.msk.f32.vlgmr.msra.gmra.mrb[2].mxu1 %vm737_vm2, %v9282_v22  ;;  %8750 = vmatprep.subr.mxu1 %v9280_v10  ;;  %v1346_v57 = vmul.f32 %v1345_v54, %v1345_v54 }
 0x1d3   : > { %8751 = vmatpush3.msra.mxu1 %v724_v37  ;;  %8752 = vmatprep.mubr.msk.f32.mxu1 %vm9281_vm1, %v9280_v10 }
 0x1d4   : > { %8755 = vmatprep.subr.mxu1 %v9280_v10 }
 0x1d6   : > { %8753 = vmatmul.mubr.msk.f32.vlgmr.msra.gmra.mrb[4].mxu1 %vm737_vm2, %v9282_v22 }
 0x1d7   : > { %8757 = vmatprep.mubr.msk.f32.mxu1 %vm9281_vm1, %v9280_v10 }
 0x2a5   : > { %v884_v38 = vpop.f32.mrb[2].mxu1 }
 0x2a6   : > { %v888_v40 = vmul.f32 0.125, %v884_v38  ;;  %v8749_v41 = vpop.f32.mrb[3].mxu1 }
 0x2a8   : > { %v889_v42 = vadd.f32 1e-06, %v888_v40 }
 0x2a9   : > { %v986_v43 = vpop.f32.mrb[4].mxu1 }
 0x2aa   : > { %8868 = vrsqrt.f32 %v889_v42  ;;  %v990_v46 = vmul.f32 0.125, %v986_v43  ;;  %v8754_v47 = vpop.f32.mrb[5].mxu1 }
 0x2ac   : > { %v994_v48 = vrot.slane %v990_v46, %v9459_v25 }
 0x2ae   : > { %v995_v51 = vsub.f32 %v724_v37, %v994_v48 }
 0x2b0   : > { %v996_v52 = vmul.f32 %v995_v51, %v995_v51 }
 0x2b2   : > { %8756 = vmatpush3.msra.mxu1 %v996_v52 }
 0x2b3   : > { %8758 = vmatmul.mubr.msk.f32.vlgmr.msra.gmra.mrb[6].mxu1 %vm737_vm2, %v9282_v22  ;;  %8765 = vmatprep.subr.mxu1 %v9280_v10 }
 0x2b4   : > { %v8869_v55 = vpop.eup %8868  ;;  %8766 = vmatpush3.msra.mxu1 %v1171_v53  ;;  %8767 = vmatprep.mubr.msk.f32.mxu1 %vm9281_vm1, %v9280_v10 }
 0x2b5   : > { %v894_v56 = vrot.slane %v8869_v55, %v9459_v25  ;;  %8775 = vmatprep.subr.mxu1 %v9280_v10 }
 0x2b7   : > { %v895_v58 = vmul.f32 %v894_v56, %v816_v34  ;;  %8768 = vmatmul.mubr.msk.f32.vlgmr.msra.gmra.mrb[8].mxu1 %vm737_vm2, %v9282_v22 }
 0x2b8   : > { %8776 = vmatpush3.msra.mxu1 %v1346_v57  ;;  %8777 = vmatprep.mubr.msk.f32.mxu1 %vm9281_vm1, %v9280_v10 }
 0x2b9   : > { %v901_v60 = vmul.f32 %v899_v59, %v895_v58  ;;  %8786 = vmatprep.subr.mxu1 %v9280_v10 }
 0x2bb   : > { %8778 = vmatmul.mubr.msk.f32.vlgmr.msra.gmra.mrb[10].mxu1 %vm737_vm2, %v9282_v22  ;;  %v907_v62 = vadd.f32 %v905_v61, %v901_v60 }
 0x2bc   : > { %8788 = vmatprep.mubr.msk.f32.mxu1 %vm9281_vm1, %v9280_v10 }
 0x2bd   : > { %v908_v63 = vmul.f32 %v907_v62, %v907_v62 }
 0x2bf   : > { %v909_v0 = vmul.f32 %v908_v63, %v907_v62 }
 0x2c1   : > { %v910_v1 = vmul.f32 0.044715, %v909_v0 }
 0x2c3   : > { %v911_v2 = vadd.f32 %v910_v1, %v907_v62 }
 0x2c5   : > { %v912_v4 = vmul.f32 0.7978846, %v911_v2 }
 0x2c7   : > { %8870 = vtanh.f32 %v912_v4 }
 0x2d1   : > { %v8871_v5 = vpop.eup %8870 }
 0x2d2   : > { %v914_v6 = vadd.f32 1.0, %v8871_v5 }
 0x2d4   : > { %v915_v7 = vmul.f32 0.5, %v914_v6 }
 0x2d6   : > { %v916_v8 = vmul.f32 %v915_v7, %v907_v62  ;;  %v1448_v7 = vld [vmem:[%s10410_s6] sm:$0xff] }
 0x2d8   : > { %v917_v9 = vpack.c.bf16 %v916_v8, %v916_v8 }
 0x2da   : > { %919 = vst.msk [vmem:[#allocation2] sm:$0xf] %vm918_vm3, %v917_v9  ;;  %v1513_v9 = vld [vmem:[%s10411_s7] sm:$0xf] }
 0x386   : > { %v1063_v11 = vpop.f32.mrb[6].mxu1 }
 0x387   : > { %v1067_v12 = vmul.f32 0.125, %v1063_v11  ;;  %v8759_v13 = vpop.f32.mrb[7].mxu1  ;;  %v1449_v11 = vld [vmem:[%s10410_s6 + $0x8] sm:$0xff] }
 0x389   : > { %v1068_v14 = vadd.f32 1e-06, %v1067_v12  ;;  %v1514_v12 = vld [vmem:[%s10412_s8] sm:$0xf] }
 0x38a   : > { %v1238_v15 = vpop.f32.mrb[8].mxu1 }
 0x38b   : > { %8872 = vrsqrt.f32 %v1068_v14  ;;  %v1242_v16 = vmul.f32 0.125, %v1238_v15  ;;  %v8769_v17 = vpop.f32.mrb[9].mxu1 }
 0x38d   : > { %v1243_v18 = vadd.f32 1e-06, %v1242_v16 }
 0x38e   : > { %v1413_v19 = vpop.f32.mrb[10].mxu1 }
 0x38f   : > { %8874 = vrsqrt.f32 %v1243_v18  ;;  %v1417_v20 = vmul.f32 0.125, %v1413_v19  ;;  %v8779_v21 = vpop.f32.mrb[11].mxu1  ;;  %v8865_v18 = vld [vmem:[%s10409_s5] sm:$0xff]  }
 0x391   : > { %v1418_v23 = vadd.f32 1e-06, %v1417_v20 }
 0x393   : > { %8876 = vrsqrt.f32 %v1418_v23 }
 0x395   : > { %v8873_v26 = vpop.eup %8872 }
 0x396   : > { %v1073_v27 = vrot.slane %v8873_v26, %v9459_v25 }
 0x398   : > { %v1074_v28 = vmul.f32 %v1073_v27, %v995_v51 }
 0x399   : > { %v8875_v29 = vpop.eup %8874 }
 0x39a   : > { %v1248_v30 = vrot.slane %v8875_v29, %v9459_v25  ;;  %v1075_v31 = vmul.f32 %v1074_v28, %v899_v59 }
 0x39c   : > { %v1249_v32 = vmul.f32 %v1248_v30, %v1170_v49  ;;  %v1076_v33 = vadd.f32 %v1075_v31, %v905_v61 }
 0x39d   : > { %v8877_v34 = vpop.eup %8876 }
 0x39e   : > { %v1423_v35 = vrot.slane %v8877_v34, %v9459_v25  ;;  %v1077_v36 = vmul.f32 %v1076_v33, %v1076_v33  ;;  %v1250_v37 = vmul.f32 %v1249_v32, %v899_v59 }
 0x3a0   : > { %v1424_v38 = vmul.f32 %v1423_v35, %v1345_v54  ;;  %v1078_v39 = vmul.f32 %v1077_v36, %v1076_v33  ;;  %v1251_v40 = vadd.f32 %v1250_v37, %v905_v61 }
 0x3a2   : > { %v1079_v41 = vmul.f32 0.044715, %v1078_v39  ;;  %v1252_v42 = vmul.f32 %v1251_v40, %v1251_v40  ;;  %v1425_v43 = vmul.f32 %v1424_v38, %v899_v59 }
 0x3a4   : > { %v1080_v44 = vadd.f32 %v1079_v41, %v1076_v33  ;;  %v1253_v45 = vmul.f32 %v1252_v42, %v1251_v40  ;;  %v1426_v46 = vadd.f32 %v1425_v43, %v905_v61 }
 0x3a6   : > { %v1081_v47 = vmul.f32 0.7978846, %v1080_v44  ;;  %v1254_v48 = vmul.f32 0.044715, %v1253_v45  ;;  %v1427_v50 = vmul.f32 %v1426_v46, %v1426_v46 }
 0x3a8   : > { %8878 = vtanh.f32 %v1081_v47  ;;  %v1255_v49 = vadd.f32 %v1254_v48, %v1251_v40  ;;  %v1428_v51 = vmul.f32 %v1427_v50, %v1426_v46 }
 0x3aa   : > { %v1256_v52 = vmul.f32 0.7978846, %v1255_v49  ;;  %v1429_v53 = vmul.f32 0.044715, %v1428_v51 }
 0x3ac   : > { %8880 = vtanh.f32 %v1256_v52  ;;  %v1430_v55 = vadd.f32 %v1429_v53, %v1426_v46 }
 0x3ae   : > { %v1431_v56 = vmul.f32 0.7978846, %v1430_v55 }
 0x3b0   : > { %8882 = vtanh.f32 %v1431_v56 }
 0x3b2   : > { %v8879_v54 = vpop.eup %8878 }
 0x3b3   : > { %v1083_v57 = vadd.f32 1.0, %v8879_v54 }
 0x3b5   : > { %v1084_v58 = vmul.f32 0.5, %v1083_v57 }
 0x3b6   : > { %v8881_v60 = vpop.eup %8880 }
 0x3b7   : > { %v1085_v59 = vmul.f32 %v1084_v58, %v1076_v33  ;;  %v1258_v62 = vadd.f32 1.0, %v8881_v60 }
 0x3b9   : > { %v8691_v63 = vpack.c.bf16 %v1085_v59, %v1085_v59  ;;  %v1259_v61 = vmul.f32 0.5, %v1258_v62 }
 0x3ba   : > { %v8883_v0 = vpop.eup %8882 }
 0x3bb   : > { %1090 = vrot.lane.b32.xlu0 %v8691_v63, %s9283_s26  ;;  %v1260_v1 = vmul.f32 %v1259_v61, %v1251_v40  ;;  %v1433_v2 = vadd.f32 1.0, %v8883_v0 }
 0x3bd   : > { %v8692_v4 = vpack.c.bf16 %v1260_v1, %v1260_v1  ;;  %v1434_v5 = vmul.f32 0.5, %v1433_v2 }
 0x3bf   : > { %1265 = vrot.lane.b32.xlu1 %v8692_v4, %s9284_s0  ;;  %v1435_v6 = vmul.f32 %v1434_v5, %v1426_v46 }
 0x3c1   : > { %v8693_v8 = vpack.c.bf16 %v1435_v6, %v1435_v6 }
 0x3c3   : > { %1452 = vperm.xlu1 %8860, %v1448_v7   ;;  %1440 = vrot.lane.b32.xlu0 %v8693_v8, %s9285_s21  ;;  %s9834_s21 = scalar_lea.vmem %s10421_s17, %s10439_s27 }
 0x3c7   : > { %1681 = vperm.xlu1 %8860, %v1513_v9   ;;  %1457 = vperm.xlu0 %8859, %v1449_v11  }
 0x3cb   : > { %1687 = vperm.xlu0 %8859, %v1514_v12  }
 0x42d   : > { %v1091_v13 = vpop.permute.xlu0 %1090 }
 0x42e   : > { %1094 = vst.msk [vmem:[#allocation2] sm:$0xf] %vm1093_vm4, %v1091_v13 }
 0x431   : > { %v1266_v14 = vpop.permute.xlu1 %1265 }
 0x432   : > { %1269 = vst.msk [vmem:[#allocation2] sm:$0xf] %vm1268_vm5, %v1266_v14 }
 0x435   : > { %v1441_v15 = vpop.permute.xlu0 %1440 }
 0x436   : > { %1444 = vst.msk [vmem:[#allocation2] sm:$0xf] %vm1443_vm6, %v1441_v15 }
 0x43d   : > { %v1447_v16 = vld [vmem:[#allocation2] sm:$0xf] }
 0x43e   : > { %v1470_v17 = vsel %vm1468_vm7, %v1447_v16, 0 }
 0x43f   : > { %8781 = vmatpush3.bf16.msra.mxu0 %v1470_v17 }
 0x440   : > { %8796 = vmatprep.subr.mxu0 %v9280_v10 }
 0x442   : > { %8783 = vmatmul.mubr.msk.bf16.vlgmr.msra.gmra.mrb[8].mxu0 %vm737_vm2, %v8865_v18  ;;  %v1453_v19 = vpop.permute.xlu1 %1452 }
 0x443   : > { %8798 = vmatprep.mubr.msk.f32.mxu0 %vm9281_vm1, %v9280_v10 }
 0x446   : > { %v1458_v29 = vpop.permute.xlu0 %1457  ;;  %v1682_v16 = vpop.permute.xlu1 %1681 }
 0x515   : > { %v1506_v20 = vpop.f32.mrb[8].mxu0 }
 0x516   : > { %v1507_v21 = vadd.f32 %v1506_v20, %v1453_v19  ;;  %v8784_v23 = vpop.f32.mrb[9].mxu0  ;;  %v1688_v19 = vpop.permute.xlu0 %1687  ;;  %v1865_v20 = vrot.slane %v1682_v16, 4 }
 0x517   : > { %v1509_v26 = vpop.f32.mrb[10].mxu0 }
 0x518   : > { %v1703_v27 = vrot.slane %v1507_v21, 4  ;;  %v8785_v28 = vpop.f32.mrb[11].mxu0  ;;  %8787 = vmatpush3.msk.msra.mxu1 %vm1468_vm7, %v1507_v21  ;;  %v1510_v30 = vadd.f32 %v1509_v26, %v1458_v29 }
 0x519   : > { %8789 = vmatmul.mubr.msk.f32.vlgmr.msra.gmra.mrb[12].mxu1 %vm1515_vm8, %v9282_v22  ;;  %8791 = vmatprep.subr.mxu1 %v9280_v10 }
 0x51a   : > { %8797 = vmatpush3.msk.msra.mxu0 %vm1468_vm7, %v1703_v27  ;;  %8793 = vmatprep.mubr.msk.f32.mxu1 %vm9281_vm1, %v9280_v10  ;;  %v2069_v31 = vrot.slane %v1510_v30, 4  ;;  %v1868_v27 = vrot.slane %v1688_v19, 4 }
 0x51b   : > { %8799 = vmatmul.mubr.msk.f32.vlgmr.msra.gmra.mrb[12].mxu0 %vm1515_vm8, %v9282_v22  ;;  %8806 = vmatprep.subr.mxu0 %v9280_v10 }
 0x51c   : > { %8807 = vmatpush3.msk.msra.mxu0 %vm1468_vm7, %v1510_v30  ;;  %8808 = vmatprep.mubr.msk.f32.mxu0 %vm9281_vm1, %v9280_v10 }
 0x51d   : > { %8816 = vmatprep.subr.mxu0 %v9280_v10 }
 0x51f   : > { %8809 = vmatmul.mubr.msk.f32.vlgmr.msra.gmra.mrb[14].mxu0 %vm1515_vm8, %v9282_v22 }
 0x520   : > { %8817 = vmatpush3.msk.msra.mxu0 %vm1468_vm7, %v2069_v31  ;;  %8818 = vmatprep.mubr.msk.f32.mxu0 %vm9281_vm1, %v9280_v10 }
 0x523   : > { %8819 = vmatmul.mubr.msk.f32.vlgmr.msra.gmra.mrb[16].mxu0 %vm1515_vm8, %v9282_v22 }
 0x524   : > { %2327 = vmatprep.mubr.bf16.mxu0 %v9279_v3 }
 0x5ec   : > { %v1587_v32 = vpop.f32.mrb[12].mxu1 }
 0x5ed   : > { %v1591_v33 = vmul.f32 0.25, %v1587_v32  ;;  %v8790_v34 = vpop.f32.mrb[13].mxu1 }
 0x5ee   : > { %v1772_v35 = vpop.f32.mrb[12].mxu0 }
 0x5ef   : > { %v1595_v36 = vrot.slane %v1591_v33, %v9459_v25  ;;  %v1776_v37 = vmul.f32 0.25, %v1772_v35  ;;  %v8800_v38 = vpop.f32.mrb[13].mxu0 }
 0x5f1   : > { %v1596_v39 = vsub.f32 %v1507_v21, %v1595_v36  ;;  %v1780_v40 = vrot.slane %v1776_v37, %v9459_v25 }
 0x5f2   : > { %v1964_v41 = vpop.f32.mrb[14].mxu0 }
 0x5f3   : > { %v1597_v42 = vmul.f32 %v1596_v39, %v1596_v39  ;;  %v1781_v43 = vsub.f32 %v1507_v21, %v1780_v40  ;;  %v1968_v44 = vmul.f32 0.25, %v1964_v41  ;;  %v8810_v45 = vpop.f32.mrb[15].mxu0 }
 0x5f5   : > { %v1782_v46 = vmul.f32 %v1781_v43, %v1781_v43  ;;  %v1972_v47 = vrot.slane %v1968_v44, %v9459_v25  ;;  %8792 = vmatpush3.msk.msra.mxu1 %vm1468_vm7, %v1597_v42 }
 0x5f6   : > { %8794 = vmatmul.mubr.msk.f32.vlgmr.msra.gmra.mrb[14].mxu1 %vm1515_vm8, %v9282_v22  ;;  %v2138_v48 = vpop.f32.mrb[16].mxu0  ;;  %8801 = vmatprep.subr.mxu1 %v9280_v10 }
 0x5f7   : > { %v1784_v50 = vrot.slane %v1782_v46, 4  ;;  %v1973_v49 = vsub.f32 %v1510_v30, %v1972_v47  ;;  %v2142_v51 = vmul.f32 0.25, %v2138_v48  ;;  %v8820_v52 = vpop.f32.mrb[17].mxu0  ;;  %8803 = vmatprep.mubr.msk.f32.mxu1 %vm9281_vm1, %v9280_v10 }
 0x5f9   : > { %v1974_v53 = vmul.f32 %v1973_v49, %v1973_v49  ;;  %v2146_v55 = vrot.slane %v2142_v51, %v9459_v25  ;;  %8802 = vmatpush3.msk.msra.mxu1 %vm1468_vm7, %v1784_v50 }
 0x5fa   : > { %8804 = vmatmul.mubr.msk.f32.vlgmr.msra.gmra.mrb[16].mxu1 %vm1515_vm8, %v9282_v22  ;;  %8811 = vmatprep.subr.mxu1 %v9280_v10 }
 0x5fb   : > { %v2147_v56 = vsub.f32 %v1510_v30, %v2146_v55  ;;  %8812 = vmatpush3.msk.msra.mxu1 %vm1468_vm7, %v1974_v53  ;;  %8813 = vmatprep.mubr.msk.f32.mxu1 %vm9281_vm1, %v9280_v10 }
 0x5fc   : > { %8821 = vmatprep.subr.mxu1 %v9280_v10 }
 0x5fd   : > { %v2148_v54 = vmul.f32 %v2147_v56, %v2147_v56 }
 0x5fe   : > { %8814 = vmatmul.mubr.msk.f32.vlgmr.msra.gmra.mrb[18].mxu1 %vm1515_vm8, %v9282_v22 }
 0x5ff   : > { %v2150_v57 = vrot.slane %v2148_v54, 4  ;;  %8823 = vmatprep.mubr.msk.f32.mxu1 %vm9281_vm1, %v9280_v10 }
 0x601   : > { %8822 = vmatpush3.msk.msra.mxu1 %vm1468_vm7, %v2150_v57 }
 0x602   : > { %8824 = vmatmul.mubr.msk.f32.vlgmr.msra.gmra.mrb[20].mxu1 %vm1515_vm8, %v9282_v22 }
 0x603   : > { %2410 = vmatprep.mubr.f32.mxu1 %v9280_v10 }
 0x6c9   : > { %v1667_v58 = vpop.f32.mrb[14].mxu1 }
 0x6ca   : > { %v1671_v60 = vmul.f32 0.25, %v1667_v58  ;;  %v8795_v59 = vpop.f32.mrb[15].mxu1 }
 0x6cb   : > { %v9286_v59 = vmov 1983009808  }
 0x6cc   : > { %v1672_v62 = vadd.f32 1e-06, %v1671_v60 }
 0x6cd   : > { %v1853_v63 = vpop.f32.mrb[16].mxu1 }
 0x6ce   : > { %8884 = vrsqrt.f32 %v1672_v62  ;;  %v1857_v61 = vmul.f32 0.25, %v1853_v63  ;;  %v8805_v0 = vpop.f32.mrb[17].mxu1  ;;  %v1883_v62 = vunpack.c.l.s4 %v9286_v59 }
 0x6d0   : > { %v1858_v1 = vadd.f32 1e-06, %v1857_v61 }
 0x6d1   : > { %v2044_v2 = vpop.f32.mrb[18].mxu1 }
 0x6d2   : > { %8886 = vrsqrt.f32 %v1858_v1  ;;  %v2048_v4 = vmul.f32 0.25, %v2044_v2  ;;  %v8815_v5 = vpop.f32.mrb[19].mxu1  ;;  %v1884_v2 = vunpack.c.0.s8 %v1883_v62 }
 0x6d4   : > { %v2049_v6 = vadd.f32 1e-06, %v2048_v4 }
 0x6d5   : > { %v2219_v7 = vpop.f32.mrb[20].mxu1 }
 0x6d6   : > { %8888 = vrsqrt.f32 %v2049_v6  ;;  %v2223_v8 = vmul.f32 0.25, %v2219_v7  ;;  %v8825_v9 = vpop.f32.mrb[21].mxu1 }
 0x6d7   : > { %v9567_v9 = vsub.s32 %v1884_v2, %v9456_v24  ;;  %v2259_v24 = vld [vmem:[%s10414_s10] sm:$0xff] }
 0x6d8   : > { %v8885_v11 = vpop.eup %8884  ;;  %v2224_v12 = vadd.f32 1e-06, %v2223_v8 }
 0x6d9   : > { %v1677_v13 = vrot.slane %v8885_v11, %v9459_v25 }
 0x6da   : > { %8890 = vrsqrt.f32 %v2224_v12 }
 0x6db   : > { %v1678_v14 = vmul.f32 %v1677_v13, %v1596_v39 }
 0x6dc   : > { %v8887_v15 = vpop.eup %8886 }
 0x6dd   : > { %v1863_v17 = vrot.slane %v8887_v15, %v9459_v25  ;;  %v1684_v18 = vmul.f32 %v1682_v16, %v1678_v14 }
 0x6df   : > { %v1864_v21 = vmul.f32 %v1863_v17, %v1781_v43  ;;  %v1690_v23 = vadd.f32 %v1688_v19, %v1684_v18 }
 0x6e0   : > { %v8889_v26 = vpop.eup %8888 }
 0x6e1   : > { %v1867_v28 = vmul.f32 %v1865_v20, %v1864_v21  ;;  %v2054_v29 = vrot.slane %v8889_v26, %v9459_v25  ;;  %v1691_v30 = vmul.f32 %v1690_v23, %v1690_v23 }
 0x6e3   : > { %v2055_v31 = vmul.f32 %v2054_v29, %v1973_v49  ;;  %v1870_v32 = vadd.f32 %v1868_v27, %v1867_v28  ;;  %v1692_v33 = vmul.f32 %v1691_v30, %v1690_v23  ;;  %v3246_v29 = vld [vmem:[%s10418_s14] sm:$0xff] }
 0x6e4   : > { %v8891_v34 = vpop.eup %8890  ;;  %v2338_v30 = vld [vmem:[%s10415_s11] sm:$0xf] }
 0x6e5   : > { %v2229_v35 = vrot.slane %v8891_v34, %v9459_v25  ;;  %v1871_v36 = vmul.f32 %v1870_v32, %v1870_v32  ;;  %v1693_v37 = vmul.f32 0.044715, %v1692_v33  ;;  %v2056_v38 = vmul.f32 %v2055_v31, %v1682_v16  ;;  %v3241_v31 = vld [vmem:[%s10420_s16] sm:$0xf]  ;;  %v3247_v34 = vld [vmem:[%s10418_s14 + $0x8] sm:$0xff] }
 0x6e6   : > { %v3240_v33 = vld [vmem:[%s10419_s15] sm:$0xf] }
 0x6e7   : > { %v2230_v39 = vmul.f32 %v2229_v35, %v2147_v56  ;;  %v1872_v40 = vmul.f32 %v1871_v36, %v1870_v32  ;;  %v1694_v41 = vadd.f32 %v1693_v37, %v1690_v23  ;;  %v2057_v42 = vadd.f32 %v2056_v38, %v1688_v19 }
 0x6e9   : > { %v2231_v43 = vmul.f32 %v2230_v39, %v1865_v20  ;;  %v1873_v44 = vmul.f32 0.044715, %v1872_v40  ;;  %v1695_v45 = vmul.f32 0.7978846, %v1694_v41  ;;  %v2058_v46 = vmul.f32 %v2057_v42, %v2057_v42  ;;  %v8866_v40 = vld [vmem:[%s10413_s9] sm:$0xff]  }
 0x6eb   : > { %v1874_v47 = vadd.f32 %v1873_v44, %v1870_v32  ;;  %v2232_v48 = vadd.f32 %v2231_v43, %v1868_v27  ;;  %8892 = vtanh.f32 %v1695_v45  ;;  %v2059_v50 = vmul.f32 %v2058_v46, %v2057_v42  ;;  %v2339_v27 = vld [vmem:[%s10416_s12] sm:$0xf] }
 0x6ed   : > { %v1875_v49 = vmul.f32 0.7978846, %v1874_v47  ;;  %v2233_v51 = vmul.f32 %v2232_v48, %v2232_v48  ;;  %v2060_v52 = vmul.f32 0.044715, %v2059_v50 }
 0x6ef   : > { %8894 = vtanh.f32 %v1875_v49  ;;  %v2234_v53 = vmul.f32 %v2233_v51, %v2232_v48  ;;  %v2061_v55 = vadd.f32 %v2060_v52, %v2057_v42 }
 0x6f1   : > { %v2235_v54 = vmul.f32 0.044715, %v2234_v53  ;;  %v2062_v57 = vmul.f32 0.7978846, %v2061_v55 }
 0x6f3   : > { %v2236_v56 = vadd.f32 %v2235_v54, %v2232_v48  ;;  %8896 = vtanh.f32 %v2062_v57 }
 0x6f5   : > { %v8893_v58 = vpop.eup %8892  ;;  %v2237_v60 = vmul.f32 0.7978846, %v2236_v56 }
 0x6f6   : > { %v1697_v63 = vadd.f32 1.0, %v8893_v58 }
 0x6f7   : > { %8898 = vtanh.f32 %v2237_v60 }
 0x6f8   : > { %v1698_v61 = vmul.f32 0.5, %v1697_v63 }
 0x6f9   : > { %v8895_v0 = vpop.eup %8894 }
 0x6fa   : > { %v1877_v1 = vadd.f32 1.0, %v8895_v0  ;;  %v1699_v4 = vmul.f32 %v1698_v61, %v1690_v23 }
 0x6fc   : > { %v1878_v5 = vmul.f32 0.5, %v1877_v1  ;;  %v1700_v6 = vpack.c.bf16 %v1699_v4, %v1699_v4 }
 0x6fd   : > { %v8897_v7 = vpop.eup %8896 }
 0x6fe   : > { %v1879_v8 = vmul.f32 %v1878_v5, %v1870_v32  ;;  %1702 = vst.msk [vmem:[#allocation3] sm:$0x3] %vm1701_vm9, %v1700_v6  ;;  %v2064_v11 = vadd.f32 1.0, %v8897_v7  ;;  %v2260_v32 = vld [vmem:[%s10414_s10 + $0x8] sm:$0xff] }
 0x700   : > { %v1880_v12 = vpack.c.bf16 %v1879_v8, %v1879_v8  ;;  %v2065_v13 = vmul.f32 0.5, %v2064_v11 }
 0x701   : > { %v8899_v14 = vpop.eup %8898 }
 0x702   : > { %v1888_v15 = vrot.slane %v1880_v12, %v9567_v9  ;;  %v2239_v16 = vadd.f32 1.0, %v8899_v14  ;;  %v2066_v17 = vmul.f32 %v2065_v13, %v2057_v42 }
 0x704   : > { %v1889_v18 = vcombine.high %v1888_v15, %v1888_v15  ;;  %v2240_v19 = vmul.f32 0.5, %v2239_v16  ;;  %v2067_v20 = vpack.c.bf16 %v2066_v17, %v2066_v17 }
 0x706   : > { %1890 = vrot.lane.b32.xlu1 %v1889_v18, %s9287_s19  ;;  %v2241_v21 = vmul.f32 %v2240_v19, %v2232_v48  ;;  %2068 = vst.msk [vmem:[#allocation3 + $0x2] sm:$0x3] %vm1701_vm9, %v2067_v20 }
 0x708   : > { %v2242_v23 = vpack.c.bf16 %v2241_v21, %v2241_v21 }
 0x70a   : > { %2263 = vperm.xlu1 %8860, %v2259_v24   ;;  %v2250_v26 = vrot.slane %v2242_v23, %v9567_v9 }
 0x70c   : > { %v2251_v28 = vcombine.high %v2250_v26, %v2250_v26 }
 0x70e   : > { %2533 = vperm.xlu1 %8860, %v2339_v27   ;;  %2252 = vrot.lane.b32.xlu0 %v2251_v28, %s9287_s19  ;;  %s8690_s19 = sshll.u32 %s10439_s27, 5 }
 0x70f   : > { %s9988_s24 = scalar_lea.vmem %s10422_s18, %s8690_s19 }
 0x712   : > { %3250 = vperm.xlu1 %8860, %v3246_v29   ;;  %2526 = vperm.xlu0 %8859, %v2338_v30  }
 0x716   : > { %3517 = vperm.xlu1 %8860, %v3241_v31   ;;  %2268 = vperm.xlu0 %8859, %v2260_v32  }
 0x71a   : > { %3510 = vperm.xlu0 %8859, %v3240_v33  }
 0x71e   : > { %3255 = vperm.xlu0 %8859, %v3247_v34  }
 0x778   : > { %v1891_v35 = vpop.permute.xlu1 %1890 }
 0x779   : > { %1894 = vst.msk [vmem:[#allocation3] sm:$0x3] %vm1893_vm10, %v1891_v35 }
 0x780   : > { %v2253_v36 = vpop.permute.xlu0 %2252 }
 0x781   : > { %2255 = vst.msk [vmem:[#allocation3 + $0x2] sm:$0x3] %vm1893_vm10, %v2253_v36 }
 0x788   : > { %v8433_v37 = vld.sshfl [vmem:[#allocation3] sm:$0x33 pattern:$0x76325410] }
 0x789   : > { %v2284_v38 = vcombine.high %v8433_v37, %v8433_v37  ;;  %v2290_v39 = vsel %vm2288_vm11, %v8433_v37, 0  ;;  %v2264_v42 = vpop.permute.xlu1 %2263 }
 0x78b   : > { %8434 = vmatprep.subr.msk.bf16.mxu0 %vm2288_vm11, %v2284_v38 }
 0x78c   : > { %2296 = vmatpush1.bf16.msra.mxu0 %v2290_v39 }
 0x78f   : > { %8435 = vmatmul.mubr.msk.bf16.vlgmr.msra.gmra.mrb[20].mxu0 %vm1515_vm8, %v8866_v40 }
 0x790   : > { %2640 = vmatprep.mubr.f32.mxu0 %v9280_v10 }
 0x791   : > { %v9604_v41 = vpop.permute.xlu0 %2526 }
 0x795   : > { %v2269_v48 = vpop.permute.xlu0 %2268 }
 0x862   : > { %v2329_v43 = vpop.f32.mrb[20].mxu0 }
 0x863   : > { %v2330_v44 = vadd.f32 %v2329_v43, %v2264_v42  ;;  %v2331_v45 = vpop.f32.mrb[21].mxu0 }
 0x864   : > { %v2332_v46 = vadd.f32 %v2331_v45, %v2264_v42  ;;  %v2333_v47 = vpop.f32.mrb[22].mxu0 }
 0x865   : > { %v2335_v50 = vpop.f32.mrb[23].mxu0  ;;  %v2570_v52 = vrot.slane %v2330_v44, 4  ;;  %v2334_v53 = vadd.f32 %v2333_v47, %v2269_v48 }
 0x866   : > { %v9606_v49 = vadd.f32 %v2335_v50, %v2269_v48  ;;  %8436 = vmatprep.subr.msk.mxu1 %vm1468_vm7, %v2332_v46  ;;  %v2571_v51 = vrot.slane %v2332_v46, 4 }
 0x867   : > { %8437 = vmatpush1.msk.msra.mxu1 %vm1468_vm7, %v2330_v44  ;;  %v3017_v54 = vrot.slane %v2334_v53, 4 }
 0x868   : > { %8438 = vmatmul.mubr.msk.f32.vlgmr.msra.gmra.mrb[22].mxu1 %vm1515_vm8, %v9282_v22  ;;  %8444 = vmatprep.subr.msk.mxu0 %vm1468_vm7, %v2571_v51  ;;  %v3018_v55 = vrot.slane %v9606_v49, 4 }
 0x869   : > { %8445 = vmatpush1.msk.msra.mxu0 %vm1468_vm7, %v2570_v52  ;;  %2501 = vmatprep.mubr.f32.mxu1 %v9280_v10 }
 0x86a   : > { %8446 = vmatmul.mubr.msk.f32.vlgmr.msra.gmra.mrb[18].mxu0 %vm1515_vm8, %v9282_v22  ;;  %8451 = vmatprep.subr.msk.mxu0 %vm1468_vm7, %v9606_v49 }
 0x86b   : > { %8452 = vmatpush1.msk.msra.mxu0 %vm1468_vm7, %v2334_v53  ;;  %2867 = vmatprep.mubr.f32.mxu0 %v9280_v10 }
 0x86c   : > { %8459 = vmatprep.subr.msk.mxu0 %vm1468_vm7, %v3018_v55 }
 0x86e   : > { %8453 = vmatmul.mubr.msk.f32.vlgmr.msra.gmra.mrb[24].mxu0 %vm1515_vm8, %v9282_v22 }
 0x86f   : > { %8460 = vmatpush1.msk.msra.mxu0 %vm1468_vm7, %v3017_v54  ;;  %3087 = vmatprep.mubr.f32.mxu0 %v9280_v10 }
 0x872   : > { %8461 = vmatmul.mubr.msk.f32.vlgmr.msra.gmra.mrb[26].mxu0 %vm1515_vm8, %v9282_v22 }
 0x873   : > { %3313 = vmatprep.mubr.bf16.mxu0 %v9279_v3 }
 0x93b   : > { %v2412_v57 = vpop.f32.mrb[22].mxu1 }
 0x93c   : > { %v2417_v56 = vmul.f32 0.25, %v2412_v57  ;;  %v2414_v58 = vpop.f32.mrb[23].mxu1 }
 0x93d   : > { %v2418_v60 = vmul.f32 0.25, %v2414_v58  ;;  %v2642_v59 = vpop.f32.mrb[18].mxu0 }
 0x93e   : > { %v2422_v62 = vrot.slane %v2417_v56, %v9459_v25  ;;  %v2647_v63 = vmul.f32 0.25, %v2642_v59  ;;  %v2644_v61 = vpop.f32.mrb[19].mxu0 }
 0x93f   : > { %v2426_v0 = vrot.slane %v2418_v60, %v9459_v25  ;;  %v2648_v1 = vmul.f32 0.25, %v2644_v61 }
 0x940   : > { %v9632_v2 = vsub.f32 %v2330_v44, %v2422_v62  ;;  %v2652_v4 = vrot.slane %v2647_v63, %v9459_v25 }
 0x941   : > { %v9635_v5 = vsub.f32 %v2332_v46, %v2426_v0  ;;  %v2656_v6 = vrot.slane %v2648_v1, %v9459_v25  ;;  %v2869_v7 = vpop.f32.mrb[24].mxu0 }
 0x942   : > { %v9638_v8 = vsub.f32 %v2330_v44, %v2652_v4  ;;  %v2874_v11 = vmul.f32 0.25, %v2869_v7  ;;  %v2871_v12 = vpop.f32.mrb[25].mxu0  ;;  %v2429_v16 = vmul.f32 %v9632_v2, %v9632_v2 }
 0x943   : > { %v2430_v13 = vmul.f32 %v9635_v5, %v9635_v5  ;;  %v9642_v14 = vsub.f32 %v2332_v46, %v2656_v6  ;;  %v2875_v15 = vmul.f32 0.25, %v2871_v12 }
 0x944   : > { %v2659_v17 = vmul.f32 %v9638_v8, %v9638_v8  ;;  %v2879_v18 = vrot.slane %v2874_v11, %v9459_v25 }
 0x945   : > { %v2660_v19 = vmul.f32 %v9642_v14, %v9642_v14  ;;  %v2883_v20 = vrot.slane %v2875_v15, %v9459_v25  ;;  %8439 = vmatprep.subr.msk.mxu1 %vm1468_vm7, %v2430_v13  ;;  %v3089_v21 = vpop.f32.mrb[26].mxu0 }
 0x946   : > { %v9653_v24 = vsub.f32 %v2334_v53, %v2879_v18  ;;  %v3094_v23 = vmul.f32 0.25, %v3089_v21  ;;  %8440 = vmatpush1.msk.msra.mxu1 %vm1468_vm7, %v2429_v16  ;;  %v3091_v26 = vpop.f32.mrb[27].mxu0  ;;  %v2663_v30 = vrot.slane %v2659_v17, 4 }
 0x947   : > { %v2664_v27 = vrot.slane %v2660_v19, 4  ;;  %v9657_v28 = vsub.f32 %v9606_v49, %v2883_v20  ;;  %v3095_v29 = vmul.f32 0.25, %v3091_v26  ;;  %8441 = vmatmul.mubr.msk.f32.vlgmr.msra.gmra.mrb[24].mxu1 %vm1515_vm8, %v9282_v22  ;;  %v2534_v19 = vpop.permute.xlu1 %2533 }
 0x948   : > { %v3099_v31 = vrot.slane %v3094_v23, %v9459_v25  ;;  %2733 = vmatprep.mubr.f32.mxu1 %v9280_v10  ;;  %v2886_v34 = vmul.f32 %v9653_v24, %v9653_v24  ;;  %v2756_v23 = vrot.slane %v9604_v41, 4 }
 0x949   : > { %v2887_v32 = vmul.f32 %v9657_v28, %v9657_v28  ;;  %v3103_v33 = vrot.slane %v3095_v29, %v9459_v25  ;;  %8447 = vmatprep.subr.msk.mxu1 %vm1468_vm7, %v2664_v27 }
 0x94a   : > { %v9669_v35 = vsub.f32 %v2334_v53, %v3099_v31  ;;  %8448 = vmatpush1.msk.msra.mxu1 %vm1468_vm7, %v2663_v30  ;;  %v2760_v31 = vrot.slane %v2534_v19, 4 }
 0x94b   : > { %v9673_v36 = vsub.f32 %v9606_v49, %v3103_v33  ;;  %8449 = vmatmul.mubr.msk.f32.vlgmr.msra.gmra.mrb[26].mxu1 %vm1515_vm8, %v9282_v22  ;;  %8454 = vmatprep.subr.msk.mxu1 %vm1468_vm7, %v2887_v32 }
 0x94c   : > { %v3106_v37 = vmul.f32 %v9669_v35, %v9669_v35  ;;  %8455 = vmatpush1.msk.msra.mxu1 %vm1468_vm7, %v2886_v34  ;;  %2958 = vmatprep.mubr.f32.mxu1 %v9280_v10 }
 0x94d   : > { %v3107_v38 = vmul.f32 %v9673_v36, %v9673_v36 }
 0x94e   : > { %v3110_v40 = vrot.slane %v3106_v37, 4 }
 0x94f   : > { %v3111_v39 = vrot.slane %v3107_v38, 4  ;;  %8456 = vmatmul.mubr.msk.f32.vlgmr.msra.gmra.mrb[28].mxu1 %vm1515_vm8, %v9282_v22 }
 0x950   : > { %3180 = vmatprep.mubr.f32.mxu1 %v9280_v10 }
 0x951   : > { %8462 = vmatprep.subr.msk.mxu1 %vm1468_vm7, %v3111_v39 }
 0x952   : > { %8463 = vmatpush1.msk.msra.mxu1 %vm1468_vm7, %v3110_v40 }
 0x953   : > { %8464 = vmatmul.mubr.msk.f32.vlgmr.msra.gmra.mrb[30].mxu1 %vm1515_vm8, %v9282_v22 }
 0x954   : > { %3394 = vmatprep.mubr.f32.mxu1 %v9280_v10 }
 0xa1a   : > { %v2503_v42 = vpop.f32.mrb[24].mxu1 }
 0xa1b   : > { %v2508_v43 = vmul.f32 0.25, %v2503_v42  ;;  %v2505_v44 = vpop.f32.mrb[25].mxu1 }
 0xa1c   : > { %v2509_v45 = vmul.f32 0.25, %v2505_v44 }
 0xa1d   : > { %v2510_v46 = vadd.f32 1e-06, %v2508_v43 }
 0xa1e   : > { %v2511_v47 = vadd.f32 1e-06, %v2509_v45  ;;  %v2735_v48 = vpop.f32.mrb[26].mxu1 }
 0xa1f   : > { %8900 = vrsqrt.f32 %v2510_v46  ;;  %v2740_v50 = vmul.f32 0.25, %v2735_v48  ;;  %v2737_v49 = vpop.f32.mrb[27].mxu1 }
 0xa20   : > { %8902 = vrsqrt.f32 %v2511_v47  ;;  %v2741_v51 = vmul.f32 0.25, %v2737_v49 }
 0xa21   : > { %v2742_v52 = vadd.f32 1e-06, %v2740_v50 }
 0xa22   : > { %v2743_v53 = vadd.f32 1e-06, %v2741_v51  ;;  %v2960_v55 = vpop.f32.mrb[28].mxu1 }
 0xa23   : > { %8904 = vrsqrt.f32 %v2742_v52  ;;  %v2965_v54 = vmul.f32 0.25, %v2960_v55  ;;  %v2962_v57 = vpop.f32.mrb[29].mxu1 }
 0xa24   : > { %8906 = vrsqrt.f32 %v2743_v53  ;;  %v2966_v56 = vmul.f32 0.25, %v2962_v57 }
 0xa25   : > { %v2967_v58 = vadd.f32 1e-06, %v2965_v54 }
 0xa26   : > { %v2968_v60 = vadd.f32 1e-06, %v2966_v56  ;;  %v3182_v59 = vpop.f32.mrb[30].mxu1 }
 0xa27   : > { %8908 = vrsqrt.f32 %v2967_v58  ;;  %v3187_v62 = vmul.f32 0.25, %v3182_v59  ;;  %v3184_v63 = vpop.f32.mrb[31].mxu1 }
 0xa28   : > { %8910 = vrsqrt.f32 %v2968_v60  ;;  %v3188_v61 = vmul.f32 0.25, %v3184_v63 }
 0xa29   : > { %v8901_v0 = vpop.eup %8900  ;;  %v3189_v1 = vadd.f32 1e-06, %v3187_v62 }
 0xa2a   : > { %v8903_v4 = vpop.eup %8902  ;;  %v2517_v6 = vrot.slane %v8901_v0, %v9459_v25  ;;  %v3190_v7 = vadd.f32 1e-06, %v3188_v61 }
 0xa2b   : > { %v2521_v11 = vrot.slane %v8903_v4, %v9459_v25  ;;  %8912 = vrsqrt.f32 %v3189_v1 }
 0xa2c   : > { %v2522_v12 = vmul.f32 %v2517_v6, %v9632_v2  ;;  %8914 = vrsqrt.f32 %v3190_v7 }
 0xa2d   : > { %v8905_v13 = vpop.eup %8904  ;;  %v2523_v15 = vmul.f32 %v2521_v11, %v9635_v5 }
 0xa2e   : > { %v8907_v16 = vpop.eup %8906  ;;  %v2529_v17 = vmul.f32 %v9604_v41, %v2522_v12  ;;  %v2749_v18 = vrot.slane %v8905_v13, %v9459_v25 }
 0xa2f   : > { %v2530_v20 = vmul.f32 %v9604_v41, %v2523_v15  ;;  %v2753_v21 = vrot.slane %v8907_v16, %v9459_v25 }
 0xa30   : > { %v9701_v26 = vadd.f32 %v2534_v19, %v2529_v17  ;;  %v2754_v2 = vmul.f32 %v2749_v18, %v9638_v8 }
 0xa31   : > { %v8909_v27 = vpop.eup %8908  ;;  %v9704_v29 = vadd.f32 %v2534_v19, %v2530_v20  ;;  %v2755_v5 = vmul.f32 %v2753_v21, %v9642_v14 }
 0xa32   : > { %v8911_v30 = vpop.eup %8910  ;;  %v2538_v32 = vmul.f32 %v9701_v26, %v9701_v26  ;;  %v2758_v33 = vmul.f32 %v2756_v23, %v2754_v2  ;;  %v2974_v34 = vrot.slane %v8909_v27, %v9459_v25 }
 0xa33   : > { %v2539_v37 = vmul.f32 %v9704_v29, %v9704_v29  ;;  %v2759_v38 = vmul.f32 %v2756_v23, %v2755_v5  ;;  %v2978_v39 = vrot.slane %v8911_v30, %v9459_v25 }
 0xa34   : > { %v2540_v8 = vmul.f32 %v2538_v32, %v9701_v26  ;;  %v9714_v40 = vadd.f32 %v2760_v31, %v2758_v33  ;;  %v2979_v14 = vmul.f32 %v2974_v34, %v9653_v24 }
 0xa35   : > { %v8913_v42 = vpop.eup %8912  ;;  %v2541_v43 = vmul.f32 %v2539_v37, %v9704_v29  ;;  %v9718_v44 = vadd.f32 %v2760_v31, %v2759_v38  ;;  %v2980_v45 = vmul.f32 %v2978_v39, %v9657_v28 }
 0xa36   : > { %v8915_v46 = vpop.eup %8914  ;;  %v2542_v47 = vmul.f32 0.044715, %v2540_v8  ;;  %v2764_v48 = vmul.f32 %v9714_v40, %v9714_v40  ;;  %v2981_v50 = vmul.f32 %v2979_v14, %v9604_v41  ;;  %v3196_v49 = vrot.slane %v8913_v42, %v9459_v25 }
 0xa37   : > { %v2543_v51 = vmul.f32 0.044715, %v2541_v43  ;;  %v2765_v24 = vmul.f32 %v9718_v44, %v9718_v44  ;;  %v2982_v52 = vmul.f32 %v2980_v45, %v9604_v41  ;;  %v3200_v53 = vrot.slane %v8915_v46, %v9459_v25 }
 0xa38   : > { %v2544_v55 = vadd.f32 %v2542_v47, %v9701_v26  ;;  %v2766_v28 = vmul.f32 %v2764_v48, %v9714_v40  ;;  %v9731_v54 = vadd.f32 %v2981_v50, %v2534_v19  ;;  %v3201_v57 = vmul.f32 %v3196_v49, %v9669_v35 }
 0xa39   : > { %v2545_v56 = vadd.f32 %v2543_v51, %v9704_v29  ;;  %v2767_v58 = vmul.f32 %v2765_v24, %v9718_v44  ;;  %v9736_v60 = vadd.f32 %v2982_v52, %v2534_v19  ;;  %v3202_v59 = vmul.f32 %v3200_v53, %v9673_v36 }
 0xa3a   : > { %v2546_v62 = vmul.f32 0.7978846, %v2544_v55  ;;  %v2768_v41 = vmul.f32 0.044715, %v2766_v28  ;;  %v2985_v63 = vmul.f32 %v9731_v54, %v9731_v54  ;;  %v3203_v61 = vmul.f32 %v3201_v57, %v2756_v23 }
 0xa3b   : > { %v2547_v0 = vmul.f32 0.7978846, %v2545_v56  ;;  %v2769_v1 = vmul.f32 0.044715, %v2767_v58  ;;  %v2986_v4 = vmul.f32 %v9736_v60, %v9736_v60  ;;  %v3204_v35 = vmul.f32 %v3202_v59, %v2756_v23 }
 0xa3c   : > { %8916 = vtanh.f32 %v2546_v62  ;;  %v2770_v6 = vadd.f32 %v2768_v41, %v9714_v40  ;;  %v2987_v7 = vmul.f32 %v2985_v63, %v9731_v54  ;;  %v9745_v11 = vadd.f32 %v3203_v61, %v2760_v31 }
 0xa3d   : > { %8918 = vtanh.f32 %v2547_v0  ;;  %v2771_v36 = vadd.f32 %v2769_v1, %v9718_v44  ;;  %v2988_v12 = vmul.f32 %v2986_v4, %v9736_v60  ;;  %v9749_v13 = vadd.f32 %v3204_v35, %v2760_v31 }
 0xa3e   : > { %v2772_v15 = vmul.f32 0.7978846, %v2770_v6  ;;  %v2989_v16 = vmul.f32 0.044715, %v2987_v7  ;;  %v3207_v17 = vmul.f32 %v9745_v11, %v9745_v11 }
 0xa3f   : > { %v2773_v18 = vmul.f32 0.7978846, %v2771_v36  ;;  %v2990_v19 = vmul.f32 0.044715, %v2988_v12  ;;  %v3208_v20 = vmul.f32 %v9749_v13, %v9749_v13 }
 0xa40   : > { %8920 = vtanh.f32 %v2772_v15  ;;  %v2991_v21 = vadd.f32 %v2989_v16, %v9731_v54  ;;  %v3209_v23 = vmul.f32 %v3207_v17, %v9745_v11 }
 0xa41   : > { %8922 = vtanh.f32 %v2773_v18  ;;  %v2992_v2 = vadd.f32 %v2990_v19, %v9736_v60  ;;  %v3210_v27 = vmul.f32 %v3208_v20, %v9749_v13  ;;  %v9781_v19 = vpop.permute.xlu1 %3250 }
 0xa42   : > { %v2993_v5 = vmul.f32 0.7978846, %v2991_v21  ;;  %v3211_v30 = vmul.f32 0.044715, %v3209_v23 }
 0xa43   : > { %v2994_v31 = vmul.f32 0.7978846, %v2992_v2  ;;  %v3212_v32 = vmul.f32 0.044715, %v3210_v27 }
 0xa44   : > { %8924 = vtanh.f32 %v2993_v5  ;;  %v3213_v33 = vadd.f32 %v3211_v30, %v9745_v11 }
 0xa45   : > { %8926 = vtanh.f32 %v2994_v31  ;;  %v3214_v34 = vadd.f32 %v3212_v32, %v9749_v13 }
 0xa46   : > { %v8917_v37 = vpop.eup %8916  ;;  %v3215_v38 = vmul.f32 0.7978846, %v3213_v33 }
 0xa47   : > { %v8919_v39 = vpop.eup %8918  ;;  %v2550_v8 = vadd.f32 1.0, %v8917_v37  ;;  %v3216_v14 = vmul.f32 0.7978846, %v3214_v34 }
 0xa48   : > { %v2551_v42 = vadd.f32 1.0, %v8919_v39  ;;  %8928 = vtanh.f32 %v3215_v38 }
 0xa49   : > { %v2552_v43 = vmul.f32 0.5, %v2550_v8  ;;  %8930 = vtanh.f32 %v3216_v14 }
 0xa4a   : > { %v8921_v45 = vpop.eup %8920  ;;  %v2553_v46 = vmul.f32 0.5, %v2551_v42 }
 0xa4b   : > { %v8923_v47 = vpop.eup %8922  ;;  %v2554_v48 = vmul.f32 %v2552_v43, %v9701_v26  ;;  %v2776_v50 = vadd.f32 1.0, %v8921_v45 }
 0xa4c   : > { %v2555_v49 = vmul.f32 %v2553_v46, %v9704_v29  ;;  %v2777_v51 = vadd.f32 1.0, %v8923_v47 }
 0xa4d   : > { %v2778_v24 = vmul.f32 0.5, %v2776_v50 }
 0xa4e   : > { %v8925_v52 = vpop.eup %8924  ;;  %v8442_v53 = vpack.c.bf16 %v2555_v49, %v2554_v48  ;;  %v2779_v55 = vmul.f32 0.5, %v2777_v51 }
 0xa4f   : > { %v8927_v28 = vpop.eup %8926  ;;  %v2780_v57 = vmul.f32 %v2778_v24, %v9714_v40  ;;  %v2997_v56 = vadd.f32 1.0, %v8925_v52 }
 0xa50   : > { %8443 = vst.sshfl [vmem:[#allocation4] sm:$0x33 pattern:$0x76325410] %v8442_v53  ;;  %v2781_v58 = vmul.f32 %v2779_v55, %v9718_v44  ;;  %v2998_v59 = vadd.f32 1.0, %v8927_v28  ;;  %v9818_v28 = vpop.permute.xlu0 %3510 }
 0xa51   : > { %v2999_v62 = vmul.f32 0.5, %v2997_v56 }
 0xa52   : > { %v8929_v41 = vpop.eup %8928  ;;  %v8450_v63 = vpack.c.bf16 %v2781_v58, %v2780_v57  ;;  %v3000_v26 = vmul.f32 0.5, %v2998_v59  ;;  %v9821_v58 = vpop.permute.xlu1 %3517 }
 0xa53   : > { %v8931_v61 = vpop.eup %8930  ;;  %v3001_v29 = vmul.f32 %v2999_v62, %v9731_v54  ;;  %v3219_v0 = vadd.f32 1.0, %v8929_v41 }
 0xa54   : > { %v2793_v1 = vrot.slane %v8450_v63, %v9567_v9  ;;  %v3002_v4 = vmul.f32 %v3000_v26, %v9736_v60  ;;  %v3220_v35 = vadd.f32 1.0, %v8931_v61  ;;  %v9775_v60 = vld [vmem:[%s10417_s13] sm:$0xff]  }
 0xa55   : > { %v3221_v6 = vmul.f32 0.5, %v3219_v0 }
 0xa56   : > { %v2794_v40 = vcombine.high %v2793_v1, %v2793_v1  ;;  %v8457_v7 = vpack.c.bf16 %v3002_v4, %v3001_v29  ;;  %v3222_v36 = vmul.f32 0.5, %v3220_v35 }
 0xa57   : > { %v3223_v44 = vmul.f32 %v3221_v6, %v9745_v11  ;;  %v8467_v12 = vld.sshfl [vmem:[#allocation4] sm:$0x33 pattern:$0x76325410] }
 0xa58   : > { %2796 = vst [vmem:[#allocation4 + $0x4] sm:$0xf] %v2794_v40  ;;  %8458 = vst.sshfl [vmem:[#allocation4 + $0x8] sm:$0x33 pattern:$0x76325410] %v8457_v7  ;;  %v3224_v15 = vmul.f32 %v3222_v36, %v9749_v13  ;;  %v3271_v16 = vcombine.high %v8467_v12, %v8467_v12 }
 0xa59   : > { %v3276_v54 = vsel %vm2288_vm11, %v8467_v12, 0 }
 0xa5a   : > { %v8465_v17 = vpack.c.bf16 %v3224_v15, %v3223_v44  ;;  %8468 = vmatprep.subr.msk.bf16.mxu0 %vm2288_vm11, %v3271_v16  ;;  %v9837_v16 = vld [vmem:[%s9834_s21] sm:$0x1] }
 0xa5b   : > { %3282 = vmatpush1.bf16.msra.mxu0 %v3276_v54 }
 0xa5c   : > { %v3236_v18 = vrot.slane %v8465_v17, %v9567_v9 }
 0xa5e   : > { %v3237_v11 = vcombine.high %v3236_v18, %v3236_v18  ;;  %8469 = vmatmul.mubr.msk.bf16.vlgmr.msra.gmra.mrb[28].mxu0 %vm1515_vm8, %v9775_v60  ;;  %v9840_v18 = vpop.permute.xlu0 %3255 }
 0xa5f   : > { %3607 = vmatprep.mubr.f32.mxu0 %v9280_v10 }
 0xa60   : > { %3239 = vst [vmem:[#allocation4 + $0xc] sm:$0xf] %v3237_v11 }
 0xb31   : > { %v3315_v13 = vpop.f32.mrb[28].mxu0 }
 0xb32   : > { %v3317_v20 = vpop.f32.mrb[29].mxu0  ;;  %v9789_v2 = vadd.f32 %v3315_v13, %v9781_v19 }
 0xb33   : > { %v9784_v21 = vadd.f32 %v3317_v20, %v9781_v19  ;;  %v9786_v23 = vpop.f32.mrb[30].mxu0 }
 0xb34   : > { %v9791_v9 = vpop.f32.mrb[31].mxu0  ;;  %v3626_v14 = vrot.slane %v9789_v2, 4  ;;  %v9856_v20 = vadd.f32 %v9786_v23, %v9840_v18 }
 0xb35   : > { %8470 = vmatprep.subr.msk.mxu1 %vm1468_vm7, %v9784_v21  ;;  %v3627_v8 = vrot.slane %v9784_v21, 4  ;;  %v9845_v13 = vadd.f32 %v9791_v9, %v9840_v18 }
 0xb36   : > { %8471 = vmatpush1.msk.msra.mxu1 %vm1468_vm7, %v9789_v2 }
 0xb37   : > { %8472 = vmatmul.mubr.msk.f32.vlgmr.msra.gmra.mrb[32].mxu1 %vm1515_vm8, %v9282_v22 }
 0xb38   : > { %3485 = vmatprep.mubr.f32.mxu1 %v9280_v10 }
 0xc0a   : > { %v3396_v27 = vpop.f32.mrb[32].mxu1 }
 0xc0b   : > { %v3401_v5 = vmul.f32 0.25, %v3396_v27  ;;  %v3398_v30 = vpop.f32.mrb[33].mxu1 }
 0xc0c   : > { %v3402_v31 = vmul.f32 0.25, %v3398_v30 }
 0xc0d   : > { %v3406_v32 = vrot.slane %v3401_v5, %v9459_v25 }
 0xc0e   : > { %v3410_v33 = vrot.slane %v3402_v31, %v9459_v25 }
 0xc0f   : > { %v3411_v34 = vsub.f32 %v9789_v2, %v3406_v32 }
 0xc10   : > { %v3412_v37 = vsub.f32 %v9784_v21, %v3410_v33 }
 0xc11   : > { %v3413_v39 = vmul.f32 %v3411_v34, %v3411_v34 }
 0xc12   : > { %v3414_v38 = vmul.f32 %v3412_v37, %v3412_v37 }
 0xc14   : > { %8473 = vmatprep.subr.msk.mxu1 %vm1468_vm7, %v3414_v38 }
 0xc15   : > { %8474 = vmatpush1.msk.msra.mxu1 %vm1468_vm7, %v3413_v39 }
 0xc16   : > { %8475 = vmatmul.mubr.msk.f32.vlgmr.msra.gmra.mrb[34].mxu1 %vm1515_vm8, %v9282_v22  ;;  %8483 = vmatprep.subr.msk.mxu1 %vm1468_vm7, %v3627_v8  ;;  %v9869_v8 = vrot.slane %v9818_v28, 4 }
 0xc17   : > { %8484 = vmatpush1.msk.msra.mxu1 %vm1468_vm7, %v3626_v14  ;;  %3696 = vmatprep.mubr.f32.mxu1 %v9280_v10 }
 0xc1a   : > { %8485 = vmatmul.mubr.msk.f32.vlgmr.msra.gmra.mrb[36].mxu1 %vm1515_vm8, %v9282_v22 }
 0xc1b   : > { %3904 = vmatprep.mubr.f32.mxu1 %v9280_v10 }
 0xce9   : > { %v3487_v42 = vpop.f32.mrb[34].mxu1 }
 0xcea   : > { %v3492_v43 = vmul.f32 0.25, %v3487_v42  ;;  %v3489_v45 = vpop.f32.mrb[35].mxu1 }
 0xceb   : > { %v3493_v46 = vmul.f32 0.25, %v3489_v45 }
 0xcec   : > { %v3494_v47 = vadd.f32 1e-06, %v3492_v43  ;;  %v9872_v43 = vrot.slane %v9821_v58, 4 }
 0xced   : > { %v3495_v48 = vadd.f32 1e-06, %v3493_v46  ;;  %v3698_v50 = vpop.f32.mrb[36].mxu1 }
 0xcee   : > { %8932 = vrsqrt.f32 %v3494_v47  ;;  %v3700_v49 = vpop.f32.mrb[37].mxu1  ;;  %v3703_v0 = vmul.f32 0.25, %v3698_v50 }
 0xcef   : > { %8934 = vrsqrt.f32 %v3495_v48  ;;  %v3704_v61 = vmul.f32 0.25, %v3700_v49 }
 0xcf0   : > { %v3708_v40 = vrot.slane %v3703_v0, %v9459_v25 }
 0xcf1   : > { %v3712_v6 = vrot.slane %v3704_v61, %v9459_v25 }
 0xcf2   : > { %v3713_v36 = vsub.f32 %v9789_v2, %v3708_v40 }
 0xcf3   : > { %v3714_v7 = vsub.f32 %v9784_v21, %v3712_v6 }
 0xcf4   : > { %v3715_v12 = vmul.f32 %v3713_v36, %v3713_v36 }
 0xcf5   : > { %v3716_v44 = vmul.f32 %v3714_v7, %v3714_v7 }
 0xcf6   : > { %v3719_v11 = vrot.slane %v3715_v12, 4 }
 0xcf7   : > { %v3720_v54 = vrot.slane %v3716_v44, 4 }
 0xcf8   : > { %v8933_v51 = vpop.eup %8932 }
 0xcf9   : > { %v8935_v24 = vpop.eup %8934  ;;  %v3501_v52 = vrot.slane %v8933_v51, %v9459_v25 }
 0xcfa   : > { %v3505_v53 = vrot.slane %v8935_v24, %v9459_v25 }
 0xcfb   : > { %v3506_v55 = vmul.f32 %v3501_v52, %v3411_v34 }
 0xcfc   : > { %v3507_v57 = vmul.f32 %v3505_v53, %v3412_v37 }
 0xcfd   : > { %v3513_v56 = vmul.f32 %v9818_v28, %v3506_v55 }
 0xcfe   : > { %v3514_v59 = vmul.f32 %v9818_v28, %v3507_v57 }
 0xcff   : > { %v3520_v62 = vadd.f32 %v9821_v58, %v3513_v56 }
 0xd00   : > { %v3521_v41 = vadd.f32 %v9821_v58, %v3514_v59 }
 0xd01   : > { %v8476_v63 = vmul.f32 -1.442695, %v3520_v62 }
 0xd02   : > { %v8477_v26 = vmul.f32 -1.442695, %v3521_v41 }
 0xd03   : > { %8936 = vpow2.f32 %v8476_v63 }
 0xd04   : > { %8938 = vpow2.f32 %v8477_v26 }
 0xd0d   : > { %v8937_v29 = vpop.eup %8936 }
 0xd0e   : > { %v8939_v1 = vpop.eup %8938  ;;  %v3528_v4 = vadd.f32 1.0, %v8937_v29 }
 0xd0f   : > { %v3529_v35 = vadd.f32 1.0, %v8939_v1 }
 0xd11   : > { %8940 = vrcp.f32 %v3529_v35  ;;  %v4212_v35 = vrot.slane %v9856_v20, 4 }
 0xd12   : > { %8942 = vrcp.f32 %v3528_v4  ;;  %v4213_v4 = vrot.slane %v9845_v13, 4 }
 0xd1b   : > { %v8941_v15 = vpop.eup %8940 }
 0xd1c   : > { %v8943_v17 = vpop.eup %8942  ;;  %8478 = vmatprep.subr.msk.mxu0 %vm1468_vm7, %v8941_v15 }
 0xd1d   : > { %8479 = vmatpush1.msk.msra.mxu0 %vm1468_vm7, %v8943_v17 }
 0xd1e   : > { %8480 = vmatmul.mubr.msk.f32.vlgmr.msra.gmra.mrb[32].mxu0 %vm1515_vm8, %v9837_v16  ;;  %8486 = vmatprep.subr.msk.mxu0 %vm1468_vm7, %v3720_v54 }
 0xd1f   : > { %8487 = vmatpush1.msk.msra.mxu0 %vm1468_vm7, %v3719_v11  ;;  %3789 = vmatprep.mubr.f32.mxu0 %v9280_v10 }
 0xd20   : > { %8496 = vmatprep.subr.msk.mxu0 %vm1468_vm7, %v9845_v13 }
 0xd22   : > { %8488 = vmatmul.mubr.msk.f32.vlgmr.msra.gmra.mrb[34].mxu0 %vm1515_vm8, %v9282_v22 }
 0xd23   : > { %8497 = vmatpush1.msk.msra.mxu0 %vm1468_vm7, %v9856_v20  ;;  %3993 = vmatprep.mubr.f32.mxu0 %v9280_v10 }
 0xd26   : > { %8498 = vmatmul.mubr.msk.f32.vlgmr.msra.gmra.mrb[36].mxu0 %vm1515_vm8, %v9282_v22 }
 0xd27   : > { %4193 = vmatprep.mubr.f32.mxu0 %v9280_v10 }
 0xdf1   : > { %v3609_v21 = vpop.f32.mrb[32].mxu0 }
 0xdf2   : > { %v3611_v2 = vpop.f32.mrb[33].mxu0  ;;  %v8481_v6 = vmul.f32 -1.442695, %v3609_v21 }
 0xdf3   : > { %v8482_v40 = vmul.f32 -1.442695, %v3611_v2 }
 0xdf5   : > { %v3791_v9 = vpop.f32.mrb[34].mxu0 }
 0xdf6   : > { %v3796_v27 = vmul.f32 0.25, %v3791_v9  ;;  %v3793_v5 = vpop.f32.mrb[35].mxu0 }
 0xdf7   : > { %v3797_v23 = vmul.f32 0.25, %v3793_v5 }
 0xdf8   : > { %v3798_v30 = vadd.f32 1e-06, %v3796_v27 }
 0xdf9   : > { %v3799_v31 = vadd.f32 1e-06, %v3797_v23  ;;  %v3995_v32 = vpop.f32.mrb[36].mxu0 }
 0xdfa   : > { %8944 = vrsqrt.f32 %v3798_v30  ;;  %v3997_v33 = vpop.f32.mrb[37].mxu0  ;;  %v4000_v57 = vmul.f32 0.25, %v3995_v32 }
 0xdfb   : > { %8946 = vrsqrt.f32 %v3799_v31  ;;  %v4001_v55 = vmul.f32 0.25, %v3997_v33 }
 0xdfc   : > { %v4005_v59 = vrot.slane %v4000_v57, %v9459_v25 }
 0xdfd   : > { %v4009_v56 = vrot.slane %v4001_v55, %v9459_v25 }
 0xdfe   : > { %v4010_v26 = vsub.f32 %v9856_v20, %v4005_v59 }
 0xdff   : > { %v4011_v41 = vsub.f32 %v9845_v13, %v4009_v56 }
 0xe00   : > { %v4012_v1 = vmul.f32 %v4010_v26, %v4010_v26 }
 0xe01   : > { %v4013_v0 = vmul.f32 %v4011_v41, %v4011_v41 }
 0xe04   : > { %v8945_v34 = vpop.eup %8944 }
 0xe05   : > { %v8947_v37 = vpop.eup %8946  ;;  %v3805_v38 = vrot.slane %v8945_v34, %v9459_v25 }
 0xe06   : > { %v3809_v39 = vrot.slane %v8947_v37, %v9459_v25 }
 0xe07   : > { %v3810_v14 = vmul.f32 %v3805_v38, %v3713_v36 }
 0xe08   : > { %v3811_v42 = vmul.f32 %v3809_v39, %v3714_v7 }
 0xe09   : > { %v3814_v45 = vmul.f32 %v9869_v8, %v3810_v14 }
 0xe0a   : > { %v3815_v46 = vmul.f32 %v9869_v8, %v3811_v42 }
 0xe0b   : > { %v3818_v47 = vadd.f32 %v9872_v43, %v3814_v45 }
 0xe0c   : > { %v3819_v48 = vadd.f32 %v9872_v43, %v3815_v46 }
 0xe0d   : > { %v8489_v50 = vmul.f32 -1.442695, %v3818_v47 }
 0xe0e   : > { %v8490_v49 = vmul.f32 -1.442695, %v3819_v48 }
 0xe0f   : > { %8948 = vpow2.f32 %v8489_v50 }
 0xe10   : > { %8950 = vpow2.f32 %v8490_v49 }
 0xe19   : > { %v8949_v51 = vpop.eup %8948 }
 0xe1a   : > { %v8951_v24 = vpop.eup %8950  ;;  %v3826_v52 = vadd.f32 1.0, %v8949_v51 }
 0xe1b   : > { %v3827_v53 = vadd.f32 1.0, %v8951_v24 }
 0xe1c   : > { %8952 = vrcp.f32 %v3826_v52 }
 0xe1d   : > { %8954 = vrcp.f32 %v3827_v53 }
 0xe1e   : > { %8956 = vpow2.f32 %v8481_v6 }
 0xe1f   : > { %8958 = vpow2.f32 %v8482_v40 }
 0xe26   : > { %v8953_v62 = vpop.eup %8952 }
 0xe27   : > { %v8955_v63 = vpop.eup %8954  ;;  %v3834_v29 = vrot.slane %v8953_v62, 4 }
 0xe28   : > { %v3835_v61 = vrot.slane %v8955_v63, 4  ;;  %v8957_v21 = vpop.eup %8956 }
 0xe29   : > { %v8959_v2 = vpop.eup %8958  ;;  %v3620_v32 = vadd.f32 1.0, %v8957_v21 }
 0xe2a   : > { %8491 = vmatprep.subr.msk.mxu1 %vm1468_vm7, %v3835_v61  ;;  %v3621_v34 = vadd.f32 1.0, %v8959_v2 }
 0xe2b   : > { %8492 = vmatpush1.msk.msra.mxu1 %vm1468_vm7, %v3834_v29 }
 0xe2c   : > { %8493 = vmatmul.mubr.msk.f32.vlgmr.msra.gmra.mrb[38].mxu1 %vm1515_vm8, %v9837_v16  ;;  %8499 = vmatprep.subr.msk.mxu1 %vm1468_vm7, %v4013_v0 }
 0xe2d   : > { %8500 = vmatpush1.msk.msra.mxu1 %vm1468_vm7, %v4012_v1  ;;  %4084 = vmatprep.mubr.f32.mxu1 %v9280_v10 }
 0xe2e   : > { %8509 = vmatprep.subr.msk.mxu1 %vm1468_vm7, %v4213_v4 }
 0xe30   : > { %8501 = vmatmul.mubr.msk.f32.vlgmr.msra.gmra.mrb[40].mxu1 %vm1515_vm8, %v9282_v22 }
 0xe31   : > { %8510 = vmatpush1.msk.msra.mxu1 %vm1468_vm7, %v4212_v35  ;;  %4282 = vmatprep.mubr.f32.mxu1 %v9280_v10 }
 0xe34   : > { %8511 = vmatmul.mubr.msk.f32.vlgmr.msra.gmra.mrb[42].mxu1 %vm1515_vm8, %v9282_v22 }
 0xe35   : > { %4486 = vmatprep.mubr.f32.mxu1 %v9280_v10 }
 0xeff   : > { %v3906_v7 = vpop.f32.mrb[38].mxu1 }
 0xf00   : > { %v8494_v36 = vmul.f32 -1.442695, %v3906_v7  ;;  %v3908_v44 = vpop.f32.mrb[39].mxu1 }
 0xf01   : > { %v8495_v12 = vmul.f32 -1.442695, %v3908_v44 }
 0xf02   : > { %8960 = vpow2.f32 %v8494_v36 }
 0xf03   : > { %8962 = vpow2.f32 %v8495_v12  ;;  %v4086_v15 = vpop.f32.mrb[40].mxu1  ;;  %v8522_v12 = vld.sshfl [vmem:[#allocation4 + $0x4] sm:$0x33 pattern:$0x76325410] }
 0xf04   : > { %v4091_v17 = vmul.f32 0.25, %v4086_v15  ;;  %v4088_v54 = vpop.f32.mrb[41].mxu1 }
 0xf05   : > { %v4092_v11 = vmul.f32 0.25, %v4088_v54 }
 0xf06   : > { %v4093_v9 = vadd.f32 1e-06, %v4091_v17 }
 0xf07   : > { %v4094_v27 = vadd.f32 1e-06, %v4092_v11  ;;  %v4284_v5 = vpop.f32.mrb[42].mxu1  ;;  %v4514_v11 = vcombine.high %v8522_v12, %v8522_v12 }
 0xf08   : > { %8964 = vrsqrt.f32 %v4093_v9  ;;  %v4286_v23 = vpop.f32.mrb[43].mxu1  ;;  %v4289_v61 = vmul.f32 0.25, %v4284_v5 }
 0xf09   : > { %8966 = vrsqrt.f32 %v4094_v27  ;;  %v4290_v63 = vmul.f32 0.25, %v4286_v23 }
 0xf0a   : > { %v4294_v35 = vrot.slane %v4289_v61, %v9459_v25 }
 0xf0b   : > { %v4298_v4 = vrot.slane %v4290_v63, %v9459_v25 }
 0xf0c   : > { %v8961_v30 = vpop.eup %8960  ;;  %v4299_v40 = vsub.f32 %v9856_v20, %v4294_v35 }
 0xf0d   : > { %v8963_v31 = vpop.eup %8962  ;;  %v3917_v33 = vadd.f32 1.0, %v8961_v30  ;;  %v4300_v6 = vsub.f32 %v9845_v13, %v4298_v4  ;;  %v4516_v13 = vsel %vm2288_vm11, %v8522_v12, 0 }
 0xf0e   : > { %v3918_v37 = vadd.f32 1.0, %v8963_v31  ;;  %v4301_v36 = vmul.f32 %v4299_v40, %v4299_v40 }
 0xf0f   : > { %8968 = vrcp.f32 %v3917_v33  ;;  %v4302_v7 = vmul.f32 %v4300_v6, %v4300_v6 }
 0xf10   : > { %8970 = vrcp.f32 %v3918_v37  ;;  %v4305_v54 = vrot.slane %v4301_v36, 4 }
 0xf11   : > { %8972 = vrcp.f32 %v3620_v32  ;;  %v4306_v17 = vrot.slane %v4302_v7, 4 }
 0xf12   : > { %v8965_v38 = vpop.eup %8964  ;;  %8974 = vrcp.f32 %v3621_v34 }
 0xf13   : > { %v8967_v39 = vpop.eup %8966  ;;  %v4100_v14 = vrot.slane %v8965_v38, %v9459_v25 }
 0xf14   : > { %v4104_v42 = vrot.slane %v8967_v39, %v9459_v25 }
 0xf15   : > { %v4105_v45 = vmul.f32 %v4100_v14, %v4010_v26 }
 0xf16   : > { %v4106_v46 = vmul.f32 %v4104_v42, %v4011_v41 }
 0xf17   : > { %v4107_v47 = vmul.f32 %v4105_v45, %v9818_v28 }
 0xf18   : > { %v4108_v48 = vmul.f32 %v4106_v46, %v9818_v28 }
 0xf19   : > { %v8969_v50 = vpop.eup %8968  ;;  %v4109_v49 = vadd.f32 %v4107_v47, %v9821_v58 }
 0xf1a   : > { %v8971_v51 = vpop.eup %8970  ;;  %v8182_v24 = vrot.slane %v8969_v50, 7  ;;  %v4110_v52 = vadd.f32 %v4108_v48, %v9821_v58 }
 0xf1b   : > { %v8973_v53 = vpop.eup %8972  ;;  %v8183_v55 = vrot.slane %v8971_v51, 7  ;;  %v8502_v57 = vmul.f32 -1.442695, %v4109_v49 }
 0xf1c   : > { %v8975_v56 = vpop.eup %8974  ;;  %v9906_v59 = vsel %vm8246_vm12, %v8973_v53, %v8182_v24  ;;  %v8503_v62 = vmul.f32 -1.442695, %v4110_v52 }
 0xf1d   : > { %v9909_v41 = vsel %vm8246_vm12, %v8975_v56, %v8183_v55  ;;  %8976 = vpow2.f32 %v8502_v57 }
 0xf1e   : > { %8978 = vpow2.f32 %v8503_v62 }
 0xf27   : > { %v8977_v26 = vpop.eup %8976 }
 0xf28   : > { %v8979_v29 = vpop.eup %8978  ;;  %v4117_v0 = vadd.f32 1.0, %v8977_v26 }
 0xf29   : > { %v4118_v1 = vadd.f32 1.0, %v8979_v29 }
 0xf2b   : > { %8980 = vrcp.f32 %v4118_v1 }
 0xf2c   : > { %8982 = vrcp.f32 %v4117_v0 }
 0xf35   : > { %v8981_v44 = vpop.eup %8980 }
 0xf36   : > { %v8983_v15 = vpop.eup %8982  ;;  %8504 = vmatprep.subr.msk.mxu0 %vm1468_vm7, %v8981_v44 }
 0xf37   : > { %8505 = vmatpush1.msk.msra.mxu0 %vm1468_vm7, %v8983_v15 }
 0xf38   : > { %8506 = vmatmul.mubr.msk.f32.vlgmr.msra.gmra.mrb[38].mxu0 %vm1515_vm8, %v9837_v16  ;;  %8512 = vmatprep.subr.msk.mxu0 %vm1468_vm7, %v4306_v17 }
 0xf39   : > { %8513 = vmatpush1.msk.msra.mxu0 %vm1468_vm7, %v4305_v54  ;;  %4375 = vmatprep.mubr.f32.mxu0 %v9280_v10 }
 0xf3a   : > { %8523 = vmatprep.subr.msk.bf16.mxu0 %vm2288_vm11, %v4514_v11 }
 0xf3c   : > { %8514 = vmatmul.mubr.msk.f32.vlgmr.msra.gmra.mrb[40].mxu0 %vm1515_vm8, %v9282_v22 }
 0xf3d   : > { %4522 = vmatpush1.bf16.msra.mxu0 %v4516_v13  ;;  %4553 = vmatprep.mubr.bf16.mxu0 %v9279_v3 }
 0xf40   : > { %8524 = vmatmul.mubr.msk.bf16.vlgmr.msra.gmra.mrb[44].mxu0 %vm1515_vm8, %v9775_v60 }
 0xf41   : > { %4834 = vmatprep.mubr.f32.mxu0 %v9280_v10 }
0x100b   : > { %v4195_v20 = vpop.f32.mrb[38].mxu0 }
0x100c   : > { %v8507_v9 = vmul.f32 -1.442695, %v4195_v20  ;;  %v4197_v27 = vpop.f32.mrb[39].mxu0 }
0x100d   : > { %v8508_v5 = vmul.f32 -1.442695, %v4197_v27 }
0x100e   : > { %8984 = vpow2.f32 %v8507_v9 }
0x100f   : > { %8986 = vpow2.f32 %v8508_v5  ;;  %v4377_v23 = vpop.f32.mrb[40].mxu0 }
0x1010   : > { %v4382_v21 = vmul.f32 0.25, %v4377_v23  ;;  %v4379_v2 = vpop.f32.mrb[41].mxu0 }
0x1011   : > { %v4383_v30 = vmul.f32 0.25, %v4379_v2 }
0x1012   : > { %v4384_v31 = vadd.f32 1e-06, %v4382_v21 }
0x1013   : > { %v4385_v32 = vadd.f32 1e-06, %v4383_v30  ;;  %v4555_v33 = vpop.f32.mrb[44].mxu0 }
0x1014   : > { %8988 = vrsqrt.f32 %v4384_v31  ;;  %v4557_v34 = vpop.f32.mrb[45].mxu0 }
0x1015   : > { %8990 = vrsqrt.f32 %v4385_v32  ;;  %v9930_v37 = vpop.f32.mrb[46].mxu0 }
0x1016   : > { %v9932_v60 = vpop.f32.mrb[47].mxu0 }
0x1018   : > { %v8985_v38 = vpop.eup %8984 }
0x1019   : > { %v8987_v39 = vpop.eup %8986  ;;  %v4206_v14 = vadd.f32 1.0, %v8985_v38 }
0x101a   : > { %v4207_v42 = vadd.f32 1.0, %v8987_v39 }
0x101b   : > { %8992 = vrcp.f32 %v4206_v14 }
0x101c   : > { %8994 = vrcp.f32 %v4207_v42 }
0x101e   : > { %v8989_v45 = vpop.eup %8988 }
0x101f   : > { %v8991_v46 = vpop.eup %8990  ;;  %v4391_v47 = vrot.slane %v8989_v45, %v9459_v25 }
0x1020   : > { %v4395_v48 = vrot.slane %v8991_v46, %v9459_v25 }
0x1021   : > { %v4396_v50 = vmul.f32 %v4391_v47, %v4299_v40 }
0x1022   : > { %v4397_v49 = vmul.f32 %v4395_v48, %v4300_v6 }
0x1023   : > { %v4398_v51 = vmul.f32 %v4396_v50, %v9869_v8 }
0x1024   : > { %v4399_v24 = vmul.f32 %v4397_v49, %v9869_v8 }
0x1025   : > { %v8993_v52 = vpop.eup %8992  ;;  %v4400_v53 = vadd.f32 %v4398_v51, %v9872_v43 }
0x1026   : > { %v8995_v55 = vpop.eup %8994  ;;  %v8206_v57 = vrot.slane %v8993_v52, 6  ;;  %v4401_v56 = vadd.f32 %v4399_v24, %v9872_v43 }
0x1027   : > { %v8207_v62 = vrot.slane %v8995_v55, 6  ;;  %v8515_v63 = vmul.f32 -1.442695, %v4400_v53 }
0x1028   : > { %v9942_v26 = vsel %vm2288_vm11, %v9906_v59, %v8206_v57  ;;  %v8516_v61 = vmul.f32 -1.442695, %v4401_v56  ;;  %v9949_v59 = vadd.f32 %v4557_v34, %v9781_v19 }
0x1029   : > { %v9946_v29 = vsel %vm2288_vm11, %v9909_v41, %v8207_v62  ;;  %8996 = vpow2.f32 %v8515_v63  ;;  %v9953_v41 = vadd.f32 %v4555_v33, %v9781_v19 }
0x102a   : > { %8998 = vpow2.f32 %v8516_v61  ;;  %v4854_v33 = vrot.slane %v9949_v59, 4 }
0x102b   : > { %v4853_v34 = vrot.slane %v9953_v41, 4 }
0x1033   : > { %v8997_v0 = vpop.eup %8996 }
0x1034   : > { %v8999_v1 = vpop.eup %8998  ;;  %v4408_v4 = vadd.f32 1.0, %v8997_v0 }
0x1035   : > { %v4409_v35 = vadd.f32 1.0, %v8999_v1 }
0x1036   : > { %9000 = vrcp.f32 %v4408_v4 }
0x1037   : > { %9002 = vrcp.f32 %v4409_v35 }
0x1040   : > { %v9001_v6 = vpop.eup %9000 }
0x1041   : > { %v9003_v40 = vpop.eup %9002  ;;  %v4416_v36 = vrot.slane %v9001_v6, 4 }
0x1042   : > { %v4417_v7 = vrot.slane %v9003_v40, 4 }
0x1044   : > { %8517 = vmatprep.subr.msk.mxu1 %vm1468_vm7, %v4417_v7 }
0x1045   : > { %8518 = vmatpush1.msk.msra.mxu1 %vm1468_vm7, %v4416_v36 }
0x1046   : > { %8519 = vmatmul.mubr.msk.f32.vlgmr.msra.gmra.mrb[44].mxu1 %vm1515_vm8, %v9837_v16  ;;  %8525 = vmatprep.subr.msk.mxu1 %vm1468_vm7, %v9949_v59 }
0x1047   : > { %8526 = vmatpush1.msk.msra.mxu1 %vm1468_vm7, %v9953_v41  ;;  %4634 = vmatprep.mubr.f32.mxu1 %v9280_v10 }
0x104a   : > { %8527 = vmatmul.mubr.msk.f32.vlgmr.msra.gmra.mrb[46].mxu1 %vm1515_vm8, %v9282_v22 }
0x104b   : > { %4725 = vmatprep.mubr.f32.mxu1 %v9280_v10 }
0x1119   : > { %v4488_v44 = vpop.f32.mrb[44].mxu1 }
0x111a   : > { %v8520_v12 = vmul.f32 -1.442695, %v4488_v44  ;;  %v4490_v15 = vpop.f32.mrb[45].mxu1 }
0x111b   : > { %v8521_v17 = vmul.f32 -1.442695, %v4490_v15 }
0x111c   : > { %9004 = vpow2.f32 %v8520_v12 }
0x111d   : > { %9006 = vpow2.f32 %v8521_v17  ;;  %v4636_v54 = vpop.f32.mrb[46].mxu1 }
0x111e   : > { %v4641_v11 = vmul.f32 0.25, %v4636_v54  ;;  %v4638_v13 = vpop.f32.mrb[47].mxu1 }
0x111f   : > { %v4642_v20 = vmul.f32 0.25, %v4638_v13 }
0x1120   : > { %v4646_v9 = vrot.slane %v4641_v11, %v9459_v25 }
0x1121   : > { %v4650_v27 = vrot.slane %v4642_v20, %v9459_v25 }
0x1122   : > { %v4651_v5 = vsub.f32 %v9953_v41, %v4646_v9 }
0x1123   : > { %v4652_v23 = vsub.f32 %v9949_v59, %v4650_v27 }
0x1124   : > { %v4653_v30 = vmul.f32 %v4651_v5, %v4651_v5 }
0x1125   : > { %v4654_v21 = vmul.f32 %v4652_v23, %v4652_v23 }
0x1126   : > { %v9005_v2 = vpop.eup %9004 }
0x1127   : > { %v9007_v31 = vpop.eup %9006  ;;  %v4499_v32 = vadd.f32 1.0, %v9005_v2  ;;  %8528 = vmatprep.subr.msk.mxu1 %vm1468_vm7, %v4654_v21 }
0x1128   : > { %v4500_v38 = vadd.f32 1.0, %v9007_v31  ;;  %8529 = vmatpush1.msk.msra.mxu1 %vm1468_vm7, %v4653_v30  ;;  %v10007_v30 = vadd.f32 %v9932_v60, %v9840_v18 }
0x1129   : > { %9008 = vrcp.f32 %v4499_v32  ;;  %8530 = vmatmul.mubr.msk.f32.vlgmr.msra.gmra.mrb[48].mxu1 %vm1515_vm8, %v9282_v22  ;;  %8538 = vmatprep.subr.msk.mxu1 %vm1468_vm7, %v4854_v33 }
0x112a   : > { %9010 = vrcp.f32 %v4500_v38  ;;  %8539 = vmatpush1.msk.msra.mxu1 %vm1468_vm7, %v4853_v34  ;;  %4923 = vmatprep.mubr.f32.mxu1 %v9280_v10 }
0x112d   : > { %8540 = vmatmul.mubr.msk.f32.vlgmr.msra.gmra.mrb[50].mxu1 %vm1515_vm8, %v9282_v22 }
0x112e   : > { %5127 = vmatprep.mubr.f32.mxu1 %v9280_v10 }
0x1133   : > { %v9009_v39 = vpop.eup %9008 }
0x1134   : > { %v9011_v14 = vpop.eup %9010  ;;  %v8230_v42 = vrot.slane %v9009_v39, 5 }
0x1135   : > { %v8231_v45 = vrot.slane %v9011_v14, 5 }
0x1136   : > { %v8264_v46 = vsel %vm8263_vm13, %v9942_v26, %v8230_v42 }
0x1137   : > { %v8265_v47 = vsel %vm8263_vm13, %v9946_v29, %v8231_v45 }
0x1138   : > { %v8280_v48 = vcombine.low %v8264_v46, %v8265_v47 }
0x113a   : > { %8288 = vst [vmem:[%s9988_s24] sm:$0xff] %v8280_v48 }
0x11fc   : > { %v4727_v50 = vpop.f32.mrb[48].mxu1 }
0x11fd   : > { %v4732_v49 = vmul.f32 0.25, %v4727_v50  ;;  %v4729_v51 = vpop.f32.mrb[49].mxu1 }
0x11fe   : > { %v4733_v24 = vmul.f32 0.25, %v4729_v51 }
0x11ff   : > { %v4734_v52 = vadd.f32 1e-06, %v4732_v49 }
0x1200   : > { %v4735_v53 = vadd.f32 1e-06, %v4733_v24  ;;  %v4925_v55 = vpop.f32.mrb[50].mxu1 }
0x1201   : > { %9012 = vrsqrt.f32 %v4734_v52  ;;  %v4927_v57 = vpop.f32.mrb[51].mxu1  ;;  %v4930_v44 = vmul.f32 0.25, %v4925_v55 }
0x1202   : > { %9014 = vrsqrt.f32 %v4735_v53  ;;  %v4931_v7 = vmul.f32 0.25, %v4927_v57 }
0x1203   : > { %v4935_v11 = vrot.slane %v4930_v44, %v9459_v25 }
0x1204   : > { %v4939_v54 = vrot.slane %v4931_v7, %v9459_v25 }
0x1205   : > { %v4940_v20 = vsub.f32 %v9953_v41, %v4935_v11 }
0x1206   : > { %v4941_v13 = vsub.f32 %v9949_v59, %v4939_v54  ;;  %v10018_v59 = vadd.f32 %v9930_v37, %v9840_v18 }
0x1207   : > { %v4942_v27 = vmul.f32 %v4940_v20, %v4940_v20 }
0x1208   : > { %v4943_v9 = vmul.f32 %v4941_v13, %v4941_v13 }
0x1209   : > { %v4946_v2 = vrot.slane %v4942_v27, 4 }
0x120a   : > { %v4947_v21 = vrot.slane %v4943_v9, 4 }
0x120b   : > { %v9013_v56 = vpop.eup %9012 }
0x120c   : > { %v9015_v62 = vpop.eup %9014  ;;  %v4741_v63 = vrot.slane %v9013_v56, %v9459_v25 }
0x120d   : > { %v4745_v26 = vrot.slane %v9015_v62, %v9459_v25 }
0x120e   : > { %v4746_v61 = vmul.f32 %v4741_v63, %v4651_v5 }
0x120f   : > { %v4747_v29 = vmul.f32 %v4745_v26, %v4652_v23 }
0x1210   : > { %v4748_v0 = vmul.f32 %v4746_v61, %v9818_v28 }
0x1211   : > { %v4749_v1 = vmul.f32 %v4747_v29, %v9818_v28 }
0x1212   : > { %v4750_v4 = vadd.f32 %v4748_v0, %v9821_v58 }
0x1213   : > { %v4751_v35 = vadd.f32 %v4749_v1, %v9821_v58 }
0x1214   : > { %v8531_v6 = vmul.f32 -1.442695, %v4750_v4 }
0x1215   : > { %v8532_v40 = vmul.f32 -1.442695, %v4751_v35 }
0x1216   : > { %9016 = vpow2.f32 %v8531_v6 }
0x1217   : > { %9018 = vpow2.f32 %v8532_v40 }
0x1220   : > { %v9017_v36 = vpop.eup %9016 }
0x1221   : > { %v9019_v12 = vpop.eup %9018  ;;  %v4758_v15 = vadd.f32 1.0, %v9017_v36 }
0x1222   : > { %v4759_v17 = vadd.f32 1.0, %v9019_v12  ;;  %v5436_v12 = vrot.slane %v10007_v30, 4 }
0x1224   : > { %9020 = vrcp.f32 %v4759_v17 }
0x1225   : > { %9022 = vrcp.f32 %v4758_v15  ;;  %v5435_v15 = vrot.slane %v10018_v59, 4 }
0x122e   : > { %v9021_v5 = vpop.eup %9020 }
0x122f   : > { %v9023_v23 = vpop.eup %9022  ;;  %8533 = vmatprep.subr.msk.mxu0 %vm1468_vm7, %v9021_v5 }
0x1230   : > { %8534 = vmatpush1.msk.msra.mxu0 %vm1468_vm7, %v9023_v23 }
0x1231   : > { %8535 = vmatmul.mubr.msk.f32.vlgmr.msra.gmra.mrb[42].mxu0 %vm1515_vm8, %v9837_v16  ;;  %8541 = vmatprep.subr.msk.mxu0 %vm1468_vm7, %v4947_v21 }
0x1232   : > { %8542 = vmatpush1.msk.msra.mxu0 %vm1468_vm7, %v4946_v2  ;;  %5016 = vmatprep.mubr.f32.mxu0 %v9280_v10 }
0x1233   : > { %8551 = vmatprep.subr.msk.mxu0 %vm1468_vm7, %v10007_v30 }
0x1235   : > { %8543 = vmatmul.mubr.msk.f32.vlgmr.msra.gmra.mrb[48].mxu0 %vm1515_vm8, %v9282_v22 }
0x1236   : > { %8552 = vmatpush1.msk.msra.mxu0 %vm1468_vm7, %v10018_v59  ;;  %5216 = vmatprep.mubr.f32.mxu0 %v9280_v10 }
0x1239   : > { %8553 = vmatmul.mubr.msk.f32.vlgmr.msra.gmra.mrb[50].mxu0 %vm1515_vm8, %v9282_v22 }
0x123a   : > { %5416 = vmatprep.mubr.f32.mxu0 %v9280_v10 }
0x1304   : > { %v4836_v60 = vpop.f32.mrb[42].mxu0 }
0x1305   : > { %v4838_v41 = vpop.f32.mrb[43].mxu0  ;;  %v8536_v17 = vmul.f32 -1.442695, %v4836_v60 }
0x1306   : > { %v8537_v54 = vmul.f32 -1.442695, %v4838_v41 }
0x1308   : > { %v5018_v31 = vpop.f32.mrb[48].mxu0 }
0x1309   : > { %v5023_v32 = vmul.f32 0.25, %v5018_v31  ;;  %v5020_v33 = vpop.f32.mrb[49].mxu0 }
0x130a   : > { %v5024_v37 = vmul.f32 0.25, %v5020_v33 }
0x130b   : > { %v5025_v34 = vadd.f32 1e-06, %v5023_v32 }
0x130c   : > { %v5026_v38 = vadd.f32 1e-06, %v5024_v37  ;;  %v5218_v39 = vpop.f32.mrb[50].mxu0 }
0x130d   : > { %9024 = vrsqrt.f32 %v5025_v34  ;;  %v5220_v14 = vpop.f32.mrb[51].mxu0  ;;  %v5223_v61 = vmul.f32 0.25, %v5218_v39 }
0x130e   : > { %9026 = vrsqrt.f32 %v5026_v38  ;;  %v5224_v26 = vmul.f32 0.25, %v5220_v14 }
0x130f   : > { %v5228_v0 = vrot.slane %v5223_v61, %v9459_v25 }
0x1310   : > { %v5232_v29 = vrot.slane %v5224_v26, %v9459_v25 }
0x1311   : > { %v5233_v6 = vsub.f32 %v10018_v59, %v5228_v0 }
0x1312   : > { %v5234_v4 = vsub.f32 %v10007_v30, %v5232_v29 }
0x1313   : > { %v5235_v44 = vmul.f32 %v5233_v6, %v5233_v6 }
0x1314   : > { %v5236_v36 = vmul.f32 %v5234_v4, %v5234_v4 }
0x1317   : > { %v9025_v42 = vpop.eup %9024 }
0x1318   : > { %v9027_v45 = vpop.eup %9026  ;;  %v5032_v46 = vrot.slane %v9025_v42, %v9459_v25 }
0x1319   : > { %v5036_v47 = vrot.slane %v9027_v45, %v9459_v25 }
0x131a   : > { %v5037_v48 = vmul.f32 %v5032_v46, %v4940_v20 }
0x131b   : > { %v5038_v50 = vmul.f32 %v5036_v47, %v4941_v13 }
0x131c   : > { %v5039_v49 = vmul.f32 %v5037_v48, %v9869_v8 }
0x131d   : > { %v5040_v51 = vmul.f32 %v5038_v50, %v9869_v8 }
0x131e   : > { %v5041_v24 = vadd.f32 %v5039_v49, %v9872_v43 }
0x131f   : > { %v5042_v52 = vadd.f32 %v5040_v51, %v9872_v43 }
0x1320   : > { %v8544_v53 = vmul.f32 -1.442695, %v5041_v24 }
0x1321   : > { %v8545_v55 = vmul.f32 -1.442695, %v5042_v52 }
0x1322   : > { %9028 = vpow2.f32 %v8544_v53 }
0x1323   : > { %9030 = vpow2.f32 %v8545_v55 }
0x132c   : > { %v9029_v57 = vpop.eup %9028 }
0x132d   : > { %v9031_v56 = vpop.eup %9030  ;;  %v5049_v62 = vadd.f32 1.0, %v9029_v57 }
0x132e   : > { %v5050_v63 = vadd.f32 1.0, %v9031_v56 }
0x132f   : > { %9032 = vrcp.f32 %v5049_v62 }
0x1330   : > { %9034 = vrcp.f32 %v5050_v63 }
0x1331   : > { %9036 = vpow2.f32 %v8536_v17 }
0x1332   : > { %9038 = vpow2.f32 %v8537_v54 }
0x1339   : > { %v9033_v1 = vpop.eup %9032 }
0x133a   : > { %v9035_v35 = vpop.eup %9034  ;;  %v5057_v7 = vrot.slane %v9033_v1, 4 }
0x133b   : > { %v5058_v40 = vrot.slane %v9035_v35, 4  ;;  %v9037_v60 = vpop.eup %9036 }
0x133c   : > { %v9039_v41 = vpop.eup %9038  ;;  %v4847_v38 = vadd.f32 1.0, %v9037_v60 }
0x133d   : > { %8546 = vmatprep.subr.msk.mxu1 %vm1468_vm7, %v5058_v40  ;;  %v4848_v14 = vadd.f32 1.0, %v9039_v41 }
0x133e   : > { %8547 = vmatpush1.msk.msra.mxu1 %vm1468_vm7, %v5057_v7 }
0x133f   : > { %8548 = vmatmul.mubr.msk.f32.vlgmr.msra.gmra.mrb[52].mxu1 %vm1515_vm8, %v9837_v16  ;;  %8554 = vmatprep.subr.msk.mxu1 %vm1468_vm7, %v5236_v36 }
0x1340   : > { %8555 = vmatpush1.msk.msra.mxu1 %vm1468_vm7, %v5235_v44  ;;  %5307 = vmatprep.mubr.f32.mxu1 %v9280_v10 }
0x1341   : > { %8564 = vmatprep.subr.msk.mxu1 %vm1468_vm7, %v5436_v12 }
0x1343   : > { %8556 = vmatmul.mubr.msk.f32.vlgmr.msra.gmra.mrb[54].mxu1 %vm1515_vm8, %v9282_v22 }
0x1344   : > { %8565 = vmatpush1.msk.msra.mxu1 %vm1468_vm7, %v5435_v15  ;;  %5505 = vmatprep.mubr.f32.mxu1 %v9280_v10 }
0x1347   : > { %8566 = vmatmul.mubr.msk.f32.vlgmr.msra.gmra.mrb[56].mxu1 %vm1515_vm8, %v9282_v22 }
0x1348   : > { %5709 = vmatprep.mubr.f32.mxu1 %v9280_v10 }
0x1412   : > { %v5129_v11 = vpop.f32.mrb[52].mxu1 }
0x1413   : > { %v8549_v13 = vmul.f32 -1.442695, %v5129_v11  ;;  %v5131_v20 = vpop.f32.mrb[53].mxu1 }
0x1414   : > { %v8550_v9 = vmul.f32 -1.442695, %v5131_v20  ;;  %v8577_v20 = vld.sshfl [vmem:[#allocation4 + $0x8] sm:$0x33 pattern:$0x76325410] }
0x1415   : > { %9040 = vpow2.f32 %v8549_v13 }
0x1416   : > { %9042 = vpow2.f32 %v8550_v9  ;;  %v5309_v27 = vpop.f32.mrb[54].mxu1 }
0x1417   : > { %v5314_v5 = vmul.f32 0.25, %v5309_v27  ;;  %v5311_v23 = vpop.f32.mrb[55].mxu1 }
0x1418   : > { %v5315_v21 = vmul.f32 0.25, %v5311_v23  ;;  %v5737_v23 = vcombine.high %v8577_v20, %v8577_v20 }
0x1419   : > { %v5316_v2 = vadd.f32 1e-06, %v5314_v5 }
0x141a   : > { %v5317_v31 = vadd.f32 1e-06, %v5315_v21  ;;  %v5507_v32 = vpop.f32.mrb[56].mxu1 }
0x141b   : > { %9044 = vrsqrt.f32 %v5316_v2  ;;  %v5509_v33 = vpop.f32.mrb[57].mxu1 }
0x141c   : > { %9046 = vrsqrt.f32 %v5317_v31 }
0x141f   : > { %v9041_v37 = vpop.eup %9040 }
0x1420   : > { %v9043_v34 = vpop.eup %9042  ;;  %v5140_v39 = vadd.f32 1.0, %v9041_v37 }
0x1421   : > { %v5141_v42 = vadd.f32 1.0, %v9043_v34 }
0x1422   : > { %9048 = vrcp.f32 %v5140_v39 }
0x1423   : > { %9050 = vrcp.f32 %v5141_v42 }
0x1424   : > { %9052 = vrcp.f32 %v4847_v38 }
0x1425   : > { %v9045_v45 = vpop.eup %9044  ;;  %9054 = vrcp.f32 %v4848_v14 }
0x1426   : > { %v9047_v46 = vpop.eup %9046  ;;  %v5323_v47 = vrot.slane %v9045_v45, %v9459_v25 }
0x1427   : > { %v5327_v48 = vrot.slane %v9047_v46, %v9459_v25 }
0x1428   : > { %v5328_v50 = vmul.f32 %v5323_v47, %v5233_v6  ;;  %v5512_v6 = vmul.f32 0.25, %v5507_v32 }
0x1429   : > { %v5329_v49 = vmul.f32 %v5327_v48, %v5234_v4  ;;  %v5513_v4 = vmul.f32 0.25, %v5509_v33 }
0x142a   : > { %v5330_v51 = vmul.f32 %v5328_v50, %v9818_v28  ;;  %v5517_v12 = vrot.slane %v5512_v6, %v9459_v25 }
0x142b   : > { %v5331_v24 = vmul.f32 %v5329_v49, %v9818_v28  ;;  %v5521_v44 = vrot.slane %v5513_v4, %v9459_v25 }
0x142c   : > { %v9049_v52 = vpop.eup %9048  ;;  %v5332_v53 = vadd.f32 %v5330_v51, %v9821_v58  ;;  %v5522_v17 = vsub.f32 %v10018_v59, %v5517_v12 }
0x142d   : > { %v9051_v55 = vpop.eup %9050  ;;  %v8184_v57 = vrot.slane %v9049_v52, 7  ;;  %v5333_v56 = vadd.f32 %v5331_v24, %v9821_v58  ;;  %v5523_v15 = vsub.f32 %v10007_v30, %v5521_v44  ;;  %v5739_v30 = vsel %vm2288_vm11, %v8577_v20, 0 }
0x142e   : > { %v9053_v62 = vpop.eup %9052  ;;  %v8185_v63 = vrot.slane %v9051_v55, 7  ;;  %v8557_v26 = vmul.f32 -1.442695, %v5332_v53  ;;  %v5524_v11 = vmul.f32 %v5522_v17, %v5522_v17 }
0x142f   : > { %v9055_v61 = vpop.eup %9054  ;;  %v10062_v29 = vsel %vm8246_vm12, %v9053_v62, %v8184_v57  ;;  %v8558_v0 = vmul.f32 -1.442695, %v5333_v56  ;;  %v5525_v54 = vmul.f32 %v5523_v15, %v5523_v15 }
0x1430   : > { %v10065_v1 = vsel %vm8246_vm12, %v9055_v61, %v8185_v63  ;;  %9056 = vpow2.f32 %v8557_v26  ;;  %v5528_v5 = vrot.slane %v5524_v11, 4 }
0x1431   : > { %9058 = vpow2.f32 %v8558_v0  ;;  %v5529_v27 = vrot.slane %v5525_v54, 4 }
0x143a   : > { %v9057_v35 = vpop.eup %9056 }
0x143b   : > { %v9059_v40 = vpop.eup %9058  ;;  %v5340_v7 = vadd.f32 1.0, %v9057_v35 }
0x143c   : > { %v5341_v36 = vadd.f32 1.0, %v9059_v40 }
0x143e   : > { %9060 = vrcp.f32 %v5341_v36 }
0x143f   : > { %9062 = vrcp.f32 %v5340_v7 }
0x1448   : > { %v9061_v13 = vpop.eup %9060 }
0x1449   : > { %v9063_v9 = vpop.eup %9062  ;;  %8559 = vmatprep.subr.msk.mxu0 %vm1468_vm7, %v9061_v13  ;;  %v10116_v13 = vld [vmem:[%s9834_s21] sm:$0x1] }
0x144a   : > { %8560 = vmatpush1.msk.msra.mxu0 %vm1468_vm7, %v9063_v9 }
0x144b   : > { %8561 = vmatmul.mubr.msk.f32.vlgmr.msra.gmra.mrb[52].mxu0 %vm1515_vm8, %v9837_v16  ;;  %8567 = vmatprep.subr.msk.mxu0 %vm1468_vm7, %v5529_v27  ;;  %v10086_v16 = vld [vmem:[%s10417_s13] sm:$0xff]  }
0x144c   : > { %8568 = vmatpush1.msk.msra.mxu0 %vm1468_vm7, %v5528_v5  ;;  %5598 = vmatprep.mubr.f32.mxu0 %v9280_v10 }
0x144d   : > { %8578 = vmatprep.subr.msk.bf16.mxu0 %vm2288_vm11, %v5737_v23 }
0x144f   : > { %8569 = vmatmul.mubr.msk.f32.vlgmr.msra.gmra.mrb[54].mxu0 %vm1515_vm8, %v9282_v22 }
0x1450   : > { %5745 = vmatpush1.bf16.msra.mxu0 %v5739_v30  ;;  %5776 = vmatprep.mubr.bf16.mxu0 %v9279_v3 }
0x1453   : > { %8579 = vmatmul.mubr.msk.bf16.vlgmr.msra.gmra.mrb[56].mxu0 %vm1515_vm8, %v10086_v16 }
0x1454   : > { %6057 = vmatprep.mubr.f32.mxu0 %v9280_v10 }
0x151e   : > { %v5418_v59 = vpop.f32.mrb[52].mxu0 }
0x151f   : > { %v8562_v21 = vmul.f32 -1.442695, %v5418_v59  ;;  %v5420_v2 = vpop.f32.mrb[53].mxu0 }
0x1520   : > { %v8563_v31 = vmul.f32 -1.442695, %v5420_v2 }
0x1521   : > { %9064 = vpow2.f32 %v8562_v21 }
0x1522   : > { %9066 = vpow2.f32 %v8563_v31  ;;  %v5600_v32 = vpop.f32.mrb[54].mxu0 }
0x1523   : > { %v5605_v33 = vmul.f32 0.25, %v5600_v32  ;;  %v5602_v60 = vpop.f32.mrb[55].mxu0 }
0x1524   : > { %v5606_v41 = vmul.f32 0.25, %v5602_v60 }
0x1525   : > { %v5607_v37 = vadd.f32 1e-06, %v5605_v33 }
0x1526   : > { %v5608_v34 = vadd.f32 1e-06, %v5606_v41  ;;  %v5778_v38 = vpop.f32.mrb[56].mxu0 }
0x1527   : > { %9068 = vrsqrt.f32 %v5607_v37  ;;  %v5780_v39 = vpop.f32.mrb[57].mxu0 }
0x1528   : > { %9070 = vrsqrt.f32 %v5608_v34  ;;  %v10091_v14 = vpop.f32.mrb[58].mxu0 }
0x1529   : > { %v10093_v42 = vpop.f32.mrb[59].mxu0 }
0x152b   : > { %v9065_v45 = vpop.eup %9064 }
0x152c   : > { %v9067_v46 = vpop.eup %9066  ;;  %v5429_v47 = vadd.f32 1.0, %v9065_v45 }
0x152d   : > { %v5430_v48 = vadd.f32 1.0, %v9067_v46 }
0x152e   : > { %9072 = vrcp.f32 %v5429_v47 }
0x152f   : > { %9074 = vrcp.f32 %v5430_v48 }
0x1531   : > { %v9069_v50 = vpop.eup %9068 }
0x1532   : > { %v9071_v49 = vpop.eup %9070  ;;  %v5614_v51 = vrot.slane %v9069_v50, %v9459_v25 }
0x1533   : > { %v5618_v24 = vrot.slane %v9071_v49, %v9459_v25 }
0x1534   : > { %v5619_v52 = vmul.f32 %v5614_v51, %v5522_v17 }
0x1535   : > { %v5620_v53 = vmul.f32 %v5618_v24, %v5523_v15 }
0x1536   : > { %v5621_v55 = vmul.f32 %v5619_v52, %v9869_v8 }
0x1537   : > { %v5622_v57 = vmul.f32 %v5620_v53, %v9869_v8 }
0x1538   : > { %v9073_v56 = vpop.eup %9072  ;;  %v5623_v62 = vadd.f32 %v5621_v55, %v9872_v43 }
0x1539   : > { %v9075_v63 = vpop.eup %9074  ;;  %v8208_v26 = vrot.slane %v9073_v56, 6  ;;  %v5624_v61 = vadd.f32 %v5622_v57, %v9872_v43 }
0x153a   : > { %v8209_v0 = vrot.slane %v9075_v63, 6  ;;  %v8570_v4 = vmul.f32 -1.442695, %v5623_v62 }
0x153b   : > { %v10103_v35 = vsel %vm2288_vm11, %v10062_v29, %v8208_v26  ;;  %v8571_v6 = vmul.f32 -1.442695, %v5624_v61  ;;  %v10108_v29 = vadd.f32 %v5780_v39, %v9781_v19 }
0x153c   : > { %v8258_v40 = vsel %vm2288_vm11, %v10065_v1, %v8209_v0  ;;  %9076 = vpow2.f32 %v8570_v4  ;;  %v10112_v1 = vadd.f32 %v5778_v38, %v9781_v19 }
0x153d   : > { %9078 = vpow2.f32 %v8571_v6  ;;  %v6077_v39 = vrot.slane %v10108_v29, 4 }
0x153e   : > { %v6076_v45 = vrot.slane %v10112_v1, 4 }
0x1546   : > { %v9077_v7 = vpop.eup %9076 }
0x1547   : > { %v9079_v36 = vpop.eup %9078  ;;  %v5631_v44 = vadd.f32 1.0, %v9077_v7 }
0x1548   : > { %v5632_v12 = vadd.f32 1.0, %v9079_v36 }
0x1549   : > { %9080 = vrcp.f32 %v5631_v44 }
0x154a   : > { %9082 = vrcp.f32 %v5632_v12 }
0x1553   : > { %v9081_v15 = vpop.eup %9080 }
0x1554   : > { %v9083_v17 = vpop.eup %9082  ;;  %v5639_v11 = vrot.slane %v9081_v15, 4 }
0x1555   : > { %v5640_v54 = vrot.slane %v9083_v17, 4 }
0x1557   : > { %8572 = vmatprep.subr.msk.mxu1 %vm1468_vm7, %v5640_v54 }
0x1558   : > { %8573 = vmatpush1.msk.msra.mxu1 %vm1468_vm7, %v5639_v11 }
0x1559   : > { %8574 = vmatmul.mubr.msk.f32.vlgmr.msra.gmra.mrb[58].mxu1 %vm1515_vm8, %v10116_v13  ;;  %8580 = vmatprep.subr.msk.mxu1 %vm1468_vm7, %v10108_v29 }
0x155a   : > { %8581 = vmatpush1.msk.msra.mxu1 %vm1468_vm7, %v10112_v1  ;;  %5857 = vmatprep.mubr.f32.mxu1 %v9280_v10 }
0x155d   : > { %8582 = vmatmul.mubr.msk.f32.vlgmr.msra.gmra.mrb[60].mxu1 %vm1515_vm8, %v9282_v22 }
0x155e   : > { %5948 = vmatprep.mubr.f32.mxu1 %v9280_v10 }
0x162c   : > { %v5711_v20 = vpop.f32.mrb[58].mxu1 }
0x162d   : > { %v8575_v9 = vmul.f32 -1.442695, %v5711_v20  ;;  %v5713_v27 = vpop.f32.mrb[59].mxu1 }
0x162e   : > { %v8576_v5 = vmul.f32 -1.442695, %v5713_v27 }
0x162f   : > { %9084 = vpow2.f32 %v8575_v9 }
0x1630   : > { %9086 = vpow2.f32 %v8576_v5  ;;  %v5859_v23 = vpop.f32.mrb[60].mxu1 }
0x1631   : > { %v5864_v30 = vmul.f32 0.25, %v5859_v23  ;;  %v5861_v59 = vpop.f32.mrb[61].mxu1 }
0x1632   : > { %v5865_v21 = vmul.f32 0.25, %v5861_v59 }
0x1633   : > { %v5869_v2 = vrot.slane %v5864_v30, %v9459_v25 }
0x1634   : > { %v5873_v31 = vrot.slane %v5865_v21, %v9459_v25 }
0x1635   : > { %v5874_v32 = vsub.f32 %v10112_v1, %v5869_v2 }
0x1636   : > { %v5875_v33 = vsub.f32 %v10108_v29, %v5873_v31 }
0x1637   : > { %v5876_v37 = vmul.f32 %v5874_v32, %v5874_v32 }
0x1638   : > { %v5877_v60 = vmul.f32 %v5875_v33, %v5875_v33 }
0x1639   : > { %v9085_v41 = vpop.eup %9084 }
0x163a   : > { %v9087_v34 = vpop.eup %9086  ;;  %v5722_v38 = vadd.f32 1.0, %v9085_v41  ;;  %8583 = vmatprep.subr.msk.mxu1 %vm1468_vm7, %v5877_v60 }
0x163b   : > { %v5723_v46 = vadd.f32 1.0, %v9087_v34  ;;  %8584 = vmatpush1.msk.msra.mxu1 %vm1468_vm7, %v5876_v37  ;;  %v10162_v34 = vadd.f32 %v10093_v42, %v9840_v18 }
0x163c   : > { %9088 = vrcp.f32 %v5722_v38  ;;  %8585 = vmatmul.mubr.msk.f32.vlgmr.msra.gmra.mrb[62].mxu1 %vm1515_vm8, %v9282_v22  ;;  %8593 = vmatprep.subr.msk.mxu1 %vm1468_vm7, %v6077_v39 }
0x163d   : > { %9090 = vrcp.f32 %v5723_v46  ;;  %8594 = vmatpush1.msk.msra.mxu1 %vm1468_vm7, %v6076_v45  ;;  %6146 = vmatprep.mubr.f32.mxu1 %v9280_v10 }
0x1640   : > { %8595 = vmatmul.mubr.msk.f32.vlgmr.msra.gmra.mrb[64].mxu1 %vm1515_vm8, %v9282_v22 }
0x1641   : > { %6350 = vmatprep.mubr.f32.mxu1 %v9280_v10 }
0x1646   : > { %v9089_v47 = vpop.eup %9088 }
0x1647   : > { %v9091_v48 = vpop.eup %9090  ;;  %v8232_v50 = vrot.slane %v9089_v47, 5 }
0x1648   : > { %v8233_v49 = vrot.slane %v9091_v48, 5 }
0x1649   : > { %v8266_v51 = vsel %vm8263_vm13, %v10103_v35, %v8232_v50 }
0x164a   : > { %v8267_v24 = vsel %vm8263_vm13, %v8258_v40, %v8233_v49 }
0x164b   : > { %v8281_v52 = vcombine.low %v8266_v51, %v8267_v24 }
0x164d   : > { %8289 = vst [vmem:[%s9988_s24 + $0x8] sm:$0xff] %v8281_v52 }
0x170f   : > { %v5950_v53 = vpop.f32.mrb[62].mxu1 }
0x1710   : > { %v5955_v55 = vmul.f32 0.25, %v5950_v53  ;;  %v5952_v57 = vpop.f32.mrb[63].mxu1 }
0x1711   : > { %v5956_v56 = vmul.f32 0.25, %v5952_v57 }
0x1712   : > { %v5957_v62 = vadd.f32 1e-06, %v5955_v55 }
0x1713   : > { %v5958_v63 = vadd.f32 1e-06, %v5956_v56  ;;  %v6148_v26 = vpop.f32.mrb[64].mxu1 }
0x1714   : > { %9092 = vrsqrt.f32 %v5957_v62  ;;  %v6150_v61 = vpop.f32.mrb[65].mxu1  ;;  %v6153_v9 = vmul.f32 0.25, %v6148_v26 }
0x1715   : > { %9094 = vrsqrt.f32 %v5958_v63  ;;  %v6154_v11 = vmul.f32 0.25, %v6150_v61 }
0x1716   : > { %v6158_v59 = vrot.slane %v6153_v9, %v9459_v25 }
0x1717   : > { %v6162_v30 = vrot.slane %v6154_v11, %v9459_v25 }
0x1718   : > { %v6163_v2 = vsub.f32 %v10112_v1, %v6158_v59 }
0x1719   : > { %v6164_v21 = vsub.f32 %v10108_v29, %v6162_v30  ;;  %v10173_v29 = vadd.f32 %v10091_v14, %v9840_v18 }
0x171b   : > { %v6166_v31 = vmul.f32 %v6164_v21, %v6164_v21 }
0x171d   : > { %v6170_v41 = vrot.slane %v6166_v31, 4 }
0x171e   : > { %v9093_v0 = vpop.eup %9092 }
0x171f   : > { %v9095_v4 = vpop.eup %9094  ;;  %v5964_v6 = vrot.slane %v9093_v0, %v9459_v25 }
0x1720   : > { %v5968_v35 = vrot.slane %v9095_v4, %v9459_v25 }
0x1721   : > { %v5969_v7 = vmul.f32 %v5964_v6, %v5874_v32  ;;  %v6165_v32 = vmul.f32 %v6163_v2, %v6163_v2 }
0x1722   : > { %v5970_v40 = vmul.f32 %v5968_v35, %v5875_v33 }
0x1723   : > { %v5971_v36 = vmul.f32 %v5969_v7, %v9818_v28  ;;  %v6169_v37 = vrot.slane %v6165_v32, 4 }
0x1724   : > { %v5972_v44 = vmul.f32 %v5970_v40, %v9818_v28 }
0x1725   : > { %v5973_v12 = vadd.f32 %v5971_v36, %v9821_v58 }
0x1726   : > { %v5974_v15 = vadd.f32 %v5972_v44, %v9821_v58 }
0x1727   : > { %v8586_v17 = vmul.f32 -1.442695, %v5973_v12 }
0x1728   : > { %v8587_v54 = vmul.f32 -1.442695, %v5974_v15 }
0x1729   : > { %9096 = vpow2.f32 %v8586_v17 }
0x172a   : > { %9098 = vpow2.f32 %v8587_v54 }
0x1733   : > { %v9097_v20 = vpop.eup %9096 }
0x1734   : > { %v9099_v27 = vpop.eup %9098  ;;  %v5981_v5 = vadd.f32 1.0, %v9097_v20 }
0x1735   : > { %v5982_v23 = vadd.f32 1.0, %v9099_v27 }
0x1737   : > { %9100 = vrcp.f32 %v5982_v23  ;;  %v6658_v23 = vrot.slane %v10173_v29, 4 }
0x1738   : > { %9102 = vrcp.f32 %v5981_v5  ;;  %v6659_v5 = vrot.slane %v10162_v34, 4 }
0x1741   : > { %v9101_v33 = vpop.eup %9100 }
0x1742   : > { %v9103_v60 = vpop.eup %9102  ;;  %8588 = vmatprep.subr.msk.mxu0 %vm1468_vm7, %v9101_v33 }
0x1743   : > { %8589 = vmatpush1.msk.msra.mxu0 %vm1468_vm7, %v9103_v60 }
0x1744   : > { %8590 = vmatmul.mubr.msk.f32.vlgmr.msra.gmra.mrb[60].mxu0 %vm1515_vm8, %v10116_v13  ;;  %8596 = vmatprep.subr.msk.mxu0 %vm1468_vm7, %v6170_v41 }
0x1745   : > { %8597 = vmatpush1.msk.msra.mxu0 %vm1468_vm7, %v6169_v37  ;;  %6239 = vmatprep.mubr.f32.mxu0 %v9280_v10 }
0x1746   : > { %8606 = vmatprep.subr.msk.mxu0 %vm1468_vm7, %v10162_v34 }
0x1748   : > { %8598 = vmatmul.mubr.msk.f32.vlgmr.msra.gmra.mrb[62].mxu0 %vm1515_vm8, %v9282_v22 }
0x1749   : > { %8607 = vmatpush1.msk.msra.mxu0 %vm1468_vm7, %v10173_v29  ;;  %6439 = vmatprep.mubr.f32.mxu0 %v9280_v10 }
0x174c   : > { %8608 = vmatmul.mubr.msk.f32.vlgmr.msra.gmra.mrb[64].mxu0 %vm1515_vm8, %v9282_v22 }
0x174d   : > { %6639 = vmatprep.mubr.f32.mxu0 %v9280_v10 }
0x1817   : > { %v6059_v42 = vpop.f32.mrb[60].mxu0 }
0x1818   : > { %v6061_v1 = vpop.f32.mrb[61].mxu0  ;;  %v8591_v30 = vmul.f32 -1.442695, %v6059_v42 }
0x1819   : > { %v8592_v59 = vmul.f32 -1.442695, %v6061_v1 }
0x181b   : > { %v6241_v38 = vpop.f32.mrb[62].mxu0 }
0x181c   : > { %v6246_v39 = vmul.f32 0.25, %v6241_v38  ;;  %v6243_v45 = vpop.f32.mrb[63].mxu0 }
0x181d   : > { %v6247_v14 = vmul.f32 0.25, %v6243_v45 }
0x181e   : > { %v6248_v46 = vadd.f32 1e-06, %v6246_v39 }
0x181f   : > { %v6249_v47 = vadd.f32 1e-06, %v6247_v14  ;;  %v6441_v48 = vpop.f32.mrb[64].mxu0 }
0x1820   : > { %9104 = vrsqrt.f32 %v6248_v46  ;;  %v6443_v50 = vpop.f32.mrb[65].mxu0  ;;  %v6446_v40 = vmul.f32 0.25, %v6441_v48 }
0x1821   : > { %9106 = vrsqrt.f32 %v6249_v47  ;;  %v6447_v7 = vmul.f32 0.25, %v6443_v50 }
0x1822   : > { %v6451_v44 = vrot.slane %v6446_v40, %v9459_v25 }
0x1823   : > { %v6455_v36 = vrot.slane %v6447_v7, %v9459_v25 }
0x1824   : > { %v6456_v54 = vsub.f32 %v10173_v29, %v6451_v44 }
0x1825   : > { %v6457_v15 = vsub.f32 %v10162_v34, %v6455_v36 }
0x1826   : > { %v6458_v27 = vmul.f32 %v6456_v54, %v6456_v54 }
0x1827   : > { %v6459_v9 = vmul.f32 %v6457_v15, %v6457_v15 }
0x182a   : > { %v9105_v49 = vpop.eup %9104 }
0x182b   : > { %v9107_v51 = vpop.eup %9106  ;;  %v6255_v24 = vrot.slane %v9105_v49, %v9459_v25 }
0x182c   : > { %v6259_v52 = vrot.slane %v9107_v51, %v9459_v25 }
0x182d   : > { %v6260_v53 = vmul.f32 %v6255_v24, %v6163_v2 }
0x182e   : > { %v6261_v55 = vmul.f32 %v6259_v52, %v6164_v21 }
0x182f   : > { %v6262_v57 = vmul.f32 %v6260_v53, %v9869_v8 }
0x1830   : > { %v6263_v56 = vmul.f32 %v6261_v55, %v9869_v8 }
0x1831   : > { %v6264_v62 = vadd.f32 %v6262_v57, %v9872_v43 }
0x1832   : > { %v6265_v63 = vadd.f32 %v6263_v56, %v9872_v43 }
0x1833   : > { %v8599_v26 = vmul.f32 -1.442695, %v6264_v62 }
0x1834   : > { %v8600_v61 = vmul.f32 -1.442695, %v6265_v63 }
0x1835   : > { %9108 = vpow2.f32 %v8599_v26 }
0x1836   : > { %9110 = vpow2.f32 %v8600_v61 }
0x183f   : > { %v9109_v0 = vpop.eup %9108 }
0x1840   : > { %v9111_v4 = vpop.eup %9110  ;;  %v6272_v6 = vadd.f32 1.0, %v9109_v0 }
0x1841   : > { %v6273_v35 = vadd.f32 1.0, %v9111_v4 }
0x1842   : > { %9112 = vrcp.f32 %v6272_v6 }
0x1843   : > { %9114 = vrcp.f32 %v6273_v35 }
0x1844   : > { %9116 = vpow2.f32 %v8591_v30 }
0x1845   : > { %9118 = vpow2.f32 %v8592_v59 }
0x184c   : > { %v9113_v12 = vpop.eup %9112 }
0x184d   : > { %v9115_v17 = vpop.eup %9114  ;;  %v6280_v20 = vrot.slane %v9113_v12, 4 }
0x184e   : > { %v6281_v11 = vrot.slane %v9115_v17, 4  ;;  %v9117_v42 = vpop.eup %9116 }
0x184f   : > { %v9119_v1 = vpop.eup %9118  ;;  %v6070_v48 = vadd.f32 1.0, %v9117_v42 }
0x1850   : > { %8601 = vmatprep.subr.msk.mxu1 %vm1468_vm7, %v6281_v11  ;;  %v6071_v49 = vadd.f32 1.0, %v9119_v1 }
0x1851   : > { %8602 = vmatpush1.msk.msra.mxu1 %vm1468_vm7, %v6280_v20 }
0x1852   : > { %8603 = vmatmul.mubr.msk.f32.vlgmr.msra.gmra.mrb[66].mxu1 %vm1515_vm8, %v10116_v13  ;;  %8609 = vmatprep.subr.msk.mxu1 %vm1468_vm7, %v6459_v9 }
0x1853   : > { %8610 = vmatpush1.msk.msra.mxu1 %vm1468_vm7, %v6458_v27  ;;  %6530 = vmatprep.mubr.f32.mxu1 %v9280_v10 }
0x1854   : > { %8619 = vmatprep.subr.msk.mxu1 %vm1468_vm7, %v6659_v5 }
0x1856   : > { %8611 = vmatmul.mubr.msk.f32.vlgmr.msra.gmra.mrb[68].mxu1 %vm1515_vm8, %v9282_v22 }
0x1857   : > { %8620 = vmatpush1.msk.msra.mxu1 %vm1468_vm7, %v6658_v23  ;;  %6728 = vmatprep.mubr.f32.mxu1 %v9280_v10 }
0x185a   : > { %8621 = vmatmul.mubr.msk.f32.vlgmr.msra.gmra.mrb[70].mxu1 %vm1515_vm8, %v9282_v22 }
0x185b   : > { %6932 = vmatprep.mubr.f32.mxu1 %v9280_v10 }
0x1925   : > { %v6352_v21 = vpop.f32.mrb[66].mxu1 }
0x1926   : > { %v8604_v2 = vmul.f32 -1.442695, %v6352_v21  ;;  %v6354_v31 = vpop.f32.mrb[67].mxu1 }
0x1927   : > { %v8605_v32 = vmul.f32 -1.442695, %v6354_v31 }
0x1928   : > { %9120 = vpow2.f32 %v8604_v2 }
0x1929   : > { %9122 = vpow2.f32 %v8605_v32  ;;  %v6532_v33 = vpop.f32.mrb[68].mxu1  ;;  %v8632_v32 = vld.sshfl [vmem:[#allocation4 + $0xc] sm:$0x33 pattern:$0x76325410] }
0x192a   : > { %v6537_v60 = vmul.f32 0.25, %v6532_v33  ;;  %v6534_v41 = vpop.f32.mrb[69].mxu1 }
0x192b   : > { %v6538_v37 = vmul.f32 0.25, %v6534_v41 }
0x192c   : > { %v6539_v38 = vadd.f32 1e-06, %v6537_v60 }
0x192d   : > { %v6540_v39 = vadd.f32 1e-06, %v6538_v37  ;;  %v6730_v45 = vpop.f32.mrb[70].mxu1  ;;  %v6960_v37 = vcombine.high %v8632_v32, %v8632_v32 }
0x192e   : > { %9124 = vrsqrt.f32 %v6539_v38  ;;  %v6732_v14 = vpop.f32.mrb[71].mxu1  ;;  %v6735_v11 = vmul.f32 0.25, %v6730_v45 }
0x192f   : > { %9126 = vrsqrt.f32 %v6540_v39  ;;  %v6736_v17 = vmul.f32 0.25, %v6732_v14 }
0x1930   : > { %v6740_v23 = vrot.slane %v6735_v11, %v9459_v25 }
0x1931   : > { %v6744_v5 = vrot.slane %v6736_v17, %v9459_v25 }
0x1932   : > { %v9121_v46 = vpop.eup %9120  ;;  %v6745_v59 = vsub.f32 %v10173_v29, %v6740_v23 }
0x1933   : > { %v9123_v47 = vpop.eup %9122  ;;  %v6363_v50 = vadd.f32 1.0, %v9121_v46  ;;  %v6746_v30 = vsub.f32 %v10162_v34, %v6744_v5  ;;  %v6962_v34 = vsel %vm2288_vm11, %v8632_v32, 0 }
0x1934   : > { %v6364_v51 = vadd.f32 1.0, %v9123_v47  ;;  %v6747_v2 = vmul.f32 %v6745_v59, %v6745_v59 }
0x1935   : > { %9128 = vrcp.f32 %v6363_v50  ;;  %v6748_v21 = vmul.f32 %v6746_v30, %v6746_v30 }
0x1936   : > { %9130 = vrcp.f32 %v6364_v51  ;;  %v6751_v41 = vrot.slane %v6747_v2, 4 }
0x1937   : > { %9132 = vrcp.f32 %v6070_v48  ;;  %v6752_v60 = vrot.slane %v6748_v21, 4 }
0x1938   : > { %v9125_v24 = vpop.eup %9124  ;;  %9134 = vrcp.f32 %v6071_v49 }
0x1939   : > { %v9127_v52 = vpop.eup %9126  ;;  %v6546_v53 = vrot.slane %v9125_v24, %v9459_v25 }
0x193a   : > { %v6550_v55 = vrot.slane %v9127_v52, %v9459_v25 }
0x193b   : > { %v6551_v57 = vmul.f32 %v6546_v53, %v6456_v54 }
0x193c   : > { %v6552_v56 = vmul.f32 %v6550_v55, %v6457_v15 }
0x193d   : > { %v6553_v62 = vmul.f32 %v6551_v57, %v9818_v28 }
0x193e   : > { %v6554_v63 = vmul.f32 %v6552_v56, %v9818_v28 }
0x193f   : > { %v9129_v26 = vpop.eup %9128  ;;  %v6555_v61 = vadd.f32 %v6553_v62, %v9821_v58 }
0x1940   : > { %v9131_v0 = vpop.eup %9130  ;;  %v8186_v4 = vrot.slane %v9129_v26, 7  ;;  %v6556_v6 = vadd.f32 %v6554_v63, %v9821_v58 }
0x1941   : > { %v9133_v35 = vpop.eup %9132  ;;  %v8187_v7 = vrot.slane %v9131_v0, 7  ;;  %v8612_v40 = vmul.f32 -1.442695, %v6555_v61 }
0x1942   : > { %v9135_v36 = vpop.eup %9134  ;;  %v10217_v44 = vsel %vm8246_vm12, %v9133_v35, %v8186_v4  ;;  %v8613_v12 = vmul.f32 -1.442695, %v6556_v6 }
0x1943   : > { %v10220_v15 = vsel %vm8246_vm12, %v9135_v36, %v8187_v7  ;;  %9136 = vpow2.f32 %v8612_v40 }
0x1944   : > { %9138 = vpow2.f32 %v8613_v12 }
0x194d   : > { %v9137_v54 = vpop.eup %9136 }
0x194e   : > { %v9139_v20 = vpop.eup %9138  ;;  %v6563_v9 = vadd.f32 1.0, %v9137_v54 }
0x194f   : > { %v6564_v27 = vadd.f32 1.0, %v9139_v20 }
0x1951   : > { %9140 = vrcp.f32 %v6564_v27 }
0x1952   : > { %9142 = vrcp.f32 %v6563_v9 }
0x195b   : > { %v9141_v31 = vpop.eup %9140 }
0x195c   : > { %v9143_v33 = vpop.eup %9142  ;;  %8614 = vmatprep.subr.msk.mxu0 %vm1468_vm7, %v9141_v31 }
0x195d   : > { %8615 = vmatpush1.msk.msra.mxu0 %vm1468_vm7, %v9143_v33 }
0x195e   : > { %8616 = vmatmul.mubr.msk.f32.vlgmr.msra.gmra.mrb[66].mxu0 %vm1515_vm8, %v10116_v13  ;;  %8622 = vmatprep.subr.msk.mxu0 %vm1468_vm7, %v6752_v60 }
0x195f   : > { %8623 = vmatpush1.msk.msra.mxu0 %vm1468_vm7, %v6751_v41  ;;  %6821 = vmatprep.mubr.f32.mxu0 %v9280_v10 }
0x1960   : > { %8633 = vmatprep.subr.msk.bf16.mxu0 %vm2288_vm11, %v6960_v37 }
0x1962   : > { %8624 = vmatmul.mubr.msk.f32.vlgmr.msra.gmra.mrb[68].mxu0 %vm1515_vm8, %v9282_v22 }
0x1963   : > { %6968 = vmatpush1.bf16.msra.mxu0 %v6962_v34  ;;  %6999 = vmatprep.mubr.bf16.mxu0 %v9279_v3 }
0x1966   : > { %8634 = vmatmul.mubr.msk.bf16.vlgmr.msra.gmra.mrb[72].mxu0 %vm1515_vm8, %v10086_v16 }
0x1967   : > { %7280 = vmatprep.mubr.f32.mxu0 %v9280_v10 }
0x1a31   : > { %v6641_v29 = vpop.f32.mrb[66].mxu0 }
0x1a32   : > { %v8617_v38 = vmul.f32 -1.442695, %v6641_v29  ;;  %v6643_v39 = vpop.f32.mrb[67].mxu0 }
0x1a33   : > { %v8618_v45 = vmul.f32 -1.442695, %v6643_v39 }
0x1a34   : > { %9144 = vpow2.f32 %v8617_v38 }
0x1a35   : > { %9146 = vpow2.f32 %v8618_v45  ;;  %v6823_v14 = vpop.f32.mrb[68].mxu0 }
0x1a36   : > { %v6828_v42 = vmul.f32 0.25, %v6823_v14  ;;  %v6825_v1 = vpop.f32.mrb[69].mxu0 }
0x1a37   : > { %v6829_v46 = vmul.f32 0.25, %v6825_v1 }
0x1a38   : > { %v6830_v47 = vadd.f32 1e-06, %v6828_v42 }
0x1a39   : > { %v6831_v48 = vadd.f32 1e-06, %v6829_v46  ;;  %v7001_v50 = vpop.f32.mrb[72].mxu0 }
0x1a3a   : > { %9148 = vrsqrt.f32 %v6830_v47  ;;  %v7003_v3 = vpop.f32.mrb[73].mxu0 }
0x1a3b   : > { %9150 = vrsqrt.f32 %v6831_v48  ;;  %v10241_v49 = vpop.f32.mrb[74].mxu0  ;;  %v10256_v2 = vadd.f32 %v7003_v3, %v9781_v19 }
0x1a3c   : > { %v10243_v16 = vpop.f32.mrb[75].mxu0 }
0x1a3d   : > { %v7300_v47 = vrot.slane %v10256_v2, 4 }
0x1a3e   : > { %v9145_v51 = vpop.eup %9144 }
0x1a3f   : > { %v9147_v24 = vpop.eup %9146  ;;  %v6652_v52 = vadd.f32 1.0, %v9145_v51 }
0x1a40   : > { %v6653_v53 = vadd.f32 1.0, %v9147_v24 }
0x1a41   : > { %9152 = vrcp.f32 %v6652_v52 }
0x1a42   : > { %9154 = vrcp.f32 %v6653_v53 }
0x1a44   : > { %v9149_v55 = vpop.eup %9148 }
0x1a45   : > { %v9151_v57 = vpop.eup %9150  ;;  %v6837_v56 = vrot.slane %v9149_v55, %v9459_v25 }
0x1a46   : > { %v6841_v62 = vrot.slane %v9151_v57, %v9459_v25 }
0x1a47   : > { %v6842_v63 = vmul.f32 %v6837_v56, %v6745_v59 }
0x1a48   : > { %v6843_v26 = vmul.f32 %v6841_v62, %v6746_v30 }
0x1a49   : > { %v6844_v61 = vmul.f32 %v6842_v63, %v9869_v8 }
0x1a4a   : > { %v6845_v0 = vmul.f32 %v6843_v26, %v9869_v8 }
0x1a4b   : > { %v9153_v4 = vpop.eup %9152  ;;  %v6846_v6 = vadd.f32 %v6844_v61, %v9872_v43 }
0x1a4c   : > { %v9155_v35 = vpop.eup %9154  ;;  %v8210_v7 = vrot.slane %v9153_v4, 6  ;;  %v6847_v40 = vadd.f32 %v6845_v0, %v9872_v43 }
0x1a4d   : > { %v8211_v36 = vrot.slane %v9155_v35, 6  ;;  %v8625_v12 = vmul.f32 -1.442695, %v6846_v6 }
0x1a4e   : > { %v8259_v17 = vsel %vm2288_vm11, %v10217_v44, %v8210_v7  ;;  %v8626_v54 = vmul.f32 -1.442695, %v6847_v40  ;;  %v10260_v44 = vadd.f32 %v7001_v50, %v9781_v19 }
0x1a4f   : > { %v8260_v11 = vsel %vm2288_vm11, %v10220_v15, %v8211_v36  ;;  %9156 = vpow2.f32 %v8625_v12 }
0x1a50   : > { %9158 = vpow2.f32 %v8626_v54  ;;  %v7299_v48 = vrot.slane %v10260_v44, 4 }
0x1a59   : > { %v9157_v20 = vpop.eup %9156 }
0x1a5a   : > { %v9159_v9 = vpop.eup %9158  ;;  %v6854_v27 = vadd.f32 1.0, %v9157_v20 }
0x1a5b   : > { %v6855_v5 = vadd.f32 1.0, %v9159_v9 }
0x1a5c   : > { %9160 = vrcp.f32 %v6854_v27 }
0x1a5d   : > { %9162 = vrcp.f32 %v6855_v5 }
0x1a66   : > { %v9161_v23 = vpop.eup %9160 }
0x1a67   : > { %v9163_v30 = vpop.eup %9162  ;;  %v6862_v21 = vrot.slane %v9161_v23, 4 }
0x1a68   : > { %v6863_v59 = vrot.slane %v9163_v30, 4 }
0x1a6a   : > { %8627 = vmatprep.subr.msk.mxu1 %vm1468_vm7, %v6863_v59 }
0x1a6b   : > { %8628 = vmatpush1.msk.msra.mxu1 %vm1468_vm7, %v6862_v21 }
0x1a6c   : > { %8629 = vmatmul.mubr.msk.f32.vlgmr.msra.gmra.mrb[72].mxu1 %vm1515_vm8, %v10116_v13  ;;  %8635 = vmatprep.subr.msk.mxu1 %vm1468_vm7, %v10256_v2 }
0x1a6d   : > { %8636 = vmatpush1.msk.msra.mxu1 %vm1468_vm7, %v10260_v44  ;;  %7080 = vmatprep.mubr.f32.mxu1 %v9280_v10 }
0x1a70   : > { %8637 = vmatmul.mubr.msk.f32.vlgmr.msra.gmra.mrb[74].mxu1 %vm1515_vm8, %v9282_v22 }
0x1a71   : > { %7171 = vmatprep.mubr.f32.mxu1 %v9280_v10 }
0x1b3f   : > { %v6934_v19 = vpop.f32.mrb[72].mxu1 }
0x1b40   : > { %v8630_v15 = vmul.f32 -1.442695, %v6934_v19  ;;  %v6936_v31 = vpop.f32.mrb[73].mxu1 }
0x1b41   : > { %v8631_v32 = vmul.f32 -1.442695, %v6936_v31 }
0x1b42   : > { %9164 = vpow2.f32 %v8630_v15 }
0x1b43   : > { %9166 = vpow2.f32 %v8631_v32  ;;  %v7082_v33 = vpop.f32.mrb[74].mxu1 }
0x1b44   : > { %v7087_v60 = vmul.f32 0.25, %v7082_v33  ;;  %v7084_v41 = vpop.f32.mrb[75].mxu1 }
0x1b45   : > { %v7088_v37 = vmul.f32 0.25, %v7084_v41 }
0x1b46   : > { %v7092_v34 = vrot.slane %v7087_v60, %v9459_v25 }
0x1b47   : > { %v7096_v29 = vrot.slane %v7088_v37, %v9459_v25 }
0x1b48   : > { %v7097_v38 = vsub.f32 %v10260_v44, %v7092_v34 }
0x1b49   : > { %v7098_v39 = vsub.f32 %v10256_v2, %v7096_v29 }
0x1b4a   : > { %v7099_v42 = vmul.f32 %v7097_v38, %v7097_v38 }
0x1b4b   : > { %v7100_v45 = vmul.f32 %v7098_v39, %v7098_v39 }
0x1b4c   : > { %v9165_v14 = vpop.eup %9164 }
0x1b4d   : > { %v9167_v1 = vpop.eup %9166  ;;  %v6945_v46 = vadd.f32 1.0, %v9165_v14  ;;  %8638 = vmatprep.subr.msk.mxu1 %vm1468_vm7, %v7100_v45  ;;  %v10306_v45 = vadd.f32 %v10243_v16, %v9840_v18 }
0x1b4e   : > { %v6946_v50 = vadd.f32 1.0, %v9167_v1  ;;  %8639 = vmatpush1.msk.msra.mxu1 %vm1468_vm7, %v7099_v42 }
0x1b4f   : > { %9168 = vrcp.f32 %v6945_v46  ;;  %8640 = vmatmul.mubr.msk.f32.vlgmr.msra.gmra.mrb[76].mxu1 %vm1515_vm8, %v9282_v22  ;;  %8648 = vmatprep.subr.msk.mxu1 %vm1468_vm7, %v7300_v47 }
0x1b50   : > { %9170 = vrcp.f32 %v6946_v50  ;;  %8649 = vmatpush1.msk.msra.mxu1 %vm1468_vm7, %v7299_v48  ;;  %7369 = vmatprep.mubr.f32.mxu1 %v9280_v10 }
0x1b53   : > { %8650 = vmatmul.mubr.msk.f32.vlgmr.msra.gmra.mrb[78].mxu1 %vm1515_vm8, %v9282_v22 }
0x1b54   : > { %7573 = vmatprep.mubr.f32.mxu1 %v9280_v10 }
0x1b59   : > { %v9169_v3 = vpop.eup %9168 }
0x1b5a   : > { %v9171_v51 = vpop.eup %9170  ;;  %v8234_v24 = vrot.slane %v9169_v3, 5 }
0x1b5b   : > { %v8235_v52 = vrot.slane %v9171_v51, 5 }
0x1b5c   : > { %v8268_v53 = vsel %vm8263_vm13, %v8259_v17, %v8234_v24 }
0x1b5d   : > { %v8269_v55 = vsel %vm8263_vm13, %v8260_v11, %v8235_v52 }
0x1b5e   : > { %v8282_v57 = vcombine.low %v8268_v53, %v8269_v55 }
0x1b60   : > { %8290 = vst [vmem:[%s9988_s24 + $0x10] sm:$0xff] %v8282_v57 }
0x1c22   : > { %v7173_v56 = vpop.f32.mrb[76].mxu1 }
0x1c23   : > { %v7178_v62 = vmul.f32 0.25, %v7173_v56  ;;  %v7175_v63 = vpop.f32.mrb[77].mxu1 }
0x1c24   : > { %v7179_v26 = vmul.f32 0.25, %v7175_v63 }
0x1c25   : > { %v7180_v61 = vadd.f32 1e-06, %v7178_v62 }
0x1c26   : > { %v7181_v0 = vadd.f32 1e-06, %v7179_v26  ;;  %v7371_v4 = vpop.f32.mrb[78].mxu1 }
0x1c27   : > { %9172 = vrsqrt.f32 %v7180_v61  ;;  %v7373_v6 = vpop.f32.mrb[79].mxu1  ;;  %v7376_v59 = vmul.f32 0.25, %v7371_v4 }
0x1c28   : > { %9174 = vrsqrt.f32 %v7181_v0  ;;  %v7377_v23 = vmul.f32 0.25, %v7373_v6 }
0x1c29   : > { %v7381_v32 = vrot.slane %v7376_v59, %v9459_v25 }
0x1c2a   : > { %v7385_v31 = vrot.slane %v7377_v23, %v9459_v25  ;;  %v7882_v23 = vrot.slane %v10306_v45, 4 }
0x1c2b   : > { %v7386_v60 = vsub.f32 %v10260_v44, %v7381_v32 }
0x1c2c   : > { %v7387_v33 = vsub.f32 %v10256_v2, %v7385_v31  ;;  %v10317_v2 = vadd.f32 %v10241_v49, %v9840_v18 }
0x1c2d   : > { %v7388_v37 = vmul.f32 %v7386_v60, %v7386_v60 }
0x1c2e   : > { %v7389_v41 = vmul.f32 %v7387_v33, %v7387_v33 }
0x1c31   : > { %v9173_v35 = vpop.eup %9172 }
0x1c32   : > { %v9175_v7 = vpop.eup %9174  ;;  %v7187_v40 = vrot.slane %v9173_v35, %v9459_v25 }
0x1c33   : > { %v7191_v36 = vrot.slane %v9175_v7, %v9459_v25 }
0x1c34   : > { %v7192_v12 = vmul.f32 %v7187_v40, %v7097_v38  ;;  %v7393_v38 = vrot.slane %v7389_v41, 4 }
0x1c35   : > { %v7193_v17 = vmul.f32 %v7191_v36, %v7098_v39  ;;  %v7392_v39 = vrot.slane %v7388_v37, 4 }
0x1c36   : > { %v7194_v54 = vmul.f32 %v7192_v12, %v9818_v28 }
0x1c37   : > { %v7195_v11 = vmul.f32 %v7193_v17, %v9818_v28 }
0x1c38   : > { %v7196_v20 = vadd.f32 %v7194_v54, %v9821_v58 }
0x1c39   : > { %v7197_v9 = vadd.f32 %v7195_v11, %v9821_v58 }
0x1c3a   : > { %v8641_v27 = vmul.f32 -1.442695, %v7196_v20 }
0x1c3b   : > { %v8642_v5 = vmul.f32 -1.442695, %v7197_v9 }
0x1c3c   : > { %9176 = vpow2.f32 %v8641_v27 }
0x1c3d   : > { %9178 = vpow2.f32 %v8642_v5 }
0x1c46   : > { %v9177_v30 = vpop.eup %9176 }
0x1c47   : > { %v9179_v21 = vpop.eup %9178  ;;  %v7204_v19 = vadd.f32 1.0, %v9177_v30  ;;  %v7881_v30 = vrot.slane %v10317_v2, 4 }
0x1c48   : > { %v7205_v15 = vadd.f32 1.0, %v9179_v21 }
0x1c4a   : > { %9180 = vrcp.f32 %v7205_v15 }
0x1c4b   : > { %9182 = vrcp.f32 %v7204_v19 }
0x1c54   : > { %v9181_v34 = vpop.eup %9180 }
0x1c55   : > { %v9183_v29 = vpop.eup %9182  ;;  %8643 = vmatprep.subr.msk.mxu0 %vm1468_vm7, %v9181_v34 }
0x1c56   : > { %8644 = vmatpush1.msk.msra.mxu0 %vm1468_vm7, %v9183_v29 }
0x1c57   : > { %8645 = vmatmul.mubr.msk.f32.vlgmr.msra.gmra.mrb[70].mxu0 %vm1515_vm8, %v10116_v13  ;;  %8651 = vmatprep.subr.msk.mxu0 %vm1468_vm7, %v7393_v38 }
0x1c58   : > { %8652 = vmatpush1.msk.msra.mxu0 %vm1468_vm7, %v7392_v39  ;;  %7462 = vmatprep.mubr.f32.mxu0 %v9280_v10 }
0x1c59   : > { %8661 = vmatprep.subr.msk.mxu0 %vm1468_vm7, %v10306_v45 }
0x1c5b   : > { %8653 = vmatmul.mubr.msk.f32.vlgmr.msra.gmra.mrb[76].mxu0 %vm1515_vm8, %v9282_v22 }
0x1c5c   : > { %8662 = vmatpush1.msk.msra.mxu0 %vm1468_vm7, %v10317_v2  ;;  %7662 = vmatprep.mubr.f32.mxu0 %v9280_v10 }
0x1c5f   : > { %8663 = vmatmul.mubr.msk.f32.vlgmr.msra.gmra.mrb[78].mxu0 %vm1515_vm8, %v9282_v22 }
0x1c60   : > { %7862 = vmatprep.mubr.f32.mxu0 %v9280_v10 }
0x1d2a   : > { %v7282_v16 = vpop.f32.mrb[70].mxu0 }
0x1d2b   : > { %v7284_v44 = vpop.f32.mrb[71].mxu0 }
0x1d2c   : > { %v8647_v59 = vmul.f32 -1.442695, %v7284_v44 }
0x1d2e   : > { %v7464_v14 = vpop.f32.mrb[76].mxu0 }
0x1d2f   : > { %v7469_v42 = vmul.f32 0.25, %v7464_v14  ;;  %v7466_v1 = vpop.f32.mrb[77].mxu0 }
0x1d30   : > { %v7470_v18 = vmul.f32 0.25, %v7466_v1 }
0x1d31   : > { %v7471_v49 = vadd.f32 1e-06, %v7469_v42 }
0x1d32   : > { %v7472_v46 = vadd.f32 1e-06, %v7470_v18  ;;  %v7664_v47 = vpop.f32.mrb[78].mxu0 }
0x1d33   : > { %9184 = vrsqrt.f32 %v7471_v49  ;;  %v7666_v48 = vpop.f32.mrb[79].mxu0  ;;  %v7669_v7 = vmul.f32 0.25, %v7664_v47 }
0x1d34   : > { %9186 = vrsqrt.f32 %v7472_v46  ;;  %v7670_v35 = vmul.f32 0.25, %v7666_v48 }
0x1d35   : > { %v7674_v36 = vrot.slane %v7669_v7, %v9459_v25 }
0x1d36   : > { %v7678_v40 = vrot.slane %v7670_v35, %v9459_v25 }
0x1d37   : > { %v7679_v11 = vsub.f32 %v10317_v2, %v7674_v36 }
0x1d38   : > { %v7680_v17 = vsub.f32 %v10306_v45, %v7678_v40 }
0x1d39   : > { %v7681_v5 = vmul.f32 %v7679_v11, %v7679_v11 }
0x1d3a   : > { %v7682_v27 = vmul.f32 %v7680_v17, %v7680_v17 }
0x1d3d   : > { %v9185_v50 = vpop.eup %9184 }
0x1d3e   : > { %v9187_v3 = vpop.eup %9186  ;;  %v7478_v51 = vrot.slane %v9185_v50, %v9459_v25 }
0x1d3f   : > { %v7482_v24 = vrot.slane %v9187_v3, %v9459_v25 }
0x1d40   : > { %v7483_v52 = vmul.f32 %v7478_v51, %v7386_v60 }
0x1d41   : > { %v7484_v53 = vmul.f32 %v7482_v24, %v7387_v33 }
0x1d42   : > { %v7485_v55 = vmul.f32 %v7483_v52, %v9869_v8 }
0x1d43   : > { %v7486_v57 = vmul.f32 %v7484_v53, %v9869_v8 }
0x1d44   : > { %v7487_v56 = vadd.f32 %v7485_v55, %v9872_v43 }
0x1d45   : > { %v7488_v62 = vadd.f32 %v7486_v57, %v9872_v43 }
0x1d46   : > { %v8654_v63 = vmul.f32 -1.442695, %v7487_v56 }
0x1d47   : > { %v8655_v26 = vmul.f32 -1.442695, %v7488_v62 }
0x1d48   : > { %9188 = vpow2.f32 %v8654_v63 }
0x1d49   : > { %9190 = vpow2.f32 %v8655_v26 }
0x1d52   : > { %v9189_v61 = vpop.eup %9188 }
0x1d53   : > { %v9191_v0 = vpop.eup %9190  ;;  %v7495_v4 = vadd.f32 1.0, %v9189_v61 }
0x1d54   : > { %v7496_v6 = vadd.f32 1.0, %v9191_v0 }
0x1d55   : > { %9192 = vrcp.f32 %v7495_v4 }
0x1d56   : > { %9194 = vrcp.f32 %v7496_v6 }
0x1d5f   : > { %v9193_v12 = vpop.eup %9192 }
0x1d60   : > { %v9195_v54 = vpop.eup %9194  ;;  %v7503_v9 = vrot.slane %v9193_v12, 4 }
0x1d61   : > { %v7504_v20 = vrot.slane %v9195_v54, 4 }
0x1d63   : > { %8656 = vmatprep.subr.msk.mxu1 %vm1468_vm7, %v7504_v20 }
0x1d64   : > { %8657 = vmatpush1.msk.msra.mxu1 %vm1468_vm7, %v7503_v9 }
0x1d65   : > { %8658 = vmatmul.mubr.msk.f32.vlgmr.msra.gmra.mrb[80].mxu1 %vm1515_vm8, %v10116_v13  ;;  %8664 = vmatprep.subr.msk.mxu1 %vm1468_vm7, %v7682_v27  ;;  %v8646_v13 = vmul.f32 -1.442695, %v7282_v16 }
0x1d66   : > { %8665 = vmatpush1.msk.msra.mxu1 %vm1468_vm7, %v7681_v5  ;;  %7753 = vmatprep.mubr.f32.mxu1 %v9280_v10 }
0x1d67   : > { %8674 = vmatprep.subr.msk.mxu1 %vm1468_vm7, %v7882_v23  ;;  %9196 = vpow2.f32 %v8646_v13 }
0x1d68   : > { %9198 = vpow2.f32 %v8647_v59  ;;  %v9254_v59 = vld [vmem:[%s9834_s21] sm:$0x1] }
0x1d69   : > { %8666 = vmatmul.mubr.msk.f32.vlgmr.msra.gmra.mrb[82].mxu1 %vm1515_vm8, %v9282_v22 }
0x1d6a   : > { %8675 = vmatpush1.msk.msra.mxu1 %vm1468_vm7, %v7881_v30  ;;  %7951 = vmatprep.mubr.f32.mxu1 %v9280_v10 }
0x1d6d   : > { %8676 = vmatmul.mubr.msk.f32.vlgmr.msra.gmra.mrb[84].mxu1 %vm1515_vm8, %v9282_v22 }
0x1d6e   : > { %8155 = vmatprep.mubr.f32.mxu1 %v9280_v10 }
0x1d71   : > { %v9197_v39 = vpop.eup %9196 }
0x1d72   : > { %v9199_v16 = vpop.eup %9198  ;;  %v7293_v42 = vadd.f32 1.0, %v9197_v39 }
0x1d73   : > { %v7294_v18 = vadd.f32 1.0, %v9199_v16 }
0x1e38   : > { %v7575_v21 = vpop.f32.mrb[80].mxu1 }
0x1e39   : > { %v8659_v19 = vmul.f32 -1.442695, %v7575_v21  ;;  %v7577_v15 = vpop.f32.mrb[81].mxu1 }
0x1e3a   : > { %v8660_v31 = vmul.f32 -1.442695, %v7577_v15 }
0x1e3b   : > { %9200 = vpow2.f32 %v8659_v19 }
0x1e3c   : > { %9202 = vpow2.f32 %v8660_v31  ;;  %v7755_v32 = vpop.f32.mrb[82].mxu1 }
0x1e3d   : > { %v7760_v33 = vmul.f32 0.25, %v7755_v32  ;;  %v7757_v60 = vpop.f32.mrb[83].mxu1 }
0x1e3e   : > { %v7761_v41 = vmul.f32 0.25, %v7757_v60 }
0x1e3f   : > { %v7762_v37 = vadd.f32 1e-06, %v7760_v33 }
0x1e40   : > { %v7763_v34 = vadd.f32 1e-06, %v7761_v41  ;;  %v7953_v29 = vpop.f32.mrb[84].mxu1 }
0x1e41   : > { %9204 = vrsqrt.f32 %v7762_v37  ;;  %v7955_v38 = vpop.f32.mrb[85].mxu1  ;;  %v7958_v40 = vmul.f32 0.25, %v7953_v29 }
0x1e42   : > { %9206 = vrsqrt.f32 %v7763_v34 }
0x1e43   : > { %v7963_v54 = vrot.slane %v7958_v40, %v9459_v25 }
0x1e45   : > { %v9201_v44 = vpop.eup %9200  ;;  %v7968_v20 = vsub.f32 %v10317_v2, %v7963_v54 }
0x1e46   : > { %v9203_v14 = vpop.eup %9202  ;;  %v7586_v1 = vadd.f32 1.0, %v9201_v44 }
0x1e47   : > { %v7587_v49 = vadd.f32 1.0, %v9203_v14  ;;  %v7970_v27 = vmul.f32 %v7968_v20, %v7968_v20 }
0x1e48   : > { %9208 = vrcp.f32 %v7586_v1 }
0x1e49   : > { %9210 = vrcp.f32 %v7587_v49  ;;  %v7974_v13 = vrot.slane %v7970_v27, 4 }
0x1e4a   : > { %9212 = vrcp.f32 %v7293_v42 }
0x1e4b   : > { %v9205_v46 = vpop.eup %9204  ;;  %9214 = vrcp.f32 %v7294_v18 }
0x1e4c   : > { %v9207_v47 = vpop.eup %9206  ;;  %v7769_v48 = vrot.slane %v9205_v46, %v9459_v25 }
0x1e4d   : > { %v7773_v50 = vrot.slane %v9207_v47, %v9459_v25 }
0x1e4e   : > { %v7774_v3 = vmul.f32 %v7769_v48, %v7679_v11 }
0x1e4f   : > { %v7775_v51 = vmul.f32 %v7773_v50, %v7680_v17 }
0x1e50   : > { %v7776_v24 = vmul.f32 %v7774_v3, %v9818_v28 }
0x1e51   : > { %v7777_v52 = vmul.f32 %v7775_v51, %v9818_v28  ;;  %v7959_v28 = vmul.f32 0.25, %v7955_v38 }
0x1e52   : > { %v9209_v53 = vpop.eup %9208  ;;  %v7778_v55 = vadd.f32 %v7776_v24, %v9821_v58 }
0x1e53   : > { %v9211_v57 = vpop.eup %9210  ;;  %v8188_v56 = vrot.slane %v9209_v53, 7  ;;  %v7779_v62 = vadd.f32 %v7777_v52, %v9821_v58  ;;  %v7967_v17 = vrot.slane %v7959_v28, %v9459_v25 }
0x1e54   : > { %v9213_v63 = vpop.eup %9212  ;;  %v8189_v26 = vrot.slane %v9211_v57, 7  ;;  %v8667_v61 = vmul.f32 -1.442695, %v7778_v55 }
0x1e55   : > { %v9215_v0 = vpop.eup %9214  ;;  %v10361_v4 = vsel %vm8246_vm12, %v9213_v63, %v8188_v56  ;;  %v8668_v6 = vmul.f32 -1.442695, %v7779_v62  ;;  %v7969_v11 = vsub.f32 %v10306_v45, %v7967_v17 }
0x1e56   : > { %v10364_v35 = vsel %vm8246_vm12, %v9215_v0, %v8189_v26  ;;  %9216 = vpow2.f32 %v8667_v61 }
0x1e57   : > { %9218 = vpow2.f32 %v8668_v6  ;;  %v7971_v9 = vmul.f32 %v7969_v11, %v7969_v11 }
0x1e59   : > { %v7975_v30 = vrot.slane %v7971_v9, 4 }
0x1e60   : > { %v9217_v7 = vpop.eup %9216 }
0x1e61   : > { %v9219_v36 = vpop.eup %9218  ;;  %v7786_v12 = vadd.f32 1.0, %v9217_v7 }
0x1e62   : > { %v7787_v58 = vadd.f32 1.0, %v9219_v36 }
0x1e64   : > { %9220 = vrcp.f32 %v7787_v58 }
0x1e65   : > { %9222 = vrcp.f32 %v7786_v12 }
0x1e6e   : > { %v9221_v5 = vpop.eup %9220 }
0x1e6f   : > { %v9223_v23 = vpop.eup %9222  ;;  %8669 = vmatprep.subr.msk.mxu0 %vm1468_vm7, %v9221_v5 }
0x1e70   : > { %8670 = vmatpush1.msk.msra.mxu0 %vm1468_vm7, %v9223_v23 }
0x1e71   : > { %8671 = vmatmul.mubr.msk.f32.vlgmr.msra.gmra.mrb[80].mxu0 %vm1515_vm8, %v9254_v59  ;;  %8677 = vmatprep.subr.msk.mxu0 %vm1468_vm7, %v7975_v30 }
0x1e72   : > { %8678 = vmatpush1.msk.msra.mxu0 %vm1468_vm7, %v7974_v13  ;;  %8044 = vmatprep.mubr.f32.mxu0 %v9280_v10 }
0x1e75   : > { %8679 = vmatmul.mubr.msk.f32.vlgmr.msra.gmra.mrb[82].mxu0 %vm1515_vm8, %v9282_v22 }
0x1f44   : > { %v7864_v45 = vpop.f32.mrb[80].mxu0 }
0x1f45   : > { %v8672_v2 = vmul.f32 -1.442695, %v7864_v45  ;;  %v7866_v21 = vpop.f32.mrb[81].mxu0 }
0x1f46   : > { %v8673_v19 = vmul.f32 -1.442695, %v7866_v21 }
0x1f47   : > { %9224 = vpow2.f32 %v8672_v2 }
0x1f48   : > { %9226 = vpow2.f32 %v8673_v19  ;;  %v8046_v15 = vpop.f32.mrb[82].mxu0 }
0x1f49   : > { %v8051_v31 = vmul.f32 0.25, %v8046_v15  ;;  %v8048_v32 = vpop.f32.mrb[83].mxu0 }
0x1f4a   : > { %v8052_v33 = vmul.f32 0.25, %v8048_v32 }
0x1f4b   : > { %v8053_v60 = vadd.f32 1e-06, %v8051_v31 }
0x1f4c   : > { %v8054_v41 = vadd.f32 1e-06, %v8052_v33 }
0x1f4d   : > { %9228 = vrsqrt.f32 %v8053_v60 }
0x1f4e   : > { %9230 = vrsqrt.f32 %v8054_v41 }
0x1f51   : > { %v9225_v37 = vpop.eup %9224 }
0x1f52   : > { %v9227_v34 = vpop.eup %9226  ;;  %v7875_v10 = vadd.f32 1.0, %v9225_v37 }
0x1f53   : > { %v7876_v29 = vadd.f32 1.0, %v9227_v34 }
0x1f54   : > { %9232 = vrcp.f32 %v7875_v10 }
0x1f55   : > { %9234 = vrcp.f32 %v7876_v29 }
0x1f57   : > { %v9229_v22 = vpop.eup %9228 }
0x1f58   : > { %v9231_v38 = vpop.eup %9230  ;;  %v8060_v39 = vrot.slane %v9229_v22, %v9459_v25 }
0x1f59   : > { %v8064_v16 = vrot.slane %v9231_v38, %v9459_v25 }
0x1f5a   : > { %v8065_v44 = vmul.f32 %v8060_v39, %v7968_v20 }
0x1f5b   : > { %v8066_v14 = vmul.f32 %v8064_v16, %v7969_v11 }
0x1f5c   : > { %v8067_v42 = vmul.f32 %v8065_v44, %v9869_v8 }
0x1f5d   : > { %v8068_v1 = vmul.f32 %v8066_v14, %v9869_v8 }
0x1f5e   : > { %v9233_v18 = vpop.eup %9232  ;;  %v8069_v49 = vadd.f32 %v8067_v42, %v9872_v43 }
0x1f5f   : > { %v9235_v46 = vpop.eup %9234  ;;  %v8212_v47 = vrot.slane %v9233_v18, 6  ;;  %v8070_v48 = vadd.f32 %v8068_v1, %v9872_v43 }
0x1f60   : > { %v8213_v50 = vrot.slane %v9235_v46, 6  ;;  %v8680_v3 = vmul.f32 -1.442695, %v8069_v49 }
0x1f61   : > { %v8261_v51 = vsel %vm2288_vm11, %v10361_v4, %v8212_v47  ;;  %v8681_v24 = vmul.f32 -1.442695, %v8070_v48 }
0x1f62   : > { %v8262_v25 = vsel %vm2288_vm11, %v10364_v35, %v8213_v50  ;;  %9236 = vpow2.f32 %v8680_v3 }
0x1f63   : > { %9238 = vpow2.f32 %v8681_v24 }
0x1f6c   : > { %v9237_v52 = vpop.eup %9236 }
0x1f6d   : > { %v9239_v8 = vpop.eup %9238  ;;  %v8077_v53 = vadd.f32 1.0, %v9237_v52 }
0x1f6e   : > { %v8078_v55 = vadd.f32 1.0, %v9239_v8 }
0x1f6f   : > { %9240 = vrcp.f32 %v8077_v53 }
0x1f70   : > { %9242 = vrcp.f32 %v8078_v55 }
0x1f79   : > { %v9241_v57 = vpop.eup %9240 }
0x1f7a   : > { %v9243_v56 = vpop.eup %9242  ;;  %v8085_v62 = vrot.slane %v9241_v57, 4 }
0x1f7b   : > { %v8086_v43 = vrot.slane %v9243_v56, 4 }
0x1f7d   : > { %8682 = vmatprep.subr.msk.mxu1 %vm1468_vm7, %v8086_v43 }
0x1f7e   : > { %8683 = vmatpush1.msk.msra.mxu1 %vm1468_vm7, %v8085_v62 }
0x1f7f   : > { %8684 = vmatmul.mubr.msk.f32.vlgmr.msra.gmra.mrb[86].mxu1 %vm1515_vm8, %v9254_v59 }
0x2052   : > { %v8157_v63 = vpop.f32.mrb[86].mxu1 }
0x2053   : > { %v8685_v26 = vmul.f32 -1.442695, %v8157_v63  ;;  %v8159_v61 = vpop.f32.mrb[87].mxu1 }
0x2054   : > { %v8686_v0 = vmul.f32 -1.442695, %v8159_v61 }
0x2055   : > { %9244 = vpow2.f32 %v8685_v26 }
0x2056   : > { %9246 = vpow2.f32 %v8686_v0 }
0x205f   : > { %v9245_v4 = vpop.eup %9244 }
0x2060   : > { %v9247_v6 = vpop.eup %9246  ;;  %v8168_v35 = vadd.f32 1.0, %v9245_v4 }
0x2061   : > { %v8169_v28 = vadd.f32 1.0, %v9247_v6 }
0x2062   : > { %9248 = vrcp.f32 %v8168_v35 }
0x2063   : > { %9250 = vrcp.f32 %v8169_v28 }
0x206c   : > { %v9249_v7 = vpop.eup %9248 }
0x206d   : > { %v9251_v40 = vpop.eup %9250  ;;  %v8236_v36 = vrot.slane %v9249_v7, 5 }
0x206e   : > { %v8237_v12 = vrot.slane %v9251_v40, 5 }
0x206f   : > { %v8270_v58 = vsel %vm8263_vm13, %v8261_v51, %v8236_v36 }
0x2070   : > { %v8271_v17 = vsel %vm8263_vm13, %v8262_v25, %v8237_v12 }
0x2071   : > { %v8283_v54 = vcombine.low %v8270_v58, %v8271_v17 }
0x2073   : > { %8291 = vst [vmem:[%s9988_s24 + $0x18] sm:$0xff] %v8283_v54 }
0x2074 PF: > { %s28_s29 = sadd.s32 1, %s9277_s29   ;;  %s10434_s27 = sld [smem:[#allocation5_spill]] }
0x2075   : > { %p25_p5 = scmp.ge.s32.totalorder %s28_s29, 4   ;;  %s10435_s28 = sld [smem:[#allocation6_spill]] }
0x2077   :  { %27 = sbr.rel (!%p25_p5) target bundleno = 4 (0x4), region = 125 }

</bundles_post_ra>
